<compile_context>
chip_gen: v6e
topology: v6e:2x2x1
jax: 0.10.0
libtpu: 0.0.40
codegen_flags: <defaults>
</compile_context>

<pallas_src>
import functools

import numpy as np
import jax
import jax.numpy as jnp
from jax.experimental import pallas as pl
from jax.experimental.pallas import tpu as pltpu

EPS = 1e-5     # PyTorch BatchNorm default eps
_WOFF = 8      # sublane offset of the W interior inside the padded h1 scratch


# ------------------------------- fused kernel -------------------------------

def _fused_bottleneck_kernel(x_ref, xt_ref, xb_ref,
                             w1_ref, s1_ref, b1_ref,
                             w2_ref, s2_ref, b2_ref,
                             w3_ref, s3_ref, b3_ref,
                             o_ref, h1p_ref,
                             *, td, h, w, cc, n_chunks, n_dt):
    rows = td * h * w
    mid = cc * n_chunks
    cin = x_ref.shape[-1]
    cout = o_ref.shape[-1]
    t = pl.program_id(1)

    w1 = w1_ref[...]                      # (cin, mid)  bf16
    s1 = s1_ref[...]                      # (1, mid)    f32
    b1 = b1_ref[...]

    def conv1_bn_relu(x2d_bf16):
        y = jnp.dot(x2d_bf16, w1, preferred_element_type=jnp.float32)
        return jnp.maximum(y * s1 + b1, 0.0)          # f32

    # conv1 on the main D slab and on the two one-plane D halos.  Halo planes
    # outside the volume arrive via a clamped index and are masked to zero,
    # reproducing conv2's zero padding along D.
    h1 = conv1_bn_relu(x_ref[...].reshape(rows, cin).astype(jnp.bfloat16))

    top_ok = jnp.where(t > 0, 1.0, 0.0)
    bot_ok = jnp.where(t < n_dt - 1, 1.0, 0.0)
    h1_top = conv1_bn_relu(
        xt_ref[...].reshape(h * w, cin).astype(jnp.bfloat16)) * top_ok
    h1_bot = conv1_bn_relu(
        xb_ref[...].reshape(h * w, cin).astype(jnp.bfloat16)) * bot_ok

    # --- assemble the zero-padded h1 volume in VMEM.  Only the pad border of
    #     the read region is zeroed (H rows 0 / h+1 and W cols _WOFF-1 /
    #     _WOFF+w); every D plane's interior is overwritten below.  Zeroing is
    #     done every step (cannot gate on program_id==0: both axes are
    #     'parallel' and megacore cores do not start at (0, 0)).
    zrow = jnp.zeros((td + 2, 1, w + 2, mid), jnp.float32)
    h1p_ref[0:td + 2, 0:1, _WOFF - 1:_WOFF + w + 1, :] = zrow
    h1p_ref[0:td + 2, h + 1:h + 2, _WOFF - 1:_WOFF + w + 1, :] = zrow
    zcol = jnp.zeros((td + 2, h, 1, mid), jnp.float32)
    h1p_ref[0:td + 2, 1:h + 1, _WOFF - 1:_WOFF, :] = zcol
    h1p_ref[0:td + 2, 1:h + 1, _WOFF + w:_WOFF + w + 1, :] = zcol

    h1p_ref[1:td + 1, 1:h + 1, _WOFF:_WOFF + w, :] = h1.reshape(td, h, w, mid)
    h1p_ref[0:1, 1:h + 1, _WOFF:_WOFF + w, :] = h1_top.reshape(1, h, w, mid)
    h1p_ref[td + 1:td + 2, 1:h + 1, _WOFF:_WOFF + w, :] = (
        h1_bot.reshape(1, h, w, mid))

    # --- grouped conv2 + bn2 + relu, then conv3, chunked over output channels
    #     (partial group packing) and accumulated over the 27 taps.  No im2col
    #     concat / patches staging; each tap window is sliced straight from
    #     the scratch ref so live ranges stay small.  conv3 is accumulated per
    #     chunk so the full h2 is never materialized.
    y = jnp.zeros((rows, cout), jnp.float32)
    for c in range(n_chunks):
        cs = c * cc
        acc = jnp.zeros((rows, cc), jnp.float32)
        for kd in range(3):
            for kh in range(3):
                for kw in range(3):
                    tap = kd * 9 + kh * 3 + kw
                    r0 = (c * 27 + tap) * cc
                    win = h1p_ref[kd:kd + td, kh:kh + h,
                                  _WOFF - 1 + kw:_WOFF - 1 + kw + w,
                                  cs:cs + cc]
                    acc = acc + jnp.dot(
                        win.reshape(rows, cc).astype(jnp.bfloat16),
                        w2_ref[r0:r0 + cc, :],
                        preferred_element_type=jnp.float32)
        h2c = jnp.maximum(acc * s2_ref[:, cs:cs + cc] + b2_ref[:, cs:cs + cc],
                          0.0)
        y = y + jnp.dot(h2c.astype(jnp.bfloat16), w3_ref[cs:cs + cc, :],
                        preferred_element_type=jnp.float32)

    # --- bn3 + identity residual + relu (x re-loaded here so its vregs are not
    #     pinned live across the whole conv2 tap loop).
    y = y * s3_ref[...] + b3_ref[...]
    y = jnp.maximum(y + x_ref[...].reshape(rows, cout), 0.0)
    o_ref[...] = y.reshape(1, td, h, w, cout).astype(o_ref.dtype)


# ------------------------------ pallas_call wrapper --------------------------

def _pick_d_tile(d, h, w, n, target_rows=2048, min_steps=4):
    """Largest divisor of d whose slab fits the row budget while keeping at
    least `min_steps` grid steps (so both v7x TensorCores get >=2 steps)."""
    divisors = [t for t in range(1, d + 1) if d % t == 0]
    fitting = [t for t in divisors if t * h * w <= target_rows] or [1]
    balanced = [t for t in fitting if n * (d // t) >= min_steps]
    return max(balanced) if balanced else max(fitting)


def _vmem_limit_bytes():
    """~3/4 of physical VMEM: ~48 MiB on v7x (64 MiB), ~96 MiB on v5e/v6e."""
    cap = 64 << 20          # conservative (v7x-safe) default if query fails
    try:
        cap = int(pltpu.get_tpu_info().vmem_capacity_bytes)
    except Exception:
        pass
    return max(32 << 20, min((cap * 3) // 4, 100 << 20))


def resnext_bottleneck_forward(x_ncdhw, kp, d_tile=None):
    """Fused ResNeXtBottleneck forward.  x: (N, C, D, H, W) float32."""
    n, cin, d, h, w = x_ncdhw.shape
    cin_w, mid = kp["w1"].shape
    cout = kp["w3"].shape[1]
    cc = kp["chunk"]
    n_chunks = mid // cc
    assert cin_w == cin
    assert cout == cin, "identity residual requires out_planes == inplanes"
    assert kp["w2_flat"].shape == (n_chunks * 27 * cc, cc)

    td = _pick_d_tile(d, h, w, n) if d_tile is None else d_tile
    assert d % td == 0, "d_tile must divide D"
    n_dt = d // td

    # Channels-last so channels map to TPU lanes.  In a full network the graph
    # would stay NDHWC end-to-end; these transposes exist only at the block
    # boundary of this standalone test.
    x_cl = jnp.transpose(x_ncdhw, (0, 2, 3, 4, 1))            # (N, D, H, W, C)

    kernel = functools.partial(_fused_bottleneck_kernel,
                               td=td, h=h, w=w, cc=cc,
                               n_chunks=n_chunks, n_dt=n_dt)
    rep2 = lambda i, j: (0, 0)

    # Advisory cost estimate for XLA's scheduler around the custom call.
    rows_total = n * d * h * w
    halo_rows = n * n_dt * 2 * h * w
    flops = 2 * ((rows_total + halo_rows) * cin * mid       # conv1 (+ halo recompute)
                 + rows_total * 27 * cc * mid               # conv2 (chunk-packed)
                 + rows_total * mid * cout)                 # conv3
    param_bytes = sum(int(kp[k].size) * kp[k].dtype.itemsize
                      for k in ("w1", "w2_flat", "w3",
                                "s1", "b1", "s2", "b2", "s3", "b3"))
    bytes_accessed = (int(x_cl.size) * 4 * (d + 2 * n_dt) // d
                      + rows_total * cout * 4 + param_bytes)

    out_cl = pl.pallas_call(
        kernel,
        out_shape=jax.ShapeDtypeStruct((n, d, h, w, cout), x_cl.dtype),
        grid=(n, n_dt),
        in_specs=[
            # main D slab
            pl.BlockSpec((1, td, h, w, cin), lambda i, j: (i, j, 0, 0, 0)),
            # one-plane halos above / below the slab (clamped index; invalid
            # halos are masked to zero inside the kernel)
            pl.BlockSpec((1, 1, h, w, cin),
                         lambda i, j: (i, jnp.maximum(j * td - 1, 0), 0, 0, 0)),
            pl.BlockSpec((1, 1, h, w, cin),
                         lambda i, j: (i, jnp.minimum(j * td + td, d - 1),
                                       0, 0, 0)),
            pl.BlockSpec((cin, mid), rep2),                  # w1 (bf16)
            pl.BlockSpec((1, mid), rep2),                    # s1
            pl.BlockSpec((1, mid), rep2),                    # b1
            pl.BlockSpec((n_chunks * 27 * cc, cc), rep2),    # w2 packed (bf16)
            pl.BlockSpec((1, mid), rep2),                    # s2
            pl.BlockSpec((1, mid), rep2),                    # b2
            pl.BlockSpec((mid, cout), rep2),                 # w3 (bf16)
            pl.BlockSpec((1, cout), rep2),                   # s3
            pl.BlockSpec((1, cout), rep2),                   # b3
        ],
        out_specs=pl.BlockSpec((1, td, h, w, cout),
                               lambda i, j: (i, j, 0, 0, 0)),
        scratch_shapes=[
            pltpu.VMEM((td + 2, h + 2, _WOFF + w + 1, mid), jnp.float32)],
        compiler_params=pltpu.CompilerParams(
            dimension_semantics=("parallel", "parallel"),
            vmem_limit_bytes=_vmem_limit_bytes()),
        cost_estimate=pl.CostEstimate(flops=int(flops), transcendentals=0,
                                      bytes_accessed=int(bytes_accessed)),
    )(x_cl, x_cl, x_cl,
      kp["w1"], kp["s1"], kp["b1"],
      kp["w2_flat"], kp["s2"], kp["b2"],
      kp["w3"], kp["s3"], kp["b3"])

    return jnp.transpose(out_cl, (0, 4, 1, 2, 3))             # back to NCDHW


# ------------------------------ parameter setup ------------------------------

def make_params(key, inplanes, planes, cardinality):
    expansion = 2
    mid = cardinality * (planes // 32)
    out_planes = planes * expansion
    cpg = mid // cardinality
    ks = jax.random.split(key, 6)

    w1 = jax.random.normal(ks[0], (mid, inplanes, 1, 1, 1), jnp.float32) * 0.1
    w2 = jax.random.normal(ks[1], (mid, cpg, 3, 3, 3), jnp.float32) * 0.1
    w3 = jax.random.normal(ks[2], (out_planes, mid, 1, 1, 1), jnp.float32) * 0.1

    def bn_init(k, c):
        k1, k2, k3, k4 = jax.random.split(k, 4)
        gamma = jax.random.uniform(k1, (c,), jnp.float32, 0.5, 1.5)
        beta = jax.random.normal(k2, (c,), jnp.float32) * 0.1
        rm = jax.random.normal(k3, (c,), jnp.float32) * 0.1
        rv = jax.random.uniform(k4, (c,), jnp.float32, 0.5, 1.5)
        return gamma, beta, rm, rv

    return dict(w1=w1, w2=w2, w3=w3,
                bn1=bn_init(ks[3], mid),
                bn2=bn_init(ks[4], mid),
                bn3=bn_init(ks[5], out_planes),
                cardinality=cardinality)


def fold_bn(bn):
    gamma, beta, rm, rv = bn
    s = gamma / jnp.sqrt(rv + EPS)
    b = beta - rm * s
    return s.reshape(1, -1), b.reshape(1, -1)


def pick_chunk(mid, cpg):
    """Output-channel chunk for partial group packing: a full 128-lane block
    where possible.  Groups never straddle a chunk (cpg | chunk)."""
    cc = min(mid, 128)
    assert mid % cc == 0 and cc % cpg == 0
    return cc


def pack_grouped_w2(w2, cardinality, chunk):
    """(mid, cpg, 3,3,3) grouped weight -> (n_chunks*27*chunk, chunk) packed.

    Partial group packing: output channels are processed in `chunk`-wide
    (lane-dense) blocks; the weight block for (chunk c, tap t) densely expands
    ONLY the chunk/cpg groups owning those channels, so wasted MACs are
    ~(chunk/cpg) x instead of ~cardinality x once mid > 128.
    Row index = (c*27 + tap)*chunk + ci_local, col index = co_local, with
    tap = kd*9 + kh*3 + kw matching the in-kernel tap loop.
    """
    w2 = np.asarray(w2)
    mid, cpg = w2.shape[0], w2.shape[1]
    opg = mid // cardinality
    assert opg == cpg, "conv2 has equal in/out channels per group"
    n_chunks = mid // chunk
    flat = np.zeros((n_chunks * 27 * chunk, chunk), np.float32)
    for co in range(mid):
        g = co // opg
        c, co_l = divmod(co, chunk)
        for cil in range(cpg):
            ci = g * cpg + cil
            assert ci // chunk == c, "group straddles a chunk"
            ci_l = ci % chunk
            for kd in range(3):
                for kh in range(3):
                    for kw in range(3):
                        tap = kd * 9 + kh * 3 + kw
                        flat[(c * 27 + tap) * chunk + ci_l, co_l] = (
                            w2[co, cil, kd, kh, kw])
    return jnp.asarray(flat, jnp.bfloat16)


# ------------------------------ pure-JAX reference ---------------------------

def reference_forward(x, p):
    def bn(y, bnp):
        gamma, beta, rm, rv = bnp
        sh = (1, -1, 1, 1, 1)
        return ((y - rm.reshape(sh)) / jnp.sqrt(rv.reshape(sh) + EPS)
                * gamma.reshape(sh) + beta.reshape(sh))

    dn = ("NCDHW", "OIDHW", "NCDHW")
    out = jax.lax.conv_general_dilated(x, p["w1"], (1, 1, 1), "VALID",
                                       dimension_numbers=dn)
    out = jax.nn.relu(bn(out, p["bn1"]))
    out = jax.lax.conv_general_dilated(out, p["w2"], (1, 1, 1),
                                       [(1, 1), (1, 1), (1, 1)],
                                       dimension_numbers=dn,
                                       feature_group_count=p["cardinality"])
    out = jax.nn.relu(bn(out, p["bn2"]))
    out = jax.lax.conv_general_dilated(out, p["w3"], (1, 1, 1), "VALID",
                                       dimension_numbers=dn)
    out = bn(out, p["bn3"]) + x
    return jax.nn.relu(out)


# ----------------------------------- main -------------------------------------

if __name__ == "__main__":
    # identity-residual bottleneck: inplanes == planes * expansion
    inplanes, planes, cardinality = 128, 64, 16   # mid = 32, cpg = 2, out = 128
    N, D, H, W = 2, 8, 8, 8

    key = jax.random.PRNGKey(0)
    kx, kparam = jax.random.split(key)
    x = jax.random.normal(kx, (N, inplanes, D, H, W), jnp.float32)
    p = make_params(kparam, inplanes, planes, cardinality)

    mid = p["w1"].shape[0]
    cpg = p["w2"].shape[1]
    chunk = pick_chunk(mid, cpg)

    s1, b1 = fold_bn(p["bn1"])
    s2, b2 = fold_bn(p["bn2"])
    s3, b3 = fold_bn(p["bn3"])
    kernel_params = dict(
        w1=jnp.transpose(p["w1"][:, :, 0, 0, 0]).astype(jnp.bfloat16),   # (Cin, mid)
        w3=jnp.transpose(p["w3"][:, :, 0, 0, 0]).astype(jnp.bfloat16),   # (mid, Cout)
        w2_flat=pack_grouped_w2(p["w2"], cardinality, chunk),
        chunk=chunk,
        s1=s1, b1=b1, s2=s2, b2=b2, s3=s3, b3=b3,
    )

    # D-tile picker -> td=4, grid (N=2, D/TD=2): both the boundary-halo (zero
    # mask) and interior-halo paths are exercised and both v7x cores get work.
    out = resnext_bottleneck_forward(x, kernel_params)
    out = jax.block_until_ready(out)

    ref = reference_forward(x, p)
    # bf16 MXU inputs vs. f32 reference -> loosened tolerance (review note).
    np.testing.assert_allclose(np.asarray(out), np.asarray(ref),
                               rtol=2e-2, atol=1e-1)
    print("KERNEL_OK")
</pallas_src>

<mosaic_0001>
module attributes {stable_mosaic.version = 11 : i64} {
  func.func @_fused_bottleneck_kernel(%arg0: i32, %arg1: i32, %arg2: memref<1x4x8x8x128xf32, #tpu.memory_space<vmem>>, %arg3: memref<1x1x8x8x128xf32, #tpu.memory_space<vmem>>, %arg4: memref<1x1x8x8x128xf32, #tpu.memory_space<vmem>>, %arg5: memref<128x32xbf16, #tpu.memory_space<vmem>>, %arg6: memref<1x32xf32, #tpu.memory_space<vmem>>, %arg7: memref<1x32xf32, #tpu.memory_space<vmem>>, %arg8: memref<864x32xbf16, #tpu.memory_space<vmem>>, %arg9: memref<1x32xf32, #tpu.memory_space<vmem>>, %arg10: memref<1x32xf32, #tpu.memory_space<vmem>>, %arg11: memref<32x128xbf16, #tpu.memory_space<vmem>>, %arg12: memref<1x128xf32, #tpu.memory_space<vmem>>, %arg13: memref<1x128xf32, #tpu.memory_space<vmem>>, %arg14: memref<1x4x8x8x128xf32, #tpu.memory_space<vmem>>, %arg15: memref<6x10x17x32xf32, #tpu.memory_space<vmem>>) attributes {dimension_semantics = [#tpu.dimension_semantics<parallel>, #tpu.dimension_semantics<parallel>], iteration_bounds = array<i64: 2, 2>, scalar_prefetch = 0 : i64, scratch_operands = 1 : i64, tpu.core_type = #tpu.core_type<tc>, window_params = [{transform_indices = @transform_0, window_bounds = array<i64: 1, 4, 8, 8, 128>}, {transform_indices = @transform_1, window_bounds = array<i64: 1, 1, 8, 8, 128>}, {transform_indices = @transform_2, window_bounds = array<i64: 1, 1, 8, 8, 128>}, {pipeline_mode = #tpu.pipeline_mode<synchronous>, transform_indices = @transform_3, window_bounds = array<i64: 128, 32>}, {pipeline_mode = #tpu.pipeline_mode<synchronous>, transform_indices = @transform_4, window_bounds = array<i64: 1, 32>}, {pipeline_mode = #tpu.pipeline_mode<synchronous>, transform_indices = @transform_5, window_bounds = array<i64: 1, 32>}, {pipeline_mode = #tpu.pipeline_mode<synchronous>, transform_indices = @transform_6, window_bounds = array<i64: 864, 32>}, {pipeline_mode = #tpu.pipeline_mode<synchronous>, transform_indices = @transform_7, window_bounds = array<i64: 1, 32>}, {pipeline_mode = #tpu.pipeline_mode<synchronous>, transform_indices = @transform_8, window_bounds = array<i64: 1, 32>}, {pipeline_mode = #tpu.pipeline_mode<synchronous>, transform_indices = @transform_9, window_bounds = array<i64: 32, 128>}, {pipeline_mode = #tpu.pipeline_mode<synchronous>, transform_indices = @transform_10, window_bounds = array<i64: 1, 128>}, {pipeline_mode = #tpu.pipeline_mode<synchronous>, transform_indices = @transform_11, window_bounds = array<i64: 1, 128>}, {transform_indices = @transform_12, window_bounds = array<i64: 1, 4, 8, 8, 128>}]} {
    %c0 = arith.constant 0 : index
    %c0_0 = arith.constant 0 : index
    %0 = vector.load %arg5[%c0, %c0_0] : memref<128x32xbf16, #tpu.memory_space<vmem>>, vector<128x32xbf16>
    %c0_1 = arith.constant 0 : index
    %c0_2 = arith.constant 0 : index
    %1 = vector.load %arg6[%c0_1, %c0_2] : memref<1x32xf32, #tpu.memory_space<vmem>>, vector<1x32xf32>
    %c0_3 = arith.constant 0 : index
    %c0_4 = arith.constant 0 : index
    %2 = vector.load %arg7[%c0_3, %c0_4] : memref<1x32xf32, #tpu.memory_space<vmem>>, vector<1x32xf32>
    %c0_5 = arith.constant 0 : index
    %c0_6 = arith.constant 0 : index
    %c0_7 = arith.constant 0 : index
    %c0_8 = arith.constant 0 : index
    %c0_9 = arith.constant 0 : index
    %3 = vector.load %arg2[%c0_5, %c0_6, %c0_7, %c0_8, %c0_9] : memref<1x4x8x8x128xf32, #tpu.memory_space<vmem>>, vector<1x4x8x8x128xf32>
    %4 = vector.shape_cast %3 : vector<1x4x8x8x128xf32> to vector<256x128xf32>
    %5 = arith.truncf %4 : vector<256x128xf32> to vector<256x128xbf16>
    %cst = arith.constant dense<0.000000e+00> : vector<256x32xf32>
    %6 = tpu.matmul %5, %0, %cst {dimension_numbers = #tpu.dot_dimension_numbers<[1], [0], [0], [1], [0, 0, 1, 1], [], []>} : vector<256x128xbf16>, vector<128x32xbf16>, vector<256x32xf32> -> vector<256x32xf32>
    %7 = vector.broadcast %1 : vector<1x32xf32> to vector<256x32xf32>
    %8 = arith.mulf %6, %7 : vector<256x32xf32>
    %9 = vector.broadcast %2 : vector<1x32xf32> to vector<256x32xf32>
    %10 = arith.addf %8, %9 : vector<256x32xf32>
    %cst_10 = arith.constant 0.000000e+00 : f32
    %11 = vector.broadcast %cst_10 : f32 to vector<256x32xf32>
    %12 = arith.maximumf %10, %11 : vector<256x32xf32>
    %c0_i32 = arith.constant 0 : i32
    %13 = arith.cmpi sgt, %arg1, %c0_i32 : i32
    %cst_11 = arith.constant 1.000000e+00 : f32
    %cst_12 = arith.constant 0.000000e+00 : f32
    %14 = arith.select %13, %cst_11, %cst_12 : f32
    %c1_i32 = arith.constant 1 : i32
    %15 = arith.cmpi slt, %arg1, %c1_i32 : i32
    %cst_13 = arith.constant 1.000000e+00 : f32
    %cst_14 = arith.constant 0.000000e+00 : f32
    %16 = arith.select %15, %cst_13, %cst_14 : f32
    %c0_15 = arith.constant 0 : index
    %c0_16 = arith.constant 0 : index
    %c0_17 = arith.constant 0 : index
    %c0_18 = arith.constant 0 : index
    %c0_19 = arith.constant 0 : index
    %17 = vector.load %arg3[%c0_15, %c0_16, %c0_17, %c0_18, %c0_19] : memref<1x1x8x8x128xf32, #tpu.memory_space<vmem>>, vector<1x1x8x8x128xf32>
    %18 = vector.shape_cast %17 : vector<1x1x8x8x128xf32> to vector<64x128xf32>
    %19 = arith.truncf %18 : vector<64x128xf32> to vector<64x128xbf16>
    %cst_20 = arith.constant dense<0.000000e+00> : vector<64x32xf32>
    %20 = tpu.matmul %19, %0, %cst_20 {dimension_numbers = #tpu.dot_dimension_numbers<[1], [0], [0], [1], [0, 0, 1, 1], [], []>} : vector<64x128xbf16>, vector<128x32xbf16>, vector<64x32xf32> -> vector<64x32xf32>
    %21 = vector.broadcast %1 : vector<1x32xf32> to vector<64x32xf32>
    %22 = arith.mulf %20, %21 : vector<64x32xf32>
    %23 = vector.broadcast %2 : vector<1x32xf32> to vector<64x32xf32>
    %24 = arith.addf %22, %23 : vector<64x32xf32>
    %cst_21 = arith.constant 0.000000e+00 : f32
    %25 = vector.broadcast %cst_21 : f32 to vector<64x32xf32>
    %26 = arith.maximumf %24, %25 : vector<64x32xf32>
    %27 = vector.broadcast %14 : f32 to vector<64x32xf32>
    %28 = arith.mulf %26, %27 : vector<64x32xf32>
    %c0_22 = arith.constant 0 : index
    %c0_23 = arith.constant 0 : index
    %c0_24 = arith.constant 0 : index
    %c0_25 = arith.constant 0 : index
    %c0_26 = arith.constant 0 : index
    %29 = vector.load %arg4[%c0_22, %c0_23, %c0_24, %c0_25, %c0_26] : memref<1x1x8x8x128xf32, #tpu.memory_space<vmem>>, vector<1x1x8x8x128xf32>
    %30 = vector.shape_cast %29 : vector<1x1x8x8x128xf32> to vector<64x128xf32>
    %31 = arith.truncf %30 : vector<64x128xf32> to vector<64x128xbf16>
    %cst_27 = arith.constant dense<0.000000e+00> : vector<64x32xf32>
    %32 = tpu.matmul %31, %0, %cst_27 {dimension_numbers = #tpu.dot_dimension_numbers<[1], [0], [0], [1], [0, 0, 1, 1], [], []>} : vector<64x128xbf16>, vector<128x32xbf16>, vector<64x32xf32> -> vector<64x32xf32>
    %33 = vector.broadcast %1 : vector<1x32xf32> to vector<64x32xf32>
    %34 = arith.mulf %32, %33 : vector<64x32xf32>
    %35 = vector.broadcast %2 : vector<1x32xf32> to vector<64x32xf32>
    %36 = arith.addf %34, %35 : vector<64x32xf32>
    %cst_28 = arith.constant 0.000000e+00 : f32
    %37 = vector.broadcast %cst_28 : f32 to vector<64x32xf32>
    %38 = arith.maximumf %36, %37 : vector<64x32xf32>
    %39 = vector.broadcast %16 : f32 to vector<64x32xf32>
    %40 = arith.mulf %38, %39 : vector<64x32xf32>
    %cst_29 = arith.constant 0.000000e+00 : f32
    %41 = vector.broadcast %cst_29 : f32 to vector<6x1x10x32xf32>
    %c0_30 = arith.constant 0 : index
    %c0_31 = arith.constant 0 : index
    %c7 = arith.constant 7 : index
    %c0_32 = arith.constant 0 : index
    %42 = vector.load %arg15[%c0_30, %c0_31, %c7, %c0_32] : memref<6x10x17x32xf32, #tpu.memory_space<vmem>>, vector<6x1x10x32xf32>
    tpu.vector_store %arg15[%c0_30, %c0_31, %c7, %c0_32], %41 {strides = array<i32>} : memref<6x10x17x32xf32, #tpu.memory_space<vmem>>, vector<6x1x10x32xf32>,
    %c0_33 = arith.constant 0 : index
    %c9 = arith.constant 9 : index
    %c7_34 = arith.constant 7 : index
    %c0_35 = arith.constant 0 : index
    %43 = vector.load %arg15[%c0_33, %c9, %c7_34, %c0_35] : memref<6x10x17x32xf32, #tpu.memory_space<vmem>>, vector<6x1x10x32xf32>
    tpu.vector_store %arg15[%c0_33, %c9, %c7_34, %c0_35], %41 {strides = array<i32>} : memref<6x10x17x32xf32, #tpu.memory_space<vmem>>, vector<6x1x10x32xf32>,
    %cst_36 = arith.constant 0.000000e+00 : f32
    %44 = vector.broadcast %cst_36 : f32 to vector<6x8x1x32xf32>
    %c0_37 = arith.constant 0 : index
    %c1 = arith.constant 1 : index
    %c7_38 = arith.constant 7 : index
    %c0_39 = arith.constant 0 : index
    %45 = vector.load %arg15[%c0_37, %c1, %c7_38, %c0_39] : memref<6x10x17x32xf32, #tpu.memory_space<vmem>>, vector<6x8x1x32xf32>
    tpu.vector_store %arg15[%c0_37, %c1, %c7_38, %c0_39], %44 {strides = array<i32>} : memref<6x10x17x32xf32, #tpu.memory_space<vmem>>, vector<6x8x1x32xf32>,
    %c0_40 = arith.constant 0 : index
    %c1_41 = arith.constant 1 : index
    %c16 = arith.constant 16 : index
    %c0_42 = arith.constant 0 : index
    %46 = vector.load %arg15[%c0_40, %c1_41, %c16, %c0_42] : memref<6x10x17x32xf32, #tpu.memory_space<vmem>>, vector<6x8x1x32xf32>
    tpu.vector_store %arg15[%c0_40, %c1_41, %c16, %c0_42], %44 {strides = array<i32>} : memref<6x10x17x32xf32, #tpu.memory_space<vmem>>, vector<6x8x1x32xf32>,
    %47 = vector.shape_cast %12 : vector<256x32xf32> to vector<4x8x8x32xf32>
    %c1_43 = arith.constant 1 : index
    %c1_44 = arith.constant 1 : index
    %c8 = arith.constant 8 : index
    %c0_45 = arith.constant 0 : index
    %48 = vector.load %arg15[%c1_43, %c1_44, %c8, %c0_45] : memref<6x10x17x32xf32, #tpu.memory_space<vmem>>, vector<4x8x8x32xf32>
    tpu.vector_store %arg15[%c1_43, %c1_44, %c8, %c0_45], %47 {strides = array<i32>} : memref<6x10x17x32xf32, #tpu.memory_space<vmem>>, vector<4x8x8x32xf32>,
    %49 = vector.shape_cast %28 : vector<64x32xf32> to vector<1x8x8x32xf32>
    %c0_46 = arith.constant 0 : index
    %c1_47 = arith.constant 1 : index
    %c8_48 = arith.constant 8 : index
    %c0_49 = arith.constant 0 : index
    %50 = vector.load %arg15[%c0_46, %c1_47, %c8_48, %c0_49] : memref<6x10x17x32xf32, #tpu.memory_space<vmem>>, vector<1x8x8x32xf32>
    tpu.vector_store %arg15[%c0_46, %c1_47, %c8_48, %c0_49], %49 {strides = array<i32>} : memref<6x10x17x32xf32, #tpu.memory_space<vmem>>, vector<1x8x8x32xf32>,
    %51 = vector.shape_cast %40 : vector<64x32xf32> to vector<1x8x8x32xf32>
    %c5 = arith.constant 5 : index
    %c1_50 = arith.constant 1 : index
    %c8_51 = arith.constant 8 : index
    %c0_52 = arith.constant 0 : index
    %52 = vector.load %arg15[%c5, %c1_50, %c8_51, %c0_52] : memref<6x10x17x32xf32, #tpu.memory_space<vmem>>, vector<1x8x8x32xf32>
    tpu.vector_store %arg15[%c5, %c1_50, %c8_51, %c0_52], %51 {strides = array<i32>} : memref<6x10x17x32xf32, #tpu.memory_space<vmem>>, vector<1x8x8x32xf32>,
    %cst_53 = arith.constant 0.000000e+00 : f32
    %53 = vector.broadcast %cst_53 : f32 to vector<256x128xf32>
    %cst_54 = arith.constant 0.000000e+00 : f32
    %54 = vector.broadcast %cst_54 : f32 to vector<256x32xf32>
    %c0_55 = arith.constant 0 : index
    %c0_56 = arith.constant 0 : index
    %c7_57 = arith.constant 7 : index
    %c0_58 = arith.constant 0 : index
    %55 = vector.load %arg15[%c0_55, %c0_56, %c7_57, %c0_58] : memref<6x10x17x32xf32, #tpu.memory_space<vmem>>, vector<4x8x8x32xf32>
    %56 = vector.shape_cast %55 : vector<4x8x8x32xf32> to vector<256x32xf32>
    %57 = arith.truncf %56 : vector<256x32xf32> to vector<256x32xbf16>
    %c0_59 = arith.constant 0 : index
    %c0_60 = arith.constant 0 : index
    %58 = vector.load %arg8[%c0_59, %c0_60] : memref<864x32xbf16, #tpu.memory_space<vmem>>, vector<32x32xbf16>
    %cst_61 = arith.constant dense<0.000000e+00> : vector<256x32xf32>
    %59 = tpu.matmul %57, %58, %cst_61 {dimension_numbers = #tpu.dot_dimension_numbers<[1], [0], [0], [1], [0, 0, 1, 1], [], []>} : vector<256x32xbf16>, vector<32x32xbf16>, vector<256x32xf32> -> vector<256x32xf32>
    %60 = arith.addf %54, %59 : vector<256x32xf32>
    %c0_62 = arith.constant 0 : index
    %c0_63 = arith.constant 0 : index
    %c8_64 = arith.constant 8 : index
    %c0_65 = arith.constant 0 : index
    %61 = vector.load %arg15[%c0_62, %c0_63, %c8_64, %c0_65] : memref<6x10x17x32xf32, #tpu.memory_space<vmem>>, vector<4x8x8x32xf32>
    %62 = vector.shape_cast %61 : vector<4x8x8x32xf32> to vector<256x32xf32>
    %63 = arith.truncf %62 : vector<256x32xf32> to vector<256x32xbf16>
    %c32 = arith.constant 32 : index
    %c0_66 = arith.constant 0 : index
    %64 = vector.load %arg8[%c32, %c0_66] : memref<864x32xbf16, #tpu.memory_space<vmem>>, vector<32x32xbf16>
    %cst_67 = arith.constant dense<0.000000e+00> : vector<256x32xf32>
    %65 = tpu.matmul %63, %64, %cst_67 {dimension_numbers = #tpu.dot_dimension_numbers<[1], [0], [0], [1], [0, 0, 1, 1], [], []>} : vector<256x32xbf16>, vector<32x32xbf16>, vector<256x32xf32> -> vector<256x32xf32>
    %66 = arith.addf %60, %65 : vector<256x32xf32>
    %c0_68 = arith.constant 0 : index
    %c0_69 = arith.constant 0 : index
    %c9_70 = arith.constant 9 : index
    %c0_71 = arith.constant 0 : index
    %67 = vector.load %arg15[%c0_68, %c0_69, %c9_70, %c0_71] : memref<6x10x17x32xf32, #tpu.memory_space<vmem>>, vector<4x8x8x32xf32>
    %68 = vector.shape_cast %67 : vector<4x8x8x32xf32> to vector<256x32xf32>
    %69 = arith.truncf %68 : vector<256x32xf32> to vector<256x32xbf16>
    %c64 = arith.constant 64 : index
    %c0_72 = arith.constant 0 : index
    %70 = vector.load %arg8[%c64, %c0_72] : memref<864x32xbf16, #tpu.memory_space<vmem>>, vector<32x32xbf16>
    %cst_73 = arith.constant dense<0.000000e+00> : vector<256x32xf32>
    %71 = tpu.matmul %69, %70, %cst_73 {dimension_numbers = #tpu.dot_dimension_numbers<[1], [0], [0], [1], [0, 0, 1, 1], [], []>} : vector<256x32xbf16>, vector<32x32xbf16>, vector<256x32xf32> -> vector<256x32xf32>
    %72 = arith.addf %66, %71 : vector<256x32xf32>
    %c0_74 = arith.constant 0 : index
    %c1_75 = arith.constant 1 : index
    %c7_76 = arith.constant 7 : index
    %c0_77 = arith.constant 0 : index
    %73 = vector.load %arg15[%c0_74, %c1_75, %c7_76, %c0_77] : memref<6x10x17x32xf32, #tpu.memory_space<vmem>>, vector<4x8x8x32xf32>
    %74 = vector.shape_cast %73 : vector<4x8x8x32xf32> to vector<256x32xf32>
    %75 = arith.truncf %74 : vector<256x32xf32> to vector<256x32xbf16>
    %c96 = arith.constant 96 : index
    %c0_78 = arith.constant 0 : index
    %76 = vector.load %arg8[%c96, %c0_78] : memref<864x32xbf16, #tpu.memory_space<vmem>>, vector<32x32xbf16>
    %cst_79 = arith.constant dense<0.000000e+00> : vector<256x32xf32>
    %77 = tpu.matmul %75, %76, %cst_79 {dimension_numbers = #tpu.dot_dimension_numbers<[1], [0], [0], [1], [0, 0, 1, 1], [], []>} : vector<256x32xbf16>, vector<32x32xbf16>, vector<256x32xf32> -> vector<256x32xf32>
    %78 = arith.addf %72, %77 : vector<256x32xf32>
    %c0_80 = arith.constant 0 : index
    %c1_81 = arith.constant 1 : index
    %c8_82 = arith.constant 8 : index
    %c0_83 = arith.constant 0 : index
    %79 = vector.load %arg15[%c0_80, %c1_81, %c8_82, %c0_83] : memref<6x10x17x32xf32, #tpu.memory_space<vmem>>, vector<4x8x8x32xf32>
    %80 = vector.shape_cast %79 : vector<4x8x8x32xf32> to vector<256x32xf32>
    %81 = arith.truncf %80 : vector<256x32xf32> to vector<256x32xbf16>
    %c128 = arith.constant 128 : index
    %c0_84 = arith.constant 0 : index
    %82 = vector.load %arg8[%c128, %c0_84] : memref<864x32xbf16, #tpu.memory_space<vmem>>, vector<32x32xbf16>
    %cst_85 = arith.constant dense<0.000000e+00> : vector<256x32xf32>
    %83 = tpu.matmul %81, %82, %cst_85 {dimension_numbers = #tpu.dot_dimension_numbers<[1], [0], [0], [1], [0, 0, 1, 1], [], []>} : vector<256x32xbf16>, vector<32x32xbf16>, vector<256x32xf32> -> vector<256x32xf32>
    %84 = arith.addf %78, %83 : vector<256x32xf32>
    %c0_86 = arith.constant 0 : index
    %c1_87 = arith.constant 1 : index
    %c9_88 = arith.constant 9 : index
    %c0_89 = arith.constant 0 : index
    %85 = vector.load %arg15[%c0_86, %c1_87, %c9_88, %c0_89] : memref<6x10x17x32xf32, #tpu.memory_space<vmem>>, vector<4x8x8x32xf32>
    %86 = vector.shape_cast %85 : vector<4x8x8x32xf32> to vector<256x32xf32>
    %87 = arith.truncf %86 : vector<256x32xf32> to vector<256x32xbf16>
    %c160 = arith.constant 160 : index
    %c0_90 = arith.constant 0 : index
    %88 = vector.load %arg8[%c160, %c0_90] : memref<864x32xbf16, #tpu.memory_space<vmem>>, vector<32x32xbf16>
    %cst_91 = arith.constant dense<0.000000e+00> : vector<256x32xf32>
    %89 = tpu.matmul %87, %88, %cst_91 {dimension_numbers = #tpu.dot_dimension_numbers<[1], [0], [0], [1], [0, 0, 1, 1], [], []>} : vector<256x32xbf16>, vector<32x32xbf16>, vector<256x32xf32> -> vector<256x32xf32>
    %90 = arith.addf %84, %89 : vector<256x32xf32>
    %c0_92 = arith.constant 0 : index
    %c2 = arith.constant 2 : index
    %c7_93 = arith.constant 7 : index
    %c0_94 = arith.constant 0 : index
    %91 = vector.load %arg15[%c0_92, %c2, %c7_93, %c0_94] : memref<6x10x17x32xf32, #tpu.memory_space<vmem>>, vector<4x8x8x32xf32>
    %92 = vector.shape_cast %91 : vector<4x8x8x32xf32> to vector<256x32xf32>
    %93 = arith.truncf %92 : vector<256x32xf32> to vector<256x32xbf16>
    %c192 = arith.constant 192 : index
    %c0_95 = arith.constant 0 : index
    %94 = vector.load %arg8[%c192, %c0_95] : memref<864x32xbf16, #tpu.memory_space<vmem>>, vector<32x32xbf16>
    %cst_96 = arith.constant dense<0.000000e+00> : vector<256x32xf32>
    %95 = tpu.matmul %93, %94, %cst_96 {dimension_numbers = #tpu.dot_dimension_numbers<[1], [0], [0], [1], [0, 0, 1, 1], [], []>} : vector<256x32xbf16>, vector<32x32xbf16>, vector<256x32xf32> -> vector<256x32xf32>
    %96 = arith.addf %90, %95 : vector<256x32xf32>
    %c0_97 = arith.constant 0 : index
    %c2_98 = arith.constant 2 : index
    %c8_99 = arith.constant 8 : index
    %c0_100 = arith.constant 0 : index
    %97 = vector.load %arg15[%c0_97, %c2_98, %c8_99, %c0_100] : memref<6x10x17x32xf32, #tpu.memory_space<vmem>>, vector<4x8x8x32xf32>
    %98 = vector.shape_cast %97 : vector<4x8x8x32xf32> to vector<256x32xf32>
    %99 = arith.truncf %98 : vector<256x32xf32> to vector<256x32xbf16>
    %c224 = arith.constant 224 : index
    %c0_101 = arith.constant 0 : index
    %100 = vector.load %arg8[%c224, %c0_101] : memref<864x32xbf16, #tpu.memory_space<vmem>>, vector<32x32xbf16>
    %cst_102 = arith.constant dense<0.000000e+00> : vector<256x32xf32>
    %101 = tpu.matmul %99, %100, %cst_102 {dimension_numbers = #tpu.dot_dimension_numbers<[1], [0], [0], [1], [0, 0, 1, 1], [], []>} : vector<256x32xbf16>, vector<32x32xbf16>, vector<256x32xf32> -> vector<256x32xf32>
    %102 = arith.addf %96, %101 : vector<256x32xf32>
    %c0_103 = arith.constant 0 : index
    %c2_104 = arith.constant 2 : index
    %c9_105 = arith.constant 9 : index
    %c0_106 = arith.constant 0 : index
    %103 = vector.load %arg15[%c0_103, %c2_104, %c9_105, %c0_106] : memref<6x10x17x32xf32, #tpu.memory_space<vmem>>, vector<4x8x8x32xf32>
    %104 = vector.shape_cast %103 : vector<4x8x8x32xf32> to vector<256x32xf32>
    %105 = arith.truncf %104 : vector<256x32xf32> to vector<256x32xbf16>
    %c256 = arith.constant 256 : index
    %c0_107 = arith.constant 0 : index
    %106 = vector.load %arg8[%c256, %c0_107] : memref<864x32xbf16, #tpu.memory_space<vmem>>, vector<32x32xbf16>
    %cst_108 = arith.constant dense<0.000000e+00> : vector<256x32xf32>
    %107 = tpu.matmul %105, %106, %cst_108 {dimension_numbers = #tpu.dot_dimension_numbers<[1], [0], [0], [1], [0, 0, 1, 1], [], []>} : vector<256x32xbf16>, vector<32x32xbf16>, vector<256x32xf32> -> vector<256x32xf32>
    %108 = arith.addf %102, %107 : vector<256x32xf32>
    %c1_109 = arith.constant 1 : index
    %c0_110 = arith.constant 0 : index
    %c7_111 = arith.constant 7 : index
    %c0_112 = arith.constant 0 : index
    %109 = vector.load %arg15[%c1_109, %c0_110, %c7_111, %c0_112] : memref<6x10x17x32xf32, #tpu.memory_space<vmem>>, vector<4x8x8x32xf32>
    %110 = vector.shape_cast %109 : vector<4x8x8x32xf32> to vector<256x32xf32>
    %111 = arith.truncf %110 : vector<256x32xf32> to vector<256x32xbf16>
    %c288 = arith.constant 288 : index
    %c0_113 = arith.constant 0 : index
    %112 = vector.load %arg8[%c288, %c0_113] : memref<864x32xbf16, #tpu.memory_space<vmem>>, vector<32x32xbf16>
    %cst_114 = arith.constant dense<0.000000e+00> : vector<256x32xf32>
    %113 = tpu.matmul %111, %112, %cst_114 {dimension_numbers = #tpu.dot_dimension_numbers<[1], [0], [0], [1], [0, 0, 1, 1], [], []>} : vector<256x32xbf16>, vector<32x32xbf16>, vector<256x32xf32> -> vector<256x32xf32>
    %114 = arith.addf %108, %113 : vector<256x32xf32>
    %c1_115 = arith.constant 1 : index
    %c0_116 = arith.constant 0 : index
    %c8_117 = arith.constant 8 : index
    %c0_118 = arith.constant 0 : index
    %115 = vector.load %arg15[%c1_115, %c0_116, %c8_117, %c0_118] : memref<6x10x17x32xf32, #tpu.memory_space<vmem>>, vector<4x8x8x32xf32>
    %116 = vector.shape_cast %115 : vector<4x8x8x32xf32> to vector<256x32xf32>
    %117 = arith.truncf %116 : vector<256x32xf32> to vector<256x32xbf16>
    %c320 = arith.constant 320 : index
    %c0_119 = arith.constant 0 : index
    %118 = vector.load %arg8[%c320, %c0_119] : memref<864x32xbf16, #tpu.memory_space<vmem>>, vector<32x32xbf16>
    %cst_120 = arith.constant dense<0.000000e+00> : vector<256x32xf32>
    %119 = tpu.matmul %117, %118, %cst_120 {dimension_numbers = #tpu.dot_dimension_numbers<[1], [0], [0], [1], [0, 0, 1, 1], [], []>} : vector<256x32xbf16>, vector<32x32xbf16>, vector<256x32xf32> -> vector<256x32xf32>
    %120 = arith.addf %114, %119 : vector<256x32xf32>
    %c1_121 = arith.constant 1 : index
    %c0_122 = arith.constant 0 : index
    %c9_123 = arith.constant 9 : index
    %c0_124 = arith.constant 0 : index
    %121 = vector.load %arg15[%c1_121, %c0_122, %c9_123, %c0_124] : memref<6x10x17x32xf32, #tpu.memory_space<vmem>>, vector<4x8x8x32xf32>
    %122 = vector.shape_cast %121 : vector<4x8x8x32xf32> to vector<256x32xf32>
    %123 = arith.truncf %122 : vector<256x32xf32> to vector<256x32xbf16>
    %c352 = arith.constant 352 : index
    %c0_125 = arith.constant 0 : index
    %124 = vector.load %arg8[%c352, %c0_125] : memref<864x32xbf16, #tpu.memory_space<vmem>>, vector<32x32xbf16>
    %cst_126 = arith.constant dense<0.000000e+00> : vector<256x32xf32>
    %125 = tpu.matmul %123, %124, %cst_126 {dimension_numbers = #tpu.dot_dimension_numbers<[1], [0], [0], [1], [0, 0, 1, 1], [], []>} : vector<256x32xbf16>, vector<32x32xbf16>, vector<256x32xf32> -> vector<256x32xf32>
    %126 = arith.addf %120, %125 : vector<256x32xf32>
    %c1_127 = arith.constant 1 : index
    %c1_128 = arith.constant 1 : index
    %c7_129 = arith.constant 7 : index
    %c0_130 = arith.constant 0 : index
    %127 = vector.load %arg15[%c1_127, %c1_128, %c7_129, %c0_130] : memref<6x10x17x32xf32, #tpu.memory_space<vmem>>, vector<4x8x8x32xf32>
    %128 = vector.shape_cast %127 : vector<4x8x8x32xf32> to vector<256x32xf32>
    %129 = arith.truncf %128 : vector<256x32xf32> to vector<256x32xbf16>
    %c384 = arith.constant 384 : index
    %c0_131 = arith.constant 0 : index
    %130 = vector.load %arg8[%c384, %c0_131] : memref<864x32xbf16, #tpu.memory_space<vmem>>, vector<32x32xbf16>
    %cst_132 = arith.constant dense<0.000000e+00> : vector<256x32xf32>
    %131 = tpu.matmul %129, %130, %cst_132 {dimension_numbers = #tpu.dot_dimension_numbers<[1], [0], [0], [1], [0, 0, 1, 1], [], []>} : vector<256x32xbf16>, vector<32x32xbf16>, vector<256x32xf32> -> vector<256x32xf32>
    %132 = arith.addf %126, %131 : vector<256x32xf32>
    %c1_133 = arith.constant 1 : index
    %c1_134 = arith.constant 1 : index
    %c8_135 = arith.constant 8 : index
    %c0_136 = arith.constant 0 : index
    %133 = vector.load %arg15[%c1_133, %c1_134, %c8_135, %c0_136] : memref<6x10x17x32xf32, #tpu.memory_space<vmem>>, vector<4x8x8x32xf32>
    %134 = vector.shape_cast %133 : vector<4x8x8x32xf32> to vector<256x32xf32>
    %135 = arith.truncf %134 : vector<256x32xf32> to vector<256x32xbf16>
    %c416 = arith.constant 416 : index
    %c0_137 = arith.constant 0 : index
    %136 = vector.load %arg8[%c416, %c0_137] : memref<864x32xbf16, #tpu.memory_space<vmem>>, vector<32x32xbf16>
    %cst_138 = arith.constant dense<0.000000e+00> : vector<256x32xf32>
    %137 = tpu.matmul %135, %136, %cst_138 {dimension_numbers = #tpu.dot_dimension_numbers<[1], [0], [0], [1], [0, 0, 1, 1], [], []>} : vector<256x32xbf16>, vector<32x32xbf16>, vector<256x32xf32> -> vector<256x32xf32>
    %138 = arith.addf %132, %137 : vector<256x32xf32>
    %c1_139 = arith.constant 1 : index
    %c1_140 = arith.constant 1 : index
    %c9_141 = arith.constant 9 : index
    %c0_142 = arith.constant 0 : index
    %139 = vector.load %arg15[%c1_139, %c1_140, %c9_141, %c0_142] : memref<6x10x17x32xf32, #tpu.memory_space<vmem>>, vector<4x8x8x32xf32>
    %140 = vector.shape_cast %139 : vector<4x8x8x32xf32> to vector<256x32xf32>
    %141 = arith.truncf %140 : vector<256x32xf32> to vector<256x32xbf16>
    %c448 = arith.constant 448 : index
    %c0_143 = arith.constant 0 : index
    %142 = vector.load %arg8[%c448, %c0_143] : memref<864x32xbf16, #tpu.memory_space<vmem>>, vector<32x32xbf16>
    %cst_144 = arith.constant dense<0.000000e+00> : vector<256x32xf32>
    %143 = tpu.matmul %141, %142, %cst_144 {dimension_numbers = #tpu.dot_dimension_numbers<[1], [0], [0], [1], [0, 0, 1, 1], [], []>} : vector<256x32xbf16>, vector<32x32xbf16>, vector<256x32xf32> -> vector<256x32xf32>
    %144 = arith.addf %138, %143 : vector<256x32xf32>
    %c1_145 = arith.constant 1 : index
    %c2_146 = arith.constant 2 : index
    %c7_147 = arith.constant 7 : index
    %c0_148 = arith.constant 0 : index
    %145 = vector.load %arg15[%c1_145, %c2_146, %c7_147, %c0_148] : memref<6x10x17x32xf32, #tpu.memory_space<vmem>>, vector<4x8x8x32xf32>
    %146 = vector.shape_cast %145 : vector<4x8x8x32xf32> to vector<256x32xf32>
    %147 = arith.truncf %146 : vector<256x32xf32> to vector<256x32xbf16>
    %c480 = arith.constant 480 : index
    %c0_149 = arith.constant 0 : index
    %148 = vector.load %arg8[%c480, %c0_149] : memref<864x32xbf16, #tpu.memory_space<vmem>>, vector<32x32xbf16>
    %cst_150 = arith.constant dense<0.000000e+00> : vector<256x32xf32>
    %149 = tpu.matmul %147, %148, %cst_150 {dimension_numbers = #tpu.dot_dimension_numbers<[1], [0], [0], [1], [0, 0, 1, 1], [], []>} : vector<256x32xbf16>, vector<32x32xbf16>, vector<256x32xf32> -> vector<256x32xf32>
    %150 = arith.addf %144, %149 : vector<256x32xf32>
    %c1_151 = arith.constant 1 : index
    %c2_152 = arith.constant 2 : index
    %c8_153 = arith.constant 8 : index
    %c0_154 = arith.constant 0 : index
    %151 = vector.load %arg15[%c1_151, %c2_152, %c8_153, %c0_154] : memref<6x10x17x32xf32, #tpu.memory_space<vmem>>, vector<4x8x8x32xf32>
    %152 = vector.shape_cast %151 : vector<4x8x8x32xf32> to vector<256x32xf32>
    %153 = arith.truncf %152 : vector<256x32xf32> to vector<256x32xbf16>
    %c512 = arith.constant 512 : index
    %c0_155 = arith.constant 0 : index
    %154 = vector.load %arg8[%c512, %c0_155] : memref<864x32xbf16, #tpu.memory_space<vmem>>, vector<32x32xbf16>
    %cst_156 = arith.constant dense<0.000000e+00> : vector<256x32xf32>
    %155 = tpu.matmul %153, %154, %cst_156 {dimension_numbers = #tpu.dot_dimension_numbers<[1], [0], [0], [1], [0, 0, 1, 1], [], []>} : vector<256x32xbf16>, vector<32x32xbf16>, vector<256x32xf32> -> vector<256x32xf32>
    %156 = arith.addf %150, %155 : vector<256x32xf32>
    %c1_157 = arith.constant 1 : index
    %c2_158 = arith.constant 2 : index
    %c9_159 = arith.constant 9 : index
    %c0_160 = arith.constant 0 : index
    %157 = vector.load %arg15[%c1_157, %c2_158, %c9_159, %c0_160] : memref<6x10x17x32xf32, #tpu.memory_space<vmem>>, vector<4x8x8x32xf32>
    %158 = vector.shape_cast %157 : vector<4x8x8x32xf32> to vector<256x32xf32>
    %159 = arith.truncf %158 : vector<256x32xf32> to vector<256x32xbf16>
    %c544 = arith.constant 544 : index
    %c0_161 = arith.constant 0 : index
    %160 = vector.load %arg8[%c544, %c0_161] : memref<864x32xbf16, #tpu.memory_space<vmem>>, vector<32x32xbf16>
    %cst_162 = arith.constant dense<0.000000e+00> : vector<256x32xf32>
    %161 = tpu.matmul %159, %160, %cst_162 {dimension_numbers = #tpu.dot_dimension_numbers<[1], [0], [0], [1], [0, 0, 1, 1], [], []>} : vector<256x32xbf16>, vector<32x32xbf16>, vector<256x32xf32> -> vector<256x32xf32>
    %162 = arith.addf %156, %161 : vector<256x32xf32>
    %c2_163 = arith.constant 2 : index
    %c0_164 = arith.constant 0 : index
    %c7_165 = arith.constant 7 : index
    %c0_166 = arith.constant 0 : index
    %163 = vector.load %arg15[%c2_163, %c0_164, %c7_165, %c0_166] : memref<6x10x17x32xf32, #tpu.memory_space<vmem>>, vector<4x8x8x32xf32>
    %164 = vector.shape_cast %163 : vector<4x8x8x32xf32> to vector<256x32xf32>
    %165 = arith.truncf %164 : vector<256x32xf32> to vector<256x32xbf16>
    %c576 = arith.constant 576 : index
    %c0_167 = arith.constant 0 : index
    %166 = vector.load %arg8[%c576, %c0_167] : memref<864x32xbf16, #tpu.memory_space<vmem>>, vector<32x32xbf16>
    %cst_168 = arith.constant dense<0.000000e+00> : vector<256x32xf32>
    %167 = tpu.matmul %165, %166, %cst_168 {dimension_numbers = #tpu.dot_dimension_numbers<[1], [0], [0], [1], [0, 0, 1, 1], [], []>} : vector<256x32xbf16>, vector<32x32xbf16>, vector<256x32xf32> -> vector<256x32xf32>
    %168 = arith.addf %162, %167 : vector<256x32xf32>
    %c2_169 = arith.constant 2 : index
    %c0_170 = arith.constant 0 : index
    %c8_171 = arith.constant 8 : index
    %c0_172 = arith.constant 0 : index
    %169 = vector.load %arg15[%c2_169, %c0_170, %c8_171, %c0_172] : memref<6x10x17x32xf32, #tpu.memory_space<vmem>>, vector<4x8x8x32xf32>
    %170 = vector.shape_cast %169 : vector<4x8x8x32xf32> to vector<256x32xf32>
    %171 = arith.truncf %170 : vector<256x32xf32> to vector<256x32xbf16>
    %c608 = arith.constant 608 : index
    %c0_173 = arith.constant 0 : index
    %172 = vector.load %arg8[%c608, %c0_173] : memref<864x32xbf16, #tpu.memory_space<vmem>>, vector<32x32xbf16>
    %cst_174 = arith.constant dense<0.000000e+00> : vector<256x32xf32>
    %173 = tpu.matmul %171, %172, %cst_174 {dimension_numbers = #tpu.dot_dimension_numbers<[1], [0], [0], [1], [0, 0, 1, 1], [], []>} : vector<256x32xbf16>, vector<32x32xbf16>, vector<256x32xf32> -> vector<256x32xf32>
    %174 = arith.addf %168, %173 : vector<256x32xf32>
    %c2_175 = arith.constant 2 : index
    %c0_176 = arith.constant 0 : index
    %c9_177 = arith.constant 9 : index
    %c0_178 = arith.constant 0 : index
    %175 = vector.load %arg15[%c2_175, %c0_176, %c9_177, %c0_178] : memref<6x10x17x32xf32, #tpu.memory_space<vmem>>, vector<4x8x8x32xf32>
    %176 = vector.shape_cast %175 : vector<4x8x8x32xf32> to vector<256x32xf32>
    %177 = arith.truncf %176 : vector<256x32xf32> to vector<256x32xbf16>
    %c640 = arith.constant 640 : index
    %c0_179 = arith.constant 0 : index
    %178 = vector.load %arg8[%c640, %c0_179] : memref<864x32xbf16, #tpu.memory_space<vmem>>, vector<32x32xbf16>
    %cst_180 = arith.constant dense<0.000000e+00> : vector<256x32xf32>
    %179 = tpu.matmul %177, %178, %cst_180 {dimension_numbers = #tpu.dot_dimension_numbers<[1], [0], [0], [1], [0, 0, 1, 1], [], []>} : vector<256x32xbf16>, vector<32x32xbf16>, vector<256x32xf32> -> vector<256x32xf32>
    %180 = arith.addf %174, %179 : vector<256x32xf32>
    %c2_181 = arith.constant 2 : index
    %c1_182 = arith.constant 1 : index
    %c7_183 = arith.constant 7 : index
    %c0_184 = arith.constant 0 : index
    %181 = vector.load %arg15[%c2_181, %c1_182, %c7_183, %c0_184] : memref<6x10x17x32xf32, #tpu.memory_space<vmem>>, vector<4x8x8x32xf32>
    %182 = vector.shape_cast %181 : vector<4x8x8x32xf32> to vector<256x32xf32>
    %183 = arith.truncf %182 : vector<256x32xf32> to vector<256x32xbf16>
    %c672 = arith.constant 672 : index
    %c0_185 = arith.constant 0 : index
    %184 = vector.load %arg8[%c672, %c0_185] : memref<864x32xbf16, #tpu.memory_space<vmem>>, vector<32x32xbf16>
    %cst_186 = arith.constant dense<0.000000e+00> : vector<256x32xf32>
    %185 = tpu.matmul %183, %184, %cst_186 {dimension_numbers = #tpu.dot_dimension_numbers<[1], [0], [0], [1], [0, 0, 1, 1], [], []>} : vector<256x32xbf16>, vector<32x32xbf16>, vector<256x32xf32> -> vector<256x32xf32>
    %186 = arith.addf %180, %185 : vector<256x32xf32>
    %c2_187 = arith.constant 2 : index
    %c1_188 = arith.constant 1 : index
    %c8_189 = arith.constant 8 : index
    %c0_190 = arith.constant 0 : index
    %187 = vector.load %arg15[%c2_187, %c1_188, %c8_189, %c0_190] : memref<6x10x17x32xf32, #tpu.memory_space<vmem>>, vector<4x8x8x32xf32>
    %188 = vector.shape_cast %187 : vector<4x8x8x32xf32> to vector<256x32xf32>
    %189 = arith.truncf %188 : vector<256x32xf32> to vector<256x32xbf16>
    %c704 = arith.constant 704 : index
    %c0_191 = arith.constant 0 : index
    %190 = vector.load %arg8[%c704, %c0_191] : memref<864x32xbf16, #tpu.memory_space<vmem>>, vector<32x32xbf16>
    %cst_192 = arith.constant dense<0.000000e+00> : vector<256x32xf32>
    %191 = tpu.matmul %189, %190, %cst_192 {dimension_numbers = #tpu.dot_dimension_numbers<[1], [0], [0], [1], [0, 0, 1, 1], [], []>} : vector<256x32xbf16>, vector<32x32xbf16>, vector<256x32xf32> -> vector<256x32xf32>
    %192 = arith.addf %186, %191 : vector<256x32xf32>
    %c2_193 = arith.constant 2 : index
    %c1_194 = arith.constant 1 : index
    %c9_195 = arith.constant 9 : index
    %c0_196 = arith.constant 0 : index
    %193 = vector.load %arg15[%c2_193, %c1_194, %c9_195, %c0_196] : memref<6x10x17x32xf32, #tpu.memory_space<vmem>>, vector<4x8x8x32xf32>
    %194 = vector.shape_cast %193 : vector<4x8x8x32xf32> to vector<256x32xf32>
    %195 = arith.truncf %194 : vector<256x32xf32> to vector<256x32xbf16>
    %c736 = arith.constant 736 : index
    %c0_197 = arith.constant 0 : index
    %196 = vector.load %arg8[%c736, %c0_197] : memref<864x32xbf16, #tpu.memory_space<vmem>>, vector<32x32xbf16>
    %cst_198 = arith.constant dense<0.000000e+00> : vector<256x32xf32>
    %197 = tpu.matmul %195, %196, %cst_198 {dimension_numbers = #tpu.dot_dimension_numbers<[1], [0], [0], [1], [0, 0, 1, 1], [], []>} : vector<256x32xbf16>, vector<32x32xbf16>, vector<256x32xf32> -> vector<256x32xf32>
    %198 = arith.addf %192, %197 : vector<256x32xf32>
    %c2_199 = arith.constant 2 : index
    %c2_200 = arith.constant 2 : index
    %c7_201 = arith.constant 7 : index
    %c0_202 = arith.constant 0 : index
    %199 = vector.load %arg15[%c2_199, %c2_200, %c7_201, %c0_202] : memref<6x10x17x32xf32, #tpu.memory_space<vmem>>, vector<4x8x8x32xf32>
    %200 = vector.shape_cast %199 : vector<4x8x8x32xf32> to vector<256x32xf32>
    %201 = arith.truncf %200 : vector<256x32xf32> to vector<256x32xbf16>
    %c768 = arith.constant 768 : index
    %c0_203 = arith.constant 0 : index
    %202 = vector.load %arg8[%c768, %c0_203] : memref<864x32xbf16, #tpu.memory_space<vmem>>, vector<32x32xbf16>
    %cst_204 = arith.constant dense<0.000000e+00> : vector<256x32xf32>
    %203 = tpu.matmul %201, %202, %cst_204 {dimension_numbers = #tpu.dot_dimension_numbers<[1], [0], [0], [1], [0, 0, 1, 1], [], []>} : vector<256x32xbf16>, vector<32x32xbf16>, vector<256x32xf32> -> vector<256x32xf32>
    %204 = arith.addf %198, %203 : vector<256x32xf32>
    %c2_205 = arith.constant 2 : index
    %c2_206 = arith.constant 2 : index
    %c8_207 = arith.constant 8 : index
    %c0_208 = arith.constant 0 : index
    %205 = vector.load %arg15[%c2_205, %c2_206, %c8_207, %c0_208] : memref<6x10x17x32xf32, #tpu.memory_space<vmem>>, vector<4x8x8x32xf32>
    %206 = vector.shape_cast %205 : vector<4x8x8x32xf32> to vector<256x32xf32>
    %207 = arith.truncf %206 : vector<256x32xf32> to vector<256x32xbf16>
    %c800 = arith.constant 800 : index
    %c0_209 = arith.constant 0 : index
    %208 = vector.load %arg8[%c800, %c0_209] : memref<864x32xbf16, #tpu.memory_space<vmem>>, vector<32x32xbf16>
    %cst_210 = arith.constant dense<0.000000e+00> : vector<256x32xf32>
    %209 = tpu.matmul %207, %208, %cst_210 {dimension_numbers = #tpu.dot_dimension_numbers<[1], [0], [0], [1], [0, 0, 1, 1], [], []>} : vector<256x32xbf16>, vector<32x32xbf16>, vector<256x32xf32> -> vector<256x32xf32>
    %210 = arith.addf %204, %209 : vector<256x32xf32>
    %c2_211 = arith.constant 2 : index
    %c2_212 = arith.constant 2 : index
    %c9_213 = arith.constant 9 : index
    %c0_214 = arith.constant 0 : index
    %211 = vector.load %arg15[%c2_211, %c2_212, %c9_213, %c0_214] : memref<6x10x17x32xf32, #tpu.memory_space<vmem>>, vector<4x8x8x32xf32>
    %212 = vector.shape_cast %211 : vector<4x8x8x32xf32> to vector<256x32xf32>
    %213 = arith.truncf %212 : vector<256x32xf32> to vector<256x32xbf16>
    %c832 = arith.constant 832 : index
    %c0_215 = arith.constant 0 : index
    %214 = vector.load %arg8[%c832, %c0_215] : memref<864x32xbf16, #tpu.memory_space<vmem>>, vector<32x32xbf16>
    %cst_216 = arith.constant dense<0.000000e+00> : vector<256x32xf32>
    %215 = tpu.matmul %213, %214, %cst_216 {dimension_numbers = #tpu.dot_dimension_numbers<[1], [0], [0], [1], [0, 0, 1, 1], [], []>} : vector<256x32xbf16>, vector<32x32xbf16>, vector<256x32xf32> -> vector<256x32xf32>
    %216 = arith.addf %210, %215 : vector<256x32xf32>
    %c0_217 = arith.constant 0 : index
    %c0_218 = arith.constant 0 : index
    %217 = vector.load %arg9[%c0_217, %c0_218] : memref<1x32xf32, #tpu.memory_space<vmem>>, vector<1x32xf32>
    %218 = vector.broadcast %217 : vector<1x32xf32> to vector<256x32xf32>
    %219 = arith.mulf %216, %218 : vector<256x32xf32>
    %c0_219 = arith.constant 0 : index
    %c0_220 = arith.constant 0 : index
    %220 = vector.load %arg10[%c0_219, %c0_220] : memref<1x32xf32, #tpu.memory_space<vmem>>, vector<1x32xf32>
    %221 = vector.broadcast %220 : vector<1x32xf32> to vector<256x32xf32>
    %222 = arith.addf %219, %221 : vector<256x32xf32>
    %cst_221 = arith.constant 0.000000e+00 : f32
    %223 = vector.broadcast %cst_221 : f32 to vector<256x32xf32>
    %224 = arith.maximumf %222, %223 : vector<256x32xf32>
    %225 = arith.truncf %224 : vector<256x32xf32> to vector<256x32xbf16>
    %c0_222 = arith.constant 0 : index
    %c0_223 = arith.constant 0 : index
    %226 = vector.load %arg11[%c0_222, %c0_223] : memref<32x128xbf16, #tpu.memory_space<vmem>>, vector<32x128xbf16>
    %cst_224 = arith.constant dense<0.000000e+00> : vector<256x128xf32>
    %227 = tpu.matmul %225, %226, %cst_224 {dimension_numbers = #tpu.dot_dimension_numbers<[1], [0], [0], [1], [0, 0, 1, 1], [], []>} : vector<256x32xbf16>, vector<32x128xbf16>, vector<256x128xf32> -> vector<256x128xf32>
    %228 = arith.addf %53, %227 : vector<256x128xf32>
    %c0_225 = arith.constant 0 : index
    %c0_226 = arith.constant 0 : index
    %229 = vector.load %arg12[%c0_225, %c0_226] : memref<1x128xf32, #tpu.memory_space<vmem>>, vector<1x128xf32>
    %230 = vector.broadcast %229 : vector<1x128xf32> to vector<256x128xf32>
    %231 = arith.mulf %228, %230 : vector<256x128xf32>
    %c0_227 = arith.constant 0 : index
    %c0_228 = arith.constant 0 : index
    %232 = vector.load %arg13[%c0_227, %c0_228] : memref<1x128xf32, #tpu.memory_space<vmem>>, vector<1x128xf32>
    %233 = vector.broadcast %232 : vector<1x128xf32> to vector<256x128xf32>
    %234 = arith.addf %231, %233 : vector<256x128xf32>
    %c0_229 = arith.constant 0 : index
    %c0_230 = arith.constant 0 : index
    %c0_231 = arith.constant 0 : index
    %c0_232 = arith.constant 0 : index
    %c0_233 = arith.constant 0 : index
    %235 = vector.load %arg2[%c0_229, %c0_230, %c0_231, %c0_232, %c0_233] : memref<1x4x8x8x128xf32, #tpu.memory_space<vmem>>, vector<1x4x8x8x128xf32>
    %236 = vector.shape_cast %235 : vector<1x4x8x8x128xf32> to vector<256x128xf32>
    %237 = arith.addf %234, %236 : vector<256x128xf32>
    %cst_234 = arith.constant 0.000000e+00 : f32
    %238 = vector.broadcast %cst_234 : f32 to vector<256x128xf32>
    %239 = arith.maximumf %237, %238 : vector<256x128xf32>
    %240 = vector.shape_cast %239 : vector<256x128xf32> to vector<1x4x8x8x128xf32>
    %c0_235 = arith.constant 0 : index
    %c0_236 = arith.constant 0 : index
    %c0_237 = arith.constant 0 : index
    %c0_238 = arith.constant 0 : index
    %c0_239 = arith.constant 0 : index
    %241 = vector.load %arg14[%c0_235, %c0_236, %c0_237, %c0_238, %c0_239] : memref<1x4x8x8x128xf32, #tpu.memory_space<vmem>>, vector<1x4x8x8x128xf32>
    tpu.vector_store %arg14[%c0_235, %c0_236, %c0_237, %c0_238, %c0_239], %240 {strides = array<i32>} : memref<1x4x8x8x128xf32, #tpu.memory_space<vmem>>, vector<1x4x8x8x128xf32>,
    return
  }
  func.func @transform_0(%arg0: i32, %arg1: i32) -> (i32, i32, i32, i32, i32) {
    %c0_i32 = arith.constant 0 : i32
    %c0_i32_0 = arith.constant 0 : i32
    %c0_i32_1 = arith.constant 0 : i32
    %c0_i32_2 = arith.constant 0 : i32
    return %arg0, %arg1, %c0_i32, %c0_i32_0, %c0_i32_1 : i32, i32, i32, i32, i32
  }
  func.func @transform_1(%arg0: i32, %arg1: i32) -> (i32, i32, i32, i32, i32) {
    %c4_i32 = arith.constant 4 : i32
    %0 = arith.muli %arg1, %c4_i32 : i32
    %c1_i32 = arith.constant 1 : i32
    %1 = arith.subi %0, %c1_i32 : i32
    %c0_i32 = arith.constant 0 : i32
    %2 = arith.maxsi %1, %c0_i32 : i32
    %c0_i32_0 = arith.constant 0 : i32
    %c0_i32_1 = arith.constant 0 : i32
    %c0_i32_2 = arith.constant 0 : i32
    %c0_i32_3 = arith.constant 0 : i32
    return %arg0, %2, %c0_i32_0, %c0_i32_1, %c0_i32_2 : i32, i32, i32, i32, i32
  }
  func.func @transform_2(%arg0: i32, %arg1: i32) -> (i32, i32, i32, i32, i32) {
    %c4_i32 = arith.constant 4 : i32
    %0 = arith.muli %arg1, %c4_i32 : i32
    %c4_i32_0 = arith.constant 4 : i32
    %1 = arith.addi %0, %c4_i32_0 : i32
    %c7_i32 = arith.constant 7 : i32
    %2 = arith.minsi %1, %c7_i32 : i32
    %c0_i32 = arith.constant 0 : i32
    %c0_i32_1 = arith.constant 0 : i32
    %c0_i32_2 = arith.constant 0 : i32
    %c0_i32_3 = arith.constant 0 : i32
    return %arg0, %2, %c0_i32, %c0_i32_1, %c0_i32_2 : i32, i32, i32, i32, i32
  }
  func.func @transform_3(%arg0: i32, %arg1: i32) -> (i32, i32) {
    %c0_i32 = arith.constant 0 : i32
    %c0_i32_0 = arith.constant 0 : i32
    %c0_i32_1 = arith.constant 0 : i32
    return %c0_i32, %c0_i32_0 : i32, i32
  }
  func.func @transform_4(%arg0: i32, %arg1: i32) -> (i32, i32) {
    %c0_i32 = arith.constant 0 : i32
    %c0_i32_0 = arith.constant 0 : i32
    %c0_i32_1 = arith.constant 0 : i32
    return %c0_i32, %c0_i32_0 : i32, i32
  }
  func.func @transform_5(%arg0: i32, %arg1: i32) -> (i32, i32) {
    %c0_i32 = arith.constant 0 : i32
    %c0_i32_0 = arith.constant 0 : i32
    %c0_i32_1 = arith.constant 0 : i32
    return %c0_i32, %c0_i32_0 : i32, i32
  }
  func.func @transform_6(%arg0: i32, %arg1: i32) -> (i32, i32) {
    %c0_i32 = arith.constant 0 : i32
    %c0_i32_0 = arith.constant 0 : i32
    %c0_i32_1 = arith.constant 0 : i32
    return %c0_i32, %c0_i32_0 : i32, i32
  }
  func.func @transform_7(%arg0: i32, %arg1: i32) -> (i32, i32) {
    %c0_i32 = arith.constant 0 : i32
    %c0_i32_0 = arith.constant 0 : i32
    %c0_i32_1 = arith.constant 0 : i32
    return %c0_i32, %c0_i32_0 : i32, i32
  }
  func.func @transform_8(%arg0: i32, %arg1: i32) -> (i32, i32) {
    %c0_i32 = arith.constant 0 : i32
    %c0_i32_0 = arith.constant 0 : i32
    %c0_i32_1 = arith.constant 0 : i32
    return %c0_i32, %c0_i32_0 : i32, i32
  }
  func.func @transform_9(%arg0: i32, %arg1: i32) -> (i32, i32) {
    %c0_i32 = arith.constant 0 : i32
    %c0_i32_0 = arith.constant 0 : i32
    %c0_i32_1 = arith.constant 0 : i32
    return %c0_i32, %c0_i32_0 : i32, i32
  }
  func.func @transform_10(%arg0: i32, %arg1: i32) -> (i32, i32) {
    %c0_i32 = arith.constant 0 : i32
    %c0_i32_0 = arith.constant 0 : i32
    %c0_i32_1 = arith.constant 0 : i32
    return %c0_i32, %c0_i32_0 : i32, i32
  }
  func.func @transform_11(%arg0: i32, %arg1: i32) -> (i32, i32) {
    %c0_i32 = arith.constant 0 : i32
    %c0_i32_0 = arith.constant 0 : i32
    %c0_i32_1 = arith.constant 0 : i32
    return %c0_i32, %c0_i32_0 : i32, i32
  }
  func.func @transform_12(%arg0: i32, %arg1: i32) -> (i32, i32, i32, i32, i32) {
    %c0_i32 = arith.constant 0 : i32
    %c0_i32_0 = arith.constant 0 : i32
    %c0_i32_1 = arith.constant 0 : i32
    %c0_i32_2 = arith.constant 0 : i32
    return %arg0, %arg1, %c0_i32, %c0_i32_0, %c0_i32_1 : i32, i32, i32, i32, i32
  }
}

</mosaic_0001>

<bundles_post_ra>
// kernel: tpu_custom_call.1
= control target key start
LH: loop header
LB: loop body
LE: loop exit
PB: predicated region body
PF: predicated region fallthrough
CT: control target
= control target key end

     0   :  { %s18165_s0 = inlined_call_operand.hbm [shape: f32[2,8,8,8,128], index: 0, kind: input, shape index: {}]   ;;  %s18166_s1 = inlined_call_operand.hbm [shape: f32[2,8,8,8,128], index: 1, kind: input, shape index: {}]   ;;  %s18167_s2 = inlined_call_operand.hbm [shape: f32[2,8,8,8,128], index: 2, kind: input, shape index: {}]   ;;  %s18168_s3 = inlined_call_operand.vmem [shape: bf16[128,32], index: 3, kind: input, shape index: {}]   ;;  %s18169_s4 = inlined_call_operand.vmem [shape: f32[1,32], index: 4, kind: input, shape index: {}]   ;;  %s18170_s5 = inlined_call_operand.vmem [shape: f32[1,32], index: 5, kind: input, shape index: {}]   ;;  %s18171_s6 = inlined_call_operand.vmem [shape: bf16[864,32], index: 6, kind: input, shape index: {}]   ;;  %s18172_s7 = inlined_call_operand.vmem [shape: f32[1,32], index: 7, kind: input, shape index: {}]   ;;  %s18173_s8 = inlined_call_operand.vmem [shape: f32[1,32], index: 8, kind: input, shape index: {}]   ;;  %s18174_s9 = inlined_call_operand.vmem [shape: bf16[32,128], index: 9, kind: input, shape index: {}]   ;;  %s18175_s10 = inlined_call_operand.vmem [shape: f32[1,128], index: 10, kind: input, shape index: {}]   ;;  %s18176_s11 = inlined_call_operand.vmem [shape: f32[1,128], index: 11, kind: input, shape index: {}]   ;;  %s18177_s12 = inlined_call_operand.hbm [shape: f32[2,8,8,8,128], index: 12, kind: output, shape index: {}]  }
   0x1   :  { %18216 = sst [smem:[#allocation44_spill]] %s18165_s0 }
   0x2   :  { %18217 = sst [smem:[#allocation45_spill]] %s18166_s1 }
   0x3   :  { %18218 = sst [smem:[#allocation46_spill]] %s18167_s2 }
   0x4   :  { %18219 = sst [smem:[#allocation47_spill]] %s18168_s3 }
   0x5   :  { %18220 = sst [smem:[#allocation48_spill]] %s18169_s4 }
   0x6   :  { %18221 = sst [smem:[#allocation49_spill]] %s18170_s5 }
   0x7   :  { %18222 = sst [smem:[#allocation50_spill]] %s18171_s6 }
   0x8   :  { %18223 = sst [smem:[#allocation51_spill]] %s18172_s7 }
   0x9   :  { %18224 = sst [smem:[#allocation52_spill]] %s18173_s8 }
   0xa   :  { %18225 = sst [smem:[#allocation53_spill]] %s18174_s9 }
   0xb   :  { %18226 = sst [smem:[#allocation54_spill]] %s18175_s10 }
   0xc   :  { %18227 = sst [smem:[#allocation55_spill]] %s18176_s11 }
   0xd   :  { %18228 = sst [smem:[#allocation56_spill]] %s18177_s12 }
   0xe   :  { %17 = vsyncpa [#allocation4], 0 }
   0xf   :  { %19 = vsyncpa [#allocation4 + $0x1], 0 }
  0x10   :  { %20 = vsyncpa [#allocation7], 0 }
  0x11   :  { %22 = vsyncpa [#allocation7 + $0x1], 0 }
  0x12   :  { %23 = vsyncpa [#allocation5], 0 }
  0x13   :  { %25 = vsyncpa [#allocation5 + $0x1], 0  ;;  %s12978_s21 = smov 0   ;;  %s12980_s22 = smov 0  }
  0x14   :  { %s12982_s23 = smov 0   ;;  %s12984_s24 = smov 0  }
  0x15   :  { %s12986_s25 = smov 0   ;;  %s12988_s26 = smov 0  }
  0x16   :  { %s12990_s27 = smov 0   ;;  %s12992_s28 = smov 0  }
  0x17   :  { %s12994_s29 = smov 0   ;;  %s12996_s30 = smov 0  }
  0x18   :  { %s12998_s13 = smov 0   ;;  %s13000_s14 = smov 0  }
  0x19   :  { %s13002_s15 = smov 0   ;;  %s13004_s16 = smov 0  }
  0x1a LB: > { %18229 = sst [smem:[#allocation14_spill]] %s12866_s25  ;;  %s13049_s17 = sadd.s32 4294967295, %s12902_s16   ;;  %s12902_s16 = sphi %s13004_s16, %s31_s16   ;;  %s12898_s15 = sphi %s13002_s15, %s18568_s15   ;;  %s12894_s14 = sphi %s13000_s14, %s18567_s14   ;;  %s12890_s13 = sphi %s12998_s13, %s18566_s13   ;;  %s12886_s30 = sphi %s12996_s30, %s18565_s30   ;;  %s12882_s29 = sphi %s12994_s29, %s18564_s29   ;;  %s12878_s28 = sphi %s12992_s28, %s18575_s28   ;;  %s12874_s27 = sphi %s12990_s27, %s18574_s27   ;;  %s12870_s26 = sphi %s12988_s26, %s18562_s26   ;;  %s12866_s25 = sphi %s12986_s25, %s18561_s25   ;;  %s12862_s24 = sphi %s12984_s24, %s18573_s24   ;;  %s12858_s23 = sphi %s12982_s23, %s18572_s23   ;;  %s12854_s22 = sphi %s12980_s22, %s18571_s22   ;;  %s12850_s21 = sphi %s12978_s21, %s18570_s21  }
  0x1b   : > { %18230 = sst [smem:[#allocation15_spill]] %s12870_s26  ;;  %s40_s18 = sadd.s32 1, %s12894_s14 }
  0x1c   : > { %18231 = sst [smem:[#allocation16_spill]] %s12882_s29  ;;  %p41_p0 = scmp.ge.s32.totalorder %s40_s18, 2 }
  0x1d   : > { %18232 = sst [smem:[#allocation17_spill]] %s12886_s30  ;;  %s43_s19 = sadd.s32 1, %s12898_s15 }
  0x1e   : > { %18233 = sst [smem:[#allocation18_spill]] %s12890_s13  ;;  %p18198_p1 = scmp.eq.s32.totalorder %s12902_s16, 0 }
  0x1f   : > { %18234 = sst [smem:[#allocation19_spill]] %s12894_s14  ;;  %p18190_p2 = scmp.eq.s32.totalorder %s13049_s17, 0 }
  0x20   : > { %18235 = sst [smem:[#allocation20_spill]] %s12898_s15  ;;  %s18577_s18 = smov (%p41_p0, %s40_s18), 0 }
  0x21   : > { %18236 = sst [smem:[#allocation21_spill]] %s18577_s18  ;;  %s18579_s19 = smov (!%p41_p0, %s43_s19), %s12898_s15 }
  0x22   : > { %s48_s20 = ssub.s32 %s12894_s14, %s18577_s18  ;;  %s10245_s12 = sshll.u32 %s12894_s14, 2 }
  0x23   : > { %p45_p3 = scmp.ge.s32.totalorder %s18579_s19, 2  ;;  %s10246_s13 = sadd.s32 4294967295, %s10245_s12 }
  0x24   : > { %p77_p4 = scmp.gt.s32.totalorder %s10246_s13, 0  ;;  %s10247_s11 = sshll.u32 %s18577_s18, 2 }
  0x25   : > { %s18581_s19 = smov (%p45_p3, %s18579_s19), 0  ;;  %s10248_s8 = sadd.s32 4294967295, %s10247_s11 }
  0x26   : > { %18237 = sst [smem:[#allocation22_spill]] %s18581_s19  ;;  %s18583_s13 = smov (!%p77_p4, %s10246_s13), 0 }
  0x27   : > { %s13066_s10 = ssub.s32 %s12898_s15, %s18581_s19  ;;  %p81_p5 = scmp.gt.s32.totalorder %s10248_s8, 0 }
  0x28   : > { %18238 = sst [smem:[#allocation23_spill]] %s13066_s10  ;;  %s13069_s7 = sor.u32 %s48_s20, %s13066_s10 }
  0x29   : > { %p50_p6 = scmp.eq.s32.totalorder %s13069_s7, 0  ;;  %s88_s9 = sadd.s32 1, %s12870_s26 }
  0x2a   : > { %s18585_s8 = smov (!%p81_p5, %s10248_s8), 0  ;;  %p95_p7 = scmp.ne.s32.totalorder %s12870_s26, %s12866_s25 }
  0x2b   : > { %p101_p8 = scmp.ne.s32.totalorder %s12866_s25, %s12862_s24  ;;  %s84_s18 = ssub.s32 %s18583_s13, %s18585_s8 }
  0x2c   : > { %s13077_s19 = sadd.s32 4, %s10245_s12  ;;  %s85_s5 = sor.u32 %s84_s18, %s13066_s10 }
  0x2d   : > { %p13082_p9 = por %p95_p7, %p18198_p1  ;;  %p86_p10 = scmp.eq.s32.totalorder %s85_s5, 0 }
  0x2e   : > { %p13088_p11 = por %p101_p8, %p18190_p2  ;;  %s13093_s24 = sadd.s32 4, %s10247_s11 }
  0x2f   : > { %s13096_s8 = scalar_select %p86_p10, %s12870_s26, %s88_s9  }
  0x30   : > { %s18240_s4 = scalar_select %p13088_p11, 1, 0 }
  0x31   : > { %18242 = sst [smem:[#allocation25_spill]] %s13096_s8  ;;  %p18189_p0 = scmp.lt.s32.totalorder %s12902_s16, 4 }
  0x32   : > { %18241 = sst [smem:[#allocation24_spill]] %s18240_s4  ;;  %s13101_s12 = sshll.u32 %s12898_s15, 6 }
  0x33   : > { %s429_s5 = sand.u32 1, %s12902_s16   ;;  %s431_s18 = sand.u32 1, %s12870_s26  }
  0x34   : > { %s10258_s30 = sshll.u32 %s431_s18, 6  ;;  %s10261_s6 = sshll.u32 %s18583_s13, 3 }
  0x35   : > { %s443_s3 = sadd.s32 %s10261_s6, %s13101_s12  ;;  %s433_s4 = scalar_lea.vmem [#allocation6], %s10258_s30 }
  0x36   : > { %s446_s25 = sshll.u32 %s433_s4, 4  ;;  %s10263_s2 = sshll.u32 %s443_s3, 7  ;;  %s447_s25 = int_to_ptr.vmem [resolvable:$true] %s446_s25 }
  0x37   : > { %s18243_s1 = sld [smem:[#allocation45_spill]]  ;;  %p13113_p3 = pnand %p18189_p0, %p13082_p9 }
  0x38   : > { %p10269_p4 = scmp.ge.s32.totalorder %s12902_s16, 1  ;;  %p481_p5 = scmp.lt.s32.totalorder %s12902_s16, 5 }
  0x39   : > { %s13119_s18 = scalar_lea.sflag [#allocation7], %s429_s5  ;;  %p12668_p7 = pneg %p13113_p3 }
  0x3a   : > { %s12679_s4 = scalar_lea.vmem %s447_s25, 1024  ;;  %s12904_s3 = smov [#allocation6]  }
  0x3b   : > { %p12680_p8 = scmp.ne.s32.totalorder %s447_s25, %s12679_s4  ;;  %s12684_s6 = sshll.u32 %s12904_s3, 4  ;;  %s12685_s6 = int_to_ptr.vmem [resolvable:$false] %s12684_s6 }
  0x3c   : > { %p12687_p12 = scmp.lt.s32.totalorder %s447_s25, %s12685_s6 }
  0x3d   : > { %s445_s9 = scalar_lea.hbm %s18243_s1, %s10263_s2  ;;  %p12682_p10 = pnand %p12680_p8, %p12668_p7 }
  0x3e   : > { %s12686_s2 = scalar_lea.vmem %s12685_s6, 2048 }
  0x3f   : > { %p12683_p13 = pneg %p12682_p10  ;;  %p12688_p9 = scmp.lt.s32.totalorder %s12686_s2, %s12679_s4 }
  0x41   : > { %p12689_p0 = por %p12688_p9, %p12687_p12 }
  0x43   : > { %p12690_p2 = pnand %p12689_p0, %p12683_p13 }
  0x45   : > { %12693 = shalt.err (!%p12690_p2)
}
  0x46   : > { %s18191_s10 = smov 128   ;;  %s18193_s30 = smov 8  }
  0x47   : > { %12475 = dma.hbm_to_vmem [thread:$0]  (!%p13113_p3), %s445_s9, 1024, %s447_s25, %s13119_s18, %s18191_s10, %s18191_s10, %s18193_s30  }
  0x48   : > { %p13133_p2 = pnand %p10269_p4, %p481_p5  ;;  %s10244_s20 = sadd.s32 4294967294, %s12902_s16  }
  0x49   : > { %s52_s5 = sadd.s32 1, %s12882_s29  ;;  %p59_p12 = scmp.ne.s32.totalorder %s12882_s29, %s12878_s28 }
  0x4a   : > { %s13142_s11 = scalar_select %p50_p6, %s12882_s29, %s52_s5  }
  0x4b   : > { %p65_p13 = scmp.ne.s32.totalorder %s12878_s28, %s12874_s27  ;;  %p352_p0 = scmp.eq.s32.totalorder %s13049_s17, 3 }
  0x4c   : > { %18246 = sst [smem:[#allocation26_spill]] %s13142_s11  ;;  %p358_p7 = scmp.eq.s32.totalorder %s10244_s20, 3 }
  0x4d   : > { %p13151_p8 = por %p18198_p1, %p59_p12  ;;  %p18248_p3 = scmp.eq.s32.totalorder %s13049_s17, 0 }
  0x4e   : > { %p13161_p5 = por %p352_p0, %p59_p12  ;;  %p13165_p6 = por %p358_p7, %p65_p13 }
  0x4f   : > { %p13157_p4 = por %p18248_p3, %p65_p13  ;;  %s405_s4 = sand.u32 1, %s12882_s29  }
  0x50   : > { %s18250_s7 = scalar_select %p13161_p5, 1, 0 }
  0x51   : > { %s18251_s9 = scalar_select %p13165_p6, 1, 0 }
  0x52   : > { %s10799_s3 = sshll.u32 %s12894_s14, 5  ;;  %s10253_s6 = sshll.u32 %s405_s4, 8 }
  0x53   : > { %s416_s2 = sadd.s32 %s10799_s3, %s13101_s12  ;;  %s409_s5 = scalar_lea.vmem [#allocation3], %s10253_s6 }
  0x54   : > { %s10257_s20 = sshll.u32 %s416_s2, 7  ;;  %s419_s10 = sshll.u32 %s409_s5, 4  ;;  %s420_s10 = int_to_ptr.vmem [resolvable:$true] %s419_s10 }
  0x55   : > { %s18252_s0 = sld [smem:[#allocation44_spill]]  ;;  %p18253_p10 = scmp.lt.s32.totalorder %s12902_s16, 4 }
  0x56   : > { %s406_s26 = scalar_lea.sflag [#allocation4], %s405_s4  ;;  %s12707_s14 = scalar_lea.vmem %s420_s10, 4096 }
  0x57   : > { %p13179_p9 = pnand %p18253_p10, %p13151_p8  ;;  %p12708_p13 = scmp.ne.s32.totalorder %s420_s10, %s12707_s14 }
  0x58   : > { %s12907_s3 = smov [#allocation3]  }
  0x59   : > { %p12696_p12 = pneg %p13179_p9  ;;  %s12712_s6 = sshll.u32 %s12907_s3, 4  ;;  %s12713_s6 = int_to_ptr.vmem [resolvable:$false] %s12712_s6 }
  0x5a   : > { %s12714_s1 = scalar_lea.vmem %s12713_s6, 8192  ;;  %p12715_p3 = scmp.lt.s32.totalorder %s420_s10, %s12713_s6 }
  0x5b   : > { %s418_s15 = scalar_lea.hbm %s18252_s0, %s10257_s20  ;;  %p12710_p0 = pnand %p12708_p13, %p12696_p12 }
  0x5c   : > { %p12716_p1 = scmp.lt.s32.totalorder %s12714_s1, %s12707_s14 }
  0x5d   : > { %p12711_p7 = pneg %p12710_p0 }
  0x5e   : > { %p12717_p6 = por %p12716_p1, %p12715_p3 }
  0x60   : > { %p12718_p5 = pnand %p12717_p6, %p12711_p7 }
  0x62   : > { %12721 = shalt.err (!%p12718_p5)
}
  0x63   : > { %s18255_s30 = smov 8   ;;  %s18256_s25 = smov 128  }
  0x64   : > { %s18257_s4 = sld [smem:[#allocation23_spill]]  ;;  %p18258_p1 = scmp.lt.s32.totalorder %s13077_s19, 7 }
  0x65   : > { %12472 = dma.hbm_to_vmem [thread:$0]  (!%p13179_p9), %s418_s15, 4096, %s420_s10, %s406_s26, %s18256_s25, %s18256_s25, %s18255_s30  }
  0x66   : > { %s18587_s19 = smov (!%p18258_p1, %s13077_s19), 7  ;;  %p18259_p8 = scmp.lt.s32.totalorder %s13093_s24, 7 }
  0x67   : > { %s124_s14 = sadd.s32 1, %s12858_s23  ;;  %p131_p5 = scmp.ne.s32.totalorder %s12858_s23, %s12854_s22 }
  0x68   : > { %s18589_s24 = smov (!%p18259_p8, %s13093_s24), 7  ;;  %p137_p6 = scmp.ne.s32.totalorder %s12854_s22, %s12850_s21 }
  0x69   : > { %s120_s11 = ssub.s32 %s18587_s19, %s18589_s24  ;;  %p18260_p10 = scmp.eq.s32.totalorder %s12902_s16, 0 }
  0x6a   : > { %s121_s2 = sor.u32 %s120_s11, %s18257_s4  ;;  %p18262_p0 = scmp.eq.s32.totalorder %s13049_s17, 0 }
  0x6b   : > { %p13204_p12 = por %p131_p5, %p18260_p10  ;;  %p122_p13 = scmp.eq.s32.totalorder %s121_s2, 0 }
  0x6c   : > { %p13210_p7 = por %p137_p6, %p18262_p0  ;;  %s458_s15 = sand.u32 1, %s12858_s23  }
  0x6d   : > { %s10266_s10 = sshll.u32 %s18587_s19, 3  ;;  %s10264_s24 = sshll.u32 %s458_s15, 6 }
  0x6e   : > { %s18263_s26 = scalar_select %p13210_p7, 1, 0 }
  0x6f   : > { %s13216_s5 = scalar_select %p122_p13, %s12858_s23, %s124_s14  }
  0x70   : > { %s470_s3 = sadd.s32 %s10266_s10, %s13101_s12  ;;  %s18264_s4 = sld [smem:[#allocation46_spill]] }
  0x71   : > { %s10268_s21 = sshll.u32 %s470_s3, 7  ;;  %s460_s0 = scalar_lea.vmem [#allocation8], %s10264_s24 }
  0x72   : > { %s473_s29 = sshll.u32 %s460_s0, 4  ;;  %p18265_p9 = scmp.lt.s32.totalorder %s12902_s16, 4  ;;  %s474_s29 = int_to_ptr.vmem [resolvable:$true] %s473_s29 }
  0x73   : > { %s12735_s19 = scalar_lea.vmem %s474_s29, 1024  ;;  %s12908_s12 = smov [#allocation8]  }
  0x74   : > { %p13226_p3 = pnand %p18265_p9, %p13204_p12  ;;  %p12736_p8 = scmp.ne.s32.totalorder %s474_s29, %s12735_s19 }
  0x75   : > { %s12740_s14 = sshll.u32 %s12908_s12, 4  ;;  %s12741_s14 = int_to_ptr.vmem [resolvable:$false] %s12740_s14 }
  0x76   : > { %s472_s11 = scalar_lea.hbm %s18264_s4, %s10268_s21  ;;  %p12724_p1 = pneg %p13226_p3 }
  0x77   : > { %s12742_s15 = scalar_lea.vmem %s12741_s14, 2048  ;;  %p12743_p10 = scmp.lt.s32.totalorder %s474_s29, %s12741_s14 }
  0x78   : > { %p12738_p5 = pnand %p12736_p8, %p12724_p1  ;;  %p12744_p13 = scmp.lt.s32.totalorder %s12742_s15, %s12735_s19 }
  0x7a   : > { %p12739_p6 = pneg %p12738_p5  ;;  %p12745_p0 = por %p12744_p13, %p12743_p10 }
  0x7c   : > { %p12746_p7 = pnand %p12745_p0, %p12739_p6 }
  0x7e   : > { %12749 = shalt.err (!%p12746_p7)
}
  0x7f   : > { %12478 = dma.hbm_to_vmem [thread:$0]  (!%p13226_p3), %s472_s11, 1024, %s474_s29, %s13119_s18, %s18256_s25, %s18256_s25, %s18255_s30  }
  0x80   : > { %485 = sbr.rel (%p13133_p2) target bundleno = 1734 (0x6c6), region = 68 }
  0x85   : > { %s13241_s0 = sand.u32 1, %s12878_s28  }
  0x86   : > { %s10270_s20 = sshll.u32 %s13241_s0, 8  ;;  %s488_s10 = scalar_lea.sflag [#allocation4], %s13241_s0 }
  0x87   : > { %s13247_s24 = scalar_lea.vmem [#allocation3], %s10270_s20 }
  0x88   : > { %12833 = dma.done.wait (%p13157_p4), %s488_s10, 4096  }
  0x89   : > { %12835 = vsyncadd (%p13157_p4), %s488_s10, 4294963200  ;;  %s18267_s29 = sld [smem:[#allocation14_spill]]  ;;  %s496_s13 = sand.u32 1, %s13049_s17  }
  0x8a   : > { %s497_s3 = scalar_lea.sflag [#allocation7], %s496_s13 }
  0x8f   : > { %s498_s30 = sand.u32 1, %s18267_s29  }
  0x90   : > { %s10271_s25 = sshll.u32 %s498_s30, 6 }
  0x91   : > { %s13255_s21 = scalar_lea.vmem [#allocation6], %s10271_s25 }
  0x92   : > { %12837 = dma.done.wait (%p13088_p11), %s497_s3, 1024  }
  0x93   : > { %12839 = vsyncadd (%p13088_p11), %s497_s3, 4294966272  ;;  %s507_s6 = sand.u32 1, %s12854_s22   ;;  %p18269_p2 = scmp.ne.s32.totalorder %s18263_s26, 0 }
  0x94   : > { %s10272_s1 = sshll.u32 %s507_s6, 6 }
  0x95   : > { %s13262_s8 = scalar_lea.vmem [#allocation8], %s10272_s1 }
  0x96   : > { %12841 = dma.done.wait (%p18269_p2), %s497_s3, 1024  }
  0x97   : > { %12843 = vsyncadd (%p18269_p2), %s497_s3, 4294966272  ;;  %s18270_s11 = sld [smem:[#allocation47_spill]]  ;;  %v958_v4 = vld [vmem:[%s13255_s21] sm:$0xff]  ;;  %v959_v5 = vld [vmem:[%s13255_s21 + $0x8] sm:$0xff]  ;;  %vm1178_vm0 = vcmask 261120   ;;  %vm1206_vm1 = vcmask 253952  }
  0x98   : > { %v966_v6 = vpack.c.bf16 %v959_v5, %v958_v4  ;;  %v589_v7 = vld [vmem:[%s13247_s24] sm:$0xff]  ;;  %v590_v8 = vld [vmem:[%s13247_s24 + $0x8] sm:$0xff]  ;;  %v960_v14 = vld [vmem:[%s13255_s21 + $0x10] sm:$0xff]  ;;  %vm1180_vm2 = vcmask 254976   ;;  %s18272_s2 = sld [smem:[#allocation17_spill]]  ;;  %s17961_s25 = scalar_lea.vmem [#allocation9], %s10270_s20 }
  0x99   : > { %v621_v9 = vpack.c.bf16 %v590_v8, %v589_v7  ;;  %v961_v15 = vld [vmem:[%s13255_s21 + $0x18] sm:$0xff]  ;;  %v591_v16 = vld [vmem:[%s13247_s24 + $0x10] sm:$0xff]  ;;  %v962_v18 = vld [vmem:[%s13255_s21 + $0x20] sm:$0xff]  ;;  %s18273_s13 = sld [smem:[#allocation48_spill]]  ;;  %s10104_s1 = sshll.u32 %s17961_s25, 4  ;;  %s18081_s1 = int_to_ptr.vmem [resolvable:$true] %s10104_s1 }
  0x9a   : > { %11417 = vmatprep.mubr.bf16.mxu1 %v966_v6  ;;  %v592_v17 = vld [vmem:[%s13247_s24 + $0x18] sm:$0xff]  ;;  %v963_v19 = vld [vmem:[%s13255_s21 + $0x28] sm:$0xff]  ;;  %v593_v20 = vld [vmem:[%s13247_s24 + $0x20] sm:$0xff]  ;;  %v967_v22 = vpack.c.bf16 %v961_v15, %v960_v14  ;;  %s18274_s3 = sld [smem:[#allocation49_spill]]  ;;  %p18557_p7 = scmp.ne.s32.totalorder %s18250_s7, 0 }
  0x9b   : > { %11369 = vmatprep.mubr.bf16.mxu0 %v621_v9  ;;  %v594_v21 = vld [vmem:[%s13247_s24 + $0x28] sm:$0xff]  ;;  %v622_v23 = vpack.c.bf16 %v592_v17, %v591_v16  ;;  %v968_v24 = vpack.c.bf16 %v963_v19, %v962_v18  ;;  %v964_v26 = vld [vmem:[%s13255_s21 + $0x30] sm:$0xff]  ;;  %v965_v27 = vld [vmem:[%s13255_s21 + $0x38] sm:$0xff]  ;;  %s18538_s19 = sld [smem:[#allocation51_spill]]  ;;  %s12910_s15 = smov [#allocation9]  }
  0x9c   : > { %v623_v25 = vpack.c.bf16 %v594_v21, %v593_v20  ;;  %v595_v28 = vld [vmem:[%s13247_s24 + $0x30] sm:$0xff]  ;;  %v596_v29 = vld [vmem:[%s13247_s24 + $0x38] sm:$0xff]  ;;  %v597_v30 = vld [vmem:[%s13247_s24 + $0x40] sm:$0xff]  ;;  %v969_v34 = vpack.c.bf16 %v965_v27, %v964_v26  ;;  %s18539_s14 = sld [smem:[#allocation52_spill]]  ;;  %s12754_s10 = sshll.u32 %s12910_s15, 4  ;;  %s12755_s10 = int_to_ptr.vmem [resolvable:$false] %s12754_s10 }
  0x9d   : > { %v13271_v0 = vld [vmem:[%s18270_s11 + $0x38] sm:$0xff]   ;;  %v13276_v1 = vld [vmem:[%s18270_s11 + $0x30] sm:$0xff]   ;;  %v13286_v2 = vld [vmem:[%s18270_s11 + $0x28] sm:$0xff]   ;;  %v624_v35 = vpack.c.bf16 %v596_v29, %v595_v28  ;;  %s18553_s29 = sld [smem:[#allocation54_spill]]  ;;  %p12757_p1 = scmp.lt.s32.totalorder %s18081_s1, %s12755_s10 }
  0x9e   : > { %11401 = vmatprep.subr.bf16.mxu1 %v13271_v0  ;;  %11353 = vmatprep.subr.bf16.mxu0 %v13271_v0  ;;  %v13295_v3 = vld [vmem:[%s18270_s11 + $0x20] sm:$0xff]   ;;  %v13308_v10 = vld [vmem:[%s18270_s11 + $0x18] sm:$0xff]   ;;  %v13317_v11 = vld [vmem:[%s18270_s11 + $0x10] sm:$0xff]   ;;  %p954_p11 = scmp.gt.s32.totalorder %s18272_s2, 0  ;;  %p956_p4 = scmp.lt.s32.totalorder %s18272_s2, 1 }
  0x9f   : > { %11402 = vmatpush3.bf16.msra.mxu1 %v13271_v0  ;;  %11354 = vmatpush3.bf16.msra.mxu0 %v13271_v0  ;;  %v13326_v12 = vld [vmem:[%s18270_s11 + $0x8] sm:$0xff]   ;;  %v13332_v13 = vld [vmem:[%s18270_s11] sm:$0xff]   ;;  %v599_v38 = vld [vmem:[%s13247_s24 + $0x50] sm:$0xff]  ;;  %s18554_s30 = sld [smem:[#allocation55_spill]] }
  0xa0   : > { %11403 = vmatprep.subr.bf16.mxu1 %v13276_v1  ;;  %11355 = vmatprep.subr.bf16.mxu0 %v13276_v1  ;;  %v598_v31 = vld [vmem:[%s13247_s24 + $0x48] sm:$0xff]  ;;  %v1068_v32 = vld [vmem:[%s13262_s8] sm:$0xff]  ;;  %v600_v39 = vld [vmem:[%s13247_s24 + $0x58] sm:$0xff]  ;;  %s955_s6 = scalar_select %p954_p11, 1.0, 0.0 }
  0xa1   : > { %v1069_v33 = vld [vmem:[%s13262_s8 + $0x8] sm:$0xff]  ;;  %v625_v36 = vpack.c.bf16 %v598_v31, %v597_v30  ;;  %v601_v40 = vld [vmem:[%s13247_s24 + $0x60] sm:$0xff]  ;;  %v626_v42 = vpack.c.bf16 %v600_v39, %v599_v38  ;;  %v603_v44 = vld [vmem:[%s13247_s24 + $0x70] sm:$0xff]  ;;  %s957_s12 = scalar_select %p956_p4, 1.0, 0.0 }
  0xa2   : > { %v1076_v37 = vpack.c.bf16 %v1069_v33, %v1068_v32  ;;  %v602_v41 = vld [vmem:[%s13247_s24 + $0x68] sm:$0xff]  ;;  %v604_v45 = vld [vmem:[%s13247_s24 + $0x78] sm:$0xff]  ;;  %v605_v46 = vld [vmem:[%s13247_s24 + $0x80] sm:$0xff]  ;;  %s18555_s20 = sld [smem:[#allocation18_spill]] }
  0xa3   : > { %11404 = vmatpush3.bf16.msra.mxu1 %v13276_v1  ;;  %11356 = vmatpush3.bf16.msra.mxu0 %v13276_v1  ;;  %v627_v43 = vpack.c.bf16 %v602_v41, %v601_v40  ;;  %v606_v47 = vld [vmem:[%s13247_s24 + $0x88] sm:$0xff]  ;;  %v628_v48 = vpack.c.bf16 %v604_v45, %v603_v44  ;;  %v607_v50 = vld [vmem:[%s13247_s24 + $0x90] sm:$0xff]  ;;  %v608_v51 = vld [vmem:[%s13247_s24 + $0x98] sm:$0xff] }
  0xa4   : > { %11405 = vmatprep.subr.bf16.mxu1 %v13286_v2  ;;  %11357 = vmatprep.subr.bf16.mxu0 %v13286_v2  ;;  %v629_v49 = vpack.c.bf16 %v606_v47, %v605_v46  ;;  %v609_v52 = vld [vmem:[%s13247_s24 + $0xa0] sm:$0xff]  ;;  %v610_v53 = vld [vmem:[%s13247_s24 + $0xa8] sm:$0xff]  ;;  %v1070_v54 = vld [vmem:[%s13262_s8 + $0x10] sm:$0xff]  ;;  %v630_v56 = vpack.c.bf16 %v608_v51, %v607_v50 }
  0xa5   : > { %v1071_v55 = vld [vmem:[%s13262_s8 + $0x18] sm:$0xff]  ;;  %v631_v57 = vpack.c.bf16 %v610_v53, %v609_v52  ;;  %v611_v59 = vld [vmem:[%s13247_s24 + $0xb0] sm:$0xff]  ;;  %v1072_v62 = vld [vmem:[%s13262_s8 + $0x20] sm:$0xff] }
  0xa6   : > { %v1077_v58 = vpack.c.bf16 %v1071_v55, %v1070_v54  ;;  %v612_v60 = vld [vmem:[%s13247_s24 + $0xb8] sm:$0xff]  ;;  %v1073_v63 = vld [vmem:[%s13262_s8 + $0x28] sm:$0xff]  ;;  %v613_v4 = vld [vmem:[%s13247_s24 + $0xc0] sm:$0xff] }
  0xa7   : > { %11406 = vmatpush3.bf16.msra.mxu1 %v13286_v2  ;;  %11358 = vmatpush3.bf16.msra.mxu0 %v13286_v2  ;;  %v632_v61 = vpack.c.bf16 %v612_v60, %v611_v59  ;;  %v614_v5 = vld [vmem:[%s13247_s24 + $0xc8] sm:$0xff]  ;;  %v615_v7 = vld [vmem:[%s13247_s24 + $0xd0] sm:$0xff]  ;;  %v616_v8 = vld [vmem:[%s13247_s24 + $0xd8] sm:$0xff] }
  0xa8   : > { %11407 = vmatprep.subr.bf16.mxu1 %v13295_v3  ;;  %11359 = vmatprep.subr.bf16.mxu0 %v13295_v3  ;;  %v633_v6 = vpack.c.bf16 %v614_v5, %v613_v4  ;;  %v634_v9 = vpack.c.bf16 %v616_v8, %v615_v7  ;;  %v619_v14 = vld [vmem:[%s13247_s24 + $0xf0] sm:$0xff]  ;;  %v620_v15 = vld [vmem:[%s13247_s24 + $0xf8] sm:$0xff]  ;;  %s10795_s21 = sshll.u32 %s18555_s20, 6 }
  0xa9   : > { %v636_v17 = vpack.c.bf16 %v620_v15, %v619_v14 }
  0xab   : > { %11408 = vmatpush3.bf16.msra.mxu1 %v13295_v3  ;;  %11360 = vmatpush3.bf16.msra.mxu0 %v13295_v3 }
  0xac   : > { %11409 = vmatprep.subr.bf16.mxu1 %v13308_v10  ;;  %11361 = vmatprep.subr.bf16.mxu0 %v13308_v10 }
  0xaf   : > { %11410 = vmatpush3.bf16.msra.mxu1 %v13308_v10  ;;  %11362 = vmatpush3.bf16.msra.mxu0 %v13308_v10 }
  0xb0   : > { %11411 = vmatprep.subr.bf16.mxu1 %v13317_v11  ;;  %11363 = vmatprep.subr.bf16.mxu0 %v13317_v11 }
  0xb3   : > { %11412 = vmatpush3.bf16.msra.mxu1 %v13317_v11  ;;  %11364 = vmatpush3.bf16.msra.mxu0 %v13317_v11 }
  0xb4   : > { %11413 = vmatprep.subr.bf16.mxu1 %v13326_v12  ;;  %11365 = vmatprep.subr.bf16.mxu0 %v13326_v12 }
  0xb7   : > { %11414 = vmatpush3.bf16.msra.mxu1 %v13326_v12  ;;  %11366 = vmatpush3.bf16.msra.mxu0 %v13326_v12 }
  0xb8   : > { %11415 = vmatprep.subr.bf16.mxu1 %v13332_v13  ;;  %11367 = vmatprep.subr.bf16.mxu0 %v13332_v13 }
  0xbb   : > { %11416 = vmatpush3.bf16.msra.mxu1 %v13332_v13  ;;  %11368 = vmatpush3.bf16.msra.mxu0 %v13332_v13 }
  0xbc   : > { %11425 = vmatprep.subr.bf16.mxu1 %v13271_v0 }
  0xbe   : > { %11418 = vmatmul.mubr.bf16.vlgmr.msra.gmra.mxu1 %v967_v22  ;;  %11370 = vmatmul.mubr.bf16.vlgmr.msra.gmra.mxu0 %v622_v23  ;;  %v13663_v22 = vld [vmem:[%s18273_s13] ss:$0 sm:$0xff] }
  0xbf   : > { %11421 = vmatprep.mubr.bf16.mxu1 %v968_v24  ;;  %11373 = vmatprep.mubr.bf16.mxu0 %v623_v25  ;;  %v13668_v23 = vld [vmem:[%s18274_s3] ss:$0 sm:$0xff]  ;;  %s10800_s3 = sshll.u32 %s18272_s2, 5 }
  0xc0   : > { %11426 = vmatpush3.bf16.msra.mxu1 %v13271_v0  ;;  %v1078_v0 = vpack.c.bf16 %v1073_v63, %v1072_v62  ;;  %s10101_s2 = sadd.s32 %s10800_s3, %s10795_s21 }
  0xc1   : > { %11427 = vmatprep.subr.bf16.mxu1 %v13276_v1  ;;  %s10796_s17 = sshll.u32 %s10101_s2, 7 }
  0xc4   : > { %11428 = vmatpush3.bf16.msra.mxu1 %v13276_v1  ;;  %v1074_v1 = vld [vmem:[%s13262_s8 + $0x30] sm:$0xff] }
  0xc5   : > { %11429 = vmatprep.subr.bf16.mxu1 %v13286_v2 }
  0xc6   : > { %11422 = vmatmul.mubr.bf16.gmra.mxu1 %v969_v34  ;;  %11374 = vmatmul.mubr.bf16.gmra.mxu0 %v624_v35  ;;  %v13676_v34 = vstv %s955_s6  ;;  %s18519_s6 = sld [smem:[#allocation53_spill]] }
  0xc7   : > { %11377 = vmatprep.mubr.bf16.mxu0 %v625_v36  ;;  %11441 = vmatprep.mubr.bf16.mxu1 %v1076_v37 }
  0xc8   : > { %11430 = vmatpush3.bf16.msra.mxu1 %v13286_v2  ;;  %v1075_v2 = vld [vmem:[%s13262_s8 + $0x38] sm:$0xff]  ;;  %s18271_s8 = sld [smem:[#allocation50_spill]] }
  0xc9   : > { %11431 = vmatprep.subr.bf16.mxu1 %v13295_v3 }
  0xcc   : > { %11432 = vmatpush3.bf16.msra.mxu1 %v13295_v3  ;;  %v1079_v3 = vpack.c.bf16 %v1075_v2, %v1074_v1 }
  0xcd   : > { %11433 = vmatprep.subr.bf16.mxu1 %v13308_v10 }
  0xce   : > { %11378 = vmatmul.mubr.bf16.gmra.mxu0 %v626_v42  ;;  %v12610_v16 = vld [vmem:[%s18271_s8 + $0x18] sm:$0xff]   ;;  %v13638_v18 = vld [vmem:[%s18271_s8 + $0x8] sm:$0xff]   ;;  %v12611_v19 = vld [vmem:[%s18271_s8 + $0x10] sm:$0xff]  }
  0xcf   : > { %11381 = vmatprep.mubr.bf16.mxu0 %v627_v43  ;;  %11485 = vmatprep.subr.bf16.mxu0 %v13638_v18  ;;  %v13648_v20 = vld [vmem:[%s18271_s8] sm:$0xff]   ;;  %v13656_v21 = vld [vmem:[%s18271_s8 + $0x38] sm:$0xff]  }
  0xd0   : > { %11434 = vmatpush3.bf16.msra.mxu1 %v13308_v10  ;;  %v12909_v10 = vmov 0.0   ;;  %11486 = vmatpush3.bf16.msra.mxu0 %v13638_v18 }
  0xd1   : > { %11435 = vmatprep.subr.bf16.mxu1 %v13317_v11  ;;  %1179 = vst.msk [vmem:[#allocation2 + $0x7] sm:$0xff] %vm1178_vm0, %v12909_v10  ;;  %1182 = vst.msk [vmem:[#allocation2 + $0xf7] sm:$0xff] %vm1178_vm0, %v12909_v10  ;;  %11487 = vmatprep.subr.bf16.mxu0 %v13648_v20 }
  0xd2   : > { %1184 = vst.msk [vmem:[#allocation2 + $0x1e7] sm:$0xff] %vm1178_vm0, %v12909_v10  ;;  %1186 = vst.msk [vmem:[#allocation2 + $0x2d7] sm:$0xff] %vm1178_vm0, %v12909_v10 }
  0xd3   : > { %1188 = vst.msk [vmem:[#allocation2 + $0x3c7] sm:$0xff] %vm1178_vm0, %v12909_v10  ;;  %1190 = vst.msk [vmem:[#allocation2 + $0x4b7] sm:$0xff] %vm1178_vm0, %v12909_v10 }
  0xd4   : > { %11436 = vmatpush3.bf16.msra.mxu1 %v13317_v11  ;;  %1193 = vst.msk [vmem:[#allocation2 + $0xdf] sm:$0xff] %vm1178_vm0, %v12909_v10  ;;  %1195 = vst.msk [vmem:[#allocation2 + $0x1cf] sm:$0xff] %vm1178_vm0, %v12909_v10  ;;  %v617_v11 = vld [vmem:[%s13247_s24 + $0xe0] sm:$0xff]  ;;  %11488 = vmatpush3.bf16.msra.mxu0 %v13648_v20 }
  0xd5   : > { %11437 = vmatprep.subr.bf16.mxu1 %v13326_v12  ;;  %1197 = vst.msk [vmem:[#allocation2 + $0x2bf] sm:$0xff] %vm1178_vm0, %v12909_v10  ;;  %1199 = vst.msk [vmem:[#allocation2 + $0x3af] sm:$0xff] %vm1178_vm0, %v12909_v10  ;;  %11557 = vmatprep.subr.bf16.mxu0 %v13656_v21 }
  0xd6   : > { %11382 = vmatmul.mubr.bf16.gmra.mxu0 %v628_v48  ;;  %1201 = vst.msk [vmem:[#allocation2 + $0x49f] sm:$0xff] %vm1178_vm0, %v12909_v10  ;;  %1203 = vst.msk [vmem:[#allocation2 + $0x58f] sm:$0xff] %vm1178_vm0, %v12909_v10 }
  0xd7   : > { %11385 = vmatprep.mubr.bf16.mxu0 %v629_v49  ;;  %1207 = vst.msk [vmem:[#allocation2 + $0x1f] sm:$0x1] %vm1206_vm1, %v12909_v10  ;;  %1208 = vst.msk [vmem:[#allocation2 + $0x37] sm:$0x1] %vm1206_vm1, %v12909_v10 }
  0xd8   : > { %11438 = vmatpush3.bf16.msra.mxu1 %v13326_v12  ;;  %1209 = vst.msk [vmem:[#allocation2 + $0x4f] sm:$0x1] %vm1206_vm1, %v12909_v10  ;;  %1210 = vst.msk [vmem:[#allocation2 + $0x67] sm:$0x1] %vm1206_vm1, %v12909_v10  ;;  %v618_v12 = vld [vmem:[%s13247_s24 + $0xe8] sm:$0xff] }
  0xd9   : > { %11439 = vmatprep.subr.bf16.mxu1 %v13332_v13  ;;  %1211 = vst.msk [vmem:[#allocation2 + $0x7f] sm:$0x1] %vm1206_vm1, %v12909_v10  ;;  %1212 = vst.msk [vmem:[#allocation2 + $0x97] sm:$0x1] %vm1206_vm1, %v12909_v10 }
  0xda   : > { %1213 = vst.msk [vmem:[#allocation2 + $0xaf] sm:$0x1] %vm1206_vm1, %v12909_v10  ;;  %1214 = vst.msk [vmem:[#allocation2 + $0xc7] sm:$0x1] %vm1206_vm1, %v12909_v10 }
  0xdb   : > { %1215 = vst.msk [vmem:[#allocation2 + $0x10f] sm:$0x1] %vm1206_vm1, %v12909_v10  ;;  %1216 = vst.msk [vmem:[#allocation2 + $0x127] sm:$0x1] %vm1206_vm1, %v12909_v10 }
  0xdc   : > { %11440 = vmatpush3.bf16.msra.mxu1 %v13332_v13  ;;  %1217 = vst.msk [vmem:[#allocation2 + $0x13f] sm:$0x1] %vm1206_vm1, %v12909_v10  ;;  %1218 = vst.msk [vmem:[#allocation2 + $0x157] sm:$0x1] %vm1206_vm1, %v12909_v10  ;;  %v635_v13 = vpack.c.bf16 %v618_v12, %v617_v11 }
  0xdd   : > { %1219 = vst.msk [vmem:[#allocation2 + $0x16f] sm:$0x1] %vm1206_vm1, %v12909_v10  ;;  %1220 = vst.msk [vmem:[#allocation2 + $0x187] sm:$0x1] %vm1206_vm1, %v12909_v10  ;;  %11449 = vmatprep.subr.bf16.mxu1 %v12610_v16 }
  0xde   : > { %11386 = vmatmul.mubr.bf16.gmra.mxu0 %v630_v56  ;;  %1221 = vst.msk [vmem:[#allocation2 + $0x19f] sm:$0x1] %vm1206_vm1, %v12909_v10  ;;  %1222 = vst.msk [vmem:[#allocation2 + $0x1b7] sm:$0x1] %vm1206_vm1, %v12909_v10 }
  0xdf   : > { %11389 = vmatprep.mubr.bf16.mxu0 %v631_v57  ;;  %11442 = vmatmul.mubr.bf16.vlgmr.msra.gmra.mxu1 %v1077_v58  ;;  %1223 = vst.msk [vmem:[#allocation2 + $0x1ff] sm:$0x1] %vm1206_vm1, %v12909_v10  ;;  %1224 = vst.msk [vmem:[#allocation2 + $0x217] sm:$0x1] %vm1206_vm1, %v12909_v10 }
  0xe0   : > { %11445 = vmatprep.mubr.bf16.mxu1 %v1078_v0  ;;  %1225 = vst.msk [vmem:[#allocation2 + $0x22f] sm:$0x1] %vm1206_vm1, %v12909_v10  ;;  %1226 = vst.msk [vmem:[#allocation2 + $0x247] sm:$0x1] %vm1206_vm1, %v12909_v10  ;;  %11450 = vmatpush3.bf16.msra.mxu1 %v12610_v16 }
  0xe1   : > { %1227 = vst.msk [vmem:[#allocation2 + $0x25f] sm:$0x1] %vm1206_vm1, %v12909_v10  ;;  %1228 = vst.msk [vmem:[#allocation2 + $0x277] sm:$0x1] %vm1206_vm1, %v12909_v10  ;;  %11451 = vmatprep.subr.bf16.mxu1 %v12611_v19 }
  0xe2   : > { %1229 = vst.msk [vmem:[#allocation2 + $0x28f] sm:$0x1] %vm1206_vm1, %v12909_v10  ;;  %1230 = vst.msk [vmem:[#allocation2 + $0x2a7] sm:$0x1] %vm1206_vm1, %v12909_v10 }
  0xe3   : > { %1231 = vst.msk [vmem:[#allocation2 + $0x2ef] sm:$0x1] %vm1206_vm1, %v12909_v10  ;;  %1232 = vst.msk [vmem:[#allocation2 + $0x307] sm:$0x1] %vm1206_vm1, %v12909_v10 }
  0xe4   : > { %1233 = vst.msk [vmem:[#allocation2 + $0x31f] sm:$0x1] %vm1206_vm1, %v12909_v10  ;;  %1234 = vst.msk [vmem:[#allocation2 + $0x337] sm:$0x1] %vm1206_vm1, %v12909_v10  ;;  %11452 = vmatpush3.bf16.msra.mxu1 %v12611_v19 }
  0xe5   : > { %1235 = vst.msk [vmem:[#allocation2 + $0x34f] sm:$0x1] %vm1206_vm1, %v12909_v10  ;;  %1236 = vst.msk [vmem:[#allocation2 + $0x367] sm:$0x1] %vm1206_vm1, %v12909_v10  ;;  %12457 = vmatprep.subr.bf16.mxu1 %v13638_v18 }
  0xe6   : > { %11390 = vmatmul.mubr.bf16.gmra.mxu0 %v632_v61  ;;  %1237 = vst.msk [vmem:[#allocation2 + $0x37f] sm:$0x1] %vm1206_vm1, %v12909_v10  ;;  %1238 = vst.msk [vmem:[#allocation2 + $0x397] sm:$0x1] %vm1206_vm1, %v12909_v10 }
  0xe7   : > { %11446 = vmatmul.mubr.bf16.gmra.mxu1 %v1079_v3  ;;  %11393 = vmatprep.mubr.bf16.mxu0 %v633_v6  ;;  %1239 = vst.msk [vmem:[#allocation2 + $0x3df] sm:$0x1] %vm1206_vm1, %v12909_v10  ;;  %1240 = vst.msk [vmem:[#allocation2 + $0x3f7] sm:$0x1] %vm1206_vm1, %v12909_v10 }
  0xe8   : > { %1241 = vst.msk [vmem:[#allocation2 + $0x40f] sm:$0x1] %vm1206_vm1, %v12909_v10  ;;  %1242 = vst.msk [vmem:[#allocation2 + $0x427] sm:$0x1] %vm1206_vm1, %v12909_v10 }
  0xe9   : > { %1243 = vst.msk [vmem:[#allocation2 + $0x43f] sm:$0x1] %vm1206_vm1, %v12909_v10  ;;  %1244 = vst.msk [vmem:[#allocation2 + $0x457] sm:$0x1] %vm1206_vm1, %v12909_v10 }
  0xea   : > { %1245 = vst.msk [vmem:[#allocation2 + $0x46f] sm:$0x1] %vm1206_vm1, %v12909_v10  ;;  %1246 = vst.msk [vmem:[#allocation2 + $0x487] sm:$0x1] %vm1206_vm1, %v12909_v10 }
  0xeb   : > { %1247 = vst.msk [vmem:[#allocation2 + $0x4cf] sm:$0x1] %vm1206_vm1, %v12909_v10  ;;  %1248 = vst.msk [vmem:[#allocation2 + $0x4e7] sm:$0x1] %vm1206_vm1, %v12909_v10 }
  0xec   : > { %1249 = vst.msk [vmem:[#allocation2 + $0x4ff] sm:$0x1] %vm1206_vm1, %v12909_v10  ;;  %1250 = vst.msk [vmem:[#allocation2 + $0x517] sm:$0x1] %vm1206_vm1, %v12909_v10 }
  0xed   : > { %1251 = vst.msk [vmem:[#allocation2 + $0x52f] sm:$0x1] %vm1206_vm1, %v12909_v10  ;;  %1252 = vst.msk [vmem:[#allocation2 + $0x547] sm:$0x1] %vm1206_vm1, %v12909_v10 }
  0xee   : > { %11394 = vmatmul.mubr.bf16.gmra.mxu0 %v634_v9  ;;  %1253 = vst.msk [vmem:[#allocation2 + $0x55f] sm:$0x1] %vm1206_vm1, %v12909_v10  ;;  %1254 = vst.msk [vmem:[#allocation2 + $0x577] sm:$0x1] %vm1206_vm1, %v12909_v10 }
  0xef   : > { %1255 = vst.msk [vmem:[#allocation2 + $0x28] sm:$0x1] %vm1206_vm1, %v12909_v10  ;;  %1256 = vst.msk [vmem:[#allocation2 + $0x40] sm:$0x1] %vm1206_vm1, %v12909_v10  ;;  %11397 = vmatprep.mubr.bf16.mxu0 %v635_v13 }
  0xf0   : > { %1257 = vst.msk [vmem:[#allocation2 + $0x58] sm:$0x1] %vm1206_vm1, %v12909_v10  ;;  %1258 = vst.msk [vmem:[#allocation2 + $0x70] sm:$0x1] %vm1206_vm1, %v12909_v10 }
  0xf1   : > { %1259 = vst.msk [vmem:[#allocation2 + $0x88] sm:$0x1] %vm1206_vm1, %v12909_v10  ;;  %1260 = vst.msk [vmem:[#allocation2 + $0xa0] sm:$0x1] %vm1206_vm1, %v12909_v10 }
  0xf2   : > { %1261 = vst.msk [vmem:[#allocation2 + $0xb8] sm:$0x1] %vm1206_vm1, %v12909_v10  ;;  %1262 = vst.msk [vmem:[#allocation2 + $0xd0] sm:$0x1] %vm1206_vm1, %v12909_v10 }
  0xf3   : > { %1263 = vst.msk [vmem:[#allocation2 + $0x118] sm:$0x1] %vm1206_vm1, %v12909_v10  ;;  %1264 = vst.msk [vmem:[#allocation2 + $0x130] sm:$0x1] %vm1206_vm1, %v12909_v10 }
  0xf4   : > { %1265 = vst.msk [vmem:[#allocation2 + $0x148] sm:$0x1] %vm1206_vm1, %v12909_v10  ;;  %1266 = vst.msk [vmem:[#allocation2 + $0x160] sm:$0x1] %vm1206_vm1, %v12909_v10 }
  0xf5   : > { %1267 = vst.msk [vmem:[#allocation2 + $0x178] sm:$0x1] %vm1206_vm1, %v12909_v10  ;;  %1268 = vst.msk [vmem:[#allocation2 + $0x190] sm:$0x1] %vm1206_vm1, %v12909_v10 }
  0xf6   : > { %1269 = vst.msk [vmem:[#allocation2 + $0x1a8] sm:$0x1] %vm1206_vm1, %v12909_v10  ;;  %1270 = vst.msk [vmem:[#allocation2 + $0x1c0] sm:$0x1] %vm1206_vm1, %v12909_v10  ;;  %11398 = vmatmul.mubr.bf16.gmra.mxu0 %v636_v17 }
  0xf7   : > { %1271 = vst.msk [vmem:[#allocation2 + $0x208] sm:$0x1] %vm1206_vm1, %v12909_v10  ;;  %1272 = vst.msk [vmem:[#allocation2 + $0x220] sm:$0x1] %vm1206_vm1, %v12909_v10 }
  0xf8   : > { %1273 = vst.msk [vmem:[#allocation2 + $0x238] sm:$0x1] %vm1206_vm1, %v12909_v10  ;;  %1274 = vst.msk [vmem:[#allocation2 + $0x250] sm:$0x1] %vm1206_vm1, %v12909_v10 }
  0xf9   : > { %1275 = vst.msk [vmem:[#allocation2 + $0x268] sm:$0x1] %vm1206_vm1, %v12909_v10  ;;  %1276 = vst.msk [vmem:[#allocation2 + $0x280] sm:$0x1] %vm1206_vm1, %v12909_v10 }
  0xfa   : > { %1277 = vst.msk [vmem:[#allocation2 + $0x298] sm:$0x1] %vm1206_vm1, %v12909_v10  ;;  %1278 = vst.msk [vmem:[#allocation2 + $0x2b0] sm:$0x1] %vm1206_vm1, %v12909_v10 }
  0xfb   : > { %1279 = vst.msk [vmem:[#allocation2 + $0x2f8] sm:$0x1] %vm1206_vm1, %v12909_v10  ;;  %1280 = vst.msk [vmem:[#allocation2 + $0x310] sm:$0x1] %vm1206_vm1, %v12909_v10 }
  0xfc   : > { %1281 = vst.msk [vmem:[#allocation2 + $0x328] sm:$0x1] %vm1206_vm1, %v12909_v10  ;;  %1282 = vst.msk [vmem:[#allocation2 + $0x340] sm:$0x1] %vm1206_vm1, %v12909_v10 }
  0xfd   : > { %1283 = vst.msk [vmem:[#allocation2 + $0x358] sm:$0x1] %vm1206_vm1, %v12909_v10  ;;  %1284 = vst.msk [vmem:[#allocation2 + $0x370] sm:$0x1] %vm1206_vm1, %v12909_v10 }
  0xfe   : > { %1285 = vst.msk [vmem:[#allocation2 + $0x388] sm:$0x1] %vm1206_vm1, %v12909_v10  ;;  %1286 = vst.msk [vmem:[#allocation2 + $0x3a0] sm:$0x1] %vm1206_vm1, %v12909_v10 }
  0xff   : > { %1287 = vst.msk [vmem:[#allocation2 + $0x3e8] sm:$0x1] %vm1206_vm1, %v12909_v10  ;;  %1288 = vst.msk [vmem:[#allocation2 + $0x400] sm:$0x1] %vm1206_vm1, %v12909_v10 }
 0x100   : > { %1289 = vst.msk [vmem:[#allocation2 + $0x418] sm:$0x1] %vm1206_vm1, %v12909_v10  ;;  %1290 = vst.msk [vmem:[#allocation2 + $0x430] sm:$0x1] %vm1206_vm1, %v12909_v10 }
 0x101   : > { %1291 = vst.msk [vmem:[#allocation2 + $0x448] sm:$0x1] %vm1206_vm1, %v12909_v10  ;;  %1292 = vst.msk [vmem:[#allocation2 + $0x460] sm:$0x1] %vm1206_vm1, %v12909_v10 }
 0x102   : > { %1293 = vst.msk [vmem:[#allocation2 + $0x478] sm:$0x1] %vm1206_vm1, %v12909_v10  ;;  %1294 = vst.msk [vmem:[#allocation2 + $0x490] sm:$0x1] %vm1206_vm1, %v12909_v10 }
 0x103   : > { %1295 = vst.msk [vmem:[#allocation2 + $0x4d8] sm:$0x1] %vm1206_vm1, %v12909_v10  ;;  %1296 = vst.msk [vmem:[#allocation2 + $0x4f0] sm:$0x1] %vm1206_vm1, %v12909_v10 }
 0x104   : > { %1297 = vst.msk [vmem:[#allocation2 + $0x508] sm:$0x1] %vm1206_vm1, %v12909_v10  ;;  %1298 = vst.msk [vmem:[#allocation2 + $0x520] sm:$0x1] %vm1206_vm1, %v12909_v10 }
 0x105   : > { %1299 = vst.msk [vmem:[#allocation2 + $0x538] sm:$0x1] %vm1206_vm1, %v12909_v10  ;;  %1300 = vst.msk [vmem:[#allocation2 + $0x550] sm:$0x1] %vm1206_vm1, %v12909_v10 }
 0x106   : > { %1301 = vst.msk [vmem:[#allocation2 + $0x568] sm:$0x1] %vm1206_vm1, %v12909_v10  ;;  %1302 = vst.msk [vmem:[#allocation2 + $0x580] sm:$0x1] %vm1206_vm1, %v12909_v10 }
 0x107   : > { %1181 = vst.msk [vmem:[#allocation2 + $0xf] sm:$0x3] %vm1180_vm2, %v12909_v10  ;;  %1183 = vst.msk [vmem:[#allocation2 + $0xff] sm:$0x3] %vm1180_vm2, %v12909_v10 }
 0x108   : > { %1185 = vst.msk [vmem:[#allocation2 + $0x1ef] sm:$0x3] %vm1180_vm2, %v12909_v10  ;;  %1187 = vst.msk [vmem:[#allocation2 + $0x2df] sm:$0x3] %vm1180_vm2, %v12909_v10 }
 0x109   : > { %1189 = vst.msk [vmem:[#allocation2 + $0x3cf] sm:$0x3] %vm1180_vm2, %v12909_v10  ;;  %1191 = vst.msk [vmem:[#allocation2 + $0x4bf] sm:$0x3] %vm1180_vm2, %v12909_v10 }
 0x10a   : > { %1194 = vst.msk [vmem:[#allocation2 + $0xe7] sm:$0x3] %vm1180_vm2, %v12909_v10  ;;  %1196 = vst.msk [vmem:[#allocation2 + $0x1d7] sm:$0x3] %vm1180_vm2, %v12909_v10 }
 0x10b   : > { %1198 = vst.msk [vmem:[#allocation2 + $0x2c7] sm:$0x3] %vm1180_vm2, %v12909_v10  ;;  %1200 = vst.msk [vmem:[#allocation2 + $0x3b7] sm:$0x3] %vm1180_vm2, %v12909_v10 }
 0x10c   : > { %1202 = vst.msk [vmem:[#allocation2 + $0x4a7] sm:$0x3] %vm1180_vm2, %v12909_v10  ;;  %1204 = vst.msk [vmem:[#allocation2 + $0x597] sm:$0x3] %vm1180_vm2, %v12909_v10 }
 0x17e   : > { %v11419_v24 = vpop.f32.mrf.mxu1  ;;  %v11371_v25 = vpop.f32.mrf.mxu0 }
 0x17f   : > { %v1037_v26 = vmul.f32 %v11419_v24, %v13663_v22  ;;  %v854_v27 = vmul.f32 %v11371_v25, %v13663_v22 }
 0x180   : > { %v1004_v28 = vpop.f32.mrf.mxu1  ;;  %v719_v29 = vpop.f32.mrf.mxu0 }
 0x181   : > { %v1045_v30 = vadd.f32 %v13668_v23, %v1037_v26  ;;  %v1035_v31 = vmul.f32 %v13663_v22, %v1004_v28  ;;  %v892_v32 = vadd.f32 %v13668_v23, %v854_v27  ;;  %v852_v33 = vmul.f32 %v13663_v22, %v719_v29  ;;  %v1405_v28 = vld [vmem:[#allocation2 + $0x8] sm:$0xff] }
 0x182   : > { %v11420_v35 = vpop.f32.mrf.mxu1  ;;  %v11372_v36 = vpop.f32.mrf.mxu0  ;;  %v1353_v29 = vld [vmem:[#allocation2 + $0x7] sm:$0xff] }
 0x183   : > { %v1053_v37 = vmax.f32 %v1045_v30, 0.0  ;;  %v1043_v38 = vadd.f32 %v13668_v23, %v1035_v31  ;;  %v1038_v39 = vmul.f32 %v11420_v35, %v13663_v22  ;;  %v924_v40 = vmax.f32 %v892_v32, 0.0 }
 0x184   : > { %v1007_v41 = vpop.f32.mrf.mxu1  ;;  %v890_v42 = vadd.f32 %v13668_v23, %v852_v33  ;;  %v855_v43 = vmul.f32 %v11372_v36, %v13663_v22  ;;  %v722_v44 = vpop.f32.mrf.mxu0 }
 0x185   : > { %v1062_v45 = vmul.f32 %v13676_v34, %v1053_v37  ;;  %v1051_v46 = vmax.f32 %v1043_v38, 0.0  ;;  %v1046_v47 = vadd.f32 %v13668_v23, %v1038_v39  ;;  %v1036_v48 = vmul.f32 %v13663_v22, %v1007_v41  ;;  %1306 = vst.msk [vmem:[#allocation2 + $0x140] sm:$0xff] %vm1178_vm0, %v924_v40 }
 0x186   : > { %v11423_v49 = vpop.f32.mrf.mxu1  ;;  %v922_v50 = vmax.f32 %v890_v42, 0.0  ;;  %v893_v51 = vadd.f32 %v13668_v23, %v855_v43  ;;  %v853_v52 = vmul.f32 %v13663_v22, %v722_v44  ;;  %v11375_v53 = vpop.f32.mrf.mxu0 }
 0x187   : > { %1338 = vst.msk [vmem:[#allocation2 + $0x50] sm:$0xff] %vm1178_vm0, %v1062_v45  ;;  %v1060_v54 = vmul.f32 %v13676_v34, %v1051_v46  ;;  %v1054_v55 = vmax.f32 %v1046_v47, 0.0  ;;  %v1044_v56 = vadd.f32 %v13668_v23, %v1036_v48  ;;  %v1041_v57 = vmul.f32 %v11423_v49, %v13663_v22 }
 0x188   : > { %1304 = vst.msk [vmem:[#allocation2 + $0x110] sm:$0xff] %vm1178_vm0, %v922_v50  ;;  %v1020_v58 = vpop.f32.mrf.mxu1  ;;  %v925_v59 = vmax.f32 %v893_v51, 0.0  ;;  %v891_v60 = vadd.f32 %v13668_v23, %v853_v52  ;;  %v858_v61 = vmul.f32 %v11375_v53, %v13663_v22  ;;  %v735_v62 = vpop.f32.mrf.mxu0 }
 0x189   : > { %1336 = vst.msk [vmem:[#allocation2 + $0x20] sm:$0xff] %vm1178_vm0, %v1060_v54  ;;  %v1063_v63 = vmul.f32 %v13676_v34, %v1054_v55  ;;  %v1052_v0 = vmax.f32 %v1044_v56, 0.0  ;;  %v1049_v1 = vadd.f32 %v13668_v23, %v1041_v57  ;;  %v1039_v2 = vmul.f32 %v13663_v22, %v1020_v58 }
 0x18a   : > { %1307 = vst.msk [vmem:[#allocation2 + $0x158] sm:$0xff] %vm1178_vm0, %v925_v59  ;;  %v11424_v3 = vpop.f32.mrf.mxu1  ;;  %v923_v4 = vmax.f32 %v891_v60, 0.0  ;;  %v896_v5 = vadd.f32 %v13668_v23, %v858_v61  ;;  %v856_v6 = vmul.f32 %v13663_v22, %v735_v62  ;;  %v11376_v7 = vpop.f32.mrf.mxu0  ;;  %v12615_v62 = vld [vmem:[%s18271_s8 + $0x30] sm:$0xff]  }
 0x18b   : > { %1339 = vst.msk [vmem:[#allocation2 + $0x68] sm:$0xff] %vm1178_vm0, %v1063_v63  ;;  %v1061_v8 = vmul.f32 %v13676_v34, %v1052_v0  ;;  %v1057_v9 = vmax.f32 %v1049_v1, 0.0  ;;  %v1047_v10 = vadd.f32 %v13668_v23, %v1039_v2  ;;  %v1042_v11 = vmul.f32 %v11424_v3, %v13663_v22 }
 0x18c   : > { %1305 = vst.msk [vmem:[#allocation2 + $0x128] sm:$0xff] %vm1178_vm0, %v923_v4  ;;  %v1023_v12 = vpop.f32.mrf.mxu1  ;;  %v928_v13 = vmax.f32 %v896_v5, 0.0  ;;  %v894_v14 = vadd.f32 %v13668_v23, %v856_v6  ;;  %v859_v15 = vmul.f32 %v11376_v7, %v13663_v22  ;;  %v738_v16 = vpop.f32.mrf.mxu0  ;;  %v1413_v5 = vld [vmem:[#allocation2 + $0xf8] sm:$0xff] }
 0x18d   : > { %1337 = vst.msk [vmem:[#allocation2 + $0x38] sm:$0xff] %vm1178_vm0, %v1061_v8  ;;  %v1066_v17 = vmul.f32 %v13676_v34, %v1057_v9  ;;  %v1055_v19 = vmax.f32 %v1047_v10, 0.0  ;;  %v1050_v24 = vadd.f32 %v13668_v23, %v1042_v11  ;;  %v1040_v25 = vmul.f32 %v13663_v22, %v1023_v12  ;;  %v1361_v6 = vld [vmem:[#allocation2 + $0xf7] sm:$0xff] }
 0x18e   : > { %1310 = vst.msk [vmem:[#allocation2 + $0x1a0] sm:$0xff] %vm1178_vm0, %v928_v13  ;;  %v926_v26 = vmax.f32 %v894_v14, 0.0  ;;  %v897_v27 = vadd.f32 %v13668_v23, %v859_v15  ;;  %v857_v30 = vmul.f32 %v13663_v22, %v738_v16  ;;  %v11379_v31 = vpop.f32.mrf.mxu0  ;;  %v13734_v51 = vld [vmem:[#allocation2 + $0x50] sm:$0xff] }
 0x18f   : > { %1342 = vst.msk [vmem:[#allocation2 + $0xb0] sm:$0xff] %vm1178_vm0, %v1066_v17  ;;  %v1064_v32 = vmul.f32 %v13676_v34, %v1055_v19  ;;  %v1058_v33 = vmax.f32 %v1050_v24, 0.0  ;;  %v1048_v35 = vadd.f32 %v13668_v23, %v1040_v25  ;;  %v862_v36 = vmul.f32 %v11379_v31, %v13663_v22  ;;  %v13742_v56 = vld [vmem:[#allocation2 + $0x4f] sm:$0xff]  ;;  %v13791_v19 = vld [vmem:[%s18271_s8 + $0x58] sm:$0xff]  }
 0x190   : > { %1308 = vst.msk [vmem:[#allocation2 + $0x170] sm:$0xff] %vm1178_vm0, %v926_v26  ;;  %v929_v37 = vmax.f32 %v897_v27, 0.0  ;;  %v1406_v38 = vld [vmem:[#allocation2 + $0x20] sm:$0xff]  ;;  %v895_v40 = vadd.f32 %v13668_v23, %v857_v30  ;;  %v751_v41 = vpop.f32.mrf.mxu0  ;;  %v13777_v14 = vld [vmem:[#allocation2 + $0x110] sm:$0xff] }
 0x191   : > { %v13721_v39 = vld [vmem:[#allocation2 + $0x1f] sm:$0xff]  ;;  %1340 = vst.msk [vmem:[#allocation2 + $0x80] sm:$0xff] %vm1178_vm0, %v1064_v32  ;;  %v1067_v42 = vmul.f32 %v13676_v34, %v1058_v33  ;;  %v1056_v43 = vmax.f32 %v1048_v35, 0.0  ;;  %v1437_v44 = vpack.c.bf16 %v1406_v38, %v1405_v28  ;;  %v900_v47 = vadd.f32 %v13668_v23, %v862_v36  ;;  %v13779_v15 = vld [vmem:[#allocation2 + $0x10f] sm:$0xff] }
 0x192   : > { %v1385_v45 = vpack.c.bf16 %v13721_v39, %v1353_v29  ;;  %1311 = vst.msk [vmem:[#allocation2 + $0x1b8] sm:$0xff] %vm1178_vm0, %v929_v37  ;;  %v927_v46 = vmax.f32 %v895_v40, 0.0  ;;  %v860_v48 = vmul.f32 %v13663_v22, %v751_v41  ;;  %v11380_v49 = vpop.f32.mrf.mxu0  ;;  %v13758_v2 = vld [vmem:[#allocation2 + $0x68] sm:$0xff]  ;;  %v1441_v31 = vpack.c.bf16 %v13777_v14, %v1413_v5 }
 0x193   : > { %1343 = vst.msk [vmem:[#allocation2 + $0xc8] sm:$0xff] %vm1178_vm0, %v1067_v42  ;;  %v1065_v50 = vmul.f32 %v13676_v34, %v1056_v43  ;;  %11453 = vmatprep.mubr.msk.bf16.mxu1 %vm1178_vm0, %v1437_v44  ;;  %v863_v52 = vmul.f32 %v11380_v49, %v13663_v22  ;;  %v932_v53 = vmax.f32 %v900_v47, 0.0  ;;  %v13766_v8 = vld [vmem:[#allocation2 + $0x67] sm:$0xff]  ;;  %v1389_v32 = vpack.c.bf16 %v13779_v15, %v1361_v6 }
 0x194   : > { %11489 = vmatprep.mubr.msk.bf16.mxu0 %vm1178_vm0, %v1385_v45  ;;  %1309 = vst.msk [vmem:[#allocation2 + $0x188] sm:$0xff] %vm1178_vm0, %v927_v46  ;;  %v13738_v54 = vld [vmem:[#allocation2 + $0x38] sm:$0xff]  ;;  %v898_v57 = vadd.f32 %v13668_v23, %v860_v48  ;;  %v754_v34 = vpop.f32.mrf.mxu0  ;;  %v13827_v47 = vld [vmem:[#allocation2 + $0x128] sm:$0xff]  ;;  %v13829_v48 = vld [vmem:[#allocation2 + $0x140] sm:$0xff] }
 0x195   : > { %v13740_v55 = vld [vmem:[#allocation2 + $0x37] sm:$0xff]  ;;  %1341 = vst.msk [vmem:[#allocation2 + $0x98] sm:$0xff] %vm1178_vm0, %v1065_v50  ;;  %v1438_v58 = vpack.c.bf16 %v13734_v51, %v13738_v54  ;;  %v901_v60 = vadd.f32 %v13668_v23, %v863_v52  ;;  %v861_v61 = vmul.f32 %v13663_v22, %v754_v34  ;;  %1314 = vst.msk [vmem:[#allocation2 + $0x230] sm:$0xff] %vm1178_vm0, %v932_v53  ;;  %v13832_v50 = vld [vmem:[#allocation2 + $0x127] sm:$0xff] }
 0x196   : > { %v1386_v59 = vpack.c.bf16 %v13742_v56, %v13740_v55  ;;  %v930_v63 = vmax.f32 %v898_v57, 0.0  ;;  %v11383_v0 = vpop.f32.mrf.mxu0  ;;  %v13796_v25 = vld [vmem:[#allocation2 + $0xb0] sm:$0xff]  ;;  %v13834_v52 = vld [vmem:[#allocation2 + $0x13f] sm:$0xff] }
 0x197   : > { %11454 = vmatmul.mubr.msk.bf16.vlgmr.msra.gmra.mxu1 %vm1178_vm0, %v1438_v58  ;;  %v933_v1 = vmax.f32 %v901_v60, 0.0  ;;  %v899_v3 = vadd.f32 %v13668_v23, %v861_v61  ;;  %v866_v4 = vmul.f32 %v11383_v0, %v13663_v22  ;;  %v13803_v29 = vld [vmem:[#allocation2 + $0xaf] sm:$0xff]  ;;  %v13836_v53 = vld [vmem:[#allocation2 + $0x158] sm:$0xff] }
 0x198   : > { %11490 = vmatmul.mubr.msk.bf16.vlgmr.msra.gmra.mxu0 %vm1178_vm0, %v1386_v59  ;;  %12459 = vmatpush3.bf16.msra.mxu1 %v13638_v18  ;;  %1312 = vst.msk [vmem:[#allocation2 + $0x200] sm:$0xff] %vm1178_vm0, %v930_v63  ;;  %v13764_v7 = vld [vmem:[#allocation2 + $0x80] sm:$0xff]  ;;  %v767_v10 = vpop.f32.mrf.mxu0  ;;  %v13840_v59 = vld [vmem:[#allocation2 + $0x170] sm:$0xff]  ;;  %v1442_v63 = vpack.c.bf16 %v13829_v48, %v13827_v47 }
 0x199   : > { %v13768_v9 = vld [vmem:[#allocation2 + $0x7f] sm:$0xff]  ;;  %11558 = vmatpush3.bf16.msra.mxu0 %v13656_v21  ;;  %1315 = vst.msk [vmem:[#allocation2 + $0x248] sm:$0xff] %vm1178_vm0, %v933_v1  ;;  %v1439_v11 = vpack.c.bf16 %v13764_v7, %v13758_v2  ;;  %v931_v18 = vmax.f32 %v899_v3, 0.0  ;;  %v904_v13 = vadd.f32 %v13668_v23, %v866_v4  ;;  %12458 = vmatprep.subr.bf16.mxu1 %v13648_v20  ;;  %v13785_v21 = vld [vmem:[%s18271_s8 + $0x28] sm:$0xff]   ;;  %v13842_v60 = vld [vmem:[#allocation2 + $0x157] sm:$0xff] }
 0x19a   : > { %v1387_v12 = vpack.c.bf16 %v13768_v9, %v13766_v8  ;;  %11559 = vmatprep.subr.bf16.mxu0 %v12615_v62  ;;  %v864_v16 = vmul.f32 %v13663_v22, %v767_v10  ;;  %v11384_v17 = vpop.f32.mrf.mxu0  ;;  %v13844_v61 = vld [vmem:[#allocation2 + $0x16f] sm:$0xff]  ;;  %v1390_v1 = vpack.c.bf16 %v13834_v52, %v13832_v50  ;;  %v1443_v6 = vpack.c.bf16 %v13840_v59, %v13836_v53 }
 0x19b   : > { %11457 = vmatprep.mubr.msk.bf16.mxu1 %vm1178_vm0, %v1439_v11  ;;  %1313 = vst.msk [vmem:[#allocation2 + $0x218] sm:$0xff] %vm1178_vm0, %v931_v18  ;;  %v936_v24 = vmax.f32 %v904_v13, 0.0  ;;  %v867_v26 = vmul.f32 %v11384_v17, %v13663_v22  ;;  %v1391_v10 = vpack.c.bf16 %v13844_v61, %v13842_v60  ;;  %v13980_v18 = vstv %s957_s12  ;;  %s10088_s12 = scalar_lea.sflag [#allocation5], %s13241_s0 }
 0x19c   : > { %11493 = vmatprep.mubr.msk.bf16.mxu0 %vm1178_vm0, %v1387_v12  ;;  %v13799_v27 = vld [vmem:[#allocation2 + $0x98] sm:$0xff]  ;;  %v902_v30 = vadd.f32 %v13668_v23, %v864_v16  ;;  %v770_v33 = vpop.f32.mrf.mxu0  ;;  %12460 = vmatpush3.bf16.msra.mxu1 %v13648_v20 }
 0x19d   : > { %v13801_v28 = vld [vmem:[#allocation2 + $0x97] sm:$0xff]  ;;  %11560 = vmatpush3.bf16.msra.mxu0 %v12615_v62  ;;  %1318 = vst.msk [vmem:[#allocation2 + $0x290] sm:$0xff] %vm1178_vm0, %v936_v24  ;;  %v1440_v35 = vpack.c.bf16 %v13796_v25, %v13799_v27  ;;  %v905_v37 = vadd.f32 %v13668_v23, %v867_v26  ;;  %v865_v38 = vmul.f32 %v13663_v22, %v770_v33  ;;  %v1421_v24 = vld [vmem:[#allocation2 + $0x1e8] sm:$0xff] }
 0x19e   : > { %v1388_v36 = vpack.c.bf16 %v13803_v29, %v13801_v28  ;;  %11521 = vmatprep.subr.bf16.mxu1 %v13785_v21  ;;  %v934_v40 = vmax.f32 %v902_v30, 0.0  ;;  %v11387_v41 = vpop.f32.mrf.mxu0  ;;  %11629 = vmatprep.subr.bf16.mxu0 %v13791_v19  ;;  %v1369_v26 = vld [vmem:[#allocation2 + $0x1e7] sm:$0xff] }
 0x19f   : > { %11458 = vmatmul.mubr.msk.bf16.gmra.mxu1 %vm1178_vm0, %v1440_v35  ;;  %v937_v20 = vmax.f32 %v905_v37, 0.0  ;;  %v903_v42 = vadd.f32 %v13668_v23, %v865_v38  ;;  %v870_v43 = vmul.f32 %v11387_v41, %v13663_v22  ;;  %v13869_v30 = vld [vmem:[#allocation2 + $0x188] sm:$0xff]  ;;  %v13882_v41 = vld [vmem:[#allocation2 + $0x1ff] sm:$0xff] }
 0x1a0   : > { %11494 = vmatmul.mubr.msk.bf16.gmra.mxu0 %vm1178_vm0, %v1388_v36  ;;  %1316 = vst.msk [vmem:[#allocation2 + $0x260] sm:$0xff] %vm1178_vm0, %v934_v40  ;;  %11461 = vmatprep.mubr.msk.bf16.mxu1 %vm1178_vm0, %v1441_v31  ;;  %v783_v44 = vpop.f32.mrf.mxu0  ;;  %v13871_v31 = vld [vmem:[#allocation2 + $0x1a0] sm:$0xff] }
 0x1a1   : > { %11497 = vmatprep.mubr.msk.bf16.mxu0 %vm1178_vm0, %v1389_v32  ;;  %1319 = vst.msk [vmem:[#allocation2 + $0x2a8] sm:$0xff] %vm1178_vm0, %v937_v20  ;;  %v935_v45 = vmax.f32 %v903_v42, 0.0  ;;  %v908_v46 = vadd.f32 %v13668_v23, %v870_v43  ;;  %v868_v49 = vmul.f32 %v13663_v22, %v783_v44  ;;  %v13873_v32 = vld [vmem:[#allocation2 + $0x19f] sm:$0xff]  ;;  %v13877_v37 = vld [vmem:[#allocation2 + $0x187] sm:$0xff] }
 0x1a2   : > { %v11388_v57 = vpop.f32.mrf.mxu0  ;;  %v13880_v40 = vld [vmem:[#allocation2 + $0x200] sm:$0xff] }
 0x1a3   : > { %1317 = vst.msk [vmem:[#allocation2 + $0x278] sm:$0xff] %vm1178_vm0, %v935_v45  ;;  %v940_v34 = vmax.f32 %v908_v46, 0.0  ;;  %v906_v58 = vadd.f32 %v13668_v23, %v868_v49  ;;  %v871_v62 = vmul.f32 %v11388_v57, %v13663_v22  ;;  %v13891_v49 = vld [vmem:[#allocation2 + $0x218] sm:$0xff]  ;;  %v1444_v57 = vpack.c.bf16 %v13871_v31, %v13869_v30 }
 0x1a4   : > { %v786_v0 = vpop.f32.mrf.mxu0 }
 0x1a5   : > { %1322 = vst.msk [vmem:[#allocation2 + $0x320] sm:$0xff] %vm1178_vm0, %v940_v34  ;;  %v938_v3 = vmax.f32 %v906_v58, 0.0  ;;  %v909_v4 = vadd.f32 %v13668_v23, %v871_v62  ;;  %v869_v5 = vmul.f32 %v13663_v22, %v786_v0  ;;  %v1392_v34 = vpack.c.bf16 %v13873_v32, %v13877_v37 }
 0x1a6   : > { %v11391_v11 = vpop.f32.mrf.mxu0  ;;  %v1445_v58 = vpack.c.bf16 %v13880_v40, %v1421_v24  ;;  %v1393_v62 = vpack.c.bf16 %v13882_v41, %v1369_v26 }
 0x1a7   : > { %11462 = vmatmul.mubr.msk.bf16.gmra.mxu1 %vm1178_vm0, %v1442_v63  ;;  %1320 = vst.msk [vmem:[#allocation2 + $0x2f0] sm:$0xff] %vm1178_vm0, %v938_v3  ;;  %v941_v13 = vmax.f32 %v909_v4, 0.0  ;;  %v907_v16 = vadd.f32 %v13668_v23, %v869_v5  ;;  %v874_v17 = vmul.f32 %v11391_v11, %v13663_v22  ;;  %v13901_v3 = vld [vmem:[#allocation2 + $0x230] sm:$0xff]  ;;  %v13904_v5 = vld [vmem:[#allocation2 + $0x248] sm:$0xff] }
 0x1a8   : > { %11498 = vmatmul.mubr.msk.bf16.gmra.mxu0 %vm1178_vm0, %v1390_v1  ;;  %11465 = vmatprep.mubr.msk.bf16.mxu1 %vm1178_vm0, %v1443_v6  ;;  %v799_v33 = vpop.f32.mrf.mxu0 }
 0x1a9   : > { %11501 = vmatprep.mubr.msk.bf16.mxu0 %vm1178_vm0, %v1391_v10  ;;  %1323 = vst.msk [vmem:[#allocation2 + $0x338] sm:$0xff] %vm1178_vm0, %v941_v13  ;;  %v939_v35 = vmax.f32 %v907_v16, 0.0  ;;  %v912_v36 = vadd.f32 %v13668_v23, %v874_v17  ;;  %v872_v38 = vmul.f32 %v13663_v22, %v799_v33  ;;  %v13916_v17 = vld [vmem:[#allocation2 + $0x260] sm:$0xff]  ;;  %v13966_v33 = vld [vmem:[#allocation2 + $0x28f] sm:$0xff] }
 0x1aa   : > { %v11392_v20 = vpop.f32.mrf.mxu0  ;;  %v13906_v6 = vld [vmem:[#allocation2 + $0x278] sm:$0xff]  ;;  %18276 = vst [vmem:[#allocation28_spill] sm:$0xff] %v13916_v17 }
 0x1ab   : > { %1321 = vst.msk [vmem:[#allocation2 + $0x308] sm:$0xff] %vm1178_vm0, %v939_v35  ;;  %v944_v44 = vmax.f32 %v912_v36, 0.0  ;;  %v910_v45 = vadd.f32 %v13668_v23, %v872_v38  ;;  %v875_v46 = vmul.f32 %v11392_v20, %v13663_v22  ;;  %18275 = vst [vmem:[#allocation27_spill] sm:$0xff] %v13906_v6  ;;  %v13931_v20 = vld [vmem:[#allocation2 + $0x217] sm:$0xff] }
 0x1ac   : > { %v802_v63 = vpop.f32.mrf.mxu0  ;;  %v13918_v24 = vld [vmem:[#allocation2 + $0x320] sm:$0xff]  ;;  %v13964_v35 = vld [vmem:[#allocation2 + $0x277] sm:$0xff] }
 0x1ad   : > { %1326 = vst.msk [vmem:[#allocation2 + $0x380] sm:$0xff] %vm1178_vm0, %v944_v44  ;;  %v942_v0 = vmax.f32 %v910_v45, 0.0  ;;  %v913_v1 = vadd.f32 %v13668_v23, %v875_v46  ;;  %v873_v4 = vmul.f32 %v13663_v22, %v802_v63  ;;  %18277 = vst [vmem:[#allocation29_spill] sm:$0xff] %v13918_v24  ;;  %v13933_v44 = vld [vmem:[#allocation2 + $0x22f] sm:$0xff]  ;;  %v1396_v42 = vpack.c.bf16 %v13966_v33, %v13964_v35  ;;  %v13993_v12 = vld [vmem:[#allocation2 + $0x31f] sm:$0xff] }
 0x1ae   : > { %v13929_v38 = vld [vmem:[#allocation2 + $0x2f0] sm:$0xff]  ;;  %v1394_v63 = vpack.c.bf16 %v13933_v44, %v13931_v20 }
 0x1af   : > { %11466 = vmatmul.mubr.msk.bf16.gmra.mxu1 %vm1178_vm0, %v1444_v57  ;;  %1324 = vst.msk [vmem:[#allocation2 + $0x350] sm:$0xff] %vm1178_vm0, %v942_v0  ;;  %v945_v13 = vmax.f32 %v913_v1, 0.0  ;;  %v911_v16 = vadd.f32 %v13668_v23, %v873_v4  ;;  %18279 = vst [vmem:[#allocation31_spill] sm:$0xff] %v13929_v38  ;;  %v13940_v57 = vld [vmem:[#allocation2 + $0x247] sm:$0xff]  ;;  %v1447_v0 = vpack.c.bf16 %v13916_v17, %v13904_v5  ;;  %v1429_v4 = vld [vmem:[#allocation2 + $0x2d8] sm:$0xff] }
 0x1b0   : > { %11502 = vmatmul.mubr.msk.bf16.gmra.mxu0 %vm1178_vm0, %v1392_v34  ;;  %11469 = vmatprep.mubr.msk.bf16.mxu1 %vm1178_vm0, %v1445_v58  ;;  %v13922_v26 = vld [vmem:[#allocation2 + $0x338] sm:$0xff]  ;;  %v13961_v46 = vld [vmem:[#allocation2 + $0x2ef] sm:$0xff] }
 0x1b1   : > { %11505 = vmatprep.mubr.msk.bf16.mxu0 %vm1178_vm0, %v1393_v62  ;;  %18278 = vst [vmem:[#allocation30_spill] sm:$0xff] %v13922_v26  ;;  %1327 = vst.msk [vmem:[#allocation2 + $0x398] sm:$0xff] %vm1178_vm0, %v945_v13  ;;  %v943_v36 = vmax.f32 %v911_v16, 0.0  ;;  %v13942_v34 = vld [vmem:[#allocation2 + $0x25f] sm:$0xff]  ;;  %v1446_v62 = vpack.c.bf16 %v13901_v3, %v13891_v49  ;;  %v11443_v13 = vpop.f32.mrf.mxu1  ;;  %v13959_v16 = vld [vmem:[#allocation2 + $0x290] sm:$0xff] }
 0x1b2   : > { %v13935_v45 = vld [vmem:[#allocation2 + $0x308] sm:$0xff]  ;;  %v1395_v1 = vpack.c.bf16 %v13942_v34, %v13940_v57  ;;  %18281 = vst [vmem:[#allocation33_spill] sm:$0xff] %v13959_v16  ;;  %v1147_v58 = vmul.f32 %v11443_v13, %v13663_v22  ;;  %v1448_v13 = vpack.c.bf16 %v13959_v16, %v13906_v6 }
 0x1b3   : > { %18280 = vst [vmem:[#allocation32_spill] sm:$0xff] %v13935_v45  ;;  %1325 = vst.msk [vmem:[#allocation2 + $0x368] sm:$0xff] %vm1178_vm0, %v943_v36  ;;  %v1377_v36 = vld [vmem:[#allocation2 + $0x2d7] sm:$0xff]  ;;  %v13991_v17 = vld [vmem:[#allocation2 + $0x307] sm:$0xff] }
 0x1b4   : > { %v1155_v10 = vadd.f32 %v13668_v23, %v1147_v58 }
 0x1b6   : > { %v13972_v11 = vld [vmem:[#allocation2 + $0x350] sm:$0xff] }
 0x1b7   : > { %11470 = vmatmul.mubr.msk.bf16.gmra.mxu1 %vm1178_vm0, %v1446_v62  ;;  %18282 = vst [vmem:[#allocation34_spill] sm:$0xff] %v13972_v11 }
 0x1b8   : > { %11506 = vmatmul.mubr.msk.bf16.gmra.mxu0 %vm1178_vm0, %v1394_v63  ;;  %11473 = vmatprep.mubr.msk.bf16.mxu1 %vm1178_vm0, %v1447_v0  ;;  %v1114_v63 = vpop.f32.mrf.mxu1  ;;  %v1449_v0 = vpack.c.bf16 %v13929_v38, %v1429_v4  ;;  %v1163_v4 = vmax.f32 %v1155_v10, 0.0 }
 0x1b9   : > { %11509 = vmatprep.mubr.msk.bf16.mxu0 %vm1178_vm0, %v1395_v1  ;;  %v1397_v1 = vpack.c.bf16 %v13961_v46, %v1377_v36  ;;  %v1145_v43 = vmul.f32 %v13663_v22, %v1114_v63 }
 0x1ba   : > { %v13968_v62 = vld [vmem:[#allocation2 + $0x368] sm:$0xff]  ;;  %v1172_v58 = vmul.f32 %v13980_v18, %v1163_v4  ;;  %v11444_v38 = vpop.f32.mrf.mxu1 }
 0x1bb   : > { %v1153_v36 = vadd.f32 %v13668_v23, %v1145_v43  ;;  %v1148_v16 = vmul.f32 %v11444_v38, %v13663_v22  ;;  %v1398_v38 = vpack.c.bf16 %v13993_v12, %v13991_v17 }
 0x1bc   : > { %1347 = vst.msk [vmem:[#allocation2 + $0x500] sm:$0xff] %vm1178_vm0, %v1172_v58  ;;  %v1117_v10 = vpop.f32.mrf.mxu1  ;;  %v1451_v58 = vpack.c.bf16 %v13972_v11, %v13922_v26 }
 0x1bd   : > { %v1161_v63 = vmax.f32 %v1153_v36, 0.0 }
 0x1be   : > { %v11447_v36 = vpop.f32.mrf.mxu1 }
 0x1bf   : > { %11474 = vmatmul.mubr.msk.bf16.gmra.mxu1 %vm1178_vm0, %v1448_v13  ;;  %v1170_v43 = vmul.f32 %v13980_v18, %v1161_v63  ;;  %v1151_v63 = vmul.f32 %v11447_v36, %v13663_v22 }
 0x1c0   : > { %11510 = vmatmul.mubr.msk.bf16.gmra.mxu0 %vm1178_vm0, %v1396_v42  ;;  %11477 = vmatprep.mubr.msk.bf16.mxu1 %vm1178_vm0, %v1449_v0  ;;  %v1156_v42 = vadd.f32 %v13668_v23, %v1148_v16  ;;  %v1146_v0 = vmul.f32 %v13663_v22, %v1117_v10  ;;  %v2236_v16 = vpack.c.bf16 %v13740_v55, %v13721_v39 }
 0x1c1   : > { %11513 = vmatprep.mubr.msk.bf16.mxu0 %vm1178_vm0, %v1397_v1  ;;  %1345 = vst.msk [vmem:[#allocation2 + $0x4d0] sm:$0xff] %vm1178_vm0, %v1170_v43  ;;  %v1450_v1 = vpack.c.bf16 %v13918_v24, %v13935_v45  ;;  %v11395_v24 = vpop.f32.mrf.mxu0 }
 0x1c2   : > { %v1164_v13 = vmax.f32 %v1156_v42, 0.0  ;;  %v1154_v4 = vadd.f32 %v13668_v23, %v1146_v0  ;;  %v1130_v42 = vpop.f32.mrf.mxu1  ;;  %v1159_v0 = vadd.f32 %v13668_v23, %v1151_v63  ;;  %v878_v11 = vmul.f32 %v11395_v24, %v13663_v22  ;;  %v14027_v63 = vld [vmem:[#allocation2 + $0x337] sm:$0xff] }
 0x1c3   : > { %v1149_v39 = vmul.f32 %v13663_v22, %v1130_v42  ;;  %v2237_v24 = vpack.c.bf16 %v13766_v8, %v13742_v56  ;;  %v14029_v42 = vld [vmem:[#allocation2 + $0x34f] sm:$0xff] }
 0x1c4   : > { %v1173_v43 = vmul.f32 %v13980_v18, %v1164_v13  ;;  %v1162_v10 = vmax.f32 %v1154_v4, 0.0  ;;  %v14020_v13 = vld [vmem:[#allocation2 + $0x380] sm:$0xff]  ;;  %v1167_v4 = vmax.f32 %v1159_v0, 0.0  ;;  %v916_v36 = vadd.f32 %v13668_v23, %v878_v11 }
 0x1c5   : > { %v1452_v56 = vpack.c.bf16 %v14020_v13, %v13968_v62 }
 0x1c6   : > { %1348 = vst.msk [vmem:[#allocation2 + $0x518] sm:$0xff] %vm1178_vm0, %v1173_v43  ;;  %v1171_v55 = vmul.f32 %v13980_v18, %v1162_v10  ;;  %v2238_v43 = vpack.c.bf16 %v13801_v28, %v13768_v9  ;;  %v948_v26 = vmax.f32 %v916_v36, 0.0 }
 0x1c7   : > { %11478 = vmatmul.mubr.msk.bf16.gmra.mxu1 %vm1178_vm0, %v1450_v1  ;;  %v815_v1 = vpop.f32.mrf.mxu0 }
 0x1c8   : > { %11514 = vmatmul.mubr.msk.bf16.gmra.mxu0 %vm1178_vm0, %v1398_v38  ;;  %11481 = vmatprep.mubr.msk.bf16.mxu1 %vm1178_vm0, %v1451_v58  ;;  %v11448_v38 = vpop.f32.mrf.mxu1  ;;  %v1157_v58 = vadd.f32 %v13668_v23, %v1149_v39  ;;  %1346 = vst.msk [vmem:[#allocation2 + $0x4e8] sm:$0xff] %vm1178_vm0, %v1171_v55  ;;  %v1176_v39 = vmul.f32 %v13980_v18, %v1167_v4  ;;  %1330 = vst.msk [vmem:[#allocation2 + $0x410] sm:$0xff] %vm1178_vm0, %v948_v26 }
 0x1c9   : > { %11561 = vmatprep.mubr.msk.bf16.mxu0 %vm1178_vm0, %v2236_v16  ;;  %v876_v16 = vmul.f32 %v13663_v22, %v815_v1  ;;  %v11396_v10 = vpop.f32.mrf.mxu0  ;;  %v1152_v0 = vmul.f32 %v11448_v38, %v13663_v22  ;;  %v1399_v55 = vpack.c.bf16 %v14029_v42, %v14027_v63  ;;  %v12621_v38 = vld [vmem:[%s18271_s8 + $0x50] sm:$0xff]  }
 0x1ca   : > { %v1133_v11 = vpop.f32.mrf.mxu1  ;;  %v1165_v1 = vmax.f32 %v1157_v58, 0.0  ;;  %v879_v8 = vmul.f32 %v11396_v10, %v13663_v22  ;;  %1351 = vst.msk [vmem:[#allocation2 + $0x560] sm:$0xff] %vm1178_vm0, %v1176_v39 }
 0x1cb   : > { %v914_v45 = vadd.f32 %v13668_v23, %v876_v16  ;;  %v818_v6 = vpop.f32.mrf.mxu0  ;;  %v1160_v9 = vadd.f32 %v13668_v23, %v1152_v0  ;;  %v1150_v28 = vmul.f32 %v13663_v22, %v1133_v11 }
 0x1cc   : > { %v1174_v4 = vmul.f32 %v13980_v18, %v1165_v1  ;;  %v877_v58 = vmul.f32 %v13663_v22, %v818_v6  ;;  %v917_v16 = vadd.f32 %v13668_v23, %v879_v8  ;;  %v14065_v8 = vld [vmem:[#allocation2 + $0x367] sm:$0xff] }
 0x1cd   : > { %v946_v36 = vmax.f32 %v914_v45, 0.0  ;;  %v1168_v10 = vmax.f32 %v1160_v9, 0.0  ;;  %v11399_v0 = vpop.f32.mrf.mxu0  ;;  %v1158_v11 = vadd.f32 %v13668_v23, %v1150_v28  ;;  %v14061_v45 = vld [vmem:[#allocation2 + $0xc7] sm:$0xff]  ;;  %v14072_v9 = vld [vmem:[%s18271_s8 + $0x78] sm:$0xff]  }
 0x1ce   : > { %1349 = vst.msk [vmem:[#allocation2 + $0x530] sm:$0xff] %vm1178_vm0, %v1174_v4  ;;  %v915_v6 = vadd.f32 %v13668_v23, %v877_v58  ;;  %v882_v26 = vmul.f32 %v11399_v0, %v13663_v22  ;;  %v1899_v4 = vld [vmem:[#allocation2 + $0x9] sm:$0xff] }
 0x1cf   : > { %11482 = vmatmul.mubr.msk.bf16.gmra.mxu1 %vm1178_vm0, %v1452_v56  ;;  %1328 = vst.msk [vmem:[#allocation2 + $0x3e0] sm:$0xff] %vm1178_vm0, %v946_v36  ;;  %v1177_v39 = vmul.f32 %v13980_v18, %v1168_v10  ;;  %v1166_v1 = vmax.f32 %v1158_v11, 0.0  ;;  %v831_v56 = vpop.f32.mrf.mxu0  ;;  %v14076_v36 = vld [vmem:[#allocation2 + $0x21] sm:$0xff] }
 0x1d0   : > { %11562 = vmatmul.mubr.msk.bf16.vlgmr.msra.gmra.mxu0 %vm1178_vm0, %v2237_v24  ;;  %11517 = vmatprep.mubr.msk.bf16.mxu1 %vm1178_vm0, %v1399_v55  ;;  %v949_v24 = vmax.f32 %v917_v16, 0.0  ;;  %v947_v28 = vmax.f32 %v915_v6, 0.0  ;;  %v920_v55 = vadd.f32 %v13668_v23, %v882_v26  ;;  %v2239_v26 = vpack.c.bf16 %v14061_v45, %v13803_v29 }
 0x1d1   : > { %11565 = vmatprep.mubr.msk.bf16.mxu0 %vm1178_vm0, %v2238_v43  ;;  %11630 = vmatpush3.bf16.msra.mxu0 %v13791_v19  ;;  %v14067_v43 = vld [vmem:[#allocation2 + $0x37f] sm:$0xff]  ;;  %v880_v19 = vmul.f32 %v13663_v22, %v831_v56  ;;  %1352 = vst.msk [vmem:[#allocation2 + $0x578] sm:$0xff] %vm1178_vm0, %v1177_v39  ;;  %v1175_v58 = vmul.f32 %v13980_v18, %v1166_v1  ;;  %v11400_v16 = vpop.f32.mrf.mxu0 }
 0x1d2   : > { %11631 = vmatprep.subr.bf16.mxu0 %v12621_v38  ;;  %1331 = vst.msk [vmem:[#allocation2 + $0x428] sm:$0xff] %vm1178_vm0, %v949_v24  ;;  %1329 = vst.msk [vmem:[#allocation2 + $0x3f8] sm:$0xff] %vm1178_vm0, %v947_v28  ;;  %v952_v10 = vmax.f32 %v920_v55, 0.0  ;;  %v883_v11 = vmul.f32 %v11400_v16, %v13663_v22  ;;  %v1400_v6 = vpack.c.bf16 %v14067_v43, %v14065_v8  ;;  %v12617_v24 = vld [vmem:[%s18271_s8 + $0x20] sm:$0xff]  }
 0x1d3   : > { %v918_v0 = vadd.f32 %v13668_v23, %v880_v19  ;;  %1350 = vst.msk [vmem:[#allocation2 + $0x548] sm:$0xff] %vm1178_vm0, %v1175_v58  ;;  %v834_v18 = vpop.f32.mrf.mxu0  ;;  %v1931_v39 = vpack.c.bf16 %v14076_v36, %v1899_v4  ;;  %v2240_v29 = vpack.c.bf16 %v13832_v50, %v13779_v15  ;;  %v14109_v19 = vld [vmem:[#allocation2 + $0x39] sm:$0xff]  ;;  %v14114_v50 = vld [vmem:[#allocation2 + $0x51] sm:$0xff]  ;;  %v2241_v4 = vpack.c.bf16 %v13842_v60, %v13834_v52  ;;  %v14121_v58 = vld [vmem:[#allocation2 + $0x69] sm:$0xff] }
 0x1d4   : > { %1334 = vst.msk [vmem:[#allocation2 + $0x470] sm:$0xff] %vm1178_vm0, %v952_v10  ;;  %v921_v56 = vadd.f32 %v13668_v23, %v883_v11  ;;  %v881_v28 = vmul.f32 %v13663_v22, %v834_v18  ;;  %v12618_v22 = vld [vmem:[%s18271_s8 + $0x48] sm:$0xff]   ;;  %v12619_v16 = vld [vmem:[%s18271_s8 + $0x40] sm:$0xff]   ;;  %v14141_v11 = vld [vmem:[#allocation2 + $0x1b7] sm:$0xff] }
 0x1d5   : > { %11632 = vmatpush3.bf16.msra.mxu0 %v12621_v38  ;;  %v950_v1 = vmax.f32 %v918_v0, 0.0  ;;  %v2242_v0 = vpack.c.bf16 %v13877_v37, %v13844_v61  ;;  %v14137_v52 = vld [vmem:[%s18271_s8 + $0x68] sm:$0xff]   ;;  %v14139_v60 = vld [vmem:[#allocation2 + $0x99] sm:$0xff]  ;;  %v2243_v37 = vpack.c.bf16 %v14141_v11, %v13873_v32 }
 0x1d6   : > { %11701 = vmatprep.subr.bf16.mxu0 %v14072_v9  ;;  %v953_v38 = vmax.f32 %v921_v56, 0.0  ;;  %v919_v55 = vadd.f32 %v13668_v23, %v881_v28  ;;  %v1932_v23 = vpack.c.bf16 %v14114_v50, %v14109_v19  ;;  %v14161_v56 = vld [vmem:[#allocation2 + $0x141] sm:$0xff]  ;;  %v14163_v32 = vld [vmem:[#allocation2 + $0x159] sm:$0xff]  ;;  %v14165_v28 = vld [vmem:[#allocation2 + $0x171] sm:$0xff] }
 0x1d7   : > { %11518 = vmatmul.mubr.msk.bf16.vlgmr.msra.gmra.mxu1 %vm1178_vm0, %v1400_v6  ;;  %1332 = vst.msk [vmem:[#allocation2 + $0x440] sm:$0xff] %vm1178_vm0, %v950_v1  ;;  %v1907_v6 = vld [vmem:[#allocation2 + $0xf9] sm:$0xff]  ;;  %v14159_v1 = vld [vmem:[#allocation2 + $0x129] sm:$0xff] }
 0x1d8   : > { %11566 = vmatmul.mubr.msk.bf16.gmra.mxu0 %vm1178_vm0, %v2239_v26  ;;  %11522 = vmatpush3.bf16.msra.mxu1 %v13785_v21  ;;  %1335 = vst.msk [vmem:[#allocation2 + $0x488] sm:$0xff] %vm1178_vm0, %v953_v38  ;;  %v951_v15 = vmax.f32 %v919_v55, 0.0  ;;  %v14112_v21 = vld [vmem:[#allocation2 + $0x81] sm:$0xff]  ;;  %v14143_v26 = vld [vmem:[#allocation2 + $0x111] sm:$0xff]  ;;  %v2246_v38 = vpack.c.bf16 %v13964_v35, %v13942_v34  ;;  %v14179_v55 = vld [vmem:[#allocation2 + $0x189] sm:$0xff] }
 0x1d9   : > { %11525 = vmatprep.mubr.msk.bf16.mxu1 %vm1178_vm0, %v1931_v39  ;;  %11569 = vmatprep.mubr.msk.bf16.mxu0 %vm1178_vm0, %v2240_v29  ;;  %v1933_v10 = vpack.c.bf16 %v14112_v21, %v14121_v58  ;;  %v1935_v18 = vpack.c.bf16 %v14143_v26, %v1907_v6  ;;  %v2244_v39 = vpack.c.bf16 %v13931_v20, %v13882_v41 }
 0x1da   : > { %11523 = vmatprep.subr.bf16.mxu1 %v12617_v24  ;;  %1333 = vst.msk [vmem:[#allocation2 + $0x458] sm:$0xff] %vm1178_vm0, %v951_v15  ;;  %v1936_v29 = vpack.c.bf16 %v14161_v56, %v14159_v1  ;;  %v2245_v41 = vpack.c.bf16 %v13940_v57, %v13933_v44  ;;  %v1937_v20 = vpack.c.bf16 %v14165_v28, %v14163_v32  ;;  %v14183_v15 = vld [vmem:[#allocation2 + $0x2a7] sm:$0xff] }
 0x1db   : > { %v1915_v44 = vld [vmem:[#allocation2 + $0x1e9] sm:$0xff]  ;;  %v14185_v57 = vld [vmem:[#allocation2 + $0x201] sm:$0xff]  ;;  %v2247_v34 = vpack.c.bf16 %v14183_v15, %v13966_v33 }
 0x1dc   : > { %11524 = vmatpush3.bf16.msra.mxu1 %v12617_v24  ;;  %v14145_v24 = vld [vmem:[#allocation2 + $0xb1] sm:$0xff]  ;;  %v14204_v33 = vld [vmem:[#allocation2 + $0x261] sm:$0xff] }
 0x1dd   : > { %11593 = vmatprep.subr.bf16.mxu1 %v12618_v22  ;;  %v1934_v61 = vpack.c.bf16 %v14145_v24, %v14139_v60 }
 0x1df   : > { %11526 = vmatmul.mubr.msk.bf16.vlgmr.msra.gmra.mxu1 %vm1178_vm0, %v1932_v23  ;;  %v1939_v23 = vpack.c.bf16 %v14185_v57, %v1915_v44  ;;  %v14238_v44 = vld [vmem:[#allocation2 + $0x339] sm:$0xff] }
 0x1e0   : > { %11570 = vmatmul.mubr.msk.bf16.gmra.mxu0 %vm1178_vm0, %v2241_v4  ;;  %11594 = vmatpush3.bf16.msra.mxu1 %v12618_v22  ;;  %v14181_v22 = vld [vmem:[#allocation2 + $0x1a1] sm:$0xff]  ;;  %v2248_v4 = vpack.c.bf16 %v13991_v17, %v13961_v46  ;;  %v2249_v17 = vpack.c.bf16 %v14027_v63, %v13993_v12  ;;  %v1923_v12 = vld [vmem:[#allocation2 + $0x2d9] sm:$0xff]  ;;  %v14222_v63 = vld [vmem:[#allocation2 + $0x2f1] sm:$0xff] }
 0x1e1   : > { %11529 = vmatprep.mubr.msk.bf16.mxu1 %vm1178_vm0, %v1933_v10  ;;  %11573 = vmatprep.mubr.msk.bf16.mxu0 %vm1178_vm0, %v2242_v0  ;;  %v1938_v35 = vpack.c.bf16 %v14181_v22, %v14179_v55  ;;  %v14200_v10 = vld [vmem:[#allocation2 + $0x231] sm:$0xff]  ;;  %v14202_v0 = vld [vmem:[#allocation2 + $0x249] sm:$0xff] }
 0x1e2   : > { %11595 = vmatprep.subr.bf16.mxu1 %v12619_v16  ;;  %v1941_v46 = vpack.c.bf16 %v14204_v33, %v14202_v0 }
 0x1e4   : > { %11596 = vmatpush3.bf16.msra.mxu1 %v12619_v16  ;;  %v14198_v16 = vld [vmem:[#allocation2 + $0x219] sm:$0xff] }
 0x1e5   : > { %11665 = vmatprep.subr.bf16.mxu1 %v14137_v52  ;;  %v1940_v6 = vpack.c.bf16 %v14200_v10, %v14198_v16 }
 0x1e7   : > { %11530 = vmatmul.mubr.msk.bf16.gmra.mxu1 %vm1178_vm0, %v1934_v61  ;;  %v2250_v61 = vpack.c.bf16 %v14065_v8, %v14029_v42  ;;  %v1943_v8 = vpack.c.bf16 %v14222_v63, %v1923_v12 }
 0x1e8   : > { %11574 = vmatmul.mubr.msk.bf16.gmra.mxu0 %vm1178_vm0, %v2243_v37  ;;  %11533 = vmatprep.mubr.msk.bf16.mxu1 %vm1178_vm0, %v1935_v18  ;;  %v14218_v37 = vld [vmem:[#allocation2 + $0x279] sm:$0xff]  ;;  %v14220_v18 = vld [vmem:[#allocation2 + $0x291] sm:$0xff] }
 0x1e9   : > { %11577 = vmatprep.mubr.msk.bf16.mxu0 %vm1178_vm0, %v2244_v39  ;;  %v2235_v39 = vld [vmem:[#allocation2 + $0x397] sm:$0xff] }
 0x1ea   : > { %v2251_v42 = vpack.c.bf16 %v2235_v39, %v14067_v43  ;;  %v14240_v43 = vld [vmem:[#allocation2 + $0x351] sm:$0xff] }
 0x1ef   : > { %11534 = vmatmul.mubr.msk.bf16.gmra.mxu1 %vm1178_vm0, %v1936_v29  ;;  %v1942_v29 = vpack.c.bf16 %v14220_v18, %v14218_v37 }
 0x1f0   : > { %11578 = vmatmul.mubr.msk.bf16.gmra.mxu0 %vm1178_vm0, %v2245_v41  ;;  %11537 = vmatprep.mubr.msk.bf16.mxu1 %vm1178_vm0, %v1937_v20  ;;  %v2846_v41 = vpack.c.bf16 %v14109_v19, %v14076_v36  ;;  %v14234_v20 = vld [vmem:[#allocation2 + $0x309] sm:$0xff]  ;;  %v2847_v36 = vpack.c.bf16 %v14121_v58, %v14114_v50  ;;  %v1945_v19 = vpack.c.bf16 %v14240_v43, %v14238_v44  ;;  %v14258_v58 = vld [vmem:[#allocation2 + $0x381] sm:$0xff] }
 0x1f1   : > { %11581 = vmatprep.mubr.msk.bf16.mxu0 %vm1178_vm0, %v2246_v38  ;;  %v14236_v38 = vld [vmem:[#allocation2 + $0x321] sm:$0xff]  ;;  %v1929_v50 = vld [vmem:[#allocation2 + $0x369] sm:$0xff] }
 0x1f7   : > { %11538 = vmatmul.mubr.msk.bf16.gmra.mxu1 %vm1178_vm0, %v1938_v35  ;;  %v1944_v35 = vpack.c.bf16 %v14236_v38, %v14234_v20 }
 0x1f8   : > { %11582 = vmatmul.mubr.msk.bf16.gmra.mxu0 %vm1178_vm0, %v2247_v34  ;;  %11541 = vmatprep.mubr.msk.bf16.mxu1 %vm1178_vm0, %v1939_v23  ;;  %v2848_v34 = vpack.c.bf16 %v14139_v60, %v14112_v21  ;;  %v12625_v23 = vld [vmem:[%s18271_s8 + $0x70] sm:$0xff]   ;;  %v14263_v21 = vld [vmem:[%s18271_s8 + $0x98] sm:$0xff]   ;;  %v1946_v60 = vpack.c.bf16 %v14258_v58, %v1929_v50 }
 0x1f9   : > { %11585 = vmatprep.mubr.msk.bf16.mxu0 %vm1178_vm0, %v2248_v4  ;;  %v2821_v4 = vld [vmem:[#allocation2 + $0xc9] sm:$0xff] }
 0x1ff   : > { %11542 = vmatmul.mubr.msk.bf16.gmra.mxu1 %vm1178_vm0, %v1940_v6  ;;  %v2849_v6 = vpack.c.bf16 %v2821_v4, %v14145_v24  ;;  %v2851_v24 = vpack.c.bf16 %v14163_v32, %v14161_v56  ;;  %v2829_v56 = vld [vmem:[#allocation2 + $0x1b9] sm:$0xff] }
 0x200   : > { %11586 = vmatmul.mubr.msk.bf16.gmra.mxu0 %vm1178_vm0, %v2249_v17  ;;  %11545 = vmatprep.mubr.msk.bf16.mxu1 %vm1178_vm0, %v1941_v46  ;;  %v2509_v17 = vld [vmem:[#allocation2 + $0x20] sm:$0xff]  ;;  %v2853_v32 = vpack.c.bf16 %v2829_v56, %v14181_v22  ;;  %v2837_v22 = vld [vmem:[#allocation2 + $0x2a9] sm:$0xff] }
 0x201   : > { %11589 = vmatprep.mubr.msk.bf16.mxu0 %vm1178_vm0, %v2250_v61  ;;  %v2541_v46 = vpack.c.bf16 %v13738_v54, %v2509_v17  ;;  %v12623_v54 = vld [vmem:[%s18271_s8 + $0x60] sm:$0xff]   ;;  %v18284_v61 = vpack.c.bf16 %v13799_v27, %v13764_v7  ;;  %v2854_v7 = vpack.c.bf16 %v14198_v16, %v14185_v57  ;;  %v18285_v27 = vpack.c.bf16 %v13827_v47, %v13777_v14  ;;  %v14327_v47 = vld [vmem:[#allocation2 + $0x1b8] sm:$0xff]  ;;  %v3433_v17 = vld [vmem:[#allocation2 + $0x128] sm:$0xff] }
 0x202   : > { %v18287_v14 = vpack.c.bf16 %v13869_v30, %v13840_v59  ;;  %v2548_v57 = vpack.c.bf16 %v14327_v47, %v13871_v31  ;;  %v2857_v16 = vpack.c.bf16 %v2837_v22, %v14220_v18  ;;  %v2859_v59 = vpack.c.bf16 %v14238_v44, %v14236_v38  ;;  %v18293_v18 = vld [vmem:[#allocation33_spill] sm:$0xff]  ;;  %v3437_v22 = vld [vmem:[#allocation2 + $0x188] sm:$0xff] }
 0x203   : > { %v2860_v30 = vpack.c.bf16 %v1929_v50, %v14240_v43  ;;  %v18289_v31 = vpack.c.bf16 %v13904_v5, %v13901_v3  ;;  %v3426_v5 = vld [vmem:[#allocation2 + $0x50] sm:$0xff]  ;;  %v14380_v50 = vld [vmem:[#allocation2 + $0x398] sm:$0xff] }
 0x204   : > { %v3430_v44 = vld [vmem:[#allocation2 + $0xb0] sm:$0xff] }
 0x207   : > { %11546 = vmatmul.mubr.msk.bf16.gmra.mxu1 %vm1178_vm0, %v1942_v29  ;;  %v18295_v29 = vld [vmem:[#allocation31_spill] sm:$0xff] }
 0x208   : > { %11590 = vmatmul.mubr.msk.bf16.gmra.mxu0 %vm1178_vm0, %v2251_v42  ;;  %11549 = vmatprep.mubr.msk.bf16.mxu1 %vm1178_vm0, %v1943_v8  ;;  %v3428_v8 = vld [vmem:[#allocation2 + $0x80] sm:$0xff] }
 0x209   : > { %11633 = vmatprep.mubr.msk.bf16.mxu0 %vm1178_vm0, %v2846_v41  ;;  %v3429_v41 = vld [vmem:[#allocation2 + $0x98] sm:$0xff] }
 0x20a   : > { %v3459_v43 = vpack.c.bf16 %v3430_v44, %v3429_v41  ;;  %v3128_v41 = vld [vmem:[#allocation2 + $0x127] sm:$0xff] }
 0x20f   : > { %11550 = vmatmul.mubr.msk.bf16.gmra.mxu1 %vm1178_vm0, %v1944_v35  ;;  %v12629_v35 = vld [vmem:[%s18271_s8 + $0x90] sm:$0xff]  }
 0x210   : > { %11634 = vmatmul.mubr.msk.bf16.vlgmr.msra.gmra.mxu0 %vm1178_vm0, %v2847_v36  ;;  %11553 = vmatprep.mubr.msk.bf16.mxu1 %vm1178_vm0, %v1945_v19  ;;  %v18297_v36 = vld [vmem:[#allocation30_spill] sm:$0xff]  ;;  %v18298_v19 = vld [vmem:[#allocation29_spill] sm:$0xff] }
 0x211   : > { %11637 = vmatprep.mubr.msk.bf16.mxu0 %vm1178_vm0, %v2848_v34  ;;  %11702 = vmatpush3.bf16.msra.mxu0 %v14072_v9  ;;  %v2850_v9 = vpack.c.bf16 %v14159_v1, %v14143_v26  ;;  %v18283_v26 = vpack.c.bf16 %v13758_v2, %v13734_v51  ;;  %v2852_v1 = vpack.c.bf16 %v14179_v55, %v14165_v28  ;;  %v14296_v51 = vld [vmem:[%s18271_s8 + $0x88] sm:$0xff]  }
 0x212   : > { %11703 = vmatprep.subr.bf16.mxu0 %v12625_v23  ;;  %v14298_v2 = vld [vmem:[#allocation2 + $0xc8] sm:$0xff]  ;;  %v2856_v28 = vpack.c.bf16 %v14218_v37, %v14204_v33  ;;  %v18286_v55 = vpack.c.bf16 %v13836_v53, %v13829_v48  ;;  %v2858_v48 = vpack.c.bf16 %v14234_v20, %v14222_v63  ;;  %v18288_v53 = vpack.c.bf16 %v13891_v49, %v13880_v40  ;;  %v2845_v49 = vld [vmem:[#allocation2 + $0x399] sm:$0xff] }
 0x213   : > { %v14354_v40 = vld [vmem:[#allocation2 + $0x2a8] sm:$0xff]  ;;  %v3425_v37 = vld [vmem:[#allocation2 + $0x38] sm:$0xff]  ;;  %v2861_v3 = vpack.c.bf16 %v2845_v49, %v14258_v58  ;;  %v18299_v34 = vpack.c.bf16 %v18297_v36, %v18298_v19  ;;  %v3432_v58 = vld [vmem:[#allocation2 + $0xe0] sm:$0xff] }
 0x214   : > { %v2552_v39 = vpack.c.bf16 %v14354_v40, %v18293_v18  ;;  %v3457_v12 = vpack.c.bf16 %v3426_v5, %v3425_v37  ;;  %v18294_v63 = vld [vmem:[#allocation32_spill] sm:$0xff] }
 0x215   : > { %11704 = vmatpush3.bf16.msra.mxu0 %v12625_v23  ;;  %v18296_v42 = vpack.c.bf16 %v18294_v63, %v18295_v29  ;;  %v3427_v20 = vld [vmem:[#allocation2 + $0x68] sm:$0xff]  ;;  %v18300_v23 = vld [vmem:[#allocation34_spill] sm:$0xff]  ;;  %v3440_v29 = vld [vmem:[#allocation2 + $0x1d0] sm:$0xff] }
 0x216   : > { %11773 = vmatprep.subr.bf16.mxu0 %v14263_v21  ;;  %v3458_v38 = vpack.c.bf16 %v3428_v8, %v3427_v20  ;;  %v18301_v4 = vpack.c.bf16 %v13968_v62, %v18300_v23  ;;  %v2556_v62 = vpack.c.bf16 %v14380_v50, %v14020_v13  ;;  %v14425_v5 = vld [vmem:[%s18271_s8 + $0xa8] sm:$0xff]   ;;  %v3127_v63 = vld [vmem:[#allocation2 + $0xdf] sm:$0xff]  ;;  %v3464_v19 = vpack.c.bf16 %v3440_v29, %v14327_v47 }
 0x217   : > { %11554 = vmatmul.mubr.msk.bf16.gmra.mxu1 %vm1178_vm0, %v1946_v60  ;;  %v14385_v60 = vld [vmem:[%s18271_s8 + $0xb8] sm:$0xff]   ;;  %v3155_v36 = vpack.c.bf16 %v3127_v63, %v14061_v45 }
 0x218   : > { %11638 = vmatmul.mubr.msk.bf16.gmra.mxu0 %vm1178_vm0, %v2849_v6  ;;  %11597 = vmatprep.mubr.msk.bf16.mxu1 %vm1178_vm0, %v2541_v46  ;;  %v3120_v6 = vld [vmem:[#allocation2 + $0x37] sm:$0xff]  ;;  %v3434_v46 = vld [vmem:[#allocation2 + $0x140] sm:$0xff] }
 0x219   : > { %11641 = vmatprep.mubr.msk.bf16.mxu0 %vm1178_vm0, %v2850_v9  ;;  %v3460_v9 = vpack.c.bf16 %v3432_v58, %v14298_v2  ;;  %v3441_v20 = vld [vmem:[#allocation2 + $0x218] sm:$0xff] }
 0x21f   : > { %11598 = vmatmul.mubr.msk.bf16.vlgmr.msra.gmra.mxu1 %vm1178_vm0, %v18283_v26 }
 0x220   : > { %11642 = vmatmul.mubr.msk.bf16.gmra.mxu0 %vm1178_vm0, %v2851_v24  ;;  %11666 = vmatpush3.bf16.msra.mxu1 %v14137_v52  ;;  %v2544_v52 = vpack.c.bf16 %v14298_v2, %v13796_v25  ;;  %v2855_v25 = vpack.c.bf16 %v14202_v0, %v14200_v10  ;;  %v18290_v10 = vld [vmem:[#allocation27_spill] sm:$0xff]  ;;  %v18291_v0 = vld [vmem:[#allocation28_spill] sm:$0xff] }
 0x221   : > { %11601 = vmatprep.mubr.msk.bf16.mxu1 %vm1178_vm0, %v18284_v61  ;;  %11645 = vmatprep.mubr.msk.bf16.mxu0 %vm1178_vm0, %v2852_v1  ;;  %v18292_v33 = vpack.c.bf16 %v18290_v10, %v18291_v0  ;;  %v3121_v24 = vld [vmem:[#allocation2 + $0x4f] sm:$0xff] }
 0x222   : > { %11667 = vmatprep.subr.bf16.mxu1 %v12623_v54 }
 0x224   : > { %11668 = vmatpush3.bf16.msra.mxu1 %v12623_v54  ;;  %v14390_v54 = vpack.c.bf16 %v3434_v46, %v3433_v17  ;;  %v3130_v46 = vld [vmem:[#allocation2 + $0x157] sm:$0xff] }
 0x225   : > { %11737 = vmatprep.subr.bf16.mxu1 %v14296_v51 }
 0x226   : > { %18302 = vst [vmem:[#allocation27_spill] sm:$0xff] %v14390_v54 }
 0x227   : > { %11602 = vmatmul.mubr.msk.bf16.gmra.mxu1 %vm1178_vm0, %v2544_v52  ;;  %v3123_v52 = vld [vmem:[#allocation2 + $0x7f] sm:$0xff] }
 0x228   : > { %11646 = vmatmul.mubr.msk.bf16.gmra.mxu0 %vm1178_vm0, %v2853_v32  ;;  %11605 = vmatprep.mubr.msk.bf16.mxu1 %vm1178_vm0, %v18285_v27  ;;  %v3435_v32 = vld [vmem:[#allocation2 + $0x158] sm:$0xff] }
 0x229   : > { %11649 = vmatprep.mubr.msk.bf16.mxu0 %vm1178_vm0, %v2854_v7  ;;  %v3436_v7 = vld [vmem:[#allocation2 + $0x170] sm:$0xff] }
 0x22f   : > { %11606 = vmatmul.mubr.msk.bf16.gmra.mxu1 %vm1178_vm0, %v18286_v55 }
 0x230   : > { %11650 = vmatmul.mubr.msk.bf16.gmra.mxu0 %vm1178_vm0, %v2855_v25  ;;  %11609 = vmatprep.mubr.msk.bf16.mxu1 %vm1178_vm0, %v18287_v14  ;;  %v3122_v14 = vld [vmem:[#allocation2 + $0x67] sm:$0xff] }
 0x231   : > { %11653 = vmatprep.mubr.msk.bf16.mxu0 %vm1178_vm0, %v2856_v28  ;;  %v3124_v28 = vld [vmem:[#allocation2 + $0x97] sm:$0xff] }
 0x237   : > { %11610 = vmatmul.mubr.msk.bf16.gmra.mxu1 %vm1178_vm0, %v2548_v57  ;;  %v3438_v57 = vld [vmem:[#allocation2 + $0x1a0] sm:$0xff] }
 0x238   : > { %11654 = vmatmul.mubr.msk.bf16.gmra.mxu0 %vm1178_vm0, %v2857_v16  ;;  %11613 = vmatprep.mubr.msk.bf16.mxu1 %vm1178_vm0, %v18288_v53  ;;  %v3153_v53 = vpack.c.bf16 %v3123_v52, %v3122_v14  ;;  %v14414_v37 = vpack.c.bf16 %v3438_v57, %v3437_v22  ;;  %v3445_v52 = vld [vmem:[#allocation2 + $0x278] sm:$0xff] }
 0x239   : > { %11657 = vmatprep.mubr.msk.bf16.mxu0 %vm1178_vm0, %v2858_v48 }
 0x23a   : > { %18304 = vst [vmem:[#allocation33_spill] sm:$0xff] %v14414_v37 }
 0x23f   : > { %11614 = vmatmul.mubr.msk.bf16.gmra.mxu1 %vm1178_vm0, %v18289_v31  ;;  %v12627_v31 = vld [vmem:[%s18271_s8 + $0x80] sm:$0xff]  }
 0x240   : > { %11658 = vmatmul.mubr.msk.bf16.gmra.mxu0 %vm1178_vm0, %v2859_v59  ;;  %11617 = vmatprep.mubr.msk.bf16.mxu1 %vm1178_vm0, %v18292_v33  ;;  %v14404_v59 = vpack.c.bf16 %v3436_v7, %v3435_v32  ;;  %v3446_v32 = vld [vmem:[#allocation2 + $0x290] sm:$0xff] }
 0x241   : > { %11661 = vmatprep.mubr.msk.bf16.mxu0 %vm1178_vm0, %v2860_v30  ;;  %v3125_v30 = vld [vmem:[#allocation2 + $0xaf] sm:$0xff] }
 0x242   : > { %18303 = vst [vmem:[#allocation28_spill] sm:$0xff] %v14404_v59  ;;  %v3154_v0 = vpack.c.bf16 %v3125_v30, %v3124_v28 }
 0x247   : > { %11618 = vmatmul.mubr.msk.bf16.gmra.mxu1 %vm1178_vm0, %v2552_v39 }
 0x248   : > { %11662 = vmatmul.mubr.msk.bf16.gmra.mxu0 %vm1178_vm0, %v2861_v3  ;;  %11621 = vmatprep.mubr.msk.bf16.mxu1 %vm1178_vm0, %v18296_v42  ;;  %v3129_v42 = vld [vmem:[#allocation2 + $0x13f] sm:$0xff] }
 0x249   : > { %11705 = vmatprep.mubr.msk.bf16.mxu0 %vm1178_vm0, %v3457_v12  ;;  %v14436_v23 = vpack.c.bf16 %v3129_v42, %v3128_v41  ;;  %v3137_v42 = vld [vmem:[#allocation2 + $0x22f] sm:$0xff] }
 0x24f   : > { %11622 = vmatmul.mubr.msk.bf16.gmra.mxu1 %vm1178_vm0, %v18299_v34 }
 0x250   : > { %11706 = vmatmul.mubr.msk.bf16.vlgmr.msra.gmra.mxu0 %vm1178_vm0, %v3458_v38  ;;  %11625 = vmatprep.mubr.msk.bf16.mxu1 %vm1178_vm0, %v18301_v4  ;;  %v3442_v38 = vld [vmem:[#allocation2 + $0x230] sm:$0xff] }
 0x251   : > { %11709 = vmatprep.mubr.msk.bf16.mxu0 %vm1178_vm0, %v3459_v43  ;;  %11774 = vmatpush3.bf16.msra.mxu0 %v14263_v21  ;;  %v3152_v21 = vpack.c.bf16 %v3121_v24, %v3120_v6  ;;  %v14438_v4 = vpack.c.bf16 %v3442_v38, %v3441_v20  ;;  %v3443_v24 = vld [vmem:[#allocation2 + $0x248] sm:$0xff] }
 0x252   : > { %11775 = vmatprep.subr.bf16.mxu0 %v12629_v35 }
 0x253   : > { %18305 = vst [vmem:[#allocation32_spill] sm:$0xff] %v14438_v4 }
 0x255   : > { %11776 = vmatpush3.bf16.msra.mxu0 %v12629_v35 }
 0x256   : > { %11845 = vmatprep.subr.bf16.mxu0 %v14385_v60 }
 0x257   : > { %v11455_v26 = vpop.f32.mrf.mxu1  ;;  %11626 = vmatmul.mubr.msk.bf16.gmra.mxu1 %vm1178_vm0, %v2556_v62  ;;  %v3131_v62 = vld [vmem:[#allocation2 + $0x16f] sm:$0xff] }
 0x258   : > { %v11491_v1 = vpop.f32.mrf.mxu0  ;;  %11710 = vmatmul.mubr.msk.bf16.gmra.mxu0 %vm1178_vm0, %v3460_v9  ;;  %11669 = vmatprep.mubr.msk.bf16.mxu1 %vm1178_vm0, %v3152_v21  ;;  %v3444_v21 = vld [vmem:[#allocation2 + $0x260] sm:$0xff]  ;;  %v14452_v28 = vpack.c.bf16 %v3131_v62, %v3130_v46 }
 0x259   : > { %v14395_v61 = vadd.f32 %v11491_v1, %v11455_v26  ;;  %11713 = vmatprep.mubr.msk.bf16.mxu0 %vm1178_vm0, %v14390_v54  ;;  %v1551_v13 = vpop.f32.mrf.mxu1  ;;  %v3132_v26 = vld [vmem:[#allocation2 + $0x187] sm:$0xff]  ;;  %v14454_v14 = vpack.c.bf16 %v3444_v21, %v3443_v24  ;;  %v3139_v62 = vld [vmem:[#allocation2 + $0x25f] sm:$0xff] }
 0x25a   : > { %v1772_v2 = vpop.f32.mrf.mxu0  ;;  %v3138_v46 = vld [vmem:[#allocation2 + $0x247] sm:$0xff]  ;;  %v3451_v21 = vld [vmem:[#allocation2 + $0x338] sm:$0xff] }
 0x25b   : > { %v14400_v56 = vadd.f32 %v1772_v2, %v1551_v13  ;;  %v11456_v27 = vpop.f32.mrf.mxu1  ;;  %v3133_v2 = vld [vmem:[#allocation2 + $0x19f] sm:$0xff]  ;;  %18306 = vst [vmem:[#allocation31_spill] sm:$0xff] %v14454_v14 }
 0x25c   : > { %v11492_v25 = vpop.f32.mrf.mxu0  ;;  %v14458_v57 = vpack.c.bf16 %v3133_v2, %v3132_v26  ;;  %v3452_v26 = vld [vmem:[#allocation2 + $0x350] sm:$0xff] }
 0x25d   : > { %v14402_v55 = vadd.f32 %v11492_v25, %v11456_v27  ;;  %v1554_v16 = vpop.f32.mrf.mxu1 }
 0x25e   : > { %v1775_v48 = vpop.f32.mrf.mxu0 }
 0x25f   : > { %v14409_v10 = vadd.f32 %v1775_v48, %v1554_v16  ;;  %v11459_v33 = vpop.f32.mrf.mxu1  ;;  %11670 = vmatmul.mubr.msk.bf16.vlgmr.msra.gmra.mxu1 %vm1178_vm0, %v3153_v53  ;;  %v3467_v16 = vpack.c.bf16 %v3446_v32, %v3445_v52  ;;  %v3141_v52 = vld [vmem:[#allocation2 + $0x28f] sm:$0xff] }
 0x260   : > { %v11495_v49 = vpop.f32.mrf.mxu0  ;;  %11714 = vmatmul.mubr.msk.bf16.gmra.mxu0 %vm1178_vm0, %v14404_v59  ;;  %11738 = vmatpush3.bf16.msra.mxu1 %v14296_v51  ;;  %v3453_v32 = vld [vmem:[#allocation2 + $0x368] sm:$0xff] }
 0x261   : > { %v14416_v18 = vadd.f32 %v11495_v49, %v11459_v33  ;;  %11673 = vmatprep.mubr.msk.bf16.mxu1 %vm1178_vm0, %v3154_v0  ;;  %11717 = vmatprep.mubr.msk.bf16.mxu0 %vm1178_vm0, %v14414_v37  ;;  %v1567_v39 = vpop.f32.mrf.mxu1  ;;  %v3135_v49 = vld [vmem:[#allocation2 + $0x1cf] sm:$0xff] }
 0x262   : > { %v1788_v3 = vpop.f32.mrf.mxu0  ;;  %11739 = vmatprep.subr.bf16.mxu1 %v12627_v31 }
 0x263   : > { %v14427_v12 = vadd.f32 %v1788_v3, %v1567_v39  ;;  %v11460_v8 = vpop.f32.mrf.mxu1  ;;  %v3448_v39 = vld [vmem:[#allocation2 + $0x2c0] sm:$0xff]  ;;  %v3136_v3 = vld [vmem:[#allocation2 + $0x217] sm:$0xff] }
 0x264   : > { %v11496_v51 = vpop.f32.mrf.mxu0  ;;  %11740 = vmatpush3.bf16.msra.mxu1 %v12627_v31 }
 0x265   : > { %v14429_v44 = vadd.f32 %v11496_v51, %v11460_v8  ;;  %v1570_v43 = vpop.f32.mrf.mxu1  ;;  %11809 = vmatprep.subr.bf16.mxu1 %v14425_v5  ;;  %v3449_v8 = vld [vmem:[#allocation2 + $0x308] sm:$0xff]  ;;  %v3450_v51 = vld [vmem:[#allocation2 + $0x320] sm:$0xff] }
 0x266   : > { %v1791_v35 = vpop.f32.mrf.mxu0 }
 0x267   : > { %v14434_v34 = vadd.f32 %v1791_v35, %v1570_v43  ;;  %v11463_v58 = vpop.f32.mrf.mxu1  ;;  %11674 = vmatmul.mubr.msk.bf16.gmra.mxu1 %vm1178_vm0, %v3155_v36  ;;  %v3159_v43 = vpack.c.bf16 %v3135_v49, %v14141_v11  ;;  %v3468_v35 = vpack.c.bf16 %v3448_v39, %v14354_v40 }
 0x268   : > { %v11499_v6 = vpop.f32.mrf.mxu0  ;;  %11718 = vmatmul.mubr.msk.bf16.gmra.mxu0 %vm1178_vm0, %v3464_v19  ;;  %11677 = vmatprep.mubr.msk.bf16.mxu1 %vm1178_vm0, %v14436_v23  ;;  %v14477_v19 = vpack.c.bf16 %v3137_v42, %v3136_v3 }
 0x269   : > { %v14442_v17 = vadd.f32 %v11499_v6, %v11463_v58  ;;  %11721 = vmatprep.mubr.msk.bf16.mxu0 %vm1178_vm0, %v14438_v4  ;;  %v1583_v45 = vpop.f32.mrf.mxu1  ;;  %v3469_v58 = vpack.c.bf16 %v3450_v51, %v3449_v8 }
 0x26a   : > { %v1804_v47 = vpop.f32.mrf.mxu0 }
 0x26b   : > { %v14448_v9 = vadd.f32 %v1804_v47, %v1583_v45  ;;  %v11464_v1 = vpop.f32.mrf.mxu1 }
 0x26c   : > { %v11500_v13 = vpop.f32.mrf.mxu0 }
 0x26d   : > { %v14450_v7 = vadd.f32 %v11500_v13, %v11464_v1  ;;  %v1586_v27 = vpop.f32.mrf.mxu1  ;;  %v3140_v1 = vld [vmem:[#allocation2 + $0x277] sm:$0xff] }
 0x26e   : > { %v1807_v25 = vpop.f32.mrf.mxu0  ;;  %v14496_v49 = vpack.c.bf16 %v3141_v52, %v3140_v1 }
 0x26f   : > { %v14456_v22 = vadd.f32 %v1807_v25, %v1586_v27  ;;  %v11467_v48 = vpop.f32.mrf.mxu1  ;;  %11678 = vmatmul.mubr.msk.bf16.gmra.mxu1 %vm1178_vm0, %v14452_v28  ;;  %v3454_v27 = vld [vmem:[#allocation2 + $0x380] sm:$0xff] }
 0x270   : > { %v11503_v53 = vpop.f32.mrf.mxu0  ;;  %11722 = vmatmul.mubr.msk.bf16.gmra.mxu0 %vm1178_vm0, %v14454_v14  ;;  %11681 = vmatprep.mubr.msk.bf16.mxu1 %vm1178_vm0, %v14458_v57  ;;  %v3471_v39 = vpack.c.bf16 %v3454_v27, %v3453_v32 }
 0x271   : > { %v14464_v30 = vadd.f32 %v11503_v53, %v11467_v48  ;;  %11725 = vmatprep.mubr.msk.bf16.mxu0 %vm1178_vm0, %v3467_v16  ;;  %v1599_v31 = vpop.f32.mrf.mxu1  ;;  %v14490_v53 = vpack.c.bf16 %v3139_v62, %v3138_v46 }
 0x272   : > { %v1820_v0 = vpop.f32.mrf.mxu0 }
 0x273   : > { %v14469_v33 = vadd.f32 %v1820_v0, %v1599_v31  ;;  %v11468_v63 = vpop.f32.mrf.mxu1  ;;  %v14492_v31 = vpack.c.bf16 %v3452_v26, %v3451_v21 }
 0x274   : > { %v11504_v29 = vpop.f32.mrf.mxu0 }
 0x275   : > { %v14471_v41 = vadd.f32 %v11504_v29, %v11468_v63  ;;  %v1602_v20 = vpop.f32.mrf.mxu1  ;;  %18307 = vst [vmem:[#allocation30_spill] sm:$0xff] %v14492_v31 }
 0x276   : > { %v1823_v38 = vpop.f32.mrf.mxu0 }
 0x277   : > { %v14475_v36 = vadd.f32 %v1823_v38, %v1602_v20  ;;  %v11471_v6 = vpop.f32.mrf.mxu1  ;;  %11682 = vmatmul.mubr.msk.bf16.gmra.mxu1 %vm1178_vm0, %v3159_v43  ;;  %v3143_v20 = vld [vmem:[#allocation2 + $0x2bf] sm:$0xff]  ;;  %v3456_v38 = vld [vmem:[#allocation2 + $0x3b0] sm:$0xff] }
 0x278   : > { %v11507_v45 = vpop.f32.mrf.mxu0  ;;  %11726 = vmatmul.mubr.msk.bf16.gmra.mxu0 %vm1178_vm0, %v3468_v35  ;;  %11685 = vmatprep.mubr.msk.bf16.mxu1 %vm1178_vm0, %v14477_v19  ;;  %v4036_v43 = vld [vmem:[#allocation2 + $0xf7] sm:$0xff]  ;;  %v3163_v21 = vpack.c.bf16 %v3143_v20, %v14183_v15  ;;  %v3472_v26 = vpack.c.bf16 %v3456_v38, %v14380_v50 }
 0x279   : > { %v14481_v47 = vadd.f32 %v11507_v45, %v11471_v6  ;;  %11729 = vmatprep.mubr.msk.bf16.mxu0 %vm1178_vm0, %v3469_v58  ;;  %v1615_v11 = vpop.f32.mrf.mxu1  ;;  %v3144_v6 = vld [vmem:[#allocation2 + $0x307] sm:$0xff]  ;;  %v3145_v45 = vld [vmem:[#allocation2 + $0x31f] sm:$0xff] }
 0x27a   : > { %v1836_v40 = vpop.f32.mrf.mxu0 }
 0x27b   : > { %v14486_v24 = vadd.f32 %v1836_v40, %v1615_v11  ;;  %v11472_v13 = vpop.f32.mrf.mxu1  ;;  %v4037_v11 = vld [vmem:[#allocation2 + $0x10f] sm:$0xff] }
 0x27c   : > { %v11508_v2 = vpop.f32.mrf.mxu0 }
 0x27d   : > { %v14488_v25 = vadd.f32 %v11508_v2, %v11472_v13  ;;  %v1618_v16 = vpop.f32.mrf.mxu1  ;;  %v14515_v13 = vpack.c.bf16 %v3145_v45, %v3144_v6  ;;  %v4068_v2 = vpack.c.bf16 %v4037_v11, %v4036_v43  ;;  %v12633_v45 = vld [vmem:[%s18271_s8 + $0xb0] sm:$0xff]  }
 0x27e   : > { %v1839_v48 = vpop.f32.mrf.mxu0 }
 0x27f   : > { %v14494_v0 = vadd.f32 %v1839_v48, %v1618_v16  ;;  %v11475_v3 = vpop.f32.mrf.mxu1  ;;  %11686 = vmatmul.mubr.msk.bf16.gmra.mxu1 %vm1178_vm0, %v14490_v53  ;;  %v3146_v48 = vld [vmem:[#allocation2 + $0x337] sm:$0xff] }
 0x280   : > { %v11511_v63 = vpop.f32.mrf.mxu0  ;;  %11730 = vmatmul.mubr.msk.bf16.gmra.mxu0 %vm1178_vm0, %v14492_v31  ;;  %11689 = vmatprep.mubr.msk.bf16.mxu1 %vm1178_vm0, %v14496_v49  ;;  %v3732_v31 = vld [vmem:[#allocation2 + $0x69] sm:$0xff] }
 0x281   : > { %v14502_v29 = vadd.f32 %v11511_v63, %v11475_v3  ;;  %11733 = vmatprep.mubr.msk.bf16.mxu0 %vm1178_vm0, %v3471_v39  ;;  %v1631_v42 = vpop.f32.mrf.mxu1  ;;  %v3147_v39 = vld [vmem:[#allocation2 + $0x34f] sm:$0xff] }
 0x282   : > { %v1852_v8 = vpop.f32.mrf.mxu0 }
 0x283   : > { %v14507_v51 = vadd.f32 %v1852_v8, %v1631_v42  ;;  %v11476_v35 = vpop.f32.mrf.mxu1  ;;  %v3148_v42 = vld [vmem:[#allocation2 + $0x367] sm:$0xff]  ;;  %v3149_v8 = vld [vmem:[#allocation2 + $0x37f] sm:$0xff] }
 0x284   : > { %v11512_v58 = vpop.f32.mrf.mxu0  ;;  %v14532_v6 = vpack.c.bf16 %v3149_v8, %v3148_v42 }
 0x285   : > { %v14509_v40 = vadd.f32 %v11512_v58, %v11476_v35  ;;  %v1634_v46 = vpop.f32.mrf.mxu1  ;;  %v14528_v35 = vpack.c.bf16 %v3147_v39, %v3146_v48  ;;  %v4045_v48 = vld [vmem:[#allocation2 + $0x1ff] sm:$0xff] }
 0x286   : > { %v1855_v62 = vpop.f32.mrf.mxu0 }
 0x287   : > { %v14513_v1 = vadd.f32 %v1855_v62, %v1634_v46  ;;  %v11479_v52 = vpop.f32.mrf.mxu1  ;;  %11690 = vmatmul.mubr.msk.bf16.gmra.mxu1 %vm1178_vm0, %v3163_v21 }
 0x288   : > { %v11515_v32 = vpop.f32.mrf.mxu0  ;;  %11734 = vmatmul.mubr.msk.bf16.gmra.mxu0 %vm1178_vm0, %v3472_v26  ;;  %11693 = vmatprep.mubr.msk.bf16.mxu1 %vm1178_vm0, %v14515_v13  ;;  %v3150_v26 = vld [vmem:[#allocation2 + $0x397] sm:$0xff] }
 0x289   : > { %v14519_v27 = vadd.f32 %v11515_v32, %v11479_v52  ;;  %11777 = vmatprep.mubr.msk.bf16.mxu0 %vm1178_vm0, %v4068_v2  ;;  %v1647_v15 = vpop.f32.mrf.mxu1  ;;  %v3151_v2 = vld [vmem:[#allocation2 + $0x3af] sm:$0xff]  ;;  %v14553_v52 = vld [vmem:[%s18271_s8 + $0xd8] sm:$0xff]  }
 0x28a   : > { %v1868_v50 = vpop.f32.mrf.mxu0 }
 0x28b   : > { %v14524_v16 = vadd.f32 %v1868_v50, %v1647_v15  ;;  %v11480_v3 = vpop.f32.mrf.mxu1  ;;  %v3730_v15 = vld [vmem:[#allocation2 + $0x39] sm:$0xff]  ;;  %v4044_v50 = vld [vmem:[#allocation2 + $0x1e7] sm:$0xff] }
 0x28c   : > { %v11516_v63 = vpop.f32.mrf.mxu0  ;;  %v4072_v42 = vpack.c.bf16 %v4045_v48, %v4044_v50 }
 0x28d   : > { %v14526_v20 = vadd.f32 %v11516_v63, %v11480_v3  ;;  %v1650_v38 = vpop.f32.mrf.mxu1  ;;  %v3167_v3 = vpack.c.bf16 %v3151_v2, %v3150_v26  ;;  %v3731_v63 = vld [vmem:[#allocation2 + $0x51] sm:$0xff] }
 0x28e   : > { %v1871_v43 = vpop.f32.mrf.mxu0 }
 0x28f   : > { %v14530_v58 = vadd.f32 %v1871_v43, %v1650_v38  ;;  %v11483_v11 = vpop.f32.mrf.mxu1  ;;  %11694 = vmatmul.mubr.msk.bf16.gmra.mxu1 %vm1178_vm0, %v14528_v35 }
 0x290   : > { %v14537_v46 = vpop.f32.mrf.mxu0  ;;  %11778 = vmatmul.mubr.msk.bf16.vlgmr.msra.gmra.mxu0 %vm1178_vm0, %v14436_v23  ;;  %11697 = vmatprep.mubr.msk.bf16.mxu1 %vm1178_vm0, %v14532_v6 }
 0x291   : > { %11781 = vmatprep.mubr.msk.bf16.mxu0 %vm1178_vm0, %v14452_v28  ;;  %v1663_v62 = vpop.f32.mrf.mxu1  ;;  %11846 = vmatpush3.bf16.msra.mxu0 %v14385_v60  ;;  %v3762_v60 = vpack.c.bf16 %v3731_v63, %v3730_v15  ;;  %v3733_v15 = vld [vmem:[#allocation2 + $0x81] sm:$0xff]  ;;  %v3734_v63 = vld [vmem:[#allocation2 + $0x99] sm:$0xff] }
 0x292   : > { %v14547_v21 = vpop.f32.mrf.mxu0  ;;  %11847 = vmatprep.subr.bf16.mxu0 %v12633_v45 }
 0x293   : > { %v11484_v23 = vpop.f32.mrf.mxu1 }
 0x294   : > { %v14555_v32 = vpop.f32.mrf.mxu0 }
 0x295   : > { %v1666_v28 = vpop.f32.mrf.mxu1  ;;  %11848 = vmatpush3.bf16.msra.mxu0 %v12633_v45 }
 0x296   : > { %v14557_v39 = vpop.f32.mrf.mxu0  ;;  %11917 = vmatprep.subr.bf16.mxu0 %v14553_v52 }
 0x297   : > { %v11519_v8 = vpop.f32.mrf.mxu1  ;;  %11698 = vmatmul.mubr.msk.bf16.gmra.mxu1 %vm1178_vm0, %v3167_v3 }
 0x298   : > { %v14560_v38 = vpop.f32.mrf.mxu0  ;;  %11782 = vmatmul.mubr.msk.bf16.gmra.mxu0 %vm1178_vm0, %v14458_v57  ;;  %v14565_v43 = vadd.f32 %v11519_v8, %v11483_v11  ;;  %11741 = vmatprep.mubr.msk.bf16.mxu1 %vm1178_vm0, %v3762_v60  ;;  %v3763_v8 = vpack.c.bf16 %v3733_v15, %v3732_v31  ;;  %v3735_v60 = vld [vmem:[#allocation2 + $0xb1] sm:$0xff]  ;;  %v14599_v15 = vld [vmem:[%s18271_s8 + $0xc8] sm:$0xff]  }
 0x299   : > { %11785 = vmatprep.mubr.msk.bf16.mxu0 %vm1178_vm0, %v4072_v42  ;;  %v1884_v26 = vpop.f32.mrf.mxu1  ;;  %v12631_v42 = vld [vmem:[%s18271_s8 + $0xa0] sm:$0xff]  }
 0x29a   : > { %v14569_v45 = vpop.f32.mrf.mxu0  ;;  %v14571_v2 = vadd.f32 %v1884_v26, %v1663_v62  ;;  %v3764_v62 = vpack.c.bf16 %v3735_v60, %v3734_v63  ;;  %v4052_v63 = vld [vmem:[#allocation2 + $0x2d7] sm:$0xff]  ;;  %v3739_v60 = vld [vmem:[#allocation2 + $0x141] sm:$0xff] }
 0x29b   : > { %v11520_v50 = vpop.f32.mrf.mxu1 }
 0x29c   : > { %v14573_v48 = vpop.f32.mrf.mxu0  ;;  %v14575_v3 = vadd.f32 %v11520_v50, %v11484_v23  ;;  %v3736_v50 = vld [vmem:[#allocation2 + $0xc9] sm:$0xff] }
 0x29d   : > { %v1887_v57 = vpop.f32.mrf.mxu1 }
 0x29e   : > { %v14577_v11 = vpop.f32.mrf.mxu0  ;;  %v14582_v14 = vadd.f32 %v1887_v57, %v1666_v28 }
 0x29f   : > { %v11527_v26 = vpop.f32.mrf.mxu1  ;;  %11742 = vmatmul.mubr.msk.bf16.vlgmr.msra.gmra.mxu1 %vm1178_vm0, %v3763_v8 }
 0x2a0   : > { %18308 = vst [vmem:[#allocation29_spill] sm:$0xff] %v14582_v14  ;;  %v14584_v4 = vpop.f32.mrf.mxu0  ;;  %11786 = vmatmul.mubr.msk.bf16.gmra.mxu0 %vm1178_vm0, %v14477_v19  ;;  %v2174_v23 = vadd.f32 %v11527_v26, %v14395_v61  ;;  %11810 = vmatpush3.bf16.msra.mxu1 %v14425_v5  ;;  %v3737_v61 = vld [vmem:[#allocation2 + $0xe1] sm:$0xff] }
 0x2a1   : > { %11745 = vmatprep.mubr.msk.bf16.mxu1 %vm1178_vm0, %v3764_v62  ;;  %11789 = vmatprep.mubr.msk.bf16.mxu0 %vm1178_vm0, %v14490_v53  ;;  %v2045_v31 = vpop.f32.mrf.mxu1  ;;  %v3738_v53 = vld [vmem:[#allocation2 + $0x129] sm:$0xff] }
 0x2a2   : > { %v14594_v28 = vpop.f32.mrf.mxu0  ;;  %11811 = vmatprep.subr.bf16.mxu1 %v12631_v42  ;;  %v2172_v19 = vadd.f32 %v2045_v31, %v14400_v56  ;;  %v14603_v5 = vadd.f32 %v14537_v46, %v2174_v23  ;;  %v4053_v62 = vld [vmem:[#allocation2 + $0x2ef] sm:$0xff]  ;;  %v3765_v31 = vpack.c.bf16 %v3737_v61, %v3736_v50  ;;  %v14615_v23 = vpack.c.bf16 %v3739_v60, %v3738_v53 }
 0x2a3   : > { %v11528_v57 = vpop.f32.mrf.mxu1  ;;  %v3741_v50 = vld [vmem:[#allocation2 + $0x171] sm:$0xff] }
 0x2a4   : > { %18309 = vst [vmem:[#allocation34_spill] sm:$0xff] %v14603_v5  ;;  %v14605_v8 = vpop.f32.mrf.mxu0  ;;  %v2175_v26 = vadd.f32 %v11528_v57, %v14402_v55  ;;  %11812 = vmatpush3.bf16.msra.mxu1 %v12631_v42  ;;  %v14609_v37 = vadd.f32 %v14547_v21, %v2172_v19  ;;  %v4076_v5 = vpack.c.bf16 %v4053_v62, %v4052_v63  ;;  %v3740_v19 = vld [vmem:[#allocation2 + $0x159] sm:$0xff]  ;;  %v3743_v63 = vld [vmem:[#allocation2 + $0x1a1] sm:$0xff] }
 0x2a5   : > { %v2048_v59 = vpop.f32.mrf.mxu1  ;;  %11881 = vmatprep.subr.bf16.mxu1 %v14599_v15  ;;  %v14646_v60 = vpack.c.bf16 %v3741_v50, %v3740_v19  ;;  %v3747_v50 = vld [vmem:[#allocation2 + $0x231] sm:$0xff] }
 0x2a6   : > { %v14611_v56 = vpop.f32.mrf.mxu0  ;;  %v2173_v46 = vadd.f32 %v2048_v59, %v14409_v10  ;;  %v14618_v54 = vadd.f32 %v14555_v32, %v2175_v26 }
 0x2a7   : > { %v11531_v14 = vpop.f32.mrf.mxu1  ;;  %11746 = vmatmul.mubr.msk.bf16.gmra.mxu1 %vm1178_vm0, %v3765_v31 }
 0x2a8   : > { %v14620_v55 = vpop.f32.mrf.mxu0  ;;  %11790 = vmatmul.mubr.msk.bf16.gmra.mxu0 %vm1178_vm0, %v14496_v49  ;;  %v2178_v21 = vadd.f32 %v11531_v14, %v14416_v18  ;;  %11749 = vmatprep.mubr.msk.bf16.mxu1 %vm1178_vm0, %v14615_v23  ;;  %v14630_v59 = vadd.f32 %v14557_v39, %v2173_v46  ;;  %v3742_v14 = vld [vmem:[#allocation2 + $0x189] sm:$0xff] }
 0x2a9   : > { %11793 = vmatprep.mubr.msk.bf16.mxu0 %vm1178_vm0, %v4076_v5  ;;  %v2061_v10 = vpop.f32.mrf.mxu1  ;;  %v14649_v62 = vpack.c.bf16 %v3743_v63, %v3742_v14 }
 0x2aa   : > { %v14632_v32 = vpop.f32.mrf.mxu0  ;;  %v2176_v42 = vadd.f32 %v2061_v10, %v14427_v12  ;;  %v14636_v61 = vadd.f32 %v14560_v38, %v2178_v21  ;;  %v3744_v21 = vld [vmem:[#allocation2 + $0x1b9] sm:$0xff]  ;;  %v3745_v10 = vld [vmem:[#allocation2 + $0x1d1] sm:$0xff] }
 0x2ab   : > { %v11532_v49 = vpop.f32.mrf.mxu1 }
 0x2ac   : > { %v14638_v18 = vpop.f32.mrf.mxu0  ;;  %v2179_v5 = vadd.f32 %v11532_v49, %v14429_v44  ;;  %v14642_v39 = vadd.f32 %v14569_v45, %v2176_v42  ;;  %v3746_v42 = vld [vmem:[#allocation2 + $0x219] sm:$0xff]  ;;  %v4060_v49 = vld [vmem:[#allocation2 + $0x3c7] sm:$0xff] }
 0x2ad   : > { %v2064_v57 = vpop.f32.mrf.mxu1 }
 0x2ae   : > { %v14644_v53 = vpop.f32.mrf.mxu0  ;;  %v2177_v12 = vadd.f32 %v2064_v57, %v14434_v34  ;;  %v14652_v38 = vadd.f32 %v14573_v48, %v2179_v5 }
 0x2af   : > { %v11535_v26 = vpop.f32.mrf.mxu1  ;;  %11750 = vmatmul.mubr.msk.bf16.gmra.mxu1 %vm1178_vm0, %v14646_v60 }
 0x2b0   : > { %v14654_v31 = vpop.f32.mrf.mxu0  ;;  %11794 = vmatmul.mubr.msk.bf16.gmra.mxu0 %vm1178_vm0, %v14515_v13  ;;  %v2182_v44 = vadd.f32 %v11535_v26, %v14442_v17  ;;  %11753 = vmatprep.mubr.msk.bf16.mxu1 %vm1178_vm0, %v14649_v62  ;;  %v14666_v34 = vadd.f32 %v14577_v11, %v2177_v12  ;;  %v14683_v12 = vpack.c.bf16 %v3747_v50, %v3746_v42  ;;  %v4062_v42 = vld [vmem:[#allocation2 + $0x3f7] sm:$0xff] }
 0x2b1   : > { %11797 = vmatprep.mubr.msk.bf16.mxu0 %vm1178_vm0, %v14528_v35  ;;  %v2077_v45 = vpop.f32.mrf.mxu1  ;;  %v4061_v35 = vld [vmem:[#allocation2 + $0x3df] sm:$0xff] }
 0x2b2   : > { %v14668_v48 = vpop.f32.mrf.mxu0  ;;  %v2180_v46 = vadd.f32 %v2077_v45, %v14448_v9  ;;  %v14672_v13 = vadd.f32 %v14584_v4, %v2182_v44  ;;  %v3769_v9 = vpack.c.bf16 %v3745_v10, %v3744_v21  ;;  %v4080_v4 = vpack.c.bf16 %v4061_v35, %v4060_v49  ;;  %v3749_v21 = vld [vmem:[#allocation2 + $0x261] sm:$0xff]  ;;  %v3751_v35 = vld [vmem:[#allocation2 + $0x291] sm:$0xff] }
 0x2b3   : > { %v11536_v17 = vpop.f32.mrf.mxu1 }
 0x2b4   : > { %v14674_v19 = vpop.f32.mrf.mxu0  ;;  %v2183_v11 = vadd.f32 %v11536_v17, %v14450_v7  ;;  %v14678_v14 = vadd.f32 %v14594_v28, %v2180_v46  ;;  %v3748_v46 = vld [vmem:[#allocation2 + $0x249] sm:$0xff] }
 0x2b5   : > { %v2080_v63 = vpop.f32.mrf.mxu1  ;;  %v4063_v17 = vld [vmem:[#allocation2 + $0x40f] sm:$0xff] }
 0x2b6   : > { %v14680_v5 = vpop.f32.mrf.mxu0  ;;  %v2181_v57 = vadd.f32 %v2080_v63, %v14456_v22  ;;  %v14686_v26 = vadd.f32 %v14605_v8, %v2183_v11  ;;  %v4064_v11 = vld [vmem:[#allocation2 + $0x427] sm:$0xff] }
 0x2b7   : > { %v11539_v44 = vpop.f32.mrf.mxu1  ;;  %11754 = vmatmul.mubr.msk.bf16.gmra.mxu1 %vm1178_vm0, %v3769_v9 }
 0x2b8   : > { %18310 = vst [vmem:[#allocation35_spill] sm:$0xff] %v14686_v26  ;;  %v14688_v45 = vpop.f32.mrf.mxu0  ;;  %11798 = vmatmul.mubr.msk.bf16.gmra.mxu0 %vm1178_vm0, %v14532_v6  ;;  %v2186_v7 = vadd.f32 %v11539_v44, %v14464_v30  ;;  %11757 = vmatprep.mubr.msk.bf16.mxu1 %vm1178_vm0, %v14683_v12  ;;  %v14698_v22 = vadd.f32 %v14611_v56, %v2181_v57  ;;  %v3750_v6 = vld [vmem:[#allocation2 + $0x279] sm:$0xff] }
 0x2b9   : > { %11801 = vmatprep.mubr.msk.bf16.mxu0 %vm1178_vm0, %v4080_v4  ;;  %v2093_v28 = vpop.f32.mrf.mxu1  ;;  %v4065_v56 = vld [vmem:[#allocation2 + $0x43f] sm:$0xff]  ;;  %v4081_v44 = vpack.c.bf16 %v4063_v17, %v4062_v42  ;;  %v3752_v42 = vld [vmem:[#allocation2 + $0x2a9] sm:$0xff]  ;;  %v4066_v17 = vld [vmem:[#allocation2 + $0x457] sm:$0xff] }
 0x2ba   : > { %18311 = vst [vmem:[#allocation36_spill] sm:$0xff] %v14698_v22  ;;  %v14700_v8 = vpop.f32.mrf.mxu0  ;;  %v2184_v10 = vadd.f32 %v2093_v28, %v14469_v33  ;;  %v14704_v30 = vadd.f32 %v14620_v55, %v2186_v7  ;;  %v14714_v33 = vpack.c.bf16 %v3749_v21, %v3748_v46  ;;  %v14717_v7 = vpack.c.bf16 %v3751_v35, %v3750_v6  ;;  %v3753_v46 = vld [vmem:[#allocation2 + $0x2c1] sm:$0xff]  ;;  %v4646_v21 = vld [vmem:[#allocation2 + $0xf9] sm:$0xff]  ;;  %v4067_v6 = vld [vmem:[#allocation2 + $0x46f] sm:$0xff] }
 0x2bb   : > { %v11540_v50 = vpop.f32.mrf.mxu1  ;;  %v4082_v28 = vpack.c.bf16 %v4065_v56, %v4064_v11  ;;  %v3754_v35 = vld [vmem:[#allocation2 + $0x309] sm:$0xff]  ;;  %v3755_v11 = vld [vmem:[#allocation2 + $0x321] sm:$0xff] }
 0x2bc   : > { %18312 = vst [vmem:[#allocation37_spill] sm:$0xff] %v14704_v30  ;;  %v14706_v49 = vpop.f32.mrf.mxu0  ;;  %v2187_v63 = vadd.f32 %v11540_v50, %v14471_v41  ;;  %v14710_v9 = vadd.f32 %v14632_v32, %v2184_v10 }
 0x2bd   : > { %v2096_v57 = vpop.f32.mrf.mxu1 }
 0x2be   : > { %v14712_v4 = vpop.f32.mrf.mxu0  ;;  %v2185_v55 = vadd.f32 %v2096_v57, %v14475_v36  ;;  %v14720_v30 = vadd.f32 %v14638_v18, %v2187_v63 }
 0x2bf   : > { %v11543_v22 = vpop.f32.mrf.mxu1  ;;  %11758 = vmatmul.mubr.msk.bf16.gmra.mxu1 %vm1178_vm0, %v14714_v33 }
 0x2c0   : > { %v14722_v26 = vpop.f32.mrf.mxu0  ;;  %11802 = vmatmul.mubr.msk.bf16.gmra.mxu0 %vm1178_vm0, %v4081_v44  ;;  %v2190_v41 = vadd.f32 %v11543_v22, %v14481_v47  ;;  %11761 = vmatprep.mubr.msk.bf16.mxu1 %vm1178_vm0, %v14717_v7  ;;  %v14732_v36 = vadd.f32 %v14644_v53, %v2185_v55  ;;  %v4647_v53 = vld [vmem:[#allocation2 + $0x111] sm:$0xff]  ;;  %v4083_v55 = vpack.c.bf16 %v4067_v6, %v4066_v17  ;;  %v3758_v6 = vld [vmem:[#allocation2 + $0x369] sm:$0xff] }
 0x2c1   : > { %11805 = vmatprep.mubr.msk.bf16.mxu0 %vm1178_vm0, %v4082_v28  ;;  %v2109_v32 = vpop.f32.mrf.mxu1 }
 0x2c2   : > { %18313 = vst [vmem:[#allocation38_spill] sm:$0xff] %v14732_v36  ;;  %v14734_v18 = vpop.f32.mrf.mxu0  ;;  %v2188_v10 = vadd.f32 %v2109_v32, %v14486_v24  ;;  %v14738_v47 = vadd.f32 %v14654_v31, %v2190_v41  ;;  %v3773_v24 = vpack.c.bf16 %v3753_v46, %v3752_v42  ;;  %v14749_v31 = vpack.c.bf16 %v3755_v11, %v3754_v35 }
 0x2c3   : > { %v11544_v22 = vpop.f32.mrf.mxu1  ;;  %v4678_v41 = vpack.c.bf16 %v4647_v53, %v4646_v21  ;;  %v3756_v21 = vld [vmem:[#allocation2 + $0x339] sm:$0xff] }
 0x2c4   : > { %18314 = vst [vmem:[#allocation39_spill] sm:$0xff] %v14738_v47  ;;  %v14740_v50 = vpop.f32.mrf.mxu0  ;;  %v2191_v56 = vadd.f32 %v11544_v22, %v14488_v25  ;;  %v14744_v63 = vadd.f32 %v14668_v48, %v2188_v10  ;;  %v3757_v10 = vld [vmem:[#allocation2 + $0x351] sm:$0xff] }
 0x2c5   : > { %v2112_v57 = vpop.f32.mrf.mxu1  ;;  %v14779_v53 = vpack.c.bf16 %v3757_v10, %v3756_v21  ;;  %v4654_v21 = vld [vmem:[#allocation2 + $0x1e9] sm:$0xff] }
 0x2c6   : > { %v14746_v44 = vpop.f32.mrf.mxu0  ;;  %v2189_v28 = vadd.f32 %v2112_v57, %v14494_v0  ;;  %v14752_v32 = vadd.f32 %v14674_v19, %v2191_v56  ;;  %v12637_v57 = vld [vmem:[%s18271_s8 + $0xd0] sm:$0xff]  }
 0x2c7   : > { %v11547_v47 = vpop.f32.mrf.mxu1  ;;  %11762 = vmatmul.mubr.msk.bf16.gmra.mxu1 %vm1178_vm0, %v3773_v24 }
 0x2c8   : > { %v14754_v36 = vpop.f32.mrf.mxu0  ;;  %11806 = vmatmul.mubr.msk.bf16.gmra.mxu0 %vm1178_vm0, %v4083_v55  ;;  %v2194_v25 = vadd.f32 %v11547_v47, %v14502_v29  ;;  %11765 = vmatprep.mubr.msk.bf16.mxu1 %vm1178_vm0, %v14749_v31  ;;  %v14763_v0 = vadd.f32 %v14680_v5, %v2189_v28  ;;  %v3759_v47 = vld [vmem:[#allocation2 + $0x381] sm:$0xff]  ;;  %v4341_v28 = vld [vmem:[#allocation2 + $0xf8] sm:$0xff] }
 0x2c9   : > { %11849 = vmatprep.mubr.msk.bf16.mxu0 %vm1178_vm0, %v4678_v41  ;;  %v2125_v48 = vpop.f32.mrf.mxu1  ;;  %v14782_v56 = vpack.c.bf16 %v3759_v47, %v3758_v6 }
 0x2ca   : > { %v14765_v19 = vpop.f32.mrf.mxu0  ;;  %v2192_v46 = vadd.f32 %v2125_v48, %v14507_v51  ;;  %v14769_v42 = vadd.f32 %v14688_v45, %v2194_v25  ;;  %v3761_v25 = vld [vmem:[#allocation2 + $0x3b1] sm:$0xff] }
 0x2cb   : > { %v11548_v17 = vpop.f32.mrf.mxu1 }
 0x2cc   : > { %v14771_v29 = vpop.f32.mrf.mxu0  ;;  %v2195_v22 = vadd.f32 %v11548_v17, %v14509_v40  ;;  %v14775_v5 = vadd.f32 %v14700_v8, %v2192_v46  ;;  %v14818_v46 = vld [vmem:[#allocation2 + $0x110] sm:$0xff] }
 0x2cd   : > { %v2128_v35 = vpop.f32.mrf.mxu1 }
 0x2ce   : > { %v14777_v11 = vpop.f32.mrf.mxu0  ;;  %v2193_v51 = vadd.f32 %v2128_v35, %v14513_v1  ;;  %v14785_v45 = vadd.f32 %v14706_v49, %v2195_v22  ;;  %v4373_v22 = vpack.c.bf16 %v14818_v46, %v4341_v28 }
 0x2cf   : > { %v11551_v40 = vpop.f32.mrf.mxu1  ;;  %11766 = vmatmul.mubr.msk.bf16.gmra.mxu1 %vm1178_vm0, %v14779_v53 }
 0x2d0   : > { %v14790_v24 = vpop.f32.mrf.mxu0  ;;  %11850 = vmatmul.mubr.msk.bf16.vlgmr.msra.gmra.mxu0 %vm1178_vm0, %v14615_v23  ;;  %v2198_v1 = vadd.f32 %v11551_v40, %v14519_v27  ;;  %11769 = vmatprep.mubr.msk.bf16.mxu1 %vm1178_vm0, %v14782_v56  ;;  %v14802_v8 = vadd.f32 %v14712_v4, %v2193_v51  ;;  %v3760_v23 = vld [vmem:[#allocation2 + $0x399] sm:$0xff] }
 0x2d1   : > { %11853 = vmatprep.mubr.msk.bf16.mxu0 %vm1178_vm0, %v14646_v60  ;;  %v2141_v49 = vpop.f32.mrf.mxu1  ;;  %11918 = vmatpush3.bf16.msra.mxu0 %v14553_v52  ;;  %v14814_v60 = vld [vmem:[%s18271_s8 + $0xf8] sm:$0xff]   ;;  %v4655_v52 = vld [vmem:[#allocation2 + $0x201] sm:$0xff]  ;;  %v3777_v6 = vpack.c.bf16 %v3761_v25, %v3760_v23 }
 0x2d2   : > { %v14804_v55 = vpop.f32.mrf.mxu0  ;;  %v2196_v41 = vadd.f32 %v2141_v49, %v14524_v16  ;;  %11919 = vmatprep.subr.bf16.mxu0 %v12637_v57  ;;  %v14809_v27 = vadd.f32 %v14722_v26, %v2198_v1  ;;  %v4682_v35 = vpack.c.bf16 %v4655_v52, %v4654_v21 }
 0x2d3   : > { %v11552_v4 = vpop.f32.mrf.mxu1 }
 0x2d4   : > { %v14816_v48 = vpop.f32.mrf.mxu0  ;;  %v2199_v16 = vadd.f32 %v11552_v4, %v14526_v20  ;;  %v14822_v10 = vadd.f32 %v14734_v18, %v2196_v41  ;;  %v18315_v4 = vld [vmem:[#allocation29_spill] sm:$0xff] }
 0x2d5   : > { %v2144_v17 = vpop.f32.mrf.mxu1  ;;  %11920 = vmatpush3.bf16.msra.mxu0 %v12637_v57 }
 0x2d6   : > { %v14824_v26 = vpop.f32.mrf.mxu0  ;;  %v2197_v47 = vadd.f32 %v2144_v17, %v14530_v58  ;;  %v14829_v51 = vadd.f32 %v14740_v50, %v2199_v16  ;;  %11989 = vmatprep.subr.bf16.mxu0 %v14814_v60  ;;  %v18316_v16 = vld [vmem:[#allocation27_spill] sm:$0xff]  ;;  %v18318_v17 = vld [vmem:[#allocation28_spill] sm:$0xff] }
 0x2d7   : > { %v11555_v40 = vpop.f32.mrf.mxu1  ;;  %11770 = vmatmul.mubr.msk.bf16.gmra.mxu1 %vm1178_vm0, %v3777_v6 }
 0x2d8   : > { %v11639_v20 = vpop.f32.mrf.mxu0  ;;  %11854 = vmatmul.mubr.msk.bf16.gmra.mxu0 %vm1178_vm0, %v14649_v62  ;;  %v2202_v18 = vadd.f32 %v11555_v40, %v14565_v43  ;;  %11813 = vmatprep.mubr.msk.bf16.mxu1 %vm1178_vm0, %v4373_v22  ;;  %v14839_v58 = vadd.f32 %v14746_v44, %v2197_v47  ;;  %v12635_v44 = vld [vmem:[%s18271_s8 + $0xc0] sm:$0xff]  }
 0x2d9   : > { %11857 = vmatprep.mubr.msk.bf16.mxu0 %vm1178_vm0, %v4682_v35  ;;  %v2157_v50 = vpop.f32.mrf.mxu1 }
 0x2da   : > { %v2976_v57 = vpop.f32.mrf.mxu0  ;;  %v2200_v1 = vadd.f32 %v2157_v50, %v14571_v2  ;;  %v14843_v49 = vadd.f32 %v14754_v36, %v2202_v18  ;;  %v14880_v18 = vld [vmem:[#allocation2 + $0x200] sm:$0xff] }
 0x2db   : > { %v11556_v28 = vpop.f32.mrf.mxu1  ;;  %v4662_v50 = vld [vmem:[#allocation2 + $0x2d9] sm:$0xff] }
 0x2dc   : > { %v11640_v41 = vpop.f32.mrf.mxu0  ;;  %v2203_v62 = vadd.f32 %v11556_v28, %v14575_v3  ;;  %v14847_v43 = vadd.f32 %v14765_v19, %v2200_v1  ;;  %v18317_v3 = vld [vmem:[#allocation34_spill] sm:$0xff] }
 0x2dd   : > { %v2160_v23 = vpop.f32.mrf.mxu1 }
 0x2de   : > { %v2979_v25 = vpop.f32.mrf.mxu0  ;;  %v2201_v21 = vadd.f32 %v2160_v23, %v18315_v4  ;;  %v14854_v2 = vadd.f32 %v14771_v29, %v2203_v62 }
 0x2df   : > { %v11599_v36 = vpop.f32.mrf.mxu1  ;;  %11814 = vmatmul.mubr.msk.bf16.vlgmr.msra.gmra.mxu1 %vm1178_vm0, %v18316_v16 }
 0x2e0   : > { %v14856_v52 = vpop.f32.mrf.mxu0  ;;  %11858 = vmatmul.mubr.msk.bf16.gmra.mxu0 %vm1178_vm0, %v14683_v12  ;;  %v2784_v19 = vadd.f32 %v11599_v36, %v18317_v3  ;;  %11882 = vmatpush3.bf16.msra.mxu1 %v14599_v15  ;;  %v14867_v6 = vadd.f32 %v14777_v11, %v2201_v21  ;;  %v14874_v12 = vld [vmem:[%s18271_s8 + $0xe8] sm:$0xff]  }
 0x2e1   : > { %11817 = vmatprep.mubr.msk.bf16.mxu1 %vm1178_vm0, %v18318_v17  ;;  %11861 = vmatprep.mubr.msk.bf16.mxu0 %vm1178_vm0, %v14714_v33  ;;  %v2655_v29 = vpop.f32.mrf.mxu1  ;;  %v4349_v15 = vld [vmem:[#allocation2 + $0x1e8] sm:$0xff]  ;;  %v4663_v33 = vld [vmem:[#allocation2 + $0x2f1] sm:$0xff] }
 0x2e2   : > { %v2992_v47 = vpop.f32.mrf.mxu0  ;;  %11883 = vmatprep.subr.bf16.mxu1 %v12635_v44  ;;  %v2782_v22 = vadd.f32 %v2655_v29, %v14609_v37  ;;  %v14878_v35 = vadd.f32 %v14790_v24, %v2784_v19  ;;  %v4377_v24 = vpack.c.bf16 %v14880_v18, %v4349_v15  ;;  %v4686_v4 = vpack.c.bf16 %v4663_v33, %v4662_v50 }
 0x2e3   : > { %v11600_v40 = vpop.f32.mrf.mxu1 }
 0x2e4   : > { %v11644_v11 = vpop.f32.mrf.mxu0  ;;  %v2785_v1 = vadd.f32 %v11600_v40, %v14618_v54  ;;  %11884 = vmatpush3.bf16.msra.mxu1 %v12635_v44  ;;  %v14884_v28 = vadd.f32 %v14804_v55, %v2782_v22  ;;  %v18319_v54 = vld [vmem:[#allocation33_spill] sm:$0xff] }
 0x2e5   : > { %v2658_v62 = vpop.f32.mrf.mxu1  ;;  %11953 = vmatprep.subr.bf16.mxu1 %v14874_v12 }
 0x2e6   : > { %v2995_v23 = vpop.f32.mrf.mxu0  ;;  %v2783_v37 = vadd.f32 %v2658_v62, %v14630_v59  ;;  %v14890_v21 = vadd.f32 %v14816_v48, %v2785_v1  ;;  %v14933_v62 = vld [vmem:[#allocation2 + $0x278] sm:$0xff] }
 0x2e7   : > { %v11603_v36 = vpop.f32.mrf.mxu1  ;;  %11818 = vmatmul.mubr.msk.bf16.gmra.mxu1 %vm1178_vm0, %v18319_v54  ;;  %v18322_v54 = vld [vmem:[#allocation35_spill] sm:$0xff] }
 0x2e8   : > { %v14892_v16 = vpop.f32.mrf.mxu0  ;;  %11862 = vmatmul.mubr.msk.bf16.gmra.mxu0 %vm1178_vm0, %v14717_v7  ;;  %v2788_v55 = vadd.f32 %v11603_v36, %v14636_v61  ;;  %11821 = vmatprep.mubr.msk.bf16.mxu1 %vm1178_vm0, %v4377_v24  ;;  %v14902_v59 = vadd.f32 %v14824_v26, %v2783_v37  ;;  %v14935_v37 = vld [vmem:[#allocation2 + $0x290] sm:$0xff] }
 0x2e9   : > { %11865 = vmatprep.mubr.msk.bf16.mxu0 %vm1178_vm0, %v4686_v4  ;;  %v2671_v48 = vpop.f32.mrf.mxu1  ;;  %v14942_v36 = vld [vmem:[#allocation2 + $0x2f0] sm:$0xff] }
 0x2ea   : > { %v3008_v44 = vpop.f32.mrf.mxu0  ;;  %v2786_v3 = vadd.f32 %v2671_v48, %v14642_v39  ;;  %v14905_v19 = vadd.f32 %v11639_v20, %v2788_v55  ;;  %v18320_v39 = vld [vmem:[#allocation32_spill] sm:$0xff]  ;;  %v18321_v20 = vld [vmem:[#allocation31_spill] sm:$0xff] }
 0x2eb   : > { %v11604_v17 = vpop.f32.mrf.mxu1 }
 0x2ec   : > { %v14907_v29 = vpop.f32.mrf.mxu0  ;;  %v2789_v7 = vadd.f32 %v11604_v17, %v14652_v38  ;;  %v14910_v22 = vadd.f32 %v2976_v57, %v2786_v3  ;;  %v4380_v17 = vpack.c.bf16 %v14935_v37, %v14933_v62 }
 0x2ed   : > { %v2674_v61 = vpop.f32.mrf.mxu1 }
 0x2ee   : > { %v14912_v15 = vpop.f32.mrf.mxu0  ;;  %v2787_v40 = vadd.f32 %v2674_v61, %v14666_v34  ;;  %v14915_v26 = vadd.f32 %v11640_v41, %v2789_v7  ;;  %v18323_v7 = vld [vmem:[#allocation36_spill] sm:$0xff] }
 0x2ef   : > { %v11607_v50 = vpop.f32.mrf.mxu1  ;;  %11822 = vmatmul.mubr.msk.bf16.gmra.mxu1 %vm1178_vm0, %v18320_v39 }
 0x2f0   : > { %v14917_v33 = vpop.f32.mrf.mxu0  ;;  %11866 = vmatmul.mubr.msk.bf16.gmra.mxu0 %vm1178_vm0, %v14749_v31  ;;  %v2792_v38 = vadd.f32 %v11607_v50, %v14672_v13  ;;  %11825 = vmatprep.mubr.msk.bf16.mxu1 %vm1178_vm0, %v18321_v20  ;;  %v14928_v34 = vadd.f32 %v2979_v25, %v2787_v40  ;;  %v4357_v31 = vld [vmem:[#allocation2 + $0x2d8] sm:$0xff]  ;;  %v4671_v25 = vld [vmem:[#allocation2 + $0x3e1] sm:$0xff] }
 0x2f1   : > { %11869 = vmatprep.mubr.msk.bf16.mxu0 %vm1178_vm0, %v14779_v53  ;;  %v2687_v57 = vpop.f32.mrf.mxu1  ;;  %v4670_v53 = vld [vmem:[#allocation2 + $0x3c9] sm:$0xff]  ;;  %v4381_v61 = vpack.c.bf16 %v14942_v36, %v4357_v31 }
 0x2f2   : > { %v14930_v41 = vpop.f32.mrf.mxu0  ;;  %v2790_v1 = vadd.f32 %v2687_v57, %v14678_v14  ;;  %v14938_v13 = vadd.f32 %v14856_v52, %v2792_v38  ;;  %v4690_v40 = vpack.c.bf16 %v4671_v25, %v4670_v53  ;;  %v14970_v53 = vld [vmem:[#allocation2 + $0x320] sm:$0xff] }
 0x2f3   : > { %v11608_v24 = vpop.f32.mrf.mxu1  ;;  %v4672_v25 = vld [vmem:[#allocation2 + $0x3f9] sm:$0xff] }
 0x2f4   : > { %v14940_v4 = vpop.f32.mrf.mxu0  ;;  %v2793_v55 = vadd.f32 %v11608_v24, %v18322_v54  ;;  %v14945_v48 = vadd.f32 %v2992_v47, %v2790_v1  ;;  %v18324_v47 = vld [vmem:[#allocation37_spill] sm:$0xff] }
 0x2f5   : > { %v2690_v14 = vpop.f32.mrf.mxu1  ;;  %v4673_v54 = vld [vmem:[#allocation2 + $0x411] sm:$0xff] }
 0x2f6   : > { %v14947_v3 = vpop.f32.mrf.mxu0  ;;  %v2791_v52 = vadd.f32 %v2690_v14, %v18323_v7  ;;  %v14953_v50 = vadd.f32 %v11644_v11, %v2793_v55  ;;  %v14967_v11 = vld [vmem:[#allocation2 + $0x308] sm:$0xff] }
 0x2f7   : > { %v11611_v39 = vpop.f32.mrf.mxu1  ;;  %11826 = vmatmul.mubr.msk.bf16.gmra.mxu1 %vm1178_vm0, %v4380_v17  ;;  %v4674_v17 = vld [vmem:[#allocation2 + $0x429] sm:$0xff] }
 0x2f8   : > { %v14955_v38 = vpop.f32.mrf.mxu0  ;;  %11870 = vmatmul.mubr.msk.bf16.gmra.mxu0 %vm1178_vm0, %v14782_v56  ;;  %v2796_v20 = vadd.f32 %v11611_v39, %v18324_v47  ;;  %11829 = vmatprep.mubr.msk.bf16.mxu1 %vm1178_vm0, %v4381_v61  ;;  %v14963_v57 = vadd.f32 %v2995_v23, %v2791_v52  ;;  %v4675_v23 = vld [vmem:[#allocation2 + $0x441] sm:$0xff]  ;;  %v4691_v39 = vpack.c.bf16 %v4673_v54, %v4672_v25  ;;  %v18327_v47 = vld [vmem:[#allocation38_spill] sm:$0xff] }
 0x2f9   : > { %11873 = vmatprep.mubr.msk.bf16.mxu0 %vm1178_vm0, %v4690_v40  ;;  %v2703_v1 = vpop.f32.mrf.mxu1 }
 0x2fa   : > { %18325 = vst [vmem:[#allocation29_spill] sm:$0xff] %v14963_v57  ;;  %v14965_v31 = vpop.f32.mrf.mxu0  ;;  %v2794_v24 = vadd.f32 %v2703_v1, %v14710_v9  ;;  %v14973_v56 = vadd.f32 %v14892_v16, %v2796_v20  ;;  %v4382_v9 = vpack.c.bf16 %v14970_v53, %v14967_v11  ;;  %v4692_v16 = vpack.c.bf16 %v4675_v23, %v4674_v17  ;;  %v15004_v23 = vld [vmem:[#allocation2 + $0x380] sm:$0xff] }
 0x2fb   : > { %v11612_v55 = vpop.f32.mrf.mxu1 }
 0x2fc   : > { %18326 = vst [vmem:[#allocation27_spill] sm:$0xff] %v14973_v56  ;;  %v14975_v14 = vpop.f32.mrf.mxu0  ;;  %v2797_v7 = vadd.f32 %v11612_v55, %v14720_v30  ;;  %v14978_v52 = vadd.f32 %v3008_v44, %v2794_v24  ;;  %v18329_v30 = vld [vmem:[#allocation39_spill] sm:$0xff]  ;;  %v18330_v24 = vld [vmem:[#allocation30_spill] sm:$0xff]  ;;  %v15001_v55 = vld [vmem:[#allocation2 + $0x368] sm:$0xff] }
 0x2fd   : > { %v2706_v61 = vpop.f32.mrf.mxu1 }
 0x2fe   : > { %v14980_v40 = vpop.f32.mrf.mxu0  ;;  %v2795_v1 = vadd.f32 %v2706_v61, %v18327_v47  ;;  %v14986_v20 = vadd.f32 %v14907_v29, %v2797_v7  ;;  %v4676_v7 = vld [vmem:[#allocation2 + $0x459] sm:$0xff]  ;;  %v4677_v61 = vld [vmem:[#allocation2 + $0x471] sm:$0xff]  ;;  %v4365_v47 = vld [vmem:[#allocation2 + $0x3c8] sm:$0xff] }
 0x2ff   : > { %v11615_v56 = vpop.f32.mrf.mxu1  ;;  %11830 = vmatmul.mubr.msk.bf16.gmra.mxu1 %vm1178_vm0, %v4382_v9 }
 0x300   : > { %18328 = vst [vmem:[#allocation34_spill] sm:$0xff] %v14986_v20  ;;  %v14988_v57 = vpop.f32.mrf.mxu0  ;;  %11874 = vmatmul.mubr.msk.bf16.gmra.mxu0 %vm1178_vm0, %v4691_v39  ;;  %v2800_v44 = vadd.f32 %v11615_v56, %v18329_v30  ;;  %11833 = vmatprep.mubr.msk.bf16.mxu1 %vm1178_vm0, %v18330_v24  ;;  %v14997_v25 = vadd.f32 %v14912_v15, %v2795_v1  ;;  %v15011_v15 = vld [vmem:[#allocation2 + $0x3e0] sm:$0xff]  ;;  %v5257_v1 = vld [vmem:[#allocation2 + $0x128] sm:$0xff] }
 0x301   : > { %11877 = vmatprep.mubr.msk.bf16.mxu0 %vm1178_vm0, %v4692_v16  ;;  %v2719_v54 = vpop.f32.mrf.mxu1 }
 0x302   : > { %18331 = vst [vmem:[#allocation28_spill] sm:$0xff] %v14997_v25  ;;  %v14999_v29 = vpop.f32.mrf.mxu0  ;;  %v2798_v17 = vadd.f32 %v2719_v54, %v14744_v63  ;;  %v15007_v56 = vadd.f32 %v14917_v33, %v2800_v44  ;;  %v4384_v54 = vpack.c.bf16 %v15004_v23, %v15001_v55  ;;  %v4693_v33 = vpack.c.bf16 %v4677_v61, %v4676_v7  ;;  %v5259_v7 = vld [vmem:[#allocation2 + $0x158] sm:$0xff] }
 0x303   : > { %v11616_v9 = vpop.f32.mrf.mxu1  ;;  %v5288_v25 = vpack.c.bf16 %v5257_v1, %v14818_v46  ;;  %v15042_v1 = vld [vmem:[#allocation2 + $0x410] sm:$0xff] }
 0x304   : > { %18332 = vst [vmem:[#allocation33_spill] sm:$0xff] %v15007_v56  ;;  %v15009_v39 = vpop.f32.mrf.mxu0  ;;  %v2801_v16 = vadd.f32 %v11616_v9, %v14752_v32  ;;  %v15015_v30 = vadd.f32 %v14930_v41, %v2798_v17  ;;  %v4385_v56 = vpack.c.bf16 %v15011_v15, %v4365_v47  ;;  %v15040_v47 = vld [vmem:[#allocation2 + $0x3f8] sm:$0xff] }
 0x305   : > { %v2722_v63 = vpop.f32.mrf.mxu1 }
 0x306   : > { %v15017_v24 = vpop.f32.mrf.mxu0  ;;  %v2799_v44 = vadd.f32 %v2722_v63, %v14763_v0  ;;  %v15025_v20 = vadd.f32 %v14940_v4, %v2801_v16  ;;  %v5258_v4 = vld [vmem:[#allocation2 + $0x140] sm:$0xff]  ;;  %v5260_v16 = vld [vmem:[#allocation2 + $0x170] sm:$0xff] }
 0x307   : > { %v11619_v32 = vpop.f32.mrf.mxu1  ;;  %11834 = vmatmul.mubr.msk.bf16.gmra.mxu1 %vm1178_vm0, %v4384_v54  ;;  %v15051_v63 = vld [vmem:[#allocation2 + $0x440] sm:$0xff]  ;;  %v5261_v54 = vld [vmem:[#allocation2 + $0x188] sm:$0xff] }
 0x308   : > { %18333 = vst [vmem:[#allocation32_spill] sm:$0xff] %v15025_v20  ;;  %v15027_v9 = vpop.f32.mrf.mxu0  ;;  %11878 = vmatmul.mubr.msk.bf16.gmra.mxu0 %vm1178_vm0, %v4693_v33  ;;  %v2804_v41 = vadd.f32 %v11619_v32, %v14769_v42  ;;  %11837 = vmatprep.mubr.msk.bf16.mxu1 %vm1178_vm0, %v4385_v56  ;;  %v15035_v0 = vadd.f32 %v14947_v3, %v2799_v44  ;;  %v15049_v3 = vld [vmem:[#allocation2 + $0x428] sm:$0xff] }
 0x309   : > { %11921 = vmatprep.mubr.msk.bf16.mxu0 %vm1178_vm0, %v5288_v25  ;;  %v2735_v46 = vpop.f32.mrf.mxu1 }
 0x30a   : > { %18334 = vst [vmem:[#allocation31_spill] sm:$0xff] %v15035_v0  ;;  %v15037_v17 = vpop.f32.mrf.mxu0  ;;  %v2802_v61 = vadd.f32 %v2735_v46, %v14775_v5  ;;  %v15045_v42 = vadd.f32 %v14955_v38, %v2804_v41  ;;  %v4386_v38 = vpack.c.bf16 %v15042_v1, %v15040_v47  ;;  %v5289_v41 = vpack.c.bf16 %v5259_v7, %v5258_v4 }
 0x30b   : > { %v11620_v56 = vpop.f32.mrf.mxu1  ;;  %v5290_v0 = vpack.c.bf16 %v5261_v54, %v5260_v16  ;;  %v5262_v16 = vld [vmem:[#allocation2 + $0x1a0] sm:$0xff] }
 0x30c   : > { %18335 = vst [vmem:[#allocation35_spill] sm:$0xff] %v15045_v42  ;;  %v15047_v25 = vpop.f32.mrf.mxu0  ;;  %v2805_v33 = vadd.f32 %v11620_v56, %v14785_v45  ;;  %v15055_v5 = vadd.f32 %v14965_v31, %v2802_v61  ;;  %v4387_v42 = vpack.c.bf16 %v15051_v63, %v15049_v3  ;;  %v12641_v45 = vld [vmem:[%s18271_s8 + $0xf0] sm:$0xff]   ;;  %v5263_v56 = vld [vmem:[#allocation2 + $0x1b8] sm:$0xff] }
 0x30d   : > { %v2738_v44 = vpop.f32.mrf.mxu1 }
 0x30e   : > { %18336 = vst [vmem:[#allocation36_spill] sm:$0xff] %v15055_v5  ;;  %v15057_v32 = vpop.f32.mrf.mxu0  ;;  %v2803_v46 = vadd.f32 %v2738_v44, %v14802_v8  ;;  %v15065_v20 = vadd.f32 %v14975_v14, %v2805_v33  ;;  %v15084_v33 = vld [vmem:[#allocation2 + $0x458] sm:$0xff]  ;;  %v15086_v44 = vld [vmem:[#allocation2 + $0x470] sm:$0xff] }
 0x30f   : > { %v11623_v31 = vpop.f32.mrf.mxu1  ;;  %11838 = vmatmul.mubr.msk.bf16.gmra.mxu1 %vm1178_vm0, %v4386_v38  ;;  %v4951_v38 = vld [vmem:[#allocation2 + $0x10f] sm:$0xff] }
 0x310   : > { %18337 = vst [vmem:[#allocation37_spill] sm:$0xff] %v15065_v20  ;;  %v15070_v61 = vpop.f32.mrf.mxu0  ;;  %11922 = vmatmul.mubr.msk.bf16.vlgmr.msra.gmra.mxu0 %vm1178_vm0, %v5289_v41  ;;  %v2808_v8 = vadd.f32 %v11623_v31, %v14809_v27  ;;  %11841 = vmatprep.mubr.msk.bf16.mxu1 %vm1178_vm0, %v4387_v42  ;;  %v15078_v14 = vadd.f32 %v14980_v40, %v2803_v46  ;;  %v15094_v40 = vld [vmem:[%s18271_s8 + $0x118] sm:$0xff]  }
 0x311   : > { %11925 = vmatprep.mubr.msk.bf16.mxu0 %vm1178_vm0, %v5290_v0  ;;  %v2751_v4 = vpop.f32.mrf.mxu1  ;;  %11990 = vmatpush3.bf16.msra.mxu0 %v14814_v60  ;;  %v15098_v60 = vld [vmem:[#allocation2 + $0x127] sm:$0xff] }
 0x312   : > { %18338 = vst [vmem:[#allocation38_spill] sm:$0xff] %v15078_v14  ;;  %v15080_v7 = vpop.f32.mrf.mxu0  ;;  %v2806_v54 = vadd.f32 %v2751_v4, %v14822_v10  ;;  %11991 = vmatprep.subr.bf16.mxu0 %v12641_v45  ;;  %v15089_v27 = vadd.f32 %v14988_v57, %v2808_v8  ;;  %v5265_v10 = vld [vmem:[#allocation2 + $0x218] sm:$0xff]  ;;  %v4388_v8 = vpack.c.bf16 %v15086_v44, %v15084_v33 }
 0x313   : > { %v11624_v0 = vpop.f32.mrf.mxu1  ;;  %v5291_v4 = vpack.c.bf16 %v5263_v56, %v5262_v16  ;;  %v4983_v14 = vpack.c.bf16 %v15098_v60, %v4951_v38  ;;  %v5292_v20 = vpack.c.bf16 %v5265_v10, %v14880_v18  ;;  %v15127_v16 = vld [vmem:[#allocation2 + $0x13f] sm:$0xff]  ;;  %v5267_v38 = vld [vmem:[#allocation2 + $0x248] sm:$0xff] }
 0x314   : > { %18339 = vst [vmem:[#allocation39_spill] sm:$0xff] %v15089_v27  ;;  %v15096_v42 = vpop.f32.mrf.mxu0  ;;  %v2809_v41 = vadd.f32 %v11624_v0, %v14829_v51  ;;  %v15102_v46 = vadd.f32 %v14999_v29, %v2806_v54  ;;  %v15130_v54 = vld [vmem:[#allocation2 + $0x157] sm:$0xff] }
 0x315   : > { %v2754_v31 = vpop.f32.mrf.mxu1  ;;  %11992 = vmatpush3.bf16.msra.mxu0 %v12641_v45  ;;  %v5266_v0 = vld [vmem:[#allocation2 + $0x230] sm:$0xff] }
 0x316   : > { %v15104_v57 = vpop.f32.mrf.mxu0  ;;  %v2807_v27 = vadd.f32 %v2754_v31, %v14839_v58  ;;  %v15112_v5 = vadd.f32 %v15009_v39, %v2809_v41  ;;  %12061 = vmatprep.subr.bf16.mxu0 %v15094_v40 }
 0x317   : > { %v11627_v51 = vpop.f32.mrf.mxu1  ;;  %11842 = vmatmul.mubr.msk.bf16.gmra.mxu1 %vm1178_vm0, %v4388_v8  ;;  %v4984_v8 = vpack.c.bf16 %v15130_v54, %v15127_v16 }
 0x318   : > { %v15115_v29 = vpop.f32.mrf.mxu0  ;;  %11926 = vmatmul.mubr.msk.bf16.gmra.mxu0 %vm1178_vm0, %v5291_v4  ;;  %v2812_v45 = vadd.f32 %v11627_v51, %v14843_v49  ;;  %11885 = vmatprep.mubr.msk.bf16.mxu1 %vm1178_vm0, %v4983_v14  ;;  %v15123_v58 = vadd.f32 %v15017_v24, %v2807_v27  ;;  %v5268_v27 = vld [vmem:[#allocation2 + $0x260] sm:$0xff]  ;;  %v5293_v4 = vpack.c.bf16 %v5267_v38, %v5266_v0 }
 0x319   : > { %11929 = vmatprep.mubr.msk.bf16.mxu0 %vm1178_vm0, %v5292_v20  ;;  %v2767_v18 = vpop.f32.mrf.mxu1  ;;  %v15137_v20 = vld [vmem:[#allocation2 + $0x187] sm:$0xff]  ;;  %v5294_v0 = vpack.c.bf16 %v14933_v62, %v5268_v27  ;;  %v15178_v62 = vld [vmem:[#allocation2 + $0x19f] sm:$0xff] }
 0x31a   : > { %v15125_v39 = vpop.f32.mrf.mxu0  ;;  %v2810_v56 = vadd.f32 %v2767_v18, %v14847_v43  ;;  %v15133_v49 = vadd.f32 %v15027_v9, %v2812_v45  ;;  %v15147_v9 = vld [vmem:[#allocation2 + $0x16f] sm:$0xff]  ;;  %v12639_v51 = vld [vmem:[%s18271_s8 + $0xe0] sm:$0xff]  }
 0x31b   : > { %v11628_v14 = vpop.f32.mrf.mxu1  ;;  %v5271_v27 = vld [vmem:[#allocation2 + $0x2a8] sm:$0xff] }
 0x31c   : > { %v15135_v10 = vpop.f32.mrf.mxu0  ;;  %v2813_v24 = vadd.f32 %v11628_v14, %v14854_v2  ;;  %v15141_v41 = vadd.f32 %v15037_v17, %v2810_v56  ;;  %v4985_v2 = vpack.c.bf16 %v15137_v20, %v15147_v9 }
 0x31d   : > { %v2770_v31 = vpop.f32.mrf.mxu1 }
 0x31e   : > { %v15143_v43 = vpop.f32.mrf.mxu0  ;;  %v2811_v45 = vadd.f32 %v2770_v31, %v14867_v6  ;;  %v15156_v17 = vadd.f32 %v15047_v25, %v2813_v24  ;;  %v15175_v24 = vld [vmem:[%s18271_s8 + $0x108] sm:$0xff]  }
 0x31f   : > { %v11671_v18 = vpop.f32.mrf.mxu1  ;;  %11886 = vmatmul.mubr.msk.bf16.vlgmr.msra.gmra.mxu1 %vm1178_vm0, %v4984_v8 }
 0x320   : > { %v15158_v56 = vpop.f32.mrf.mxu0  ;;  %11930 = vmatmul.mubr.msk.bf16.gmra.mxu0 %vm1178_vm0, %v5293_v4  ;;  %v3395_v38 = vadd.f32 %v11671_v18, %v14878_v35  ;;  %11954 = vmatpush3.bf16.msra.mxu1 %v14874_v12  ;;  %v15167_v6 = vadd.f32 %v15057_v32, %v2811_v45  ;;  %v15180_v12 = vld [vmem:[#allocation2 + $0x1b7] sm:$0xff]  ;;  %v4959_v4 = vld [vmem:[#allocation2 + $0x1ff] sm:$0xff] }
 0x321   : > { %11889 = vmatprep.mubr.msk.bf16.mxu1 %vm1178_vm0, %v4985_v2  ;;  %11933 = vmatprep.mubr.msk.bf16.mxu0 %vm1178_vm0, %v5294_v0  ;;  %v3266_v25 = vpop.f32.mrf.mxu1  ;;  %v15187_v45 = vld [vmem:[#allocation2 + $0x217] sm:$0xff] }
 0x322   : > { %v15170_v14 = vpop.f32.mrf.mxu0  ;;  %11955 = vmatprep.subr.bf16.mxu1 %v12639_v51  ;;  %v3393_v35 = vadd.f32 %v3266_v25, %v14884_v28  ;;  %v15183_v32 = vadd.f32 %v15070_v61, %v3395_v38  ;;  %v4986_v25 = vpack.c.bf16 %v15180_v12, %v15178_v62  ;;  %v5295_v61 = vpack.c.bf16 %v5271_v27, %v14935_v37  ;;  %v15219_v27 = vld [vmem:[#allocation2 + $0x22f] sm:$0xff] }
 0x323   : > { %v11672_v31 = vpop.f32.mrf.mxu1 }
 0x324   : > { %18340 = vst [vmem:[#allocation30_spill] sm:$0xff] %v15183_v32  ;;  %v15185_v8 = vpop.f32.mrf.mxu0  ;;  %v3396_v2 = vadd.f32 %v11672_v31, %v14890_v21  ;;  %11956 = vmatpush3.bf16.msra.mxu1 %v12639_v51  ;;  %v15191_v18 = vadd.f32 %v15080_v7, %v3393_v35  ;;  %v4987_v32 = vpack.c.bf16 %v15187_v45, %v4959_v4  ;;  %v15221_v31 = vld [vmem:[#allocation2 + $0x247] sm:$0xff]  ;;  %v5275_v4 = vld [vmem:[#allocation2 + $0x338] sm:$0xff] }
 0x325   : > { %v3269_v28 = vpop.f32.mrf.mxu1  ;;  %12025 = vmatprep.subr.bf16.mxu1 %v15175_v24  ;;  %v5296_v21 = vpack.c.bf16 %v14967_v11, %v14942_v36 }
 0x326   : > { %v15193_v0 = vpop.f32.mrf.mxu0  ;;  %v3394_v38 = vadd.f32 %v3269_v28, %v14902_v59  ;;  %v15204_v7 = vadd.f32 %v15096_v42, %v3396_v2  ;;  %v15228_v28 = vld [vmem:[#allocation2 + $0x277] sm:$0xff] }
 0x327   : > { %v11675_v51 = vpop.f32.mrf.mxu1  ;;  %11890 = vmatmul.mubr.msk.bf16.gmra.mxu1 %vm1178_vm0, %v4986_v25 }
 0x328   : > { %v15206_v35 = vpop.f32.mrf.mxu0  ;;  %11934 = vmatmul.mubr.msk.bf16.gmra.mxu0 %vm1178_vm0, %v5295_v61  ;;  %v3399_v37 = vadd.f32 %v11675_v51, %v14905_v19  ;;  %11893 = vmatprep.mubr.msk.bf16.mxu1 %vm1178_vm0, %v4987_v32  ;;  %v15214_v59 = vadd.f32 %v15104_v57, %v3394_v38  ;;  %v5276_v57 = vld [vmem:[#allocation2 + $0x350] sm:$0xff]  ;;  %v15239_v51 = vld [vmem:[#allocation2 + $0x25f] sm:$0xff] }
 0x329   : > { %11937 = vmatprep.mubr.msk.bf16.mxu0 %vm1178_vm0, %v5296_v21  ;;  %v3282_v36 = vpop.f32.mrf.mxu1  ;;  %v4988_v21 = vpack.c.bf16 %v15221_v31, %v15219_v27 }
 0x32a   : > { %v15216_v11 = vpop.f32.mrf.mxu0  ;;  %v3397_v42 = vadd.f32 %v3282_v36, %v14910_v22  ;;  %v15224_v2 = vadd.f32 %v15115_v29, %v3399_v37  ;;  %v5297_v29 = vpack.c.bf16 %v5275_v4, %v14970_v53  ;;  %v4989_v36 = vpack.c.bf16 %v15228_v28, %v15239_v51 }
 0x32b   : > { %v11676_v19 = vpop.f32.mrf.mxu1 }
 0x32c   : > { %v15226_v32 = vpop.f32.mrf.mxu0  ;;  %v3400_v25 = vadd.f32 %v11676_v19, %v14915_v26  ;;  %v15232_v61 = vadd.f32 %v15125_v39, %v3397_v42  ;;  %v5298_v26 = vpack.c.bf16 %v15001_v55, %v5276_v57  ;;  %v15261_v57 = vld [vmem:[#allocation2 + $0x28f] sm:$0xff] }
 0x32d   : > { %v3285_v22 = vpop.f32.mrf.mxu1 }
 0x32e   : > { %v15234_v38 = vpop.f32.mrf.mxu0  ;;  %v3398_v37 = vadd.f32 %v3285_v22, %v14928_v34  ;;  %v15246_v39 = vadd.f32 %v15135_v10, %v3400_v25  ;;  %v15263_v25 = vld [vmem:[#allocation2 + $0x2a7] sm:$0xff]  ;;  %v5279_v22 = vld [vmem:[#allocation2 + $0x398] sm:$0xff] }
 0x32f   : > { %v11679_v42 = vpop.f32.mrf.mxu1  ;;  %11894 = vmatmul.mubr.msk.bf16.gmra.mxu1 %vm1178_vm0, %v4988_v21 }
 0x330   : > { %18341 = vst [vmem:[#allocation40_spill] sm:$0xff] %v15246_v39  ;;  %v15248_v19 = vpop.f32.mrf.mxu0  ;;  %11938 = vmatmul.mubr.msk.bf16.gmra.mxu0 %vm1178_vm0, %v5297_v29  ;;  %v3403_v53 = vadd.f32 %v11679_v42, %v14938_v13  ;;  %11897 = vmatprep.mubr.msk.bf16.mxu1 %vm1178_vm0, %v4989_v36  ;;  %v15256_v34 = vadd.f32 %v15143_v43, %v3398_v37  ;;  %v4967_v36 = vld [vmem:[#allocation2 + $0x2ef] sm:$0xff] }
 0x331   : > { %11941 = vmatprep.mubr.msk.bf16.mxu0 %vm1178_vm0, %v5298_v26  ;;  %v3298_v55 = vpop.f32.mrf.mxu1  ;;  %v15270_v26 = vld [vmem:[#allocation2 + $0x307] sm:$0xff]  ;;  %v5300_v39 = vpack.c.bf16 %v15040_v47, %v15011_v15 }
 0x332   : > { %18342 = vst [vmem:[#allocation41_spill] sm:$0xff] %v15256_v34  ;;  %v15258_v4 = vpop.f32.mrf.mxu0  ;;  %v3401_v10 = vadd.f32 %v3298_v55, %v14945_v48  ;;  %v15266_v21 = vadd.f32 %v15158_v56, %v3403_v53  ;;  %v4990_v55 = vpack.c.bf16 %v15263_v25, %v15261_v57  ;;  %v5299_v56 = vpack.c.bf16 %v5279_v22, %v15004_v23  ;;  %v18345_v53 = vld [vmem:[#allocation29_spill] sm:$0xff]  ;;  %v15301_v22 = vld [vmem:[#allocation2 + $0x31f] sm:$0xff] }
 0x333   : > { %v11680_v13 = vpop.f32.mrf.mxu1  ;;  %v4991_v34 = vpack.c.bf16 %v15270_v26, %v4967_v36  ;;  %v15303_v36 = vld [vmem:[#allocation2 + $0x337] sm:$0xff] }
 0x334   : > { %18343 = vst [vmem:[#allocation42_spill] sm:$0xff] %v15266_v21  ;;  %v15268_v29 = vpop.f32.mrf.mxu0  ;;  %v3404_v43 = vadd.f32 %v11680_v13, %v14953_v50  ;;  %v15274_v37 = vadd.f32 %v15170_v14, %v3401_v10  ;;  %v18346_v13 = vld [vmem:[#allocation27_spill] sm:$0xff] }
 0x335   : > { %v3301_v48 = vpop.f32.mrf.mxu1 }
 0x336   : > { %18344 = vst [vmem:[#allocation43_spill] sm:$0xff] %v15274_v37  ;;  %v15276_v42 = vpop.f32.mrf.mxu0  ;;  %v3402_v21 = vadd.f32 %v3301_v48, %v18345_v53  ;;  %v15286_v50 = vadd.f32 %v15185_v8, %v3404_v43 }
 0x337   : > { %v11683_v14 = vpop.f32.mrf.mxu1  ;;  %11898 = vmatmul.mubr.msk.bf16.gmra.mxu1 %vm1178_vm0, %v4990_v55 }
 0x338   : > { %v15288_v10 = vpop.f32.mrf.mxu0  ;;  %11942 = vmatmul.mubr.msk.bf16.gmra.mxu0 %vm1178_vm0, %v5299_v56  ;;  %v3407_v37 = vadd.f32 %v11683_v14, %v18346_v13  ;;  %11901 = vmatprep.mubr.msk.bf16.mxu1 %vm1178_vm0, %v4991_v34  ;;  %v15296_v23 = vadd.f32 %v15193_v0, %v3402_v21  ;;  %v15310_v34 = vld [vmem:[#allocation2 + $0x367] sm:$0xff] }
 0x339   : > { %11945 = vmatprep.mubr.msk.bf16.mxu0 %vm1178_vm0, %v5300_v39  ;;  %v3314_v15 = vpop.f32.mrf.mxu1  ;;  %v18348_v39 = vld [vmem:[#allocation34_spill] sm:$0xff]  ;;  %v18350_v14 = vld [vmem:[#allocation28_spill] sm:$0xff] }
 0x33a   : > { %v15298_v47 = vpop.f32.mrf.mxu0  ;;  %v3405_v8 = vadd.f32 %v3314_v15, %v14978_v52  ;;  %v15306_v43 = vadd.f32 %v15206_v35, %v3407_v37  ;;  %v4992_v52 = vpack.c.bf16 %v15303_v36, %v15301_v22  ;;  %v5301_v35 = vpack.c.bf16 %v15049_v3, %v15042_v1  ;;  %v15322_v37 = vld [vmem:[#allocation2 + $0x34f] sm:$0xff] }
 0x33b   : > { %v11684_v48 = vpop.f32.mrf.mxu1  ;;  %v4993_v15 = vpack.c.bf16 %v15310_v34, %v15322_v37  ;;  %v18352_v1 = vld [vmem:[#allocation33_spill] sm:$0xff] }
 0x33c   : > { %18347 = vst [vmem:[#allocation29_spill] sm:$0xff] %v15306_v43  ;;  %v15308_v55 = vpop.f32.mrf.mxu0  ;;  %v3408_v0 = vadd.f32 %v11684_v48, %v18348_v39  ;;  %v15314_v21 = vadd.f32 %v15216_v11, %v3405_v8  ;;  %v5302_v11 = vpack.c.bf16 %v15084_v33, %v15051_v63  ;;  %v5899_v43 = vpack.c.bf16 %v15127_v16, %v15098_v60 }
 0x33d   : > { %v3317_v56 = vpop.f32.mrf.mxu1 }
 0x33e   : > { %18349 = vst [vmem:[#allocation27_spill] sm:$0xff] %v15314_v21  ;;  %v15316_v53 = vpop.f32.mrf.mxu0  ;;  %v3406_v13 = vadd.f32 %v3317_v56, %v18350_v14  ;;  %v15330_v8 = vadd.f32 %v15226_v32, %v3408_v0  ;;  %v15345_v0 = vld [vmem:[#allocation2 + $0x37f] sm:$0xff]  ;;  %v15347_v14 = vld [vmem:[#allocation2 + $0x397] sm:$0xff] }
 0x33f   : > { %v11687_v48 = vpop.f32.mrf.mxu1  ;;  %11902 = vmatmul.mubr.msk.bf16.gmra.mxu1 %vm1178_vm0, %v4992_v52  ;;  %v5287_v52 = vld [vmem:[#allocation2 + $0x488] sm:$0xff] }
 0x340   : > { %18351 = vst [vmem:[#allocation34_spill] sm:$0xff] %v15330_v8  ;;  %v15332_v39 = vpop.f32.mrf.mxu0  ;;  %11946 = vmatmul.mubr.msk.bf16.gmra.mxu0 %vm1178_vm0, %v5301_v35  ;;  %v3411_v3 = vadd.f32 %v11687_v48, %v18352_v1  ;;  %11905 = vmatprep.mubr.msk.bf16.mxu1 %vm1178_vm0, %v4993_v15  ;;  %v15340_v56 = vadd.f32 %v15234_v38, %v3406_v13  ;;  %v15354_v1 = vld [vmem:[#allocation2 + $0x3f7] sm:$0xff]  ;;  %v18355_v38 = vld [vmem:[#allocation32_spill] sm:$0xff] }
 0x341   : > { %11949 = vmatprep.mubr.msk.bf16.mxu0 %vm1178_vm0, %v5302_v11  ;;  %v3330_v63 = vpop.f32.mrf.mxu1  ;;  %v4975_v11 = vld [vmem:[#allocation2 + $0x3df] sm:$0xff]  ;;  %v4994_v8 = vpack.c.bf16 %v15347_v14, %v15345_v0 }
 0x342   : > { %18353 = vst [vmem:[#allocation28_spill] sm:$0xff] %v15340_v56  ;;  %v15342_v33 = vpop.f32.mrf.mxu0  ;;  %v3409_v32 = vadd.f32 %v3330_v63, %v15015_v30  ;;  %v15350_v35 = vadd.f32 %v15248_v19, %v3411_v3  ;;  %v5303_v19 = vpack.c.bf16 %v5287_v52, %v15086_v44  ;;  %v18357_v3 = vld [vmem:[#allocation31_spill] sm:$0xff]  ;;  %v4995_v21 = vpack.c.bf16 %v15354_v1, %v4975_v11  ;;  %v15385_v11 = vld [vmem:[#allocation2 + $0x40f] sm:$0xff] }
 0x343   : > { %v11688_v48 = vpop.f32.mrf.mxu1 }
 0x344   : > { %18354 = vst [vmem:[#allocation33_spill] sm:$0xff] %v15350_v35  ;;  %v15352_v15 = vpop.f32.mrf.mxu0  ;;  %v3412_v13 = vadd.f32 %v11688_v48, %v18355_v38  ;;  %v15358_v56 = vadd.f32 %v15258_v4, %v3409_v32  ;;  %v18358_v38 = vld [vmem:[#allocation35_spill] sm:$0xff] }
 0x345   : > { %v3333_v30 = vpop.f32.mrf.mxu1 }
 0x346   : > { %18356 = vst [vmem:[#allocation32_spill] sm:$0xff] %v15358_v56  ;;  %v15360_v63 = vpop.f32.mrf.mxu0  ;;  %v3410_v35 = vadd.f32 %v3333_v30, %v18357_v3  ;;  %v15370_v48 = vadd.f32 %v15268_v29, %v3412_v13  ;;  %v18359_v29 = vld [vmem:[#allocation36_spill] sm:$0xff] }
 0x347   : > { %v11691_v4 = vpop.f32.mrf.mxu1  ;;  %11906 = vmatmul.mubr.msk.bf16.gmra.mxu1 %vm1178_vm0, %v4994_v8  ;;  %v15387_v13 = vld [vmem:[#allocation2 + $0x427] sm:$0xff] }
 0x348   : > { %v15372_v32 = vpop.f32.mrf.mxu0  ;;  %11950 = vmatmul.mubr.msk.bf16.gmra.mxu0 %vm1178_vm0, %v5303_v19  ;;  %v3415_v56 = vadd.f32 %v11691_v4, %v18358_v38  ;;  %11909 = vmatprep.mubr.msk.bf16.mxu1 %vm1178_vm0, %v4995_v21  ;;  %v15380_v44 = vadd.f32 %v15276_v42, %v3410_v35  ;;  %v15394_v21 = vld [vmem:[#allocation2 + $0x457] sm:$0xff]  ;;  %v4996_v38 = vpack.c.bf16 %v15387_v13, %v15385_v11 }
 0x349   : > { %11993 = vmatprep.mubr.msk.bf16.mxu0 %vm1178_vm0, %v5899_v43  ;;  %v3346_v60 = vpop.f32.mrf.mxu1  ;;  %v18361_v43 = vld [vmem:[#allocation37_spill] sm:$0xff] }
 0x34a   : > { %v15382_v16 = vpop.f32.mrf.mxu0  ;;  %v3413_v52 = vadd.f32 %v3346_v60, %v18359_v29  ;;  %v15390_v8 = vadd.f32 %v15288_v10, %v3415_v56  ;;  %v5900_v10 = vpack.c.bf16 %v15147_v9, %v15130_v54  ;;  %v15406_v56 = vld [vmem:[#allocation2 + $0x43f] sm:$0xff] }
 0x34b   : > { %v11692_v30 = vpop.f32.mrf.mxu1  ;;  %v18363_v60 = vld [vmem:[#allocation38_spill] sm:$0xff]  ;;  %v18365_v54 = vld [vmem:[#allocation39_spill] sm:$0xff] }
 0x34c   : > { %18360 = vst [vmem:[#allocation31_spill] sm:$0xff] %v15390_v8  ;;  %v15392_v19 = vpop.f32.mrf.mxu0  ;;  %v3416_v42 = vadd.f32 %v11692_v30, %v18361_v43  ;;  %v15398_v35 = vadd.f32 %v15298_v47, %v3413_v52  ;;  %v4997_v8 = vpack.c.bf16 %v15394_v21, %v15406_v56  ;;  %v5901_v47 = vpack.c.bf16 %v15178_v62, %v15137_v20  ;;  %v12645_v30 = vld [vmem:[%s18271_s8 + $0x110] sm:$0xff]  }
 0x34d   : > { %v3349_v3 = vpop.f32.mrf.mxu1 }
 0x34e   : > { %18362 = vst [vmem:[#allocation35_spill] sm:$0xff] %v15398_v35  ;;  %v15400_v4 = vpop.f32.mrf.mxu0  ;;  %v3414_v29 = vadd.f32 %v3349_v3, %v18363_v60  ;;  %v15414_v52 = vadd.f32 %v15308_v55, %v3416_v42  ;;  %v5874_v42 = vld [vmem:[#allocation2 + $0x1cf] sm:$0xff] }
 0x34f   : > { %v11695_v43 = vpop.f32.mrf.mxu1  ;;  %11910 = vmatmul.mubr.msk.bf16.gmra.mxu1 %vm1178_vm0, %v4996_v38  ;;  %v15433_v38 = vld [vmem:[#allocation2 + $0x46f] sm:$0xff] }
 0x350   : > { %18364 = vst [vmem:[#allocation36_spill] sm:$0xff] %v15414_v52  ;;  %v15419_v35 = vpop.f32.mrf.mxu0  ;;  %11994 = vmatmul.mubr.msk.bf16.vlgmr.msra.gmra.mxu0 %vm1178_vm0, %v5900_v10  ;;  %v3419_v9 = vadd.f32 %v11695_v43, %v18365_v54  ;;  %11913 = vmatprep.mubr.msk.bf16.mxu1 %vm1178_vm0, %v4997_v8  ;;  %v15427_v20 = vadd.f32 %v15316_v53, %v3414_v29  ;;  %v15435_v10 = vld [vmem:[#allocation2 + $0x487] sm:$0xff]  ;;  %v15443_v53 = vld [vmem:[%s18271_s8 + $0x138] sm:$0xff]  }
 0x351   : > { %11997 = vmatprep.mubr.msk.bf16.mxu0 %vm1178_vm0, %v5901_v47  ;;  %v3362_v62 = vpop.f32.mrf.mxu1  ;;  %12062 = vmatpush3.bf16.msra.mxu0 %v15094_v40  ;;  %v5561_v47 = vld [vmem:[#allocation2 + $0x111] sm:$0xff]  ;;  %v15447_v40 = vld [vmem:[#allocation2 + $0x129] sm:$0xff]  ;;  %v5903_v52 = vpack.c.bf16 %v15219_v27, %v15187_v45 }
 0x352   : > { %18366 = vst [vmem:[#allocation37_spill] sm:$0xff] %v15427_v20  ;;  %v15429_v55 = vpop.f32.mrf.mxu0  ;;  %v3417_v3 = vadd.f32 %v3362_v62, %v15102_v46  ;;  %12063 = vmatprep.subr.bf16.mxu0 %v12645_v30  ;;  %v15438_v8 = vadd.f32 %v15332_v39, %v3419_v9  ;;  %v4998_v39 = vpack.c.bf16 %v15435_v10, %v15433_v38 }
 0x353   : > { %v11696_v60 = vpop.f32.mrf.mxu1  ;;  %v5902_v9 = vpack.c.bf16 %v5874_v42, %v15180_v12  ;;  %v5593_v20 = vpack.c.bf16 %v15447_v40, %v5561_v47  ;;  %v15481_v42 = vld [vmem:[#allocation2 + $0x159] sm:$0xff] }
 0x354   : > { %18367 = vst [vmem:[#allocation38_spill] sm:$0xff] %v15438_v8  ;;  %v15445_v29 = vpop.f32.mrf.mxu0  ;;  %v3420_v46 = vadd.f32 %v11696_v60, %v15112_v5  ;;  %v15451_v43 = vadd.f32 %v15342_v33, %v3417_v3 }
 0x355   : > { %v3365_v54 = vpop.f32.mrf.mxu1  ;;  %12064 = vmatpush3.bf16.msra.mxu0 %v12645_v30  ;;  %v15479_v30 = vld [vmem:[#allocation2 + $0x141] sm:$0xff] }
 0x356   : > { %v15453_v62 = vpop.f32.mrf.mxu0  ;;  %v3418_v8 = vadd.f32 %v3365_v54, %v15123_v58  ;;  %v15463_v5 = vadd.f32 %v15352_v15, %v3420_v46  ;;  %12133 = vmatprep.subr.bf16.mxu0 %v15443_v53  ;;  %v15500_v54 = vld [vmem:[#allocation2 + $0x171] sm:$0xff] }
 0x357   : > { %v11699_v33 = vpop.f32.mrf.mxu1  ;;  %11914 = vmatmul.mubr.msk.bf16.gmra.mxu1 %vm1178_vm0, %v4998_v39  ;;  %v12643_v39 = vld [vmem:[%s18271_s8 + $0x100] sm:$0xff]  }
 0x358   : > { %v15466_v3 = vpop.f32.mrf.mxu0  ;;  %11998 = vmatmul.mubr.msk.bf16.gmra.mxu0 %vm1178_vm0, %v5902_v9  ;;  %v3423_v12 = vadd.f32 %v11699_v33, %v15133_v49  ;;  %11957 = vmatprep.mubr.msk.bf16.mxu1 %vm1178_vm0, %v5593_v20  ;;  %v15474_v58 = vadd.f32 %v15360_v63, %v3418_v8  ;;  %v15488_v20 = vld [vmem:[#allocation2 + $0x189] sm:$0xff] }
 0x359   : > { %12001 = vmatprep.mubr.msk.bf16.mxu0 %vm1178_vm0, %v5903_v52  ;;  %v3378_v45 = vpop.f32.mrf.mxu1 }
 0x35a   : > { %v15476_v27 = vpop.f32.mrf.mxu0  ;;  %v3421_v15 = vadd.f32 %v3378_v45, %v15141_v41  ;;  %v15484_v60 = vadd.f32 %v15372_v32, %v3423_v12  ;;  %v5594_v41 = vpack.c.bf16 %v15481_v42, %v15479_v30  ;;  %v5904_v32 = vpack.c.bf16 %v15239_v51, %v15221_v31  ;;  %v18368_v51 = vld [vmem:[#allocation30_spill] sm:$0xff] }
 0x35b   : > { %v11700_v49 = vpop.f32.mrf.mxu1  ;;  %v5905_v31 = vpack.c.bf16 %v15261_v57, %v15228_v28  ;;  %v15532_v57 = vld [vmem:[#allocation2 + $0x1a1] sm:$0xff] }
 0x35c   : > { %v15486_v47 = vpop.f32.mrf.mxu0  ;;  %v3424_v63 = vadd.f32 %v11700_v49, %v15156_v17  ;;  %v15492_v52 = vadd.f32 %v15382_v16, %v3421_v15  ;;  %v5595_v16 = vpack.c.bf16 %v15488_v20, %v15500_v54  ;;  %v15529_v49 = vld [vmem:[%s18271_s8 + $0x128] sm:$0xff]  }
 0x35d   : > { %v3381_v8 = vpop.f32.mrf.mxu1 }
 0x35e   : > { %v15494_v46 = vpop.f32.mrf.mxu0  ;;  %v3422_v17 = vadd.f32 %v3381_v8, %v15167_v6  ;;  %v15509_v9 = vadd.f32 %v15392_v19, %v3424_v63  ;;  %v5882_v63 = vld [vmem:[#allocation2 + $0x2bf] sm:$0xff] }
 0x35f   : > { %v11743_v33 = vpop.f32.mrf.mxu1  ;;  %11958 = vmatmul.mubr.msk.bf16.vlgmr.msra.gmra.mxu1 %vm1178_vm0, %v5594_v41 }
 0x360   : > { %v15511_v12 = vpop.f32.mrf.mxu0  ;;  %12002 = vmatmul.mubr.msk.bf16.gmra.mxu0 %vm1178_vm0, %v5904_v32  ;;  %v4005_v45 = vadd.f32 %v11743_v33, %v18368_v51  ;;  %12026 = vmatpush3.bf16.msra.mxu1 %v15175_v24  ;;  %v15521_v6 = vadd.f32 %v15400_v4, %v3422_v17  ;;  %v15534_v24 = vld [vmem:[#allocation2 + $0x1b9] sm:$0xff]  ;;  %v5569_v32 = vld [vmem:[#allocation2 + $0x201] sm:$0xff] }
 0x361   : > { %11961 = vmatprep.mubr.msk.bf16.mxu1 %vm1178_vm0, %v5595_v16  ;;  %12005 = vmatprep.mubr.msk.bf16.mxu0 %vm1178_vm0, %v5905_v31  ;;  %v3876_v19 = vpop.f32.mrf.mxu1  ;;  %v15541_v17 = vld [vmem:[#allocation2 + $0x219] sm:$0xff]  ;;  %v5596_v51 = vpack.c.bf16 %v15534_v24, %v15532_v57 }
 0x362   : > { %v15524_v15 = vpop.f32.mrf.mxu0  ;;  %12027 = vmatprep.subr.bf16.mxu1 %v12643_v39  ;;  %v4003_v28 = vadd.f32 %v3876_v19, %v15191_v18  ;;  %v15537_v4 = vadd.f32 %v15419_v35, %v4005_v45  ;;  %v5906_v35 = vpack.c.bf16 %v5882_v63, %v15263_v25  ;;  %v5597_v19 = vpack.c.bf16 %v15541_v17, %v5569_v32  ;;  %v15573_v63 = vld [vmem:[#allocation2 + $0x231] sm:$0xff] }
 0x363   : > { %v11744_v8 = vpop.f32.mrf.mxu1 }
 0x364   : > { %v15539_v41 = vpop.f32.mrf.mxu0  ;;  %v4006_v16 = vadd.f32 %v11744_v8, %v15204_v7  ;;  %12028 = vmatpush3.bf16.msra.mxu1 %v12643_v39  ;;  %v15545_v33 = vadd.f32 %v15429_v55, %v4003_v28  ;;  %v5907_v7 = vpack.c.bf16 %v15301_v22, %v15270_v26  ;;  %v15575_v8 = vld [vmem:[#allocation2 + $0x249] sm:$0xff] }
 0x365   : > { %v3879_v18 = vpop.f32.mrf.mxu1  ;;  %12097 = vmatprep.subr.bf16.mxu1 %v15529_v49 }
 0x366   : > { %v15547_v31 = vpop.f32.mrf.mxu0  ;;  %v4004_v45 = vadd.f32 %v3879_v18, %v15214_v59  ;;  %v15558_v55 = vadd.f32 %v15445_v29, %v4006_v16  ;;  %v15582_v18 = vld [vmem:[#allocation2 + $0x279] sm:$0xff] }
 0x367   : > { %v11747_v39 = vpop.f32.mrf.mxu1  ;;  %11962 = vmatmul.mubr.msk.bf16.gmra.mxu1 %vm1178_vm0, %v5596_v51  ;;  %v18369_v51 = vld [vmem:[#allocation40_spill] sm:$0xff] }
 0x368   : > { %v15560_v28 = vpop.f32.mrf.mxu0  ;;  %12006 = vmatmul.mubr.msk.bf16.gmra.mxu0 %vm1178_vm0, %v5906_v35  ;;  %v4009_v25 = vadd.f32 %v11747_v39, %v15224_v2  ;;  %11965 = vmatprep.mubr.msk.bf16.mxu1 %vm1178_vm0, %v5597_v19  ;;  %v15568_v59 = vadd.f32 %v15453_v62, %v4004_v45  ;;  %v18371_v39 = vld [vmem:[#allocation41_spill] sm:$0xff] }
 0x369   : > { %12009 = vmatprep.mubr.msk.bf16.mxu0 %vm1178_vm0, %v5907_v7  ;;  %v3892_v26 = vpop.f32.mrf.mxu1  ;;  %v15594_v7 = vld [vmem:[#allocation2 + $0x261] sm:$0xff] }
 0x36a   : > { %v15570_v22 = vpop.f32.mrf.mxu0  ;;  %v4007_v29 = vadd.f32 %v3892_v26, %v15232_v61  ;;  %v15578_v32 = vadd.f32 %v15466_v3, %v4009_v25  ;;  %v5598_v61 = vpack.c.bf16 %v15575_v8, %v15573_v63  ;;  %v5908_v3 = vpack.c.bf16 %v15322_v37, %v15303_v36  ;;  %v18373_v36 = vld [vmem:[#allocation42_spill] sm:$0xff] }
 0x36b   : > { %v11748_v2 = vpop.f32.mrf.mxu1  ;;  %v5599_v26 = vpack.c.bf16 %v15582_v18, %v15594_v7 }
 0x36c   : > { %v15580_v16 = vpop.f32.mrf.mxu0  ;;  %v4010_v62 = vadd.f32 %v11748_v2, %v18369_v51  ;;  %v15586_v35 = vadd.f32 %v15476_v27, %v4007_v29  ;;  %v5909_v27 = vpack.c.bf16 %v15345_v0, %v15310_v34 }
 0x36d   : > { %v3895_v45 = vpop.f32.mrf.mxu1 }
 0x36e   : > { %18370 = vst [vmem:[#allocation39_spill] sm:$0xff] %v15586_v35  ;;  %v15588_v19 = vpop.f32.mrf.mxu0  ;;  %v4008_v25 = vadd.f32 %v3895_v45, %v18371_v39  ;;  %v15602_v29 = vadd.f32 %v15486_v47, %v4010_v62  ;;  %v18375_v47 = vld [vmem:[#allocation43_spill] sm:$0xff]  ;;  %v15617_v39 = vld [vmem:[#allocation2 + $0x291] sm:$0xff]  ;;  %v5911_v35 = vpack.c.bf16 %v15385_v11, %v15354_v1 }
 0x36f   : > { %v11751_v2 = vpop.f32.mrf.mxu1  ;;  %11966 = vmatmul.mubr.msk.bf16.gmra.mxu1 %vm1178_vm0, %v5598_v61  ;;  %v5890_v61 = vld [vmem:[#allocation2 + $0x3af] sm:$0xff]  ;;  %v18379_v11 = vld [vmem:[#allocation27_spill] sm:$0xff] }
 0x370   : > { %18372 = vst [vmem:[#allocation30_spill] sm:$0xff] %v15602_v29  ;;  %v15604_v51 = vpop.f32.mrf.mxu0  ;;  %12010 = vmatmul.mubr.msk.bf16.gmra.mxu0 %vm1178_vm0, %v5908_v3  ;;  %v4013_v37 = vadd.f32 %v11751_v2, %v18373_v36  ;;  %11969 = vmatprep.mubr.msk.bf16.mxu1 %vm1178_vm0, %v5599_v26  ;;  %v15612_v45 = vadd.f32 %v15494_v46, %v4008_v25  ;;  %v15619_v29 = vld [vmem:[#allocation2 + $0x2a9] sm:$0xff] }
 0x371   : > { %12013 = vmatprep.mubr.msk.bf16.mxu0 %vm1178_vm0, %v5909_v27  ;;  %v3908_v34 = vpop.f32.mrf.mxu1  ;;  %v5577_v27 = vld [vmem:[#allocation2 + $0x2f1] sm:$0xff]  ;;  %v15626_v36 = vld [vmem:[#allocation2 + $0x309] sm:$0xff] }
 0x372   : > { %18374 = vst [vmem:[#allocation40_spill] sm:$0xff] %v15612_v45  ;;  %v15614_v0 = vpop.f32.mrf.mxu0  ;;  %v4011_v62 = vadd.f32 %v3908_v34, %v18375_v47  ;;  %v15622_v3 = vadd.f32 %v15511_v12, %v4013_v37  ;;  %v5600_v45 = vpack.c.bf16 %v15619_v29, %v15617_v39  ;;  %v5910_v12 = vpack.c.bf16 %v5890_v61, %v15347_v14  ;;  %v15657_v61 = vld [vmem:[#allocation2 + $0x321] sm:$0xff] }
 0x373   : > { %v11752_v2 = vpop.f32.mrf.mxu1 }
 0x374   : > { %18376 = vst [vmem:[#allocation41_spill] sm:$0xff] %v15622_v3  ;;  %v15624_v26 = vpop.f32.mrf.mxu0  ;;  %v4014_v46 = vadd.f32 %v11752_v2, %v15286_v50  ;;  %v15630_v25 = vadd.f32 %v15524_v15, %v4011_v62  ;;  %v5601_v3 = vpack.c.bf16 %v15626_v36, %v5577_v27  ;;  %v18378_v2 = vld [vmem:[#allocation29_spill] sm:$0xff]  ;;  %v15659_v27 = vld [vmem:[#allocation2 + $0x339] sm:$0xff] }
 0x375   : > { %v3911_v34 = vpop.f32.mrf.mxu1 }
 0x376   : > { %18377 = vst [vmem:[#allocation42_spill] sm:$0xff] %v15630_v25  ;;  %v15632_v47 = vpop.f32.mrf.mxu0  ;;  %v4012_v37 = vadd.f32 %v3911_v34, %v15296_v23  ;;  %v15642_v50 = vadd.f32 %v15539_v41, %v4014_v46 }
 0x377   : > { %v11755_v15 = vpop.f32.mrf.mxu1  ;;  %11970 = vmatmul.mubr.msk.bf16.gmra.mxu1 %vm1178_vm0, %v5600_v45 }
 0x378   : > { %v15644_v62 = vpop.f32.mrf.mxu0  ;;  %12014 = vmatmul.mubr.msk.bf16.gmra.mxu0 %vm1178_vm0, %v5910_v12  ;;  %v4017_v25 = vadd.f32 %v11755_v15, %v18378_v2  ;;  %11973 = vmatprep.mubr.msk.bf16.mxu1 %vm1178_vm0, %v5601_v3  ;;  %v15652_v23 = vadd.f32 %v15547_v31, %v4012_v37  ;;  %v15666_v3 = vld [vmem:[#allocation2 + $0x369] sm:$0xff]  ;;  %v5602_v2 = vpack.c.bf16 %v15659_v27, %v15657_v61 }
 0x379   : > { %12017 = vmatprep.mubr.msk.bf16.mxu0 %vm1178_vm0, %v5911_v35  ;;  %v3924_v14 = vpop.f32.mrf.mxu1  ;;  %v18381_v35 = vld [vmem:[#allocation34_spill] sm:$0xff] }
 0x37a   : > { %v15654_v1 = vpop.f32.mrf.mxu0  ;;  %v4015_v41 = vadd.f32 %v3924_v14, %v18379_v11  ;;  %v15662_v45 = vadd.f32 %v15560_v28, %v4017_v25  ;;  %v5912_v28 = vpack.c.bf16 %v15406_v56, %v15387_v13  ;;  %v15678_v25 = vld [vmem:[#allocation2 + $0x351] sm:$0xff]  ;;  %v18383_v14 = vld [vmem:[#allocation28_spill] sm:$0xff] }
 0x37b   : > { %v11756_v46 = vpop.f32.mrf.mxu1  ;;  %v18385_v13 = vld [vmem:[#allocation33_spill] sm:$0xff] }
 0x37c   : > { %18380 = vst [vmem:[#allocation43_spill] sm:$0xff] %v15662_v45  ;;  %v15664_v34 = vpop.f32.mrf.mxu0  ;;  %v4018_v31 = vadd.f32 %v11756_v46, %v18381_v35  ;;  %v15670_v12 = vadd.f32 %v15570_v22, %v4015_v41  ;;  %v5603_v45 = vpack.c.bf16 %v15666_v3, %v15678_v25  ;;  %v5913_v22 = vpack.c.bf16 %v15433_v38, %v15394_v21 }
 0x37d   : > { %v3927_v37 = vpop.f32.mrf.mxu1 }
 0x37e   : > { %18382 = vst [vmem:[#allocation29_spill] sm:$0xff] %v15670_v12  ;;  %v15672_v15 = vpop.f32.mrf.mxu0  ;;  %v4016_v11 = vadd.f32 %v3927_v37, %v18383_v14  ;;  %v15686_v41 = vadd.f32 %v15580_v16, %v4018_v31  ;;  %v18387_v16 = vld [vmem:[#allocation32_spill] sm:$0xff]  ;;  %v6509_v12 = vpack.c.bf16 %v15479_v30, %v15447_v40  ;;  %v18391_v30 = vld [vmem:[#allocation35_spill] sm:$0xff] }
 0x37f   : > { %v11759_v46 = vpop.f32.mrf.mxu1  ;;  %11974 = vmatmul.mubr.msk.bf16.gmra.mxu1 %vm1178_vm0, %v5602_v2  ;;  %v15701_v14 = vld [vmem:[#allocation2 + $0x381] sm:$0xff] }
 0x380   : > { %18384 = vst [vmem:[#allocation27_spill] sm:$0xff] %v15686_v41  ;;  %v15688_v35 = vpop.f32.mrf.mxu0  ;;  %12018 = vmatmul.mubr.msk.bf16.gmra.mxu0 %vm1178_vm0, %v5912_v28  ;;  %v4021_v56 = vadd.f32 %v11759_v46, %v18385_v13  ;;  %11977 = vmatprep.mubr.msk.bf16.mxu1 %vm1178_vm0, %v5603_v45  ;;  %v15696_v37 = vadd.f32 %v15588_v19, %v4016_v11  ;;  %v15703_v41 = vld [vmem:[#allocation2 + $0x399] sm:$0xff] }
 0x381   : > { %12021 = vmatprep.mubr.msk.bf16.mxu0 %vm1178_vm0, %v5913_v22  ;;  %v3940_v21 = vpop.f32.mrf.mxu1  ;;  %v5898_v2 = vld [vmem:[#allocation2 + $0x49f] sm:$0xff] }
 0x382   : > { %18386 = vst [vmem:[#allocation34_spill] sm:$0xff] %v15696_v37  ;;  %v15698_v38 = vpop.f32.mrf.mxu0  ;;  %v4019_v31 = vadd.f32 %v3940_v21, %v18387_v16  ;;  %v15706_v28 = vadd.f32 %v15604_v51, %v4021_v56  ;;  %v5585_v22 = vld [vmem:[#allocation2 + $0x3e1] sm:$0xff]  ;;  %v15710_v13 = vld [vmem:[#allocation2 + $0x3f9] sm:$0xff]  ;;  %v5604_v37 = vpack.c.bf16 %v15703_v41, %v15701_v14  ;;  %v5914_v51 = vpack.c.bf16 %v5898_v2, %v15435_v10  ;;  %v15741_v2 = vld [vmem:[#allocation2 + $0x411] sm:$0xff] }
 0x383   : > { %v11760_v46 = vpop.f32.mrf.mxu1 }
 0x384   : > { %18388 = vst [vmem:[#allocation28_spill] sm:$0xff] %v15706_v28  ;;  %v15708_v45 = vpop.f32.mrf.mxu0  ;;  %v4022_v19 = vadd.f32 %v11760_v46, %v15370_v48  ;;  %v15714_v11 = vadd.f32 %v15614_v0, %v4019_v31  ;;  %v5605_v28 = vpack.c.bf16 %v15710_v13, %v5585_v22  ;;  %v18390_v46 = vld [vmem:[#allocation31_spill] sm:$0xff]  ;;  %v15743_v22 = vld [vmem:[#allocation2 + $0x429] sm:$0xff] }
 0x385   : > { %v3943_v21 = vpop.f32.mrf.mxu1 }
 0x386   : > { %18389 = vst [vmem:[#allocation33_spill] sm:$0xff] %v15714_v11  ;;  %v15716_v16 = vpop.f32.mrf.mxu0  ;;  %v4020_v56 = vadd.f32 %v3943_v21, %v15380_v44  ;;  %v15726_v48 = vadd.f32 %v15624_v26, %v4022_v19 }
 0x387   : > { %v11763_v0 = vpop.f32.mrf.mxu1  ;;  %11978 = vmatmul.mubr.msk.bf16.gmra.mxu1 %vm1178_vm0, %v5604_v37 }
 0x388   : > { %v15728_v31 = vpop.f32.mrf.mxu0  ;;  %12022 = vmatmul.mubr.msk.bf16.gmra.mxu0 %vm1178_vm0, %v5914_v51  ;;  %v4025_v11 = vadd.f32 %v11763_v0, %v18390_v46  ;;  %11981 = vmatprep.mubr.msk.bf16.mxu1 %vm1178_vm0, %v5605_v28  ;;  %v15736_v44 = vadd.f32 %v15632_v47, %v4020_v56  ;;  %v15750_v28 = vld [vmem:[#allocation2 + $0x459] sm:$0xff]  ;;  %v5606_v46 = vpack.c.bf16 %v15743_v22, %v15741_v2 }
 0x389   : > { %12065 = vmatprep.mubr.msk.bf16.mxu0 %vm1178_vm0, %v6509_v12  ;;  %v3956_v10 = vpop.f32.mrf.mxu1  ;;  %v18393_v12 = vld [vmem:[#allocation36_spill] sm:$0xff] }
 0x38a   : > { %v15738_v40 = vpop.f32.mrf.mxu0  ;;  %v4023_v26 = vadd.f32 %v3956_v10, %v18391_v30  ;;  %v15746_v37 = vadd.f32 %v15644_v62, %v4025_v11  ;;  %v6510_v62 = vpack.c.bf16 %v15500_v54, %v15481_v42  ;;  %v15762_v11 = vld [vmem:[#allocation2 + $0x441] sm:$0xff]  ;;  %v18395_v10 = vld [vmem:[#allocation37_spill] sm:$0xff]  ;;  %v18397_v42 = vld [vmem:[#allocation38_spill] sm:$0xff] }
 0x38b   : > { %v11764_v19 = vpop.f32.mrf.mxu1 }
 0x38c   : > { %18392 = vst [vmem:[#allocation32_spill] sm:$0xff] %v15746_v37  ;;  %v15748_v21 = vpop.f32.mrf.mxu0  ;;  %v4026_v47 = vadd.f32 %v11764_v19, %v18393_v12  ;;  %v15754_v51 = vadd.f32 %v15654_v1, %v4023_v26  ;;  %v5607_v37 = vpack.c.bf16 %v15750_v28, %v15762_v11  ;;  %v6511_v1 = vpack.c.bf16 %v15532_v57, %v15488_v20  ;;  %v12649_v19 = vld [vmem:[%s18271_s8 + $0x130] sm:$0xff]  }
 0x38d   : > { %v3959_v56 = vpop.f32.mrf.mxu1 }
 0x38e   : > { %18394 = vst [vmem:[#allocation31_spill] sm:$0xff] %v15754_v51  ;;  %v15756_v0 = vpop.f32.mrf.mxu0  ;;  %v4024_v30 = vadd.f32 %v3959_v56, %v18395_v10  ;;  %v15770_v26 = vadd.f32 %v15664_v34, %v4026_v47  ;;  %v6484_v47 = vld [vmem:[#allocation2 + $0x1d1] sm:$0xff] }
 0x38f   : > { %v11767_v12 = vpop.f32.mrf.mxu1  ;;  %11982 = vmatmul.mubr.msk.bf16.gmra.mxu1 %vm1178_vm0, %v5606_v46  ;;  %v15789_v46 = vld [vmem:[#allocation2 + $0x471] sm:$0xff] }
 0x390   : > { %18396 = vst [vmem:[#allocation35_spill] sm:$0xff] %v15770_v26  ;;  %v15775_v51 = vpop.f32.mrf.mxu0  ;;  %12066 = vmatmul.mubr.msk.bf16.vlgmr.msra.gmra.mxu0 %vm1178_vm0, %v6510_v62  ;;  %v4029_v54 = vadd.f32 %v11767_v12, %v18397_v42  ;;  %11985 = vmatprep.mubr.msk.bf16.mxu1 %vm1178_vm0, %v5607_v37  ;;  %v15783_v20 = vadd.f32 %v15672_v15, %v4024_v30  ;;  %v15791_v62 = vld [vmem:[#allocation2 + $0x489] sm:$0xff]  ;;  %v15799_v15 = vld [vmem:[%s18271_s8 + $0x158] sm:$0xff]  }
 0x391   : > { %12069 = vmatprep.mubr.msk.bf16.mxu0 %vm1178_vm0, %v6511_v1  ;;  %v3972_v57 = vpop.f32.mrf.mxu1  ;;  %12134 = vmatpush3.bf16.msra.mxu0 %v15443_v53  ;;  %v6172_v1 = vld [vmem:[#allocation2 + $0x128] sm:$0xff]  ;;  %v6173_v53 = vld [vmem:[#allocation2 + $0x140] sm:$0xff]  ;;  %v6513_v26 = vpack.c.bf16 %v15573_v63, %v15541_v17 }
 0x392   : > { %18398 = vst [vmem:[#allocation36_spill] sm:$0xff] %v15783_v20  ;;  %v15785_v34 = vpop.f32.mrf.mxu0  ;;  %v4027_v56 = vadd.f32 %v3972_v57, %v15451_v43  ;;  %12135 = vmatprep.subr.bf16.mxu0 %v12649_v19  ;;  %v15794_v37 = vadd.f32 %v15688_v35, %v4029_v54  ;;  %v5608_v35 = vpack.c.bf16 %v15791_v62, %v15789_v46 }
 0x393   : > { %v11768_v10 = vpop.f32.mrf.mxu1  ;;  %v6512_v54 = vpack.c.bf16 %v6484_v47, %v15534_v24  ;;  %v6204_v20 = vpack.c.bf16 %v6173_v53, %v6172_v1  ;;  %v6175_v47 = vld [vmem:[#allocation2 + $0x170] sm:$0xff] }
 0x394   : > { %18399 = vst [vmem:[#allocation37_spill] sm:$0xff] %v15794_v37  ;;  %v15801_v30 = vpop.f32.mrf.mxu0  ;;  %v4030_v43 = vadd.f32 %v11768_v10, %v15463_v5  ;;  %v15805_v12 = vadd.f32 %v15698_v38, %v4027_v56 }
 0x395   : > { %v3975_v42 = vpop.f32.mrf.mxu1  ;;  %12136 = vmatpush3.bf16.msra.mxu0 %v12649_v19  ;;  %v6174_v19 = vld [vmem:[#allocation2 + $0x158] sm:$0xff] }
 0x396   : > { %v15807_v57 = vpop.f32.mrf.mxu0  ;;  %v4028_v37 = vadd.f32 %v3975_v42, %v15474_v58  ;;  %v15816_v5 = vadd.f32 %v15708_v45, %v4030_v43  ;;  %12205 = vmatprep.subr.bf16.mxu0 %v15799_v15  ;;  %v6205_v42 = vpack.c.bf16 %v6175_v47, %v6174_v19  ;;  %v6180_v47 = vld [vmem:[#allocation2 + $0x218] sm:$0xff] }
 0x397   : > { %v11771_v38 = vpop.f32.mrf.mxu1  ;;  %11986 = vmatmul.mubr.msk.bf16.gmra.mxu1 %vm1178_vm0, %v5608_v35 }
 0x398   : > { %v15819_v56 = vpop.f32.mrf.mxu0  ;;  %12070 = vmatmul.mubr.msk.bf16.gmra.mxu0 %vm1178_vm0, %v6512_v54  ;;  %v4033_v24 = vadd.f32 %v11771_v38, %v15484_v60  ;;  %12029 = vmatprep.mubr.msk.bf16.mxu1 %vm1178_vm0, %v6204_v20  ;;  %v15827_v58 = vadd.f32 %v15716_v16, %v4028_v37  ;;  %v6176_v60 = vld [vmem:[#allocation2 + $0x188] sm:$0xff]  ;;  %v6177_v20 = vld [vmem:[#allocation2 + $0x1a0] sm:$0xff] }
 0x399   : > { %12073 = vmatprep.mubr.msk.bf16.mxu0 %vm1178_vm0, %v6513_v26  ;;  %v3988_v17 = vpop.f32.mrf.mxu1  ;;  %v6206_v54 = vpack.c.bf16 %v6177_v20, %v6176_v60 }
 0x39a   : > { %v15829_v63 = vpop.f32.mrf.mxu0  ;;  %v4031_v45 = vadd.f32 %v3988_v17, %v15492_v52  ;;  %v15833_v10 = vadd.f32 %v15728_v31, %v4033_v24  ;;  %v6514_v52 = vpack.c.bf16 %v15594_v7, %v15575_v8  ;;  %v12647_v31 = vld [vmem:[%s18271_s8 + $0x120] sm:$0xff]   ;;  %v6515_v8 = vpack.c.bf16 %v15617_v39, %v15582_v18  ;;  %v15870_v17 = vld [vmem:[%s18271_s8 + $0x148] sm:$0xff]   ;;  %v6178_v18 = vld [vmem:[#allocation2 + $0x1b8] sm:$0xff] }
 0x39b   : > { %v11772_v1 = vpop.f32.mrf.mxu1  ;;  %v6492_v39 = vld [vmem:[#allocation2 + $0x2c1] sm:$0xff] }
 0x39c   : > { %v15835_v53 = vpop.f32.mrf.mxu0  ;;  %v4034_v26 = vadd.f32 %v11772_v1, %v15509_v9  ;;  %v15839_v16 = vadd.f32 %v15738_v40, %v4031_v45  ;;  %v6181_v1 = vld [vmem:[#allocation2 + $0x230] sm:$0xff] }
 0x39d   : > { %v3991_v37 = vpop.f32.mrf.mxu1 }
 0x39e   : > { %v15841_v43 = vpop.f32.mrf.mxu0  ;;  %v4032_v35 = vadd.f32 %v3991_v37, %v15521_v6  ;;  %v15850_v38 = vadd.f32 %v15748_v21, %v4034_v26 }
 0x39f   : > { %v11815_v9 = vpop.f32.mrf.mxu1  ;;  %12030 = vmatmul.mubr.msk.bf16.vlgmr.msra.gmra.mxu1 %vm1178_vm0, %v6205_v42  ;;  %v6516_v42 = vpack.c.bf16 %v6492_v39, %v15619_v29 }
 0x3a0   : > { %v15852_v40 = vpop.f32.mrf.mxu0  ;;  %12074 = vmatmul.mubr.msk.bf16.gmra.mxu0 %vm1178_vm0, %v6514_v52  ;;  %v4616_v7 = vadd.f32 %v11815_v9, %v15537_v4  ;;  %12098 = vmatpush3.bf16.msra.mxu1 %v15529_v49  ;;  %v15862_v6 = vadd.f32 %v15756_v0, %v4032_v35  ;;  %v6179_v49 = vld [vmem:[#allocation2 + $0x1d0] sm:$0xff]  ;;  %v15887_v52 = vpack.c.bf16 %v6181_v1, %v6180_v47  ;;  %v6182_v9 = vld [vmem:[#allocation2 + $0x248] sm:$0xff] }
 0x3a1   : > { %12033 = vmatprep.mubr.msk.bf16.mxu1 %vm1178_vm0, %v6206_v54  ;;  %12077 = vmatprep.mubr.msk.bf16.mxu0 %vm1178_vm0, %v6515_v8  ;;  %v4487_v21 = vpop.f32.mrf.mxu1  ;;  %v6517_v35 = vpack.c.bf16 %v15657_v61, %v15626_v36  ;;  %v6183_v8 = vld [vmem:[#allocation2 + $0x260] sm:$0xff] }
 0x3a2   : > { %v15865_v24 = vpop.f32.mrf.mxu0  ;;  %12099 = vmatprep.subr.bf16.mxu1 %v12647_v31  ;;  %v4614_v4 = vadd.f32 %v4487_v21, %v15545_v33  ;;  %v15874_v45 = vadd.f32 %v15775_v51, %v4616_v7  ;;  %v6207_v33 = vpack.c.bf16 %v6179_v49, %v6178_v18  ;;  %v6185_v18 = vld [vmem:[#allocation2 + $0x290] sm:$0xff]  ;;  %v18401_v49 = vld [vmem:[#allocation30_spill] sm:$0xff]  ;;  %v15919_v1 = vpack.c.bf16 %v6183_v8, %v6182_v9 }
 0x3a3   : > { %v11816_v0 = vpop.f32.mrf.mxu1 }
 0x3a4   : > { %v15876_v19 = vpop.f32.mrf.mxu0  ;;  %v4617_v60 = vadd.f32 %v11816_v0, %v15558_v55  ;;  %12100 = vmatpush3.bf16.msra.mxu1 %v12647_v31  ;;  %v15880_v20 = vadd.f32 %v15785_v34, %v4614_v4  ;;  %v6184_v4 = vld [vmem:[#allocation2 + $0x278] sm:$0xff] }
 0x3a5   : > { %v4490_v26 = vpop.f32.mrf.mxu1  ;;  %12169 = vmatprep.subr.bf16.mxu1 %v15870_v17 }
 0x3a6   : > { %v15882_v37 = vpop.f32.mrf.mxu0  ;;  %v4615_v51 = vadd.f32 %v4490_v26, %v15568_v59  ;;  %v15892_v55 = vadd.f32 %v15801_v30, %v4617_v60  ;;  %v18400_v30 = vld [vmem:[#allocation39_spill] sm:$0xff]  ;;  %v6518_v60 = vpack.c.bf16 %v15678_v25, %v15659_v27 }
 0x3a7   : > { %v11819_v34 = vpop.f32.mrf.mxu1  ;;  %12034 = vmatmul.mubr.msk.bf16.gmra.mxu1 %vm1178_vm0, %v6207_v33  ;;  %v15924_v33 = vpack.c.bf16 %v6185_v18, %v6184_v4  ;;  %v6188_v4 = vld [vmem:[#allocation2 + $0x308] sm:$0xff]  ;;  %v6189_v18 = vld [vmem:[#allocation2 + $0x320] sm:$0xff] }
 0x3a8   : > { %v15894_v31 = vpop.f32.mrf.mxu0  ;;  %12078 = vmatmul.mubr.msk.bf16.gmra.mxu0 %vm1178_vm0, %v6516_v42  ;;  %v4620_v29 = vadd.f32 %v11819_v34, %v15578_v32  ;;  %12037 = vmatprep.mubr.msk.bf16.mxu1 %vm1178_vm0, %v15887_v52  ;;  %v15903_v59 = vadd.f32 %v15807_v57, %v4615_v51  ;;  %v6519_v42 = vpack.c.bf16 %v15701_v14, %v15666_v3  ;;  %v18403_v34 = vld [vmem:[#allocation41_spill] sm:$0xff] }
 0x3a9   : > { %12081 = vmatprep.mubr.msk.bf16.mxu0 %vm1178_vm0, %v6517_v35  ;;  %v4503_v36 = vpop.f32.mrf.mxu1 }
 0x3aa   : > { %v15905_v61 = vpop.f32.mrf.mxu0  ;;  %v4618_v54 = vadd.f32 %v4503_v36, %v18400_v30  ;;  %v15909_v7 = vadd.f32 %v15819_v56, %v4620_v29  ;;  %v18402_v56 = vld [vmem:[#allocation40_spill] sm:$0xff]  ;;  %v6187_v30 = vld [vmem:[#allocation2 + $0x2c0] sm:$0xff] }
 0x3ab   : > { %v11820_v21 = vpop.f32.mrf.mxu1  ;;  %v6186_v36 = vld [vmem:[#allocation2 + $0x2a8] sm:$0xff] }
 0x3ac   : > { %v15911_v32 = vpop.f32.mrf.mxu0  ;;  %v4621_v39 = vadd.f32 %v11820_v21, %v18401_v49  ;;  %v15915_v57 = vadd.f32 %v15829_v63, %v4618_v54  ;;  %v6500_v54 = vld [vmem:[#allocation2 + $0x3b1] sm:$0xff] }
 0x3ad   : > { %v4506_v0 = vpop.f32.mrf.mxu1 }
 0x3ae   : > { %v15917_v47 = vpop.f32.mrf.mxu0  ;;  %v4619_v26 = vadd.f32 %v4506_v0, %v18402_v56  ;;  %v15929_v51 = vadd.f32 %v15835_v53, %v4621_v39  ;;  %v18404_v53 = vld [vmem:[#allocation42_spill] sm:$0xff]  ;;  %v6520_v56 = vpack.c.bf16 %v6500_v54, %v15703_v41  ;;  %v6192_v54 = vld [vmem:[#allocation2 + $0x368] sm:$0xff] }
 0x3af   : > { %v11823_v63 = vpop.f32.mrf.mxu1  ;;  %12038 = vmatmul.mubr.msk.bf16.gmra.mxu1 %vm1178_vm0, %v15919_v1 }
 0x3b0   : > { %v15931_v35 = vpop.f32.mrf.mxu0  ;;  %12082 = vmatmul.mubr.msk.bf16.gmra.mxu0 %vm1178_vm0, %v6518_v60  ;;  %v4624_v27 = vadd.f32 %v11823_v63, %v18403_v34  ;;  %12041 = vmatprep.mubr.msk.bf16.mxu1 %vm1178_vm0, %v15924_v33  ;;  %v15941_v3 = vadd.f32 %v15841_v43, %v4619_v26  ;;  %v6211_v60 = vpack.c.bf16 %v6187_v30, %v6186_v36 }
 0x3b1   : > { %12085 = vmatprep.mubr.msk.bf16.mxu0 %vm1178_vm0, %v6519_v42  ;;  %v4519_v25 = vpop.f32.mrf.mxu1  ;;  %v6521_v42 = vpack.c.bf16 %v15741_v2, %v15710_v13  ;;  %v18406_v2 = vld [vmem:[#allocation29_spill] sm:$0xff] }
 0x3b2   : > { %v15943_v14 = vpop.f32.mrf.mxu0  ;;  %v4622_v29 = vadd.f32 %v4519_v25, %v18404_v53  ;;  %v15947_v9 = vadd.f32 %v15852_v40, %v4624_v27  ;;  %v15959_v40 = vpack.c.bf16 %v6189_v18, %v6188_v4  ;;  %v6190_v25 = vld [vmem:[#allocation2 + $0x338] sm:$0xff]  ;;  %v6191_v53 = vld [vmem:[#allocation2 + $0x350] sm:$0xff]  ;;  %v18407_v4 = vld [vmem:[#allocation27_spill] sm:$0xff] }
 0x3b3   : > { %v11824_v8 = vpop.f32.mrf.mxu1 }
 0x3b4   : > { %v15949_v21 = vpop.f32.mrf.mxu0  ;;  %v4625_v49 = vadd.f32 %v11824_v8, %v15642_v50  ;;  %v15953_v43 = vadd.f32 %v15865_v24, %v4622_v29  ;;  %v18405_v24 = vld [vmem:[#allocation43_spill] sm:$0xff] }
 0x3b5   : > { %v4522_v39 = vpop.f32.mrf.mxu1  ;;  %v6193_v8 = vld [vmem:[#allocation2 + $0x380] sm:$0xff] }
 0x3b6   : > { %v15955_v0 = vpop.f32.mrf.mxu0  ;;  %v4623_v26 = vadd.f32 %v4522_v39, %v15652_v23  ;;  %v15964_v63 = vadd.f32 %v15876_v19, %v4625_v49 }
 0x3b7   : > { %v11827_v50 = vpop.f32.mrf.mxu1  ;;  %12042 = vmatmul.mubr.msk.bf16.gmra.mxu1 %vm1178_vm0, %v6211_v60  ;;  %v15991_v60 = vpack.c.bf16 %v6191_v53, %v6190_v25  ;;  %v6194_v25 = vld [vmem:[#allocation2 + $0x398] sm:$0xff]  ;;  %v6195_v53 = vld [vmem:[#allocation2 + $0x3b0] sm:$0xff] }
 0x3b8   : > { %v15966_v34 = vpop.f32.mrf.mxu0  ;;  %12086 = vmatmul.mubr.msk.bf16.gmra.mxu0 %vm1178_vm0, %v6520_v56  ;;  %v4628_v27 = vadd.f32 %v11827_v50, %v18405_v24  ;;  %12045 = vmatprep.mubr.msk.bf16.mxu1 %vm1178_vm0, %v15959_v40  ;;  %v15975_v23 = vadd.f32 %v15882_v37, %v4623_v26  ;;  %v6522_v56 = vpack.c.bf16 %v15762_v11, %v15743_v22 }
 0x3b9   : > { %12089 = vmatprep.mubr.msk.bf16.mxu0 %vm1178_vm0, %v6521_v42  ;;  %v4535_v41 = vpop.f32.mrf.mxu1  ;;  %v15996_v42 = vpack.c.bf16 %v6193_v8, %v6192_v54  ;;  %v6523_v50 = vpack.c.bf16 %v15789_v46, %v15750_v28 }
 0x3ba   : > { %v15977_v13 = vpop.f32.mrf.mxu0  ;;  %v4626_v19 = vadd.f32 %v4535_v41, %v18406_v2  ;;  %v15981_v29 = vadd.f32 %v15894_v31, %v4628_v27  ;;  %v18408_v31 = vld [vmem:[#allocation34_spill] sm:$0xff]  ;;  %v18409_v41 = vld [vmem:[#allocation28_spill] sm:$0xff]  ;;  %v18411_v2 = vld [vmem:[#allocation33_spill] sm:$0xff] }
 0x3bb   : > { %v11828_v36 = vpop.f32.mrf.mxu1 }
 0x3bc   : > { %v15983_v30 = vpop.f32.mrf.mxu0  ;;  %v4629_v18 = vadd.f32 %v11828_v36, %v18407_v4  ;;  %v15987_v37 = vadd.f32 %v15905_v61, %v4626_v19  ;;  %v6508_v36 = vld [vmem:[#allocation2 + $0x4a1] sm:$0xff] }
 0x3bd   : > { %v4538_v49 = vpop.f32.mrf.mxu1 }
 0x3be   : > { %v15989_v39 = vpop.f32.mrf.mxu0  ;;  %v4627_v26 = vadd.f32 %v4538_v49, %v18408_v31  ;;  %v16001_v24 = vadd.f32 %v15911_v32, %v4629_v18  ;;  %v7088_v32 = vld [vmem:[#allocation2 + $0x1e8] sm:$0xff]  ;;  %v6196_v18 = vld [vmem:[#allocation2 + $0x3f8] sm:$0xff]  ;;  %v6197_v49 = vld [vmem:[#allocation2 + $0x410] sm:$0xff] }
 0x3bf   : > { %v11831_v61 = vpop.f32.mrf.mxu1  ;;  %12046 = vmatmul.mubr.msk.bf16.gmra.mxu1 %vm1178_vm0, %v15991_v60 }
 0x3c0   : > { %v16003_v27 = vpop.f32.mrf.mxu0  ;;  %12090 = vmatmul.mubr.msk.bf16.gmra.mxu0 %vm1178_vm0, %v6522_v56  ;;  %v4632_v22 = vadd.f32 %v11831_v61, %v18409_v41  ;;  %12049 = vmatprep.mubr.msk.bf16.mxu1 %vm1178_vm0, %v15996_v42  ;;  %v16013_v28 = vadd.f32 %v15917_v47, %v4627_v26  ;;  %v7089_v56 = vld [vmem:[#allocation2 + $0x200] sm:$0xff]  ;;  %v6215_v61 = vpack.c.bf16 %v6195_v53, %v6194_v25  ;;  %v6198_v25 = vld [vmem:[#allocation2 + $0x428] sm:$0xff] }
 0x3c1   : > { %12093 = vmatprep.mubr.msk.bf16.mxu0 %vm1178_vm0, %v6523_v50  ;;  %v4551_v11 = vpop.f32.mrf.mxu1  ;;  %v6524_v41 = vpack.c.bf16 %v6508_v36, %v15791_v62  ;;  %v6199_v53 = vld [vmem:[#allocation2 + $0x440] sm:$0xff] }
 0x3c2   : > { %18410 = vst [vmem:[#allocation38_spill] sm:$0xff] %v16013_v28  ;;  %v16015_v46 = vpop.f32.mrf.mxu0  ;;  %v4630_v19 = vadd.f32 %v4551_v11, %v18411_v2  ;;  %v16019_v54 = vadd.f32 %v15931_v35, %v4632_v22  ;;  %v16031_v22 = vpack.c.bf16 %v6197_v49, %v6196_v18  ;;  %v7120_v11 = vpack.c.bf16 %v7089_v56, %v7088_v32  ;;  %v18414_v32 = vld [vmem:[#allocation31_spill] sm:$0xff]  ;;  %v6200_v18 = vld [vmem:[#allocation2 + $0x458] sm:$0xff]  ;;  %v6201_v49 = vld [vmem:[#allocation2 + $0x470] sm:$0xff] }
 0x3c3   : > { %v11832_v8 = vpop.f32.mrf.mxu1  ;;  %v18415_v56 = vld [vmem:[#allocation35_spill] sm:$0xff] }
 0x3c4   : > { %18412 = vst [vmem:[#allocation39_spill] sm:$0xff] %v16019_v54  ;;  %v16021_v4 = vpop.f32.mrf.mxu0  ;;  %v4633_v47 = vadd.f32 %v11832_v8, %v15726_v48  ;;  %v16025_v31 = vadd.f32 %v15943_v14, %v4630_v19  ;;  %v18413_v48 = vld [vmem:[#allocation32_spill] sm:$0xff] }
 0x3c5   : > { %v4554_v26 = vpop.f32.mrf.mxu1 }
 0x3c6   : > { %v16027_v50 = vpop.f32.mrf.mxu0  ;;  %v4631_v35 = vadd.f32 %v4554_v26, %v15736_v44  ;;  %v16034_v2 = vadd.f32 %v15949_v21, %v4633_v47 }
 0x3c7   : > { %v11835_v54 = vpop.f32.mrf.mxu1  ;;  %12050 = vmatmul.mubr.msk.bf16.gmra.mxu1 %vm1178_vm0, %v6215_v61 }
 0x3c8   : > { %v16036_v28 = vpop.f32.mrf.mxu0  ;;  %12094 = vmatmul.mubr.msk.bf16.gmra.mxu0 %vm1178_vm0, %v6524_v41  ;;  %v4636_v14 = vadd.f32 %v11835_v54, %v18413_v48  ;;  %12053 = vmatprep.mubr.msk.bf16.mxu1 %vm1178_vm0, %v16031_v22  ;;  %v16045_v44 = vadd.f32 %v15955_v0, %v4631_v35  ;;  %v16061_v41 = vpack.c.bf16 %v6199_v53, %v6198_v25  ;;  %v18416_v35 = vld [vmem:[#allocation36_spill] sm:$0xff] }
 0x3c9   : > { %12137 = vmatprep.mubr.msk.bf16.mxu0 %vm1178_vm0, %v7120_v11  ;;  %v4567_v62 = vpop.f32.mrf.mxu1  ;;  %v16064_v48 = vpack.c.bf16 %v6201_v49, %v6200_v18  ;;  %v6203_v49 = vld [vmem:[#allocation2 + $0x4a0] sm:$0xff] }
 0x3ca   : > { %v16047_v21 = vpop.f32.mrf.mxu0  ;;  %v4634_v19 = vadd.f32 %v4567_v62, %v18414_v32  ;;  %v16051_v36 = vadd.f32 %v15966_v34, %v4636_v14  ;;  %v12653_v14 = vld [vmem:[%s18271_s8 + $0x150] sm:$0xff]  }
 0x3cb   : > { %v11836_v8 = vpop.f32.mrf.mxu1 }
 0x3cc   : > { %v16053_v54 = vpop.f32.mrf.mxu0  ;;  %v4637_v47 = vadd.f32 %v11836_v8, %v18415_v56  ;;  %v16057_v0 = vadd.f32 %v15977_v13, %v4634_v19  ;;  %v18418_v13 = vld [vmem:[#allocation37_spill] sm:$0xff]  ;;  %v6783_v8 = vld [vmem:[#allocation2 + $0x1e7] sm:$0xff] }
 0x3cd   : > { %v4570_v26 = vpop.f32.mrf.mxu1 }
 0x3ce   : > { %v16059_v61 = vpop.f32.mrf.mxu0  ;;  %v4635_v11 = vadd.f32 %v4570_v26, %v18416_v35  ;;  %v16067_v34 = vadd.f32 %v15983_v30, %v4637_v47  ;;  %v16100_v26 = vld [vmem:[#allocation2 + $0x1ff] sm:$0xff] }
 0x3cf   : > { %v11839_v62 = vpop.f32.mrf.mxu1  ;;  %12054 = vmatmul.mubr.msk.bf16.gmra.mxu1 %vm1178_vm0, %v16061_v41  ;;  %v7096_v35 = vld [vmem:[#allocation2 + $0x2d8] sm:$0xff] }
 0x3d0   : > { %18417 = vst [vmem:[#allocation30_spill] sm:$0xff] %v16067_v34  ;;  %v16072_v32 = vpop.f32.mrf.mxu0  ;;  %12138 = vmatmul.mubr.msk.bf16.vlgmr.msra.gmra.mxu0 %vm1178_vm0, %v15887_v52  ;;  %v4640_v19 = vadd.f32 %v11839_v62, %v18418_v13  ;;  %12057 = vmatprep.mubr.msk.bf16.mxu1 %vm1178_vm0, %v16064_v48  ;;  %v16084_v30 = vadd.f32 %v15989_v39, %v4635_v11  ;;  %v6202_v52 = vld [vmem:[#allocation2 + $0x488] sm:$0xff] }
 0x3d1   : > { %12141 = vmatprep.mubr.msk.bf16.mxu0 %vm1178_vm0, %v15919_v1  ;;  %v4583_v25 = vpop.f32.mrf.mxu1  ;;  %12206 = vmatpush3.bf16.msra.mxu0 %v15799_v15  ;;  %v16096_v1 = vld [vmem:[%s18271_s8 + $0x178] sm:$0xff]   ;;  %v7097_v15 = vld [vmem:[#allocation2 + $0x2f0] sm:$0xff]  ;;  %v6219_v13 = vpack.c.bf16 %v6203_v49, %v6202_v52  ;;  %v16137_v49 = vld [vmem:[#allocation2 + $0x247] sm:$0xff] }
 0x3d2   : > { %18419 = vst [vmem:[#allocation40_spill] sm:$0xff] %v16084_v30  ;;  %v16086_v53 = vpop.f32.mrf.mxu0  ;;  %v4638_v18 = vadd.f32 %v4583_v25, %v15805_v12  ;;  %12207 = vmatprep.subr.bf16.mxu0 %v12653_v14  ;;  %v16091_v56 = vadd.f32 %v16003_v27, %v4640_v19  ;;  %v6815_v25 = vpack.c.bf16 %v16100_v26, %v6783_v8  ;;  %v16130_v52 = vld [vmem:[#allocation2 + $0x22f] sm:$0xff] }
 0x3d3   : > { %v11840_v39 = vpop.f32.mrf.mxu1 }
 0x3d4   : > { %18420 = vst [vmem:[#allocation41_spill] sm:$0xff] %v16091_v56  ;;  %v16098_v47 = vpop.f32.mrf.mxu0  ;;  %v4641_v12 = vadd.f32 %v11840_v39, %v15816_v5  ;;  %v16104_v11 = vadd.f32 %v16015_v46, %v4638_v18  ;;  %v7124_v56 = vpack.c.bf16 %v7097_v15, %v7096_v35  ;;  %v16128_v18 = vld [vmem:[#allocation2 + $0x217] sm:$0xff] }
 0x3d5   : > { %v4586_v62 = vpop.f32.mrf.mxu1  ;;  %12208 = vmatpush3.bf16.msra.mxu0 %v12653_v14  ;;  %v6816_v15 = vpack.c.bf16 %v16130_v52, %v16128_v18 }
 0x3d6   : > { %v16106_v27 = vpop.f32.mrf.mxu0  ;;  %v4639_v19 = vadd.f32 %v4586_v62, %v15827_v58  ;;  %v16111_v30 = vadd.f32 %v16021_v4, %v4641_v12  ;;  %12277 = vmatprep.subr.bf16.mxu0 %v16096_v1 }
 0x3d7   : > { %v11843_v34 = vpop.f32.mrf.mxu1  ;;  %12058 = vmatmul.mubr.msk.bf16.gmra.mxu1 %vm1178_vm0, %v6219_v13 }
 0x3d8   : > { %v16114_v5 = vpop.f32.mrf.mxu0  ;;  %12142 = vmatmul.mubr.msk.bf16.gmra.mxu0 %vm1178_vm0, %v15924_v33  ;;  %v4644_v46 = vadd.f32 %v11843_v34, %v15833_v10  ;;  %12101 = vmatprep.mubr.msk.bf16.mxu1 %vm1178_vm0, %v6815_v25  ;;  %v16123_v58 = vadd.f32 %v16027_v50, %v4639_v19 }
 0x3d9   : > { %12145 = vmatprep.mubr.msk.bf16.mxu0 %vm1178_vm0, %v7124_v56  ;;  %v4599_v4 = vpop.f32.mrf.mxu1  ;;  %v16139_v56 = vld [vmem:[#allocation2 + $0x25f] sm:$0xff] }
 0x3da   : > { %v16125_v14 = vpop.f32.mrf.mxu0  ;;  %v4642_v8 = vadd.f32 %v4599_v4, %v15839_v16  ;;  %v16133_v33 = vadd.f32 %v16036_v28, %v4644_v46  ;;  %v12651_v28 = vld [vmem:[%s18271_s8 + $0x140] sm:$0xff]   ;;  %v6817_v62 = vpack.c.bf16 %v16139_v56, %v16137_v49  ;;  %v16181_v46 = vld [vmem:[#allocation2 + $0x28f] sm:$0xff] }
 0x3db   : > { %v11844_v10 = vpop.f32.mrf.mxu1 }
 0x3dc   : > { %v16135_v34 = vpop.f32.mrf.mxu0  ;;  %v4645_v50 = vadd.f32 %v11844_v10, %v15850_v38  ;;  %v16143_v39 = vadd.f32 %v16047_v21, %v4642_v8  ;;  %v16188_v10 = vld [vmem:[#allocation2 + $0x2ef] sm:$0xff] }
 0x3dd   : > { %v4602_v16 = vpop.f32.mrf.mxu1 }
 0x3de   : > { %v16145_v35 = vpop.f32.mrf.mxu0  ;;  %v4643_v12 = vadd.f32 %v4602_v16, %v15862_v6  ;;  %v16156_v38 = vadd.f32 %v16053_v54, %v4645_v50  ;;  %v7104_v50 = vld [vmem:[#allocation2 + $0x3c8] sm:$0xff]  ;;  %v7105_v16 = vld [vmem:[#allocation2 + $0x3e0] sm:$0xff] }
 0x3df   : > { %v11887_v21 = vpop.f32.mrf.mxu1  ;;  %12102 = vmatmul.mubr.msk.bf16.vlgmr.msra.gmra.mxu1 %vm1178_vm0, %v6816_v15 }
 0x3e0   : > { %v16158_v13 = vpop.f32.mrf.mxu0  ;;  %12146 = vmatmul.mubr.msk.bf16.gmra.mxu0 %vm1178_vm0, %v15959_v40  ;;  %v5226_v19 = vadd.f32 %v11887_v21, %v15874_v45  ;;  %12170 = vmatpush3.bf16.msra.mxu1 %v15870_v17  ;;  %v16167_v6 = vadd.f32 %v16059_v61, %v4643_v12  ;;  %v16176_v40 = vld [vmem:[%s18271_s8 + $0x168] sm:$0xff]   ;;  %v16179_v17 = vld [vmem:[#allocation2 + $0x277] sm:$0xff] }
 0x3e1   : > { %12105 = vmatprep.mubr.msk.bf16.mxu1 %vm1178_vm0, %v6817_v62  ;;  %12149 = vmatprep.mubr.msk.bf16.mxu0 %vm1178_vm0, %v15991_v60  ;;  %v5097_v54 = vpop.f32.mrf.mxu1  ;;  %v6791_v61 = vld [vmem:[#allocation2 + $0x2d7] sm:$0xff] }
 0x3e2   : > { %v16171_v25 = vpop.f32.mrf.mxu0  ;;  %12171 = vmatprep.subr.bf16.mxu1 %v12651_v28  ;;  %v5224_v45 = vadd.f32 %v5097_v54, %v15880_v20  ;;  %v16184_v4 = vadd.f32 %v16072_v32, %v5226_v19  ;;  %v6818_v32 = vpack.c.bf16 %v16181_v46, %v16179_v17  ;;  %v6819_v19 = vpack.c.bf16 %v16188_v10, %v6791_v61 }
 0x3e3   : > { %v11888_v60 = vpop.f32.mrf.mxu1  ;;  %v7128_v54 = vpack.c.bf16 %v7105_v16, %v7104_v50  ;;  %v16220_v50 = vld [vmem:[#allocation2 + $0x31f] sm:$0xff] }
 0x3e4   : > { %18421 = vst [vmem:[#allocation42_spill] sm:$0xff] %v16184_v4  ;;  %v16186_v8 = vpop.f32.mrf.mxu0  ;;  %v5227_v15 = vadd.f32 %v11888_v60, %v15892_v55  ;;  %12172 = vmatpush3.bf16.msra.mxu1 %v12651_v28  ;;  %v16192_v20 = vadd.f32 %v16086_v53, %v5224_v45  ;;  %v16218_v60 = vld [vmem:[#allocation2 + $0x307] sm:$0xff] }
 0x3e5   : > { %v5100_v12 = vpop.f32.mrf.mxu1  ;;  %12241 = vmatprep.subr.bf16.mxu1 %v16176_v40 }
 0x3e6   : > { %v16194_v62 = vpop.f32.mrf.mxu0  ;;  %v5225_v21 = vadd.f32 %v5100_v12, %v15903_v59  ;;  %v16202_v4 = vadd.f32 %v16098_v47, %v5227_v15  ;;  %v16227_v15 = vld [vmem:[#allocation2 + $0x337] sm:$0xff]  ;;  %v16229_v12 = vld [vmem:[#allocation2 + $0x34f] sm:$0xff] }
 0x3e7   : > { %v11891_v55 = vpop.f32.mrf.mxu1  ;;  %12106 = vmatmul.mubr.msk.bf16.gmra.mxu1 %vm1178_vm0, %v6818_v32 }
 0x3e8   : > { %v16204_v28 = vpop.f32.mrf.mxu0  ;;  %12150 = vmatmul.mubr.msk.bf16.gmra.mxu0 %vm1178_vm0, %v15996_v42  ;;  %v5230_v53 = vadd.f32 %v11891_v55, %v15909_v7  ;;  %12109 = vmatprep.mubr.msk.bf16.mxu1 %vm1178_vm0, %v6819_v19  ;;  %v16213_v59 = vadd.f32 %v16106_v27, %v5225_v21  ;;  %v6820_v19 = vpack.c.bf16 %v16220_v50, %v16218_v60 }
 0x3e9   : > { %12153 = vmatprep.mubr.msk.bf16.mxu0 %vm1178_vm0, %v7128_v54  ;;  %v5113_v45 = vpop.f32.mrf.mxu1  ;;  %v6821_v54 = vpack.c.bf16 %v16229_v12, %v16227_v15 }
 0x3ea   : > { %v16215_v47 = vpop.f32.mrf.mxu0  ;;  %v5228_v61 = vadd.f32 %v5113_v45, %v15915_v57  ;;  %v16223_v42 = vadd.f32 %v16114_v5, %v5230_v53 }
 0x3eb   : > { %v11892_v7 = vpop.f32.mrf.mxu1 }
 0x3ec   : > { %18422 = vst [vmem:[#allocation43_spill] sm:$0xff] %v16223_v42  ;;  %v16225_v16 = vpop.f32.mrf.mxu0  ;;  %v5231_v27 = vadd.f32 %v11892_v7, %v15929_v51  ;;  %v16233_v32 = vadd.f32 %v16125_v14, %v5228_v61  ;;  %v16260_v7 = vld [vmem:[#allocation2 + $0x367] sm:$0xff] }
 0x3ed   : > { %v5116_v57 = vpop.f32.mrf.mxu1 }
 0x3ee   : > { %18423 = vst [vmem:[#allocation29_spill] sm:$0xff] %v16233_v32  ;;  %v16235_v21 = vpop.f32.mrf.mxu0  ;;  %v5229_v5 = vadd.f32 %v5116_v57, %v15941_v3  ;;  %v16243_v55 = vadd.f32 %v16135_v34, %v5231_v27  ;;  %v16262_v27 = vld [vmem:[#allocation2 + $0x37f] sm:$0xff] }
 0x3ef   : > { %v11895_v53 = vpop.f32.mrf.mxu1  ;;  %12110 = vmatmul.mubr.msk.bf16.gmra.mxu1 %vm1178_vm0, %v6820_v19 }
 0x3f0   : > { %18424 = vst [vmem:[#allocation27_spill] sm:$0xff] %v16243_v55  ;;  %v16245_v45 = vpop.f32.mrf.mxu0  ;;  %12154 = vmatmul.mubr.msk.bf16.gmra.mxu0 %vm1178_vm0, %v16031_v22  ;;  %v5234_v51 = vadd.f32 %v11895_v53, %v15947_v9  ;;  %12113 = vmatprep.mubr.msk.bf16.mxu1 %vm1178_vm0, %v6821_v54  ;;  %v16255_v3 = vadd.f32 %v16145_v35, %v5229_v5  ;;  %v7112_v22 = vld [vmem:[#allocation2 + $0x4b8] sm:$0xff]  ;;  %v7113_v35 = vld [vmem:[#allocation2 + $0x4d0] sm:$0xff] }
 0x3f1   : > { %12157 = vmatprep.mubr.msk.bf16.mxu0 %vm1178_vm0, %v16061_v41  ;;  %v5129_v14 = vpop.f32.mrf.mxu1  ;;  %v6799_v41 = vld [vmem:[#allocation2 + $0x3c7] sm:$0xff]  ;;  %v16269_v54 = vld [vmem:[#allocation2 + $0x3df] sm:$0xff] }
 0x3f2   : > { %18425 = vst [vmem:[#allocation34_spill] sm:$0xff] %v16255_v3  ;;  %v16257_v34 = vpop.f32.mrf.mxu0  ;;  %v5232_v61 = vadd.f32 %v5129_v14, %v15953_v43  ;;  %v16265_v9 = vadd.f32 %v16158_v13, %v5234_v51  ;;  %v6822_v3 = vpack.c.bf16 %v16262_v27, %v16260_v7  ;;  %v6823_v51 = vpack.c.bf16 %v16269_v54, %v6799_v41  ;;  %v16300_v41 = vld [vmem:[#allocation2 + $0x40f] sm:$0xff] }
 0x3f3   : > { %v11896_v57 = vpop.f32.mrf.mxu1 }
 0x3f4   : > { %18426 = vst [vmem:[#allocation28_spill] sm:$0xff] %v16265_v9  ;;  %v16267_v19 = vpop.f32.mrf.mxu0  ;;  %v5235_v5 = vadd.f32 %v11896_v57, %v15964_v63  ;;  %v16273_v53 = vadd.f32 %v16171_v25, %v5232_v61  ;;  %v7132_v9 = vpack.c.bf16 %v7113_v35, %v7112_v22  ;;  %v7114_v61 = vld [vmem:[#allocation2 + $0x4e8] sm:$0xff]  ;;  %v7115_v22 = vld [vmem:[#allocation2 + $0x500] sm:$0xff] }
 0x3f5   : > { %v5132_v43 = vpop.f32.mrf.mxu1  ;;  %v16309_v35 = vld [vmem:[#allocation2 + $0x43f] sm:$0xff] }
 0x3f6   : > { %18427 = vst [vmem:[#allocation33_spill] sm:$0xff] %v16273_v53  ;;  %v16275_v14 = vpop.f32.mrf.mxu0  ;;  %v5233_v13 = vadd.f32 %v5132_v43, %v15975_v23  ;;  %v16282_v55 = vadd.f32 %v16186_v8, %v5235_v5  ;;  %v7117_v5 = vld [vmem:[#allocation2 + $0x530] sm:$0xff] }
 0x3f7   : > { %v11899_v32 = vpop.f32.mrf.mxu1  ;;  %12114 = vmatmul.mubr.msk.bf16.gmra.mxu1 %vm1178_vm0, %v6822_v3  ;;  %v16298_v3 = vld [vmem:[#allocation2 + $0x3f7] sm:$0xff] }
 0x3f8   : > { %18428 = vst [vmem:[#allocation32_spill] sm:$0xff] %v16282_v55  ;;  %v16284_v42 = vpop.f32.mrf.mxu0  ;;  %12158 = vmatmul.mubr.msk.bf16.gmra.mxu0 %vm1178_vm0, %v16064_v48  ;;  %v5238_v63 = vadd.f32 %v11899_v32, %v15981_v29  ;;  %12117 = vmatprep.mubr.msk.bf16.mxu1 %vm1178_vm0, %v6823_v51  ;;  %v16293_v23 = vadd.f32 %v16194_v62, %v5233_v13  ;;  %v7116_v48 = vld [vmem:[#allocation2 + $0x518] sm:$0xff]  ;;  %v16307_v62 = vld [vmem:[#allocation2 + $0x427] sm:$0xff] }
 0x3f9   : > { %12161 = vmatprep.mubr.msk.bf16.mxu0 %vm1178_vm0, %v7132_v9  ;;  %v5145_v25 = vpop.f32.mrf.mxu1  ;;  %v7134_v55 = vpack.c.bf16 %v7117_v5, %v7116_v48 }
 0x3fa   : > { %18429 = vst [vmem:[#allocation31_spill] sm:$0xff] %v16293_v23  ;;  %v16295_v8 = vpop.f32.mrf.mxu0  ;;  %v5236_v57 = vadd.f32 %v5145_v25, %v15987_v37  ;;  %v16303_v29 = vadd.f32 %v16204_v28, %v5238_v63  ;;  %v6824_v28 = vpack.c.bf16 %v16300_v41, %v16298_v3  ;;  %v7133_v63 = vpack.c.bf16 %v7115_v22, %v7114_v61  ;;  %v18431_v25 = vld [vmem:[#allocation38_spill] sm:$0xff] }
 0x3fb   : > { %v11900_v32 = vpop.f32.mrf.mxu1  ;;  %v6825_v23 = vpack.c.bf16 %v16309_v35, %v16307_v62 }
 0x3fc   : > { %18430 = vst [vmem:[#allocation35_spill] sm:$0xff] %v16303_v29  ;;  %v16305_v9 = vpop.f32.mrf.mxu0  ;;  %v5239_v43 = vadd.f32 %v11900_v32, %v16001_v24  ;;  %v16313_v37 = vadd.f32 %v16215_v47, %v5236_v57  ;;  %v18433_v47 = vld [vmem:[#allocation39_spill] sm:$0xff] }
 0x3fd   : > { %v5148_v13 = vpop.f32.mrf.mxu1 }
 0x3fe   : > { %v16315_v51 = vpop.f32.mrf.mxu0  ;;  %v5237_v29 = vadd.f32 %v5148_v13, %v18431_v25  ;;  %v16323_v53 = vadd.f32 %v16225_v16, %v5239_v43  ;;  %v7118_v16 = vld [vmem:[#allocation2 + $0x548] sm:$0xff]  ;;  %v16338_v43 = vld [vmem:[#allocation2 + $0x457] sm:$0xff] }
 0x3ff   : > { %v11903_v24 = vpop.f32.mrf.mxu1  ;;  %12118 = vmatmul.mubr.msk.bf16.gmra.mxu1 %vm1178_vm0, %v6824_v28  ;;  %v16340_v13 = vld [vmem:[#allocation2 + $0x46f] sm:$0xff]  ;;  %v7119_v28 = vld [vmem:[#allocation2 + $0x560] sm:$0xff] }
 0x400   : > { %18432 = vst [vmem:[#allocation36_spill] sm:$0xff] %v16323_v53  ;;  %v16325_v32 = vpop.f32.mrf.mxu0  ;;  %12162 = vmatmul.mubr.msk.bf16.gmra.mxu0 %vm1178_vm0, %v7133_v63  ;;  %v5242_v57 = vadd.f32 %v11903_v24, %v18433_v47  ;;  %12121 = vmatprep.mubr.msk.bf16.mxu1 %vm1178_vm0, %v6825_v23  ;;  %v16333_v61 = vadd.f32 %v16235_v21, %v5237_v29  ;;  %v16347_v21 = vld [vmem:[#allocation2 + $0x4cf] sm:$0xff] }
 0x401   : > { %12165 = vmatprep.mubr.msk.bf16.mxu0 %vm1178_vm0, %v7134_v55  ;;  %v5161_v22 = vpop.f32.mrf.mxu1  ;;  %v6807_v55 = vld [vmem:[#allocation2 + $0x4b7] sm:$0xff] }
 0x402   : > { %18434 = vst [vmem:[#allocation37_spill] sm:$0xff] %v16333_v61  ;;  %v16335_v48 = vpop.f32.mrf.mxu0  ;;  %v5240_v5 = vadd.f32 %v5161_v22, %v16025_v31  ;;  %v16343_v63 = vadd.f32 %v16245_v45, %v5242_v57  ;;  %v6826_v22 = vpack.c.bf16 %v16340_v13, %v16338_v43  ;;  %v7135_v61 = vpack.c.bf16 %v7119_v28, %v7118_v16  ;;  %v16377_v16 = vld [vmem:[#allocation2 + $0x4e7] sm:$0xff]  ;;  %v16379_v28 = vld [vmem:[#allocation2 + $0x4ff] sm:$0xff] }
 0x403   : > { %v11904_v23 = vpop.f32.mrf.mxu1  ;;  %v6827_v57 = vpack.c.bf16 %v16347_v21, %v6807_v55  ;;  %v16386_v55 = vld [vmem:[#allocation2 + $0x517] sm:$0xff] }
 0x404   : > { %18435 = vst [vmem:[#allocation38_spill] sm:$0xff] %v16343_v63  ;;  %v16345_v25 = vpop.f32.mrf.mxu0  ;;  %v5243_v29 = vadd.f32 %v11904_v23, %v16034_v2  ;;  %v16351_v24 = vadd.f32 %v16257_v34, %v5240_v5  ;;  %v7731_v63 = vpack.c.bf16 %v16128_v18, %v16100_v26 }
 0x405   : > { %v5164_v31 = vpop.f32.mrf.mxu1 }
 0x406   : > { %v16353_v47 = vpop.f32.mrf.mxu0  ;;  %v5241_v45 = vadd.f32 %v5164_v31, %v16045_v44  ;;  %v16362_v53 = vadd.f32 %v16267_v19, %v5243_v29 }
 0x407   : > { %v11907_v2 = vpop.f32.mrf.mxu1  ;;  %12122 = vmatmul.mubr.msk.bf16.gmra.mxu1 %vm1178_vm0, %v6826_v22 }
 0x408   : > { %v16364_v34 = vpop.f32.mrf.mxu0  ;;  %12166 = vmatmul.mubr.msk.bf16.gmra.mxu0 %vm1178_vm0, %v7135_v61  ;;  %v5246_v5 = vadd.f32 %v11907_v2, %v16051_v36  ;;  %12125 = vmatprep.mubr.msk.bf16.mxu1 %vm1178_vm0, %v6827_v57  ;;  %v16372_v44 = vadd.f32 %v16275_v14, %v5241_v45  ;;  %v18436_v14 = vld [vmem:[#allocation30_spill] sm:$0xff]  ;;  %v6828_v45 = vpack.c.bf16 %v16379_v28, %v16377_v16  ;;  %v18437_v57 = vld [vmem:[#allocation40_spill] sm:$0xff] }
 0x409   : > { %12209 = vmatprep.mubr.msk.bf16.mxu0 %vm1178_vm0, %v7731_v63  ;;  %v5177_v26 = vpop.f32.mrf.mxu1  ;;  %v16388_v63 = vld [vmem:[#allocation2 + $0x52f] sm:$0xff] }
 0x40a   : > { %v16374_v18 = vpop.f32.mrf.mxu0  ;;  %v5244_v19 = vadd.f32 %v5177_v26, %v16057_v0  ;;  %v16382_v61 = vadd.f32 %v16284_v42, %v5246_v5  ;;  %v7732_v42 = vpack.c.bf16 %v16137_v49, %v16130_v52  ;;  %v6829_v5 = vpack.c.bf16 %v16388_v63, %v16386_v55  ;;  %v18439_v52 = vld [vmem:[#allocation41_spill] sm:$0xff] }
 0x40b   : > { %v11908_v36 = vpop.f32.mrf.mxu1  ;;  %v7733_v26 = vpack.c.bf16 %v16179_v17, %v16139_v56 }
 0x40c   : > { %v16384_v23 = vpop.f32.mrf.mxu0  ;;  %v5247_v29 = vadd.f32 %v11908_v36, %v18436_v14  ;;  %v16392_v31 = vadd.f32 %v16295_v8, %v5244_v19  ;;  %v12657_v19 = vld [vmem:[%s18271_s8 + $0x170] sm:$0xff]  }
 0x40d   : > { %v5180_v0 = vpop.f32.mrf.mxu1 }
 0x40e   : > { %v16394_v22 = vpop.f32.mrf.mxu0  ;;  %v5245_v2 = vadd.f32 %v5180_v0, %v18437_v57  ;;  %v16406_v8 = vadd.f32 %v16305_v9, %v5247_v29  ;;  %v7706_v29 = vld [vmem:[#allocation2 + $0x2a7] sm:$0xff] }
 0x40f   : > { %v11911_v36 = vpop.f32.mrf.mxu1  ;;  %12126 = vmatmul.mubr.msk.bf16.gmra.mxu1 %vm1178_vm0, %v6828_v45  ;;  %v16425_v45 = vld [vmem:[#allocation2 + $0x547] sm:$0xff] }
 0x410   : > { %18438 = vst [vmem:[#allocation39_spill] sm:$0xff] %v16406_v8  ;;  %v16411_v14 = vpop.f32.mrf.mxu0  ;;  %12210 = vmatmul.mubr.msk.bf16.vlgmr.msra.gmra.mxu0 %vm1178_vm0, %v7732_v42  ;;  %v5250_v49 = vadd.f32 %v11911_v36, %v18439_v52  ;;  %12129 = vmatprep.mubr.msk.bf16.mxu1 %vm1178_vm0, %v6829_v5  ;;  %v16419_v56 = vadd.f32 %v16315_v51, %v5245_v2  ;;  %v16427_v42 = vld [vmem:[#allocation2 + $0x55f] sm:$0xff] }
 0x411   : > { %12213 = vmatprep.mubr.msk.bf16.mxu0 %vm1178_vm0, %v7733_v26  ;;  %v5193_v17 = vpop.f32.mrf.mxu1  ;;  %12278 = vmatpush3.bf16.msra.mxu0 %v16096_v1  ;;  %v16435_v51 = vld [vmem:[%s18271_s8 + $0x198] sm:$0xff]   ;;  %v7393_v26 = vld [vmem:[#allocation2 + $0x1e9] sm:$0xff]  ;;  %v16439_v1 = vld [vmem:[#allocation2 + $0x201] sm:$0xff]  ;;  %v7735_v8 = vpack.c.bf16 %v16218_v60, %v16188_v10 }
 0x412   : > { %18440 = vst [vmem:[#allocation30_spill] sm:$0xff] %v16419_v56  ;;  %v16421_v9 = vpop.f32.mrf.mxu0  ;;  %v5248_v0 = vadd.f32 %v5193_v17, %v16104_v11  ;;  %12279 = vmatprep.subr.bf16.mxu0 %v12657_v19  ;;  %v16430_v57 = vadd.f32 %v16325_v32, %v5250_v49  ;;  %v6830_v32 = vpack.c.bf16 %v16427_v42, %v16425_v45 }
 0x413   : > { %v11912_v2 = vpop.f32.mrf.mxu1  ;;  %v7734_v49 = vpack.c.bf16 %v7706_v29, %v16181_v46  ;;  %v7425_v56 = vpack.c.bf16 %v16439_v1, %v7393_v26  ;;  %v16473_v29 = vld [vmem:[#allocation2 + $0x231] sm:$0xff] }
 0x414   : > { %18441 = vst [vmem:[#allocation40_spill] sm:$0xff] %v16430_v57  ;;  %v16437_v5 = vpop.f32.mrf.mxu0  ;;  %v5251_v11 = vadd.f32 %v11912_v2, %v16111_v30  ;;  %v16443_v36 = vadd.f32 %v16335_v48, %v5248_v0 }
 0x415   : > { %v5196_v52 = vpop.f32.mrf.mxu1  ;;  %12280 = vmatpush3.bf16.msra.mxu0 %v12657_v19  ;;  %v16471_v19 = vld [vmem:[#allocation2 + $0x219] sm:$0xff] }
 0x416   : > { %v16445_v17 = vpop.f32.mrf.mxu0  ;;  %v5249_v57 = vadd.f32 %v5196_v52, %v16123_v58  ;;  %v16455_v30 = vadd.f32 %v16345_v25, %v5251_v11  ;;  %12349 = vmatprep.subr.bf16.mxu0 %v16435_v51  ;;  %v7426_v52 = vpack.c.bf16 %v16473_v29, %v16471_v19 }
 0x417   : > { %v11915_v48 = vpop.f32.mrf.mxu1  ;;  %12130 = vmatmul.mubr.msk.bf16.gmra.mxu1 %vm1178_vm0, %v6830_v32  ;;  %v12655_v32 = vld [vmem:[%s18271_s8 + $0x160] sm:$0xff]  }
 0x418   : > { %v16458_v0 = vpop.f32.mrf.mxu0  ;;  %12214 = vmatmul.mubr.msk.bf16.gmra.mxu0 %vm1178_vm0, %v7734_v49  ;;  %v5254_v46 = vadd.f32 %v11915_v48, %v16133_v33  ;;  %12173 = vmatprep.mubr.msk.bf16.mxu1 %vm1178_vm0, %v7425_v56  ;;  %v16466_v58 = vadd.f32 %v16353_v47, %v5249_v57  ;;  %v16480_v56 = vld [vmem:[#allocation2 + $0x249] sm:$0xff] }
 0x419   : > { %12217 = vmatprep.mubr.msk.bf16.mxu0 %vm1178_vm0, %v7735_v8  ;;  %v5209_v10 = vpop.f32.mrf.mxu1  ;;  %v16482_v8 = vld [vmem:[#allocation2 + $0x261] sm:$0xff] }
 0x41a   : > { %v16468_v60 = vpop.f32.mrf.mxu0  ;;  %v5252_v25 = vadd.f32 %v5209_v10, %v16143_v39  ;;  %v16476_v2 = vadd.f32 %v16364_v34, %v5254_v46  ;;  %v7736_v34 = vpack.c.bf16 %v16227_v15, %v16220_v50  ;;  %v7737_v50 = vpack.c.bf16 %v16260_v7, %v16229_v12  ;;  %v18442_v15 = vld [vmem:[#allocation42_spill] sm:$0xff] }
 0x41b   : > { %v11916_v33 = vpop.f32.mrf.mxu1  ;;  %v16524_v7 = vld [vmem:[#allocation2 + $0x279] sm:$0xff] }
 0x41c   : > { %v16478_v26 = vpop.f32.mrf.mxu0  ;;  %v5255_v47 = vadd.f32 %v11916_v33, %v16156_v38  ;;  %v16486_v57 = vadd.f32 %v16374_v18, %v5252_v25  ;;  %v7427_v38 = vpack.c.bf16 %v16482_v8, %v16480_v56  ;;  %v16521_v33 = vld [vmem:[%s18271_s8 + $0x188] sm:$0xff]  }
 0x41d   : > { %v5212_v39 = vpop.f32.mrf.mxu1 }
 0x41e   : > { %v16488_v11 = vpop.f32.mrf.mxu0  ;;  %v5253_v49 = vadd.f32 %v5212_v39, %v16167_v6  ;;  %v16501_v18 = vadd.f32 %v16384_v23, %v5255_v47  ;;  %v7714_v47 = vld [vmem:[#allocation2 + $0x397] sm:$0xff] }
 0x41f   : > { %v11959_v48 = vpop.f32.mrf.mxu1  ;;  %12174 = vmatmul.mubr.msk.bf16.vlgmr.msra.gmra.mxu1 %vm1178_vm0, %v7426_v52 }
 0x420   : > { %v16503_v46 = vpop.f32.mrf.mxu0  ;;  %12218 = vmatmul.mubr.msk.bf16.gmra.mxu0 %vm1178_vm0, %v7736_v34  ;;  %v5836_v10 = vadd.f32 %v11959_v48, %v18442_v15  ;;  %12242 = vmatpush3.bf16.msra.mxu1 %v16176_v40  ;;  %v16513_v6 = vadd.f32 %v16394_v22, %v5253_v49  ;;  %v16526_v40 = vld [vmem:[#allocation2 + $0x291] sm:$0xff]  ;;  %v7401_v34 = vld [vmem:[#allocation2 + $0x2d9] sm:$0xff] }
 0x421   : > { %12177 = vmatprep.mubr.msk.bf16.mxu1 %vm1178_vm0, %v7427_v38  ;;  %12221 = vmatprep.mubr.msk.bf16.mxu0 %vm1178_vm0, %v7737_v50  ;;  %v5707_v23 = vpop.f32.mrf.mxu1  ;;  %v16533_v49 = vld [vmem:[#allocation2 + $0x2f1] sm:$0xff]  ;;  %v7428_v15 = vpack.c.bf16 %v16526_v40, %v16524_v7 }
 0x422   : > { %v16516_v25 = vpop.f32.mrf.mxu0  ;;  %12243 = vmatprep.subr.bf16.mxu1 %v12655_v32  ;;  %v5834_v12 = vadd.f32 %v5707_v23, %v16192_v20  ;;  %v16529_v22 = vadd.f32 %v16411_v14, %v5836_v10  ;;  %v7738_v14 = vpack.c.bf16 %v7714_v47, %v16262_v27  ;;  %v7429_v23 = vpack.c.bf16 %v16533_v49, %v7401_v34  ;;  %v18445_v27 = vld [vmem:[#allocation43_spill] sm:$0xff]  ;;  %v16565_v34 = vld [vmem:[#allocation2 + $0x309] sm:$0xff] }
 0x423   : > { %v11960_v39 = vpop.f32.mrf.mxu1 }
 0x424   : > { %v16531_v52 = vpop.f32.mrf.mxu0  ;;  %v5837_v38 = vadd.f32 %v11960_v39, %v16202_v4  ;;  %12244 = vmatpush3.bf16.msra.mxu1 %v12655_v32  ;;  %v16537_v48 = vadd.f32 %v16421_v9, %v5834_v12  ;;  %v7739_v4 = vpack.c.bf16 %v16298_v3, %v16269_v54 }
 0x425   : > { %v5710_v20 = vpop.f32.mrf.mxu1  ;;  %12313 = vmatprep.subr.bf16.mxu1 %v16521_v33 }
 0x426   : > { %18443 = vst [vmem:[#allocation41_spill] sm:$0xff] %v16537_v48  ;;  %v16539_v50 = vpop.f32.mrf.mxu0  ;;  %v5835_v10 = vadd.f32 %v5710_v20, %v16213_v59  ;;  %v16550_v9 = vadd.f32 %v16437_v5, %v5837_v38  ;;  %v18447_v5 = vld [vmem:[#allocation29_spill] sm:$0xff]  ;;  %v16567_v38 = vld [vmem:[#allocation2 + $0x321] sm:$0xff]  ;;  %v7743_v48 = vpack.c.bf16 %v16377_v16, %v16347_v21 }
 0x427   : > { %v11963_v32 = vpop.f32.mrf.mxu1  ;;  %12178 = vmatmul.mubr.msk.bf16.gmra.mxu1 %vm1178_vm0, %v7428_v15 }
 0x428   : > { %18444 = vst [vmem:[#allocation42_spill] sm:$0xff] %v16550_v9  ;;  %v16552_v12 = vpop.f32.mrf.mxu0  ;;  %12222 = vmatmul.mubr.msk.bf16.gmra.mxu0 %vm1178_vm0, %v7738_v14  ;;  %v5840_v47 = vadd.f32 %v11963_v32, %v18445_v27  ;;  %12181 = vmatprep.mubr.msk.bf16.mxu1 %vm1178_vm0, %v7429_v23  ;;  %v16560_v59 = vadd.f32 %v16445_v17, %v5835_v10  ;;  %v16574_v23 = vld [vmem:[#allocation2 + $0x339] sm:$0xff] }
 0x429   : > { %12225 = vmatprep.mubr.msk.bf16.mxu0 %vm1178_vm0, %v7739_v4  ;;  %v5723_v54 = vpop.f32.mrf.mxu1  ;;  %v16576_v4 = vld [vmem:[#allocation2 + $0x351] sm:$0xff]  ;;  %v18449_v17 = vld [vmem:[#allocation27_spill] sm:$0xff] }
 0x42a   : > { %18446 = vst [vmem:[#allocation43_spill] sm:$0xff] %v16560_v59  ;;  %v16562_v3 = vpop.f32.mrf.mxu0  ;;  %v5838_v39 = vadd.f32 %v5723_v54, %v18447_v5  ;;  %v16570_v20 = vadd.f32 %v16458_v0, %v5840_v47  ;;  %v7430_v5 = vpack.c.bf16 %v16567_v38, %v16565_v34  ;;  %v7740_v0 = vpack.c.bf16 %v16307_v62, %v16300_v41  ;;  %v18451_v47 = vld [vmem:[#allocation34_spill] sm:$0xff] }
 0x42b   : > { %v11964_v15 = vpop.f32.mrf.mxu1  ;;  %v7431_v59 = vpack.c.bf16 %v16576_v4, %v16574_v23 }
 0x42c   : > { %18448 = vst [vmem:[#allocation29_spill] sm:$0xff] %v16570_v20  ;;  %v16572_v14 = vpop.f32.mrf.mxu0  ;;  %v5841_v10 = vadd.f32 %v11964_v15, %v18449_v17  ;;  %v16580_v32 = vadd.f32 %v16468_v60, %v5838_v39  ;;  %v7741_v15 = vpack.c.bf16 %v16338_v43, %v16309_v35 }
 0x42d   : > { %v5726_v27 = vpop.f32.mrf.mxu1 }
 0x42e   : > { %18450 = vst [vmem:[#allocation27_spill] sm:$0xff] %v16580_v32  ;;  %v16582_v54 = vpop.f32.mrf.mxu0  ;;  %v5839_v20 = vadd.f32 %v5726_v27, %v18451_v47  ;;  %v16594_v60 = vadd.f32 %v16478_v26, %v5841_v10  ;;  %v18453_v32 = vld [vmem:[#allocation28_spill] sm:$0xff]  ;;  %v18455_v26 = vld [vmem:[#allocation33_spill] sm:$0xff] }
 0x42f   : > { %v11967_v39 = vpop.f32.mrf.mxu1  ;;  %12182 = vmatmul.mubr.msk.bf16.gmra.mxu1 %vm1178_vm0, %v7430_v5  ;;  %v16609_v27 = vld [vmem:[#allocation2 + $0x369] sm:$0xff]  ;;  %v16611_v47 = vld [vmem:[#allocation2 + $0x381] sm:$0xff] }
 0x430   : > { %18452 = vst [vmem:[#allocation34_spill] sm:$0xff] %v16594_v60  ;;  %v16596_v17 = vpop.f32.mrf.mxu0  ;;  %12226 = vmatmul.mubr.msk.bf16.gmra.mxu0 %vm1178_vm0, %v7740_v0  ;;  %v5844_v41 = vadd.f32 %v11967_v39, %v18453_v32  ;;  %12185 = vmatprep.mubr.msk.bf16.mxu1 %vm1178_vm0, %v7431_v59  ;;  %v16604_v62 = vadd.f32 %v16488_v11, %v5839_v20  ;;  %v7722_v5 = vld [vmem:[#allocation2 + $0x487] sm:$0xff] }
 0x431   : > { %12229 = vmatprep.mubr.msk.bf16.mxu0 %vm1178_vm0, %v7741_v15  ;;  %v5739_v35 = vpop.f32.mrf.mxu1  ;;  %v7409_v15 = vld [vmem:[#allocation2 + $0x3c9] sm:$0xff]  ;;  %v16618_v39 = vld [vmem:[#allocation2 + $0x3e1] sm:$0xff]  ;;  %v7432_v60 = vpack.c.bf16 %v16611_v47, %v16609_v27 }
 0x432   : > { %18454 = vst [vmem:[#allocation28_spill] sm:$0xff] %v16604_v62  ;;  %v16606_v43 = vpop.f32.mrf.mxu0  ;;  %v5842_v10 = vadd.f32 %v5739_v35, %v18455_v26  ;;  %v16614_v0 = vadd.f32 %v16503_v46, %v5844_v41  ;;  %v18457_v11 = vld [vmem:[#allocation32_spill] sm:$0xff]  ;;  %v7742_v46 = vpack.c.bf16 %v7722_v5, %v16340_v13  ;;  %v18459_v41 = vld [vmem:[#allocation31_spill] sm:$0xff]  ;;  %v7433_v9 = vpack.c.bf16 %v16618_v39, %v7409_v15  ;;  %v16651_v15 = vld [vmem:[#allocation2 + $0x411] sm:$0xff] }
 0x433   : > { %v11968_v32 = vpop.f32.mrf.mxu1  ;;  %v16649_v5 = vld [vmem:[#allocation2 + $0x3f9] sm:$0xff] }
 0x434   : > { %18456 = vst [vmem:[#allocation33_spill] sm:$0xff] %v16614_v0  ;;  %v16616_v59 = vpop.f32.mrf.mxu0  ;;  %v5845_v20 = vadd.f32 %v11968_v32, %v18457_v11  ;;  %v16622_v62 = vadd.f32 %v16516_v25, %v5842_v10  ;;  %v18460_v11 = vld [vmem:[#allocation35_spill] sm:$0xff] }
 0x435   : > { %v5742_v35 = vpop.f32.mrf.mxu1 }
 0x436   : > { %18458 = vst [vmem:[#allocation32_spill] sm:$0xff] %v16622_v62  ;;  %v16624_v26 = vpop.f32.mrf.mxu0  ;;  %v5843_v0 = vadd.f32 %v5742_v35, %v18459_v41  ;;  %v16634_v32 = vadd.f32 %v16531_v52, %v5845_v20 }
 0x437   : > { %v11971_v25 = vpop.f32.mrf.mxu1  ;;  %12186 = vmatmul.mubr.msk.bf16.gmra.mxu1 %vm1178_vm0, %v7432_v60 }
 0x438   : > { %v16636_v10 = vpop.f32.mrf.mxu0  ;;  %12230 = vmatmul.mubr.msk.bf16.gmra.mxu0 %vm1178_vm0, %v7742_v46  ;;  %v5848_v62 = vadd.f32 %v11971_v25, %v18460_v11  ;;  %12189 = vmatprep.mubr.msk.bf16.mxu1 %vm1178_vm0, %v7433_v9  ;;  %v16644_v13 = vadd.f32 %v16539_v50, %v5843_v0  ;;  %v16658_v9 = vld [vmem:[#allocation2 + $0x429] sm:$0xff]  ;;  %v7434_v25 = vpack.c.bf16 %v16651_v15, %v16649_v5 }
 0x439   : > { %12233 = vmatprep.mubr.msk.bf16.mxu0 %vm1178_vm0, %v7743_v48  ;;  %v5755_v21 = vpop.f32.mrf.mxu1  ;;  %v16660_v48 = vld [vmem:[#allocation2 + $0x441] sm:$0xff] }
 0x43a   : > { %v16646_v16 = vpop.f32.mrf.mxu0  ;;  %v5846_v52 = vadd.f32 %v5755_v21, %v16313_v37  ;;  %v16654_v60 = vadd.f32 %v16552_v12, %v5848_v62  ;;  %v18461_v50 = vld [vmem:[#allocation36_spill] sm:$0xff]  ;;  %v7744_v12 = vpack.c.bf16 %v16386_v55, %v16379_v28  ;;  %v18463_v62 = vld [vmem:[#allocation37_spill] sm:$0xff]  ;;  %v7435_v21 = vpack.c.bf16 %v16660_v48, %v16658_v9 }
 0x43b   : > { %v11972_v20 = vpop.f32.mrf.mxu1 }
 0x43c   : > { %v16656_v35 = vpop.f32.mrf.mxu0  ;;  %v5849_v0 = vadd.f32 %v11972_v20, %v18461_v50  ;;  %v16664_v46 = vadd.f32 %v16562_v3, %v5846_v52  ;;  %v7745_v20 = vpack.c.bf16 %v16425_v45, %v16388_v63 }
 0x43d   : > { %v5758_v37 = vpop.f32.mrf.mxu1 }
 0x43e   : > { %18462 = vst [vmem:[#allocation31_spill] sm:$0xff] %v16664_v46  ;;  %v16666_v41 = vpop.f32.mrf.mxu0  ;;  %v5847_v11 = vadd.f32 %v5758_v37, %v18463_v62  ;;  %v16678_v3 = vadd.f32 %v16572_v14, %v5849_v0  ;;  %v18464_v46 = vld [vmem:[#allocation38_spill] sm:$0xff] }
 0x43f   : > { %v11975_v52 = vpop.f32.mrf.mxu1  ;;  %12190 = vmatmul.mubr.msk.bf16.gmra.mxu1 %vm1178_vm0, %v7434_v25  ;;  %v16693_v0 = vld [vmem:[#allocation2 + $0x459] sm:$0xff]  ;;  %v16695_v37 = vld [vmem:[#allocation2 + $0x471] sm:$0xff] }
 0x440   : > { %v16680_v50 = vpop.f32.mrf.mxu0  ;;  %12234 = vmatmul.mubr.msk.bf16.gmra.mxu0 %vm1178_vm0, %v7744_v12  ;;  %v5852_v28 = vadd.f32 %v11975_v52, %v18464_v46  ;;  %12193 = vmatprep.mubr.msk.bf16.mxu1 %vm1178_vm0, %v7435_v21  ;;  %v16688_v55 = vadd.f32 %v16582_v54, %v5847_v11  ;;  %v7730_v25 = vld [vmem:[#allocation2 + $0x577] sm:$0xff] }
 0x441   : > { %12237 = vmatprep.mubr.msk.bf16.mxu0 %vm1178_vm0, %v7745_v20  ;;  %v5771_v63 = vpop.f32.mrf.mxu1  ;;  %v7417_v21 = vld [vmem:[#allocation2 + $0x4b9] sm:$0xff]  ;;  %v16702_v20 = vld [vmem:[#allocation2 + $0x4d1] sm:$0xff] }
 0x442   : > { %18465 = vst [vmem:[#allocation35_spill] sm:$0xff] %v16688_v55  ;;  %v16690_v45 = vpop.f32.mrf.mxu0  ;;  %v5850_v14 = vadd.f32 %v5771_v63, %v16351_v24  ;;  %v16698_v12 = vadd.f32 %v16596_v17, %v5852_v28  ;;  %v7436_v63 = vpack.c.bf16 %v16695_v37, %v16693_v0  ;;  %v7746_v17 = vpack.c.bf16 %v7730_v25, %v16427_v42  ;;  %v16735_v25 = vld [vmem:[#allocation2 + $0x501] sm:$0xff] }
 0x443   : > { %v11976_v46 = vpop.f32.mrf.mxu1  ;;  %v8341_v55 = vpack.c.bf16 %v16471_v19, %v16439_v1 }
 0x444   : > { %18466 = vst [vmem:[#allocation36_spill] sm:$0xff] %v16698_v12  ;;  %v16700_v62 = vpop.f32.mrf.mxu0  ;;  %v5853_v54 = vadd.f32 %v11976_v46, %v16362_v53  ;;  %v16706_v11 = vadd.f32 %v16606_v43, %v5850_v14  ;;  %v7437_v12 = vpack.c.bf16 %v16702_v20, %v7417_v21 }
 0x445   : > { %v5774_v24 = vpop.f32.mrf.mxu1 }
 0x446   : > { %v16708_v52 = vpop.f32.mrf.mxu0  ;;  %v5851_v28 = vadd.f32 %v5774_v24, %v16372_v44  ;;  %v16718_v53 = vadd.f32 %v16616_v59, %v5853_v54  ;;  %v16733_v59 = vld [vmem:[#allocation2 + $0x4e9] sm:$0xff] }
 0x447   : > { %v11979_v43 = vpop.f32.mrf.mxu1  ;;  %12194 = vmatmul.mubr.msk.bf16.gmra.mxu1 %vm1178_vm0, %v7436_v63 }
 0x448   : > { %v16720_v14 = vpop.f32.mrf.mxu0  ;;  %12238 = vmatmul.mubr.msk.bf16.gmra.mxu0 %vm1178_vm0, %v7746_v17  ;;  %v5856_v46 = vadd.f32 %v11979_v43, %v16382_v61  ;;  %12197 = vmatprep.mubr.msk.bf16.mxu1 %vm1178_vm0, %v7437_v12  ;;  %v16728_v44 = vadd.f32 %v16624_v26, %v5851_v28  ;;  %v16742_v12 = vld [vmem:[#allocation2 + $0x519] sm:$0xff]  ;;  %v7438_v28 = vpack.c.bf16 %v16735_v25, %v16733_v59 }
 0x449   : > { %12281 = vmatprep.mubr.msk.bf16.mxu0 %vm1178_vm0, %v8341_v55  ;;  %v5787_v42 = vpop.f32.mrf.mxu1  ;;  %v16744_v55 = vld [vmem:[#allocation2 + $0x531] sm:$0xff]  ;;  %v18467_v26 = vld [vmem:[#allocation39_spill] sm:$0xff] }
 0x44a   : > { %v16730_v1 = vpop.f32.mrf.mxu0  ;;  %v5854_v19 = vadd.f32 %v5787_v42, %v16392_v31  ;;  %v16738_v21 = vadd.f32 %v16636_v10, %v5856_v46  ;;  %v8342_v10 = vpack.c.bf16 %v16480_v56, %v16473_v29  ;;  %v18469_v43 = vld [vmem:[#allocation30_spill] sm:$0xff]  ;;  %v7439_v42 = vpack.c.bf16 %v16744_v55, %v16742_v12  ;;  %v18470_v29 = vld [vmem:[#allocation40_spill] sm:$0xff] }
 0x44b   : > { %v11980_v61 = vpop.f32.mrf.mxu1 }
 0x44c   : > { %v16740_v54 = vpop.f32.mrf.mxu0  ;;  %v5857_v24 = vadd.f32 %v11980_v61, %v18467_v26  ;;  %v16748_v63 = vadd.f32 %v16646_v16, %v5854_v19  ;;  %v8343_v61 = vpack.c.bf16 %v16524_v7, %v16482_v8  ;;  %v12661_v19 = vld [vmem:[%s18271_s8 + $0x190] sm:$0xff]  }
 0x44d   : > { %v5790_v31 = vpop.f32.mrf.mxu1 }
 0x44e   : > { %18468 = vst [vmem:[#allocation37_spill] sm:$0xff] %v16748_v63  ;;  %v16750_v17 = vpop.f32.mrf.mxu0  ;;  %v5855_v46 = vadd.f32 %v5790_v31, %v18469_v43  ;;  %v16762_v16 = vadd.f32 %v16656_v35, %v5857_v24  ;;  %v16781_v31 = vld [vmem:[#allocation2 + $0x549] sm:$0xff] }
 0x44f   : > { %v11983_v26 = vpop.f32.mrf.mxu1  ;;  %12198 = vmatmul.mubr.msk.bf16.gmra.mxu1 %vm1178_vm0, %v7438_v28  ;;  %v16783_v28 = vld [vmem:[#allocation2 + $0x561] sm:$0xff] }
 0x450   : > { %v16767_v63 = vpop.f32.mrf.mxu0  ;;  %12282 = vmatmul.mubr.msk.bf16.vlgmr.msra.gmra.mxu0 %vm1178_vm0, %v8342_v10  ;;  %v5860_v56 = vadd.f32 %v11983_v26, %v18470_v29  ;;  %12201 = vmatprep.mubr.msk.bf16.mxu1 %vm1178_vm0, %v7439_v42  ;;  %v16775_v8 = vadd.f32 %v16666_v41, %v5855_v46  ;;  %v8316_v10 = vld [vmem:[#allocation2 + $0x2a9] sm:$0xff]  ;;  %v8004_v41 = vld [vmem:[#allocation2 + $0x200] sm:$0xff]  ;;  %v16790_v46 = vld [vmem:[#allocation2 + $0x218] sm:$0xff] }
 0x451   : > { %12285 = vmatprep.mubr.msk.bf16.mxu0 %vm1178_vm0, %v8343_v61  ;;  %v5803_v7 = vpop.f32.mrf.mxu1  ;;  %12350 = vmatpush3.bf16.msra.mxu0 %v16435_v51 }
 0x452   : > { %18471 = vst [vmem:[#allocation38_spill] sm:$0xff] %v16775_v8  ;;  %v16777_v35 = vpop.f32.mrf.mxu0  ;;  %v5858_v24 = vadd.f32 %v5803_v7, %v16443_v36  ;;  %12351 = vmatprep.subr.bf16.mxu0 %v12661_v19  ;;  %v16786_v43 = vadd.f32 %v16680_v50, %v5860_v56  ;;  %v7440_v7 = vpack.c.bf16 %v16783_v28, %v16781_v31 }
 0x453   : > { %v11984_v42 = vpop.f32.mrf.mxu1  ;;  %v8344_v50 = vpack.c.bf16 %v8316_v10, %v16526_v40  ;;  %v8345_v8 = vpack.c.bf16 %v16565_v34, %v16533_v49  ;;  %v16823_v10 = vld [vmem:[#allocation2 + $0x248] sm:$0xff] }
 0x454   : > { %18472 = vst [vmem:[#allocation39_spill] sm:$0xff] %v16786_v43  ;;  %v16788_v61 = vpop.f32.mrf.mxu0  ;;  %v5861_v26 = vadd.f32 %v11984_v42, %v16455_v30  ;;  %v16794_v51 = vadd.f32 %v16690_v45, %v5858_v24  ;;  %v8036_v43 = vpack.c.bf16 %v16790_v46, %v8004_v41 }
 0x455   : > { %v5806_v36 = vpop.f32.mrf.mxu1  ;;  %12352 = vmatpush3.bf16.msra.mxu0 %v12661_v19  ;;  %v16821_v19 = vld [vmem:[#allocation2 + $0x230] sm:$0xff] }
 0x456   : > { %v16796_v29 = vpop.f32.mrf.mxu0  ;;  %v5859_v56 = vadd.f32 %v5806_v36, %v16466_v58  ;;  %v16806_v30 = vadd.f32 %v16700_v62, %v5861_v26 }
 0x457   : > { %v11987_v45 = vpop.f32.mrf.mxu1  ;;  %12202 = vmatmul.mubr.msk.bf16.gmra.mxu1 %vm1178_vm0, %v7440_v7  ;;  %v16842_v7 = vld [vmem:[#allocation2 + $0x260] sm:$0xff] }
 0x458   : > { %v16808_v24 = vpop.f32.mrf.mxu0  ;;  %12286 = vmatmul.mubr.msk.bf16.gmra.mxu0 %vm1178_vm0, %v8344_v50  ;;  %v5864_v40 = vadd.f32 %v11987_v45, %v16476_v2  ;;  %12245 = vmatprep.mubr.msk.bf16.mxu1 %vm1178_vm0, %v8036_v43  ;;  %v16816_v58 = vadd.f32 %v16708_v52, %v5859_v56  ;;  %v16830_v43 = vld [vmem:[#allocation2 + $0x278] sm:$0xff]  ;;  %v12659_v50 = vld [vmem:[%s18271_s8 + $0x180] sm:$0xff]  }
 0x459   : > { %12289 = vmatprep.mubr.msk.bf16.mxu0 %vm1178_vm0, %v8345_v8  ;;  %v5819_v49 = vpop.f32.mrf.mxu1 }
 0x45a   : > { %v16818_v34 = vpop.f32.mrf.mxu0  ;;  %v5862_v62 = vadd.f32 %v5819_v49, %v16486_v57  ;;  %v16826_v42 = vadd.f32 %v16720_v14, %v5864_v40  ;;  %v8037_v57 = vpack.c.bf16 %v16823_v10, %v16821_v19  ;;  %v8346_v14 = vpack.c.bf16 %v16574_v23, %v16567_v38 }
 0x45b   : > { %v11988_v2 = vpop.f32.mrf.mxu1  ;;  %v8347_v38 = vpack.c.bf16 %v16609_v27, %v16576_v4  ;;  %v18474_v4 = vld [vmem:[#allocation41_spill] sm:$0xff] }
 0x45c   : > { %v16828_v41 = vpop.f32.mrf.mxu0  ;;  %v5865_v52 = vadd.f32 %v11988_v2, %v16501_v18  ;;  %v16834_v8 = vadd.f32 %v16730_v1, %v5862_v62  ;;  %v8038_v1 = vpack.c.bf16 %v16830_v43, %v16842_v7  ;;  %v16871_v62 = vld [vmem:[%s18271_s8 + $0x1a8] sm:$0xff]   ;;  %v16874_v27 = vld [vmem:[#allocation2 + $0x290] sm:$0xff]  ;;  %v8324_v2 = vld [vmem:[#allocation2 + $0x399] sm:$0xff] }
 0x45d   : > { %v5822_v26 = vpop.f32.mrf.mxu1 }
 0x45e   : > { %v16836_v36 = vpop.f32.mrf.mxu0  ;;  %v5863_v18 = vadd.f32 %v5822_v26, %v16513_v6  ;;  %v16851_v56 = vadd.f32 %v16740_v54, %v5865_v52 }
 0x45f   : > { %v12031_v45 = vpop.f32.mrf.mxu1  ;;  %12246 = vmatmul.mubr.msk.bf16.vlgmr.msra.gmra.mxu1 %vm1178_vm0, %v8037_v57  ;;  %v8012_v57 = vld [vmem:[#allocation2 + $0x2f0] sm:$0xff] }
 0x460   : > { %v16853_v40 = vpop.f32.mrf.mxu0  ;;  %12290 = vmatmul.mubr.msk.bf16.gmra.mxu0 %vm1178_vm0, %v8346_v14  ;;  %v6447_v23 = vadd.f32 %v12031_v45, %v16529_v22  ;;  %12314 = vmatpush3.bf16.msra.mxu1 %v16521_v33  ;;  %v16863_v6 = vadd.f32 %v16750_v17, %v5863_v18  ;;  %v16876_v33 = vld [vmem:[#allocation2 + $0x2a8] sm:$0xff]  ;;  %v18476_v18 = vld [vmem:[#allocation42_spill] sm:$0xff] }
 0x461   : > { %12249 = vmatprep.mubr.msk.bf16.mxu1 %vm1178_vm0, %v8038_v1  ;;  %12293 = vmatprep.mubr.msk.bf16.mxu0 %vm1178_vm0, %v8347_v38  ;;  %v6318_v54 = vpop.f32.mrf.mxu1  ;;  %v16883_v14 = vld [vmem:[#allocation2 + $0x308] sm:$0xff] }
 0x462   : > { %18473 = vst [vmem:[#allocation30_spill] sm:$0xff] %v16863_v6  ;;  %v16866_v49 = vpop.f32.mrf.mxu0  ;;  %12315 = vmatprep.subr.bf16.mxu1 %v12659_v50  ;;  %v6445_v22 = vadd.f32 %v6318_v54, %v18474_v4  ;;  %v16879_v17 = vadd.f32 %v16767_v63, %v6447_v23  ;;  %v8039_v4 = vpack.c.bf16 %v16876_v33, %v16874_v27  ;;  %v18477_v23 = vld [vmem:[#allocation43_spill] sm:$0xff] }
 0x463   : > { %v12032_v52 = vpop.f32.mrf.mxu1  ;;  %v8348_v63 = vpack.c.bf16 %v8324_v2, %v16611_v47  ;;  %v8040_v6 = vpack.c.bf16 %v16883_v14, %v8012_v57  ;;  %v18478_v47 = vld [vmem:[#allocation29_spill] sm:$0xff] }
 0x464   : > { %18475 = vst [vmem:[#allocation40_spill] sm:$0xff] %v16879_v17  ;;  %v16881_v26 = vpop.f32.mrf.mxu0  ;;  %v6448_v1 = vadd.f32 %v12032_v52, %v18476_v18  ;;  %12316 = vmatpush3.bf16.msra.mxu1 %v12659_v50  ;;  %v16887_v45 = vadd.f32 %v16777_v35, %v6445_v22  ;;  %v8349_v50 = vpack.c.bf16 %v16649_v5, %v16618_v39 }
 0x465   : > { %v6321_v38 = vpop.f32.mrf.mxu1  ;;  %12385 = vmatprep.subr.bf16.mxu1 %v16871_v62 }
 0x466   : > { %v16889_v54 = vpop.f32.mrf.mxu0  ;;  %v6446_v17 = vadd.f32 %v6321_v38, %v18477_v23  ;;  %v16900_v35 = vadd.f32 %v16788_v61, %v6448_v1  ;;  %v18480_v61 = vld [vmem:[#allocation27_spill] sm:$0xff]  ;;  %v16917_v38 = vld [vmem:[#allocation2 + $0x338] sm:$0xff] }
 0x467   : > { %v12035_v22 = vpop.f32.mrf.mxu1  ;;  %12250 = vmatmul.mubr.msk.bf16.gmra.mxu1 %vm1178_vm0, %v8039_v4  ;;  %v16915_v1 = vld [vmem:[#allocation2 + $0x320] sm:$0xff] }
 0x468   : > { %v16902_v52 = vpop.f32.mrf.mxu0  ;;  %12294 = vmatmul.mubr.msk.bf16.gmra.mxu0 %vm1178_vm0, %v8348_v63  ;;  %v6451_v2 = vadd.f32 %v12035_v22, %v18478_v47  ;;  %12253 = vmatprep.mubr.msk.bf16.mxu1 %vm1178_vm0, %v8040_v6  ;;  %v16910_v57 = vadd.f32 %v16796_v29, %v6446_v17  ;;  %v16924_v6 = vld [vmem:[#allocation2 + $0x368] sm:$0xff] }
 0x469   : > { %12297 = vmatprep.mubr.msk.bf16.mxu0 %vm1178_vm0, %v8349_v50  ;;  %v6334_v39 = vpop.f32.mrf.mxu1  ;;  %v18482_v50 = vld [vmem:[#allocation34_spill] sm:$0xff] }
 0x46a   : > { %18479 = vst [vmem:[#allocation41_spill] sm:$0xff] %v16910_v57  ;;  %v16912_v5 = vpop.f32.mrf.mxu0  ;;  %v6449_v18 = vadd.f32 %v6334_v39, %v18480_v61  ;;  %v16920_v4 = vadd.f32 %v16808_v24, %v6451_v2  ;;  %v8041_v39 = vpack.c.bf16 %v16917_v38, %v16915_v1  ;;  %v8350_v24 = vpack.c.bf16 %v16658_v9, %v16651_v15  ;;  %v16936_v2 = vld [vmem:[#allocation2 + $0x350] sm:$0xff]  ;;  %v18484_v61 = vld [vmem:[#allocation28_spill] sm:$0xff] }
 0x46b   : > { %v12036_v63 = vpop.f32.mrf.mxu1  ;;  %v8042_v57 = vpack.c.bf16 %v16924_v6, %v16936_v2  ;;  %v18486_v15 = vld [vmem:[#allocation33_spill] sm:$0xff] }
 0x46c   : > { %18481 = vst [vmem:[#allocation42_spill] sm:$0xff] %v16920_v4  ;;  %v16922_v23 = vpop.f32.mrf.mxu0  ;;  %v6452_v29 = vadd.f32 %v12036_v63, %v18482_v50  ;;  %v16928_v17 = vadd.f32 %v16818_v34, %v6449_v18  ;;  %v8351_v34 = vpack.c.bf16 %v16693_v0, %v16660_v48 }
 0x46d   : > { %v6337_v22 = vpop.f32.mrf.mxu1 }
 0x46e   : > { %18483 = vst [vmem:[#allocation43_spill] sm:$0xff] %v16928_v17  ;;  %v16930_v47 = vpop.f32.mrf.mxu0  ;;  %v6450_v4 = vadd.f32 %v6337_v22, %v18484_v61  ;;  %v16944_v18 = vadd.f32 %v16828_v41, %v6452_v29  ;;  %v18488_v41 = vld [vmem:[#allocation32_spill] sm:$0xff]  ;;  %v16959_v61 = vld [vmem:[#allocation2 + $0x380] sm:$0xff]  ;;  %v8353_v17 = vpack.c.bf16 %v16733_v59, %v16702_v20 }
 0x46f   : > { %v12039_v63 = vpop.f32.mrf.mxu1  ;;  %12254 = vmatmul.mubr.msk.bf16.gmra.mxu1 %vm1178_vm0, %v8041_v39  ;;  %v8332_v39 = vld [vmem:[#allocation2 + $0x489] sm:$0xff]  ;;  %v18490_v59 = vld [vmem:[#allocation31_spill] sm:$0xff] }
 0x470   : > { %18485 = vst [vmem:[#allocation29_spill] sm:$0xff] %v16944_v18  ;;  %v16946_v50 = vpop.f32.mrf.mxu0  ;;  %12298 = vmatmul.mubr.msk.bf16.gmra.mxu0 %vm1178_vm0, %v8350_v24  ;;  %v6455_v9 = vadd.f32 %v12039_v63, %v18486_v15  ;;  %12257 = vmatprep.mubr.msk.bf16.mxu1 %vm1178_vm0, %v8042_v57  ;;  %v16954_v22 = vadd.f32 %v16836_v36, %v6450_v4  ;;  %v16961_v18 = vld [vmem:[#allocation2 + $0x398] sm:$0xff] }
 0x471   : > { %12301 = vmatprep.mubr.msk.bf16.mxu0 %vm1178_vm0, %v8351_v34  ;;  %v6350_v48 = vpop.f32.mrf.mxu1  ;;  %v8020_v34 = vld [vmem:[#allocation2 + $0x3e0] sm:$0xff]  ;;  %v16968_v15 = vld [vmem:[#allocation2 + $0x3f8] sm:$0xff] }
 0x472   : > { %18487 = vst [vmem:[#allocation27_spill] sm:$0xff] %v16954_v22  ;;  %v16956_v0 = vpop.f32.mrf.mxu0  ;;  %v6453_v29 = vadd.f32 %v6350_v48, %v18488_v41  ;;  %v16964_v24 = vadd.f32 %v16853_v40, %v6455_v9  ;;  %v8043_v22 = vpack.c.bf16 %v16961_v18, %v16959_v61  ;;  %v8352_v40 = vpack.c.bf16 %v8332_v39, %v16695_v37  ;;  %v16999_v39 = vld [vmem:[#allocation2 + $0x410] sm:$0xff] }
 0x473   : > { %v12040_v63 = vpop.f32.mrf.mxu1 }
 0x474   : > { %18489 = vst [vmem:[#allocation34_spill] sm:$0xff] %v16964_v24  ;;  %v16966_v57 = vpop.f32.mrf.mxu0  ;;  %v6456_v36 = vadd.f32 %v12040_v63, %v16634_v32  ;;  %v16972_v4 = vadd.f32 %v16866_v49, %v6453_v29  ;;  %v8044_v24 = vpack.c.bf16 %v16968_v15, %v8020_v34  ;;  %v17001_v34 = vld [vmem:[#allocation2 + $0x428] sm:$0xff] }
 0x475   : > { %v6353_v48 = vpop.f32.mrf.mxu1 }
 0x476   : > { %v16974_v41 = vpop.f32.mrf.mxu0  ;;  %v6454_v9 = vadd.f32 %v6353_v48, %v16644_v13  ;;  %v16984_v32 = vadd.f32 %v16881_v26, %v6456_v36 }
 0x477   : > { %v12043_v49 = vpop.f32.mrf.mxu1  ;;  %12258 = vmatmul.mubr.msk.bf16.gmra.mxu1 %vm1178_vm0, %v8043_v22 }
 0x478   : > { %v16986_v29 = vpop.f32.mrf.mxu0  ;;  %12302 = vmatmul.mubr.msk.bf16.gmra.mxu0 %vm1178_vm0, %v8352_v40  ;;  %v6459_v63 = vadd.f32 %v12043_v49, %v16654_v60  ;;  %12261 = vmatprep.mubr.msk.bf16.mxu1 %vm1178_vm0, %v8044_v24  ;;  %v16994_v13 = vadd.f32 %v16889_v54, %v6454_v9  ;;  %v17008_v24 = vld [vmem:[#allocation2 + $0x458] sm:$0xff]  ;;  %v8045_v9 = vpack.c.bf16 %v17001_v34, %v16999_v39  ;;  %v17020_v49 = vld [vmem:[#allocation2 + $0x440] sm:$0xff] }
 0x479   : > { %12305 = vmatprep.mubr.msk.bf16.mxu0 %vm1178_vm0, %v8353_v17  ;;  %v6366_v37 = vpop.f32.mrf.mxu1 }
 0x47a   : > { %v16996_v20 = vpop.f32.mrf.mxu0  ;;  %v6457_v26 = vadd.f32 %v6366_v37, %v18490_v59  ;;  %v17004_v22 = vadd.f32 %v16902_v52, %v6459_v63  ;;  %v8354_v52 = vpack.c.bf16 %v16742_v12, %v16735_v25  ;;  %v18491_v63 = vld [vmem:[#allocation35_spill] sm:$0xff]  ;;  %v8046_v59 = vpack.c.bf16 %v17008_v24, %v17020_v49  ;;  %v18493_v25 = vld [vmem:[#allocation36_spill] sm:$0xff] }
 0x47b   : > { %v12044_v60 = vpop.f32.mrf.mxu1 }
 0x47c   : > { %v17006_v36 = vpop.f32.mrf.mxu0  ;;  %v6460_v54 = vadd.f32 %v12044_v60, %v16678_v3  ;;  %v17012_v17 = vadd.f32 %v16912_v5, %v6457_v26  ;;  %v8355_v3 = vpack.c.bf16 %v16781_v31, %v16744_v55 }
 0x47d   : > { %v6369_v48 = vpop.f32.mrf.mxu1 }
 0x47e   : > { %v17014_v40 = vpop.f32.mrf.mxu0  ;;  %v6458_v37 = vadd.f32 %v6369_v48, %v18491_v63  ;;  %v17028_v5 = vadd.f32 %v16922_v23, %v6460_v54  ;;  %v17043_v54 = vld [vmem:[#allocation2 + $0x470] sm:$0xff]  ;;  %v17045_v63 = vld [vmem:[#allocation2 + $0x488] sm:$0xff] }
 0x47f   : > { %v12047_v26 = vpop.f32.mrf.mxu1  ;;  %12262 = vmatmul.mubr.msk.bf16.gmra.mxu1 %vm1178_vm0, %v8045_v9  ;;  %v8340_v9 = vld [vmem:[#allocation2 + $0x579] sm:$0xff] }
 0x480   : > { %18492 = vst [vmem:[#allocation28_spill] sm:$0xff] %v17028_v5  ;;  %v17030_v60 = vpop.f32.mrf.mxu0  ;;  %12306 = vmatmul.mubr.msk.bf16.gmra.mxu0 %vm1178_vm0, %v8354_v52  ;;  %v6463_v12 = vadd.f32 %v12047_v26, %v18493_v25  ;;  %12265 = vmatprep.mubr.msk.bf16.mxu1 %vm1178_vm0, %v8046_v59  ;;  %v17038_v48 = vadd.f32 %v16930_v47, %v6458_v37  ;;  %v17052_v25 = vld [vmem:[#allocation2 + $0x4e8] sm:$0xff] }
 0x481   : > { %12309 = vmatprep.mubr.msk.bf16.mxu0 %vm1178_vm0, %v8355_v3  ;;  %v6382_v55 = vpop.f32.mrf.mxu1  ;;  %v8028_v3 = vld [vmem:[#allocation2 + $0x4d0] sm:$0xff]  ;;  %v8952_v5 = vpack.c.bf16 %v16821_v19, %v16790_v46 }
 0x482   : > { %18494 = vst [vmem:[#allocation33_spill] sm:$0xff] %v17038_v48  ;;  %v17040_v31 = vpop.f32.mrf.mxu0  ;;  %v6461_v23 = vadd.f32 %v6382_v55, %v16706_v11  ;;  %v17048_v52 = vadd.f32 %v16946_v50, %v6463_v12  ;;  %v8047_v48 = vpack.c.bf16 %v17045_v63, %v17043_v54  ;;  %v8356_v50 = vpack.c.bf16 %v8340_v9, %v16783_v28  ;;  %v18496_v19 = vld [vmem:[#allocation37_spill] sm:$0xff]  ;;  %v17083_v9 = vld [vmem:[#allocation2 + $0x500] sm:$0xff] }
 0x483   : > { %v12048_v26 = vpop.f32.mrf.mxu1 }
 0x484   : > { %18495 = vst [vmem:[#allocation32_spill] sm:$0xff] %v17048_v52  ;;  %v17050_v59 = vpop.f32.mrf.mxu0  ;;  %v6464_v47 = vadd.f32 %v12048_v26, %v16718_v53  ;;  %v17056_v37 = vadd.f32 %v16956_v0, %v6461_v23  ;;  %v8048_v52 = vpack.c.bf16 %v17052_v25, %v8028_v3  ;;  %v17085_v3 = vld [vmem:[#allocation2 + $0x518] sm:$0xff] }
 0x485   : > { %v6385_v11 = vpop.f32.mrf.mxu1 }
 0x486   : > { %v17058_v55 = vpop.f32.mrf.mxu0  ;;  %v6462_v12 = vadd.f32 %v6385_v11, %v16728_v44  ;;  %v17068_v53 = vadd.f32 %v16966_v57, %v6464_v47 }
 0x487   : > { %v12051_v0 = vpop.f32.mrf.mxu1  ;;  %12266 = vmatmul.mubr.msk.bf16.gmra.mxu1 %vm1178_vm0, %v8047_v48 }
 0x488   : > { %v17070_v23 = vpop.f32.mrf.mxu0  ;;  %12310 = vmatmul.mubr.msk.bf16.gmra.mxu0 %vm1178_vm0, %v8356_v50  ;;  %v6467_v26 = vadd.f32 %v12051_v0, %v16738_v21  ;;  %12269 = vmatprep.mubr.msk.bf16.mxu1 %vm1178_vm0, %v8048_v52  ;;  %v17078_v44 = vadd.f32 %v16974_v41, %v6462_v12  ;;  %v17092_v52 = vld [vmem:[#allocation2 + $0x548] sm:$0xff]  ;;  %v8049_v12 = vpack.c.bf16 %v17085_v3, %v17083_v9  ;;  %v17104_v0 = vld [vmem:[#allocation2 + $0x530] sm:$0xff] }
 0x489   : > { %12353 = vmatprep.mubr.msk.bf16.mxu0 %vm1178_vm0, %v8952_v5  ;;  %v6398_v28 = vpop.f32.mrf.mxu1 }
 0x48a   : > { %v17080_v46 = vpop.f32.mrf.mxu0  ;;  %v6465_v57 = vadd.f32 %v6398_v28, %v18496_v19  ;;  %v17088_v48 = vadd.f32 %v16986_v29, %v6467_v26  ;;  %v8953_v29 = vpack.c.bf16 %v16842_v7, %v16823_v10  ;;  %v18498_v26 = vld [vmem:[#allocation38_spill] sm:$0xff]  ;;  %v8050_v19 = vpack.c.bf16 %v17092_v52, %v17104_v0  ;;  %v18500_v10 = vld [vmem:[#allocation39_spill] sm:$0xff] }
 0x48b   : > { %v12052_v21 = vpop.f32.mrf.mxu1 }
 0x48c   : > { %v17090_v47 = vpop.f32.mrf.mxu0  ;;  %v6468_v41 = vadd.f32 %v12052_v21, %v16762_v16  ;;  %v17096_v5 = vadd.f32 %v16996_v20, %v6465_v57  ;;  %v8954_v16 = vpack.c.bf16 %v16874_v27, %v16830_v43 }
 0x48d   : > { %v6401_v11 = vpop.f32.mrf.mxu1 }
 0x48e   : > { %18497 = vst [vmem:[#allocation31_spill] sm:$0xff] %v17096_v5  ;;  %v17098_v50 = vpop.f32.mrf.mxu0  ;;  %v6466_v28 = vadd.f32 %v6401_v11, %v18498_v26  ;;  %v17112_v20 = vadd.f32 %v17006_v36, %v6468_v41  ;;  %v17127_v41 = vld [vmem:[#allocation2 + $0x560] sm:$0xff]  ;;  %v17129_v26 = vld [vmem:[#allocation2 + $0x578] sm:$0xff] }
 0x48f   : > { %v12055_v57 = vpop.f32.mrf.mxu1  ;;  %12270 = vmatmul.mubr.msk.bf16.gmra.mxu1 %vm1178_vm0, %v8049_v12  ;;  %v8927_v12 = vld [vmem:[#allocation2 + $0x2c0] sm:$0xff] }
 0x490   : > { %18499 = vst [vmem:[#allocation35_spill] sm:$0xff] %v17112_v20  ;;  %v17114_v21 = vpop.f32.mrf.mxu0  ;;  %12354 = vmatmul.mubr.msk.bf16.vlgmr.msra.gmra.mxu0 %vm1178_vm0, %v8953_v29  ;;  %v6471_v7 = vadd.f32 %v12055_v57, %v18500_v10  ;;  %12273 = vmatprep.mubr.msk.bf16.mxu1 %vm1178_vm0, %v8050_v19  ;;  %v17122_v11 = vadd.f32 %v17014_v40, %v6466_v28  ;;  %v8616_v10 = vld [vmem:[#allocation2 + $0x22f] sm:$0xff] }
 0x491   : > { %12357 = vmatprep.mubr.msk.bf16.mxu0 %vm1178_vm0, %v8954_v16  ;;  %v6414_v43 = vpop.f32.mrf.mxu1  ;;  %v8615_v16 = vld [vmem:[#allocation2 + $0x217] sm:$0xff]  ;;  %v8955_v20 = vpack.c.bf16 %v8927_v12, %v16876_v33 }
 0x492   : > { %18501 = vst [vmem:[#allocation36_spill] sm:$0xff] %v17122_v11  ;;  %v17124_v27 = vpop.f32.mrf.mxu0  ;;  %v6469_v36 = vadd.f32 %v6414_v43, %v16794_v51  ;;  %v17132_v29 = vadd.f32 %v17030_v60, %v6471_v7  ;;  %v8051_v43 = vpack.c.bf16 %v17129_v26, %v17127_v41  ;;  %v8647_v7 = vpack.c.bf16 %v8616_v10, %v8615_v16  ;;  %v8620_v16 = vld [vmem:[#allocation2 + $0x28f] sm:$0xff] }
 0x493   : > { %v12056_v57 = vpop.f32.mrf.mxu1 }
 0x494   : > { %18502 = vst [vmem:[#allocation37_spill] sm:$0xff] %v17132_v29  ;;  %v17134_v19 = vpop.f32.mrf.mxu0  ;;  %v6472_v40 = vadd.f32 %v12056_v57, %v16806_v30  ;;  %v17138_v28 = vadd.f32 %v17040_v31, %v6469_v36  ;;  %v8956_v29 = vpack.c.bf16 %v16915_v1, %v16883_v14 }
 0x495   : > { %v6417_v11 = vpop.f32.mrf.mxu1 }
 0x496   : > { %v17140_v51 = vpop.f32.mrf.mxu0  ;;  %v6470_v60 = vadd.f32 %v6417_v11, %v16816_v58  ;;  %v17149_v5 = vadd.f32 %v17050_v59, %v6472_v40  ;;  %v8617_v59 = vld [vmem:[#allocation2 + $0x247] sm:$0xff]  ;;  %v8618_v11 = vld [vmem:[#allocation2 + $0x25f] sm:$0xff] }
 0x497   : > { %v12059_v30 = vpop.f32.mrf.mxu1  ;;  %12274 = vmatmul.mubr.msk.bf16.gmra.mxu1 %vm1178_vm0, %v8051_v43  ;;  %v8648_v43 = vpack.c.bf16 %v8618_v11, %v8617_v59 }
 0x498   : > { %v17151_v31 = vpop.f32.mrf.mxu0  ;;  %12358 = vmatmul.mubr.msk.bf16.gmra.mxu0 %vm1178_vm0, %v8955_v20  ;;  %v6475_v36 = vadd.f32 %v12059_v30, %v16826_v42  ;;  %12317 = vmatprep.mubr.msk.bf16.mxu1 %vm1178_vm0, %v8647_v7  ;;  %v17159_v58 = vadd.f32 %v17058_v55, %v6470_v60  ;;  %v8619_v42 = vld [vmem:[#allocation2 + $0x277] sm:$0xff] }
 0x499   : > { %12361 = vmatprep.mubr.msk.bf16.mxu0 %vm1178_vm0, %v8956_v29  ;;  %v6430_v33 = vpop.f32.mrf.mxu1  ;;  %v18503_v60 = vld [vmem:[#allocation30_spill] sm:$0xff]  ;;  %v8649_v30 = vpack.c.bf16 %v8620_v16, %v8619_v42 }
 0x49a   : > { %v17161_v14 = vpop.f32.mrf.mxu0  ;;  %v6473_v1 = vadd.f32 %v6430_v33, %v16834_v8  ;;  %v17165_v12 = vadd.f32 %v17070_v23, %v6475_v36  ;;  %v8957_v8 = vpack.c.bf16 %v16936_v2, %v16917_v38  ;;  %v12663_v23 = vld [vmem:[%s18271_s8 + $0x1a0] sm:$0xff]   ;;  %v8958_v38 = vpack.c.bf16 %v16959_v61, %v16924_v6  ;;  %v18504_v2 = vld [vmem:[#allocation40_spill] sm:$0xff]  ;;  %v8935_v6 = vld [vmem:[#allocation2 + $0x3b0] sm:$0xff] }
 0x49b   : > { %v12060_v20 = vpop.f32.mrf.mxu1  ;;  %v8622_v42 = vld [vmem:[#allocation2 + $0x2bf] sm:$0xff] }
 0x49c   : > { %v17167_v57 = vpop.f32.mrf.mxu0  ;;  %v6476_v29 = vadd.f32 %v12060_v20, %v16851_v56  ;;  %v17171_v55 = vadd.f32 %v17080_v46, %v6473_v1  ;;  %v8621_v20 = vld [vmem:[#allocation2 + $0x2a7] sm:$0xff] }
 0x49d   : > { %v6433_v10 = vpop.f32.mrf.mxu1 }
 0x49e   : > { %v17173_v40 = vpop.f32.mrf.mxu0  ;;  %v6474_v7 = vadd.f32 %v6433_v10, %v18503_v60  ;;  %v17182_v36 = vadd.f32 %v17090_v47, %v6476_v29  ;;  %v8623_v29 = vld [vmem:[#allocation2 + $0x307] sm:$0xff] }
 0x49f   : > { %v12103_v56 = vpop.f32.mrf.mxu1  ;;  %12318 = vmatmul.mubr.msk.bf16.vlgmr.msra.gmra.mxu1 %vm1178_vm0, %v8648_v43 }
 0x4a0   : > { %v17184_v46 = vpop.f32.mrf.mxu0  ;;  %12362 = vmatmul.mubr.msk.bf16.gmra.mxu0 %vm1178_vm0, %v8957_v8  ;;  %v7058_v33 = vadd.f32 %v12103_v56, %v18504_v2  ;;  %12386 = vmatpush3.bf16.msra.mxu1 %v16871_v62  ;;  %v17194_v1 = vadd.f32 %v17098_v50, %v6474_v7  ;;  %v8624_v50 = vld [vmem:[#allocation2 + $0x31f] sm:$0xff]  ;;  %v8959_v7 = vpack.c.bf16 %v8935_v6, %v16961_v18 }
 0x4a1   : > { %12321 = vmatprep.mubr.msk.bf16.mxu1 %vm1178_vm0, %v8649_v30  ;;  %12365 = vmatprep.mubr.msk.bf16.mxu0 %vm1178_vm0, %v8958_v38  ;;  %v6929_v47 = vpop.f32.mrf.mxu1  ;;  %v18505_v30 = vld [vmem:[#allocation41_spill] sm:$0xff]  ;;  %v8651_v56 = vpack.c.bf16 %v8624_v50, %v8623_v29  ;;  %v8960_v38 = vpack.c.bf16 %v16999_v39, %v16968_v15  ;;  %v8627_v29 = vld [vmem:[#allocation2 + $0x367] sm:$0xff]  ;;  %v8628_v50 = vld [vmem:[#allocation2 + $0x37f] sm:$0xff] }
 0x4a2   : > { %v17197_v59 = vpop.f32.mrf.mxu0  ;;  %12387 = vmatprep.subr.bf16.mxu1 %v12663_v23  ;;  %v7056_v11 = vadd.f32 %v6929_v47, %v16887_v45  ;;  %v17201_v61 = vadd.f32 %v17114_v21, %v7058_v33  ;;  %v8650_v45 = vpack.c.bf16 %v8622_v42, %v8621_v20  ;;  %v8626_v20 = vld [vmem:[#allocation2 + $0x34f] sm:$0xff] }
 0x4a3   : > { %v12104_v62 = vpop.f32.mrf.mxu1 }
 0x4a4   : > { %v17203_v16 = vpop.f32.mrf.mxu0  ;;  %v7059_v10 = vadd.f32 %v12104_v62, %v16900_v35  ;;  %12388 = vmatpush3.bf16.msra.mxu1 %v12663_v23  ;;  %v17207_v43 = vadd.f32 %v17124_v27, %v7056_v11  ;;  %v18506_v27 = vld [vmem:[#allocation42_spill] sm:$0xff] }
 0x4a5   : > { %v6932_v8 = vpop.f32.mrf.mxu1  ;;  %v8625_v11 = vld [vmem:[#allocation2 + $0x337] sm:$0xff] }
 0x4a6   : > { %v17209_v60 = vpop.f32.mrf.mxu0  ;;  %v7057_v21 = vadd.f32 %v6932_v8, %v18505_v30  ;;  %v17216_v2 = vadd.f32 %v17134_v19, %v7059_v10  ;;  %v18507_v19 = vld [vmem:[#allocation43_spill] sm:$0xff]  ;;  %v18508_v10 = vld [vmem:[#allocation29_spill] sm:$0xff]  ;;  %v8652_v30 = vpack.c.bf16 %v8626_v20, %v8625_v11 }
 0x4a7   : > { %v12107_v35 = vpop.f32.mrf.mxu1  ;;  %12322 = vmatmul.mubr.msk.bf16.gmra.mxu1 %vm1178_vm0, %v8650_v45  ;;  %v8943_v11 = vld [vmem:[#allocation2 + $0x4a0] sm:$0xff] }
 0x4a8   : > { %v17218_v23 = vpop.f32.mrf.mxu0  ;;  %12366 = vmatmul.mubr.msk.bf16.gmra.mxu0 %vm1178_vm0, %v8959_v7  ;;  %v7062_v33 = vadd.f32 %v12107_v35, %v18506_v27  ;;  %12325 = vmatprep.mubr.msk.bf16.mxu1 %vm1178_vm0, %v8651_v56  ;;  %v17226_v18 = vadd.f32 %v17140_v51, %v7057_v21  ;;  %v8961_v21 = vpack.c.bf16 %v17020_v49, %v17001_v34  ;;  %v18509_v56 = vld [vmem:[#allocation27_spill] sm:$0xff] }
 0x4a9   : > { %12369 = vmatprep.mubr.msk.bf16.mxu0 %vm1178_vm0, %v8960_v38  ;;  %v6945_v15 = vpop.f32.mrf.mxu1  ;;  %v8653_v38 = vpack.c.bf16 %v8628_v50, %v8627_v29  ;;  %v8962_v35 = vpack.c.bf16 %v17043_v54, %v17008_v24  ;;  %v8631_v50 = vld [vmem:[#allocation2 + $0x3f7] sm:$0xff] }
 0x4aa   : > { %v17228_v39 = vpop.f32.mrf.mxu0  ;;  %v7060_v47 = vadd.f32 %v6945_v15, %v18507_v19  ;;  %v17232_v42 = vadd.f32 %v17151_v31, %v7062_v33 }
 0x4ab   : > { %v12108_v6 = vpop.f32.mrf.mxu1 }
 0x4ac   : > { %v17234_v62 = vpop.f32.mrf.mxu0  ;;  %v7063_v8 = vadd.f32 %v12108_v6, %v18508_v10  ;;  %v17238_v51 = vadd.f32 %v17161_v14, %v7060_v47  ;;  %v18510_v14 = vld [vmem:[#allocation34_spill] sm:$0xff]  ;;  %v8630_v47 = vld [vmem:[#allocation2 + $0x3af] sm:$0xff] }
 0x4ad   : > { %v6948_v45 = vpop.f32.mrf.mxu1  ;;  %v8632_v10 = vld [vmem:[#allocation2 + $0x40f] sm:$0xff] }
 0x4ae   : > { %v17240_v7 = vpop.f32.mrf.mxu0  ;;  %v7061_v31 = vadd.f32 %v6948_v45, %v18509_v56  ;;  %v17248_v27 = vadd.f32 %v17167_v57, %v7063_v8  ;;  %v8629_v57 = vld [vmem:[#allocation2 + $0x397] sm:$0xff] }
 0x4af   : > { %v12111_v33 = vpop.f32.mrf.mxu1  ;;  %12326 = vmatmul.mubr.msk.bf16.gmra.mxu1 %vm1178_vm0, %v8652_v30 }
 0x4b0   : > { %v17250_v15 = vpop.f32.mrf.mxu0  ;;  %12370 = vmatmul.mubr.msk.bf16.gmra.mxu0 %vm1178_vm0, %v8961_v21  ;;  %v7066_v19 = vadd.f32 %v12111_v33, %v18510_v14  ;;  %12329 = vmatprep.mubr.msk.bf16.mxu1 %vm1178_vm0, %v8653_v38  ;;  %v17258_v34 = vadd.f32 %v17173_v40, %v7061_v31  ;;  %v8963_v21 = vpack.c.bf16 %v8943_v11, %v17045_v63  ;;  %v8634_v33 = vld [vmem:[#allocation2 + $0x43f] sm:$0xff] }
 0x4b1   : > { %12373 = vmatprep.mubr.msk.bf16.mxu0 %vm1178_vm0, %v8962_v35  ;;  %v6961_v24 = vpop.f32.mrf.mxu1  ;;  %v8964_v31 = vpack.c.bf16 %v17083_v9, %v17052_v25 }
 0x4b2   : > { %v17260_v49 = vpop.f32.mrf.mxu0  ;;  %v7064_v54 = vadd.f32 %v6961_v24, %v16972_v4  ;;  %v17264_v20 = vadd.f32 %v17184_v46, %v7066_v19  ;;  %v8654_v4 = vpack.c.bf16 %v8630_v47, %v8629_v57  ;;  %v8655_v46 = vpack.c.bf16 %v8632_v10, %v8631_v50  ;;  %v18511_v57 = vld [vmem:[#allocation28_spill] sm:$0xff]  ;;  %v18512_v10 = vld [vmem:[#allocation33_spill] sm:$0xff] }
 0x4b3   : > { %v12112_v6 = vpop.f32.mrf.mxu1 }
 0x4b4   : > { %v17266_v29 = vpop.f32.mrf.mxu0  ;;  %v7067_v8 = vadd.f32 %v12112_v6, %v16984_v32  ;;  %v17270_v40 = vadd.f32 %v17197_v59, %v7064_v54  ;;  %v8636_v54 = vld [vmem:[#allocation2 + $0x46f] sm:$0xff] }
 0x4b5   : > { %v6964_v45 = vpop.f32.mrf.mxu1 }
 0x4b6   : > { %v17272_v30 = vpop.f32.mrf.mxu0  ;;  %v7065_v56 = vadd.f32 %v6964_v45, %v16994_v13  ;;  %v17279_v38 = vadd.f32 %v17203_v16, %v7067_v8  ;;  %v8633_v16 = vld [vmem:[#allocation2 + $0x427] sm:$0xff]  ;;  %v8966_v45 = vpack.c.bf16 %v17127_v41, %v17092_v52 }
 0x4b7   : > { %v12115_v35 = vpop.f32.mrf.mxu1  ;;  %12330 = vmatmul.mubr.msk.bf16.gmra.mxu1 %vm1178_vm0, %v8654_v4  ;;  %v8656_v50 = vpack.c.bf16 %v8634_v33, %v8633_v16  ;;  %v8639_v16 = vld [vmem:[#allocation2 + $0x4e7] sm:$0xff]  ;;  %v8640_v33 = vld [vmem:[#allocation2 + $0x4ff] sm:$0xff] }
 0x4b8   : > { %v17281_v32 = vpop.f32.mrf.mxu0  ;;  %12374 = vmatmul.mubr.msk.bf16.gmra.mxu0 %vm1178_vm0, %v8963_v21  ;;  %v7070_v59 = vadd.f32 %v12115_v35, %v17004_v22  ;;  %12333 = vmatprep.mubr.msk.bf16.mxu1 %vm1178_vm0, %v8655_v46  ;;  %v17289_v13 = vadd.f32 %v17209_v60, %v7065_v56  ;;  %v8635_v22 = vld [vmem:[#allocation2 + $0x457] sm:$0xff] }
 0x4b9   : > { %12377 = vmatprep.mubr.msk.bf16.mxu0 %vm1178_vm0, %v8964_v31  ;;  %v6977_v63 = vpop.f32.mrf.mxu1  ;;  %v8657_v8 = vpack.c.bf16 %v8636_v54, %v8635_v22  ;;  %v8638_v31 = vld [vmem:[#allocation2 + $0x49f] sm:$0xff]  ;;  %v8951_v35 = vld [vmem:[#allocation2 + $0x590] sm:$0xff] }
 0x4ba   : > { %v17291_v25 = vpop.f32.mrf.mxu0  ;;  %v7068_v9 = vadd.f32 %v6977_v63, %v17012_v17  ;;  %v17295_v14 = vadd.f32 %v17218_v23, %v7070_v59  ;;  %v8965_v17 = vpack.c.bf16 %v17104_v0, %v17085_v3 }
 0x4bb   : > { %v12116_v19 = vpop.f32.mrf.mxu1 }
 0x4bc   : > { %v17297_v24 = vpop.f32.mrf.mxu0  ;;  %v7071_v47 = vadd.f32 %v12116_v19, %v18511_v57  ;;  %v17301_v60 = vadd.f32 %v17228_v39, %v7068_v9  ;;  %v18513_v39 = vld [vmem:[#allocation32_spill] sm:$0xff] }
 0x4bd   : > { %v6980_v11 = vpop.f32.mrf.mxu1 }
 0x4be   : > { %v17303_v6 = vpop.f32.mrf.mxu0  ;;  %v7069_v23 = vadd.f32 %v6980_v11, %v18512_v10  ;;  %v17311_v4 = vadd.f32 %v17234_v62, %v7071_v47  ;;  %v8637_v62 = vld [vmem:[#allocation2 + $0x487] sm:$0xff] }
 0x4bf   : > { %v12119_v21 = vpop.f32.mrf.mxu1  ;;  %12334 = vmatmul.mubr.msk.bf16.gmra.mxu1 %vm1178_vm0, %v8656_v50  ;;  %v8658_v57 = vpack.c.bf16 %v8638_v31, %v8637_v62 }
 0x4c0   : > { %v12163_v56 = vpop.f32.mrf.mxu0  ;;  %12378 = vmatmul.mubr.msk.bf16.gmra.mxu0 %vm1178_vm0, %v8965_v17  ;;  %v7074_v46 = vadd.f32 %v12119_v21, %v18513_v39  ;;  %12337 = vmatprep.mubr.msk.bf16.mxu1 %vm1178_vm0, %v8657_v8  ;;  %v17319_v3 = vadd.f32 %v17240_v7, %v7069_v23  ;;  %v8642_v8 = vld [vmem:[#allocation2 + $0x52f] sm:$0xff]  ;;  %v8643_v39 = vld [vmem:[#allocation2 + $0x547] sm:$0xff] }
 0x4c1   : > { %12381 = vmatprep.mubr.msk.bf16.mxu0 %vm1178_vm0, %v8966_v45  ;;  %v6993_v0 = vpop.f32.mrf.mxu1 }
 0x4c2   : > { %v7330_v52 = vpop.f32.mrf.mxu0  ;;  %v7072_v41 = vadd.f32 %v6993_v0, %v17056_v37  ;;  %v17323_v59 = vadd.f32 %v17250_v15, %v7074_v46  ;;  %v8967_v37 = vpack.c.bf16 %v8951_v35, %v17129_v26  ;;  %v8659_v15 = vpack.c.bf16 %v8640_v33, %v8639_v16  ;;  %v18514_v26 = vld [vmem:[#allocation31_spill] sm:$0xff] }
 0x4c3   : > { %v12120_v63 = vpop.f32.mrf.mxu1  ;;  %v8644_v46 = vld [vmem:[#allocation2 + $0x55f] sm:$0xff] }
 0x4c4   : > { %v12164_v9 = vpop.f32.mrf.mxu0  ;;  %v7075_v19 = vadd.f32 %v12120_v63, %v17068_v53  ;;  %v17327_v22 = vadd.f32 %v17260_v49, %v7072_v41  ;;  %v18515_v0 = vld [vmem:[#allocation35_spill] sm:$0xff]  ;;  %v18516_v63 = vld [vmem:[#allocation36_spill] sm:$0xff]  ;;  %v8661_v33 = vpack.c.bf16 %v8644_v46, %v8643_v39 }
 0x4c5   : > { %v6996_v7 = vpop.f32.mrf.mxu1 }
 0x4c6   : > { %v17329_v54 = vpop.f32.mrf.mxu0  ;;  %v17333_v47 = vadd.f32 %v6996_v7, %v17078_v44  ;;  %v17336_v11 = vadd.f32 %v17266_v29, %v7075_v19  ;;  %v8641_v44 = vld [vmem:[#allocation2 + $0x517] sm:$0xff] }
 0x4c7   : > { %v12123_v50 = vpop.f32.mrf.mxu1  ;;  %12338 = vmatmul.mubr.msk.bf16.gmra.mxu1 %vm1178_vm0, %v8658_v57  ;;  %v8660_v35 = vpack.c.bf16 %v8642_v8, %v8641_v44  ;;  %v18517_v57 = vld [vmem:[#allocation37_spill] sm:$0xff] }
 0x4c8   : > { %v12167_v17 = vpop.f32.mrf.mxu0  ;;  %12382 = vmatmul.mubr.msk.bf16.gmra.mxu0 %vm1178_vm0, %v8967_v37  ;;  %v7078_v53 = vadd.f32 %v12123_v50, %v17088_v48  ;;  %12341 = vmatprep.mubr.msk.bf16.mxu1 %vm1178_vm0, %v8659_v15  ;;  %v9226_v8 = vld [vmem:[#allocation2 + $0x231] sm:$0xff] }
 0x4c9   : > { %v7009_v49 = vpop.f32.mrf.mxu1 }
 0x4ca   : > { %v7346_v10 = vpop.f32.mrf.mxu0  ;;  %v7076_v23 = vadd.f32 %v7009_v49, %v18514_v26  ;;  %v17344_v45 = vadd.f32 %v17281_v32, %v7078_v53  ;;  %v8645_v53 = vld [vmem:[#allocation2 + $0x577] sm:$0xff]  ;;  %v8646_v49 = vld [vmem:[#allocation2 + $0x58f] sm:$0xff] }
 0x4cb   : > { %v12124_v29 = vpop.f32.mrf.mxu1 }
 0x4cc   : > { %v12168_v21 = vpop.f32.mrf.mxu0  ;;  %v7079_v41 = vadd.f32 %v12124_v29, %v18515_v0  ;;  %v17348_v62 = vadd.f32 %v17291_v25, %v7076_v23 }
 0x4cd   : > { %v7012_v48 = vpop.f32.mrf.mxu1 }
 0x4ce   : > { %v17350_v31 = vpop.f32.mrf.mxu0  ;;  %v17353_v16 = vadd.f32 %v7012_v48, %v18516_v63  ;;  %v17356_v32 = vadd.f32 %v17297_v24, %v7079_v41  ;;  %v9225_v24 = vld [vmem:[#allocation2 + $0x219] sm:$0xff]  ;;  %v8662_v41 = vpack.c.bf16 %v8646_v49, %v8645_v53  ;;  %v9230_v53 = vld [vmem:[#allocation2 + $0x291] sm:$0xff] }
 0x4cf   : > { %v12127_v19 = vpop.f32.mrf.mxu1  ;;  %12342 = vmatmul.mubr.msk.bf16.gmra.mxu1 %vm1178_vm0, %v8660_v35 }
 0x4d0   : > { %v12211_v7 = vpop.f32.mrf.mxu0  ;;  %v7082_v37 = vadd.f32 %v12127_v19, %v18517_v57  ;;  %12345 = vmatprep.mubr.msk.bf16.mxu1 %vm1178_vm0, %v8661_v33  ;;  %v9227_v57 = vld [vmem:[#allocation2 + $0x249] sm:$0xff] }
 0x4d1   : > { %v7025_v25 = vpop.f32.mrf.mxu1 }
 0x4d2   : > { %v7845_v15 = vpop.f32.mrf.mxu0  ;;  %v7080_v50 = vadd.f32 %v7025_v25, %v17138_v28  ;;  %v17362_v26 = vadd.f32 %v12163_v56, %v7082_v37  ;;  %v9257_v28 = vpack.c.bf16 %v9226_v8, %v9225_v24  ;;  %v9228_v37 = vld [vmem:[#allocation2 + $0x261] sm:$0xff] }
 0x4d3   : > { %v12128_v23 = vpop.f32.mrf.mxu1  ;;  %v9258_v8 = vpack.c.bf16 %v9228_v37, %v9227_v57  ;;  %v9234_v37 = vld [vmem:[#allocation2 + $0x321] sm:$0xff] }
 0x4d4   : > { %v12212_v44 = vpop.f32.mrf.mxu0  ;;  %v7083_v29 = vadd.f32 %v12128_v23, %v17149_v5  ;;  %v17365_v39 = vadd.f32 %v7330_v52, %v7080_v50 }
 0x4d5   : > { %v7028_v46 = vpop.f32.mrf.mxu1 }
 0x4d6   : > { %v17367_v0 = vpop.f32.mrf.mxu0  ;;  %v17370_v48 = vadd.f32 %v7028_v46, %v17159_v58  ;;  %v17372_v35 = vadd.f32 %v12164_v9, %v7083_v29  ;;  %v9229_v9 = vld [vmem:[#allocation2 + $0x279] sm:$0xff] }
 0x4d7   : > { %v12131_v56 = vpop.f32.mrf.mxu1  ;;  %12346 = vmatmul.mubr.msk.bf16.gmra.mxu1 %vm1178_vm0, %v8662_v41 }
 0x4d8   : > { %v12215_v63 = vpop.f32.mrf.mxu0  ;;  %v7086_v33 = vadd.f32 %v12131_v56, %v17165_v12  ;;  %12389 = vmatprep.mubr.msk.bf16.mxu1 %vm1178_vm0, %v9257_v28 }
 0x4d9   : > { %v7041_v5 = vpop.f32.mrf.mxu1 }
 0x4da   : > { %v7861_v52 = vpop.f32.mrf.mxu0  ;;  %v7084_v19 = vadd.f32 %v7041_v5, %v17171_v55  ;;  %v17378_v25 = vadd.f32 %v12167_v17, %v7086_v33  ;;  %v9259_v55 = vpack.c.bf16 %v9230_v53, %v9229_v9  ;;  %v9231_v33 = vld [vmem:[#allocation2 + $0x2a9] sm:$0xff]  ;;  %v9232_v5 = vld [vmem:[#allocation2 + $0x2c1] sm:$0xff] }
 0x4db   : > { %v12132_v58 = vpop.f32.mrf.mxu1 }
 0x4dc   : > { %v12216_v50 = vpop.f32.mrf.mxu0  ;;  %v7087_v49 = vadd.f32 %v12132_v58, %v17182_v36  ;;  %v17381_v23 = vadd.f32 %v7346_v10, %v7084_v19 }
 0x4dd   : > { %v7044_v24 = vpop.f32.mrf.mxu1 }
 0x4de   : > { %v17383_v12 = vpop.f32.mrf.mxu0  ;;  %v17386_v29 = vadd.f32 %v7044_v24, %v17194_v1  ;;  %v17388_v46 = vadd.f32 %v12168_v21, %v7087_v49  ;;  %v9233_v21 = vld [vmem:[#allocation2 + $0x309] sm:$0xff]  ;;  %v9260_v49 = vpack.c.bf16 %v9232_v5, %v9231_v33 }
 0x4df   : > { %v12175_v17 = vpop.f32.mrf.mxu1  ;;  %12390 = vmatmul.mubr.msk.bf16.vlgmr.msra.gmra.mxu1 %vm1178_vm0, %v9258_v8 }
 0x4e0   : > { %v12219_v41 = vpop.f32.mrf.mxu0  ;;  %v7668_v28 = vadd.f32 %v12175_v17, %v17201_v61  ;;  %12393 = vmatprep.mubr.msk.bf16.mxu1 %vm1178_vm0, %v9259_v55 }
 0x4e1   : > { %v7539_v36 = vpop.f32.mrf.mxu1 }
 0x4e2   : > { %v7877_v10 = vpop.f32.mrf.mxu0  ;;  %v7666_v56 = vadd.f32 %v7539_v36, %v17207_v43  ;;  %v17394_v19 = vadd.f32 %v12211_v7, %v7668_v28  ;;  %v9261_v43 = vpack.c.bf16 %v9234_v37, %v9233_v21  ;;  %v9235_v36 = vld [vmem:[#allocation2 + $0x339] sm:$0xff] }
 0x4e3   : > { %v12176_v1 = vpop.f32.mrf.mxu1 }
 0x4e4   : > { %v12220_v57 = vpop.f32.mrf.mxu0  ;;  %v7669_v58 = vadd.f32 %v12176_v1, %v17216_v2  ;;  %v17397_v9 = vadd.f32 %v7845_v15, %v7666_v56  ;;  %v9236_v56 = vld [vmem:[#allocation2 + $0x351] sm:$0xff]  ;;  %v9238_v1 = vld [vmem:[#allocation2 + $0x381] sm:$0xff] }
 0x4e5   : > { %v7542_v53 = vpop.f32.mrf.mxu1 }
 0x4e6   : > { %v17399_v61 = vpop.f32.mrf.mxu0  ;;  %v17402_v24 = vadd.f32 %v7542_v53, %v17226_v18  ;;  %v17404_v8 = vadd.f32 %v12212_v44, %v7669_v58  ;;  %v9237_v44 = vld [vmem:[#allocation2 + $0x369] sm:$0xff]  ;;  %v9262_v53 = vpack.c.bf16 %v9236_v56, %v9235_v36  ;;  %v9240_v36 = vld [vmem:[#allocation2 + $0x3b1] sm:$0xff] }
 0x4e7   : > { %v12179_v7 = vpop.f32.mrf.mxu1  ;;  %12394 = vmatmul.mubr.msk.bf16.gmra.mxu1 %vm1178_vm0, %v9260_v49 }
 0x4e8   : > { %v12223_v55 = vpop.f32.mrf.mxu0  ;;  %v7672_v17 = vadd.f32 %v12179_v7, %v17232_v42  ;;  %12397 = vmatprep.mubr.msk.bf16.mxu1 %vm1178_vm0, %v9261_v43 }
 0x4e9   : > { %v7555_v2 = vpop.f32.mrf.mxu1 }
 0x4ea   : > { %v7893_v15 = vpop.f32.mrf.mxu0  ;;  %v7670_v28 = vadd.f32 %v7555_v2, %v17238_v51  ;;  %v17410_v33 = vadd.f32 %v12215_v63, %v7672_v17  ;;  %v9263_v51 = vpack.c.bf16 %v9238_v1, %v9237_v44  ;;  %v9241_v44 = vld [vmem:[#allocation2 + $0x3f9] sm:$0xff]  ;;  %v9242_v1 = vld [vmem:[#allocation2 + $0x411] sm:$0xff] }
 0x4eb   : > { %v12180_v18 = vpop.f32.mrf.mxu1 }
 0x4ec   : > { %v12224_v5 = vpop.f32.mrf.mxu0  ;;  %v7673_v21 = vadd.f32 %v12180_v18, %v17248_v27  ;;  %v17413_v37 = vadd.f32 %v7861_v52, %v7670_v28  ;;  %v12664_v27 = vld [vmem:[%s18519_s6 + $0x8] sm:$0xff]   ;;  %v9239_v28 = vld [vmem:[#allocation2 + $0x399] sm:$0xff] }
 0x4ed   : > { %v7558_v58 = vpop.f32.mrf.mxu1  ;;  %12421 = vmatprep.subr.bf16.mxu0 %v12664_v27 }
 0x4ee   : > { %v17415_v42 = vpop.f32.mrf.mxu0  ;;  %v17418_v49 = vadd.f32 %v7558_v58, %v17258_v34  ;;  %v17420_v43 = vadd.f32 %v12216_v50, %v7673_v21  ;;  %12422 = vmatpush3.bf16.msra.mxu0 %v12664_v27 }
 0x4ef   : > { %18518 = vst [vmem:[#allocation38_spill] sm:$0xff] %v17415_v42  ;;  %v12183_v63 = vpop.f32.mrf.mxu1  ;;  %12398 = vmatmul.mubr.msk.bf16.gmra.mxu1 %vm1178_vm0, %v9262_v53 }
 0x4f0   : > { %v12227_v7 = vpop.f32.mrf.mxu0  ;;  %v7676_v17 = vadd.f32 %v12183_v63, %v17264_v20  ;;  %12401 = vmatprep.mubr.msk.bf16.mxu1 %vm1178_vm0, %v9263_v51  ;;  %v9264_v51 = vpack.c.bf16 %v9240_v36, %v9239_v28  ;;  %v9244_v28 = vld [vmem:[#allocation2 + $0x441] sm:$0xff] }
 0x4f1   : > { %v7571_v52 = vpop.f32.mrf.mxu1 }
 0x4f2   : > { %v7909_v2 = vpop.f32.mrf.mxu0  ;;  %v7674_v34 = vadd.f32 %v7571_v52, %v17270_v40  ;;  %v17429_v50 = vadd.f32 %v12219_v41, %v7676_v17  ;;  %v9265_v40 = vpack.c.bf16 %v9242_v1, %v9241_v44  ;;  %v9246_v44 = vld [vmem:[#allocation2 + $0x471] sm:$0xff] }
 0x4f3   : > { %v12184_v56 = vpop.f32.mrf.mxu1 }
 0x4f4   : > { %v12228_v18 = vpop.f32.mrf.mxu0  ;;  %v7677_v20 = vadd.f32 %v12184_v56, %v17279_v38  ;;  %v17432_v21 = vadd.f32 %v7877_v10, %v7674_v34  ;;  %v9243_v34 = vld [vmem:[#allocation2 + $0x429] sm:$0xff] }
 0x4f5   : > { %v7574_v58 = vpop.f32.mrf.mxu1 }
 0x4f6   : > { %v7912_v53 = vpop.f32.mrf.mxu0  ;;  %v17435_v63 = vadd.f32 %v7574_v58, %v17289_v13  ;;  %v17437_v52 = vadd.f32 %v12220_v57, %v7677_v20  ;;  %v9245_v57 = vld [vmem:[#allocation2 + $0x459] sm:$0xff] }
 0x4f7   : > { %v12187_v41 = vpop.f32.mrf.mxu1  ;;  %12402 = vmatmul.mubr.msk.bf16.gmra.mxu1 %vm1178_vm0, %v9264_v51  ;;  %v9266_v51 = vpack.c.bf16 %v9244_v28, %v9243_v34  ;;  %v9248_v34 = vld [vmem:[#allocation2 + $0x4a1] sm:$0xff] }
 0x4f8   : > { %v12231_v17 = vpop.f32.mrf.mxu0  ;;  %v7680_v42 = vadd.f32 %v12187_v41, %v17295_v14  ;;  %12405 = vmatprep.mubr.msk.bf16.mxu1 %vm1178_vm0, %v9265_v40  ;;  %v9267_v41 = vpack.c.bf16 %v9246_v44, %v9245_v57  ;;  %v9250_v44 = vld [vmem:[#allocation2 + $0x501] sm:$0xff] }
 0x4f9   : > { %v7587_v38 = vpop.f32.mrf.mxu1 }
 0x4fa   : > { %v7925_v10 = vpop.f32.mrf.mxu0  ;;  %v7678_v27 = vadd.f32 %v7587_v38, %v17301_v60  ;;  %v17443_v36 = vadd.f32 %v12223_v55, %v7680_v42 }
 0x4fb   : > { %v12188_v13 = vpop.f32.mrf.mxu1 }
 0x4fc   : > { %v12232_v56 = vpop.f32.mrf.mxu0  ;;  %v7681_v1 = vadd.f32 %v12188_v13, %v17311_v4  ;;  %v17446_v20 = vadd.f32 %v7893_v15, %v7678_v27  ;;  %v9247_v13 = vld [vmem:[#allocation2 + $0x489] sm:$0xff] }
 0x4fd   : > { %v7590_v58 = vpop.f32.mrf.mxu1 }
 0x4fe   : > { %v7928_v14 = vpop.f32.mrf.mxu0  ;;  %v17449_v40 = vadd.f32 %v7590_v58, %v17319_v3  ;;  %v17451_v60 = vadd.f32 %v12224_v5, %v7681_v1  ;;  %v9249_v5 = vld [vmem:[#allocation2 + $0x4e9] sm:$0xff]  ;;  %v7378_v58 = vadd.f32 %v17272_v30, %v17333_v47 }
 0x4ff   : > { %v12191_v38 = vpop.f32.mrf.mxu1  ;;  %12406 = vmatmul.mubr.msk.bf16.gmra.mxu1 %vm1178_vm0, %v9266_v51 }
 0x500   : > { %18520 = vst [vmem:[#allocation39_spill] sm:$0xff] %v17449_v40  ;;  %v12235_v55 = vpop.f32.mrf.mxu0  ;;  %v7684_v42 = vadd.f32 %v12191_v38, %v17323_v59  ;;  %12409 = vmatprep.mubr.msk.bf16.mxu1 %vm1178_vm0, %v9267_v41  ;;  %v9268_v38 = vpack.c.bf16 %v9248_v34, %v9247_v13  ;;  %v9252_v13 = vld [vmem:[#allocation2 + $0x531] sm:$0xff] }
 0x501   : > { %v7603_v4 = vpop.f32.mrf.mxu1 }
 0x502   : > { %v7941_v15 = vpop.f32.mrf.mxu0  ;;  %v7682_v27 = vadd.f32 %v7603_v4, %v17327_v22  ;;  %v17457_v28 = vadd.f32 %v12227_v7, %v7684_v42  ;;  %v9269_v22 = vpack.c.bf16 %v9250_v44, %v9249_v5  ;;  %v9253_v5 = vld [vmem:[#allocation2 + $0x549] sm:$0xff]  ;;  %v9254_v44 = vld [vmem:[#allocation2 + $0x561] sm:$0xff] }
 0x503   : > { %v12192_v3 = vpop.f32.mrf.mxu1 }
 0x504   : > { %18521 = vst [vmem:[#allocation30_spill] sm:$0xff] %v17457_v28  ;;  %v12236_v57 = vpop.f32.mrf.mxu0  ;;  %v7685_v1 = vadd.f32 %v12192_v3, %v17336_v11  ;;  %v17462_v59 = vadd.f32 %v7909_v2, %v7682_v27  ;;  %v9251_v27 = vld [vmem:[#allocation2 + $0x519] sm:$0xff] }
 0x505   : > { %v7606_v51 = vpop.f32.mrf.mxu1 }
 0x506   : > { %v7944_v41 = vpop.f32.mrf.mxu0  ;;  %v7683_v40 = vadd.f32 %v7606_v51, %v7378_v58  ;;  %v17464_v4 = vadd.f32 %v12228_v18, %v7685_v1  ;;  %v9270_v51 = vpack.c.bf16 %v9252_v13, %v9251_v27 }
 0x507   : > { %v12195_v7 = vpop.f32.mrf.mxu1  ;;  %12410 = vmatmul.mubr.msk.bf16.gmra.mxu1 %vm1178_vm0, %v9268_v38 }
 0x508   : > { %v12239_v42 = vpop.f32.mrf.mxu0  ;;  %v7688_v28 = vadd.f32 %v12195_v7, %v17344_v45  ;;  %12413 = vmatprep.mubr.msk.bf16.mxu1 %vm1178_vm0, %v9269_v22  ;;  %v17469_v11 = vadd.f32 %v7912_v53, %v7683_v40  ;;  %v7382_v45 = vadd.f32 %v17303_v6, %v17353_v16  ;;  %v12665_v6 = vld [vmem:[%s18519_s6] sm:$0xff]  }
 0x509   : > { %v7619_v30 = vpop.f32.mrf.mxu1  ;;  %12423 = vmatprep.subr.bf16.mxu0 %v12665_v6 }
 0x50a   : > { %v7957_v47 = vpop.f32.mrf.mxu0  ;;  %v7686_v2 = vadd.f32 %v7619_v30, %v17348_v62  ;;  %v17472_v34 = vadd.f32 %v12231_v17, %v7688_v28  ;;  %v9271_v62 = vpack.c.bf16 %v9254_v44, %v9253_v5  ;;  %12424 = vmatpush3.bf16.msra.mxu0 %v12665_v6  ;;  %v7390_v6 = vadd.f32 %v17350_v31, %v17386_v29 }
 0x50b   : > { %v12196_v18 = vpop.f32.mrf.mxu1 }
 0x50c   : > { %v12240_v3 = vpop.f32.mrf.mxu0  ;;  %v7689_v1 = vadd.f32 %v12196_v18, %v17356_v32  ;;  %v17477_v58 = vadd.f32 %v7925_v10, %v7686_v2  ;;  %v9256_v2 = vld [vmem:[#allocation2 + $0x591] sm:$0xff] }
 0x50d   : > { %v7622_v53 = vpop.f32.mrf.mxu1 }
 0x50e   : > { %v7960_v40 = vpop.f32.mrf.mxu0  ;;  %v7687_v38 = vadd.f32 %v7622_v53, %v7382_v45  ;;  %v17479_v22 = vadd.f32 %v12232_v56, %v7689_v1  ;;  %v9255_v56 = vld [vmem:[#allocation2 + $0x579] sm:$0xff] }
 0x50f   : > { %v12199_v17 = vpop.f32.mrf.mxu1  ;;  %12414 = vmatmul.mubr.msk.bf16.gmra.mxu1 %vm1178_vm0, %v9270_v51 }
 0x510   : > { %v12283_v28 = vpop.f32.mrf.mxu0  ;;  %v7692_v7 = vadd.f32 %v12199_v17, %v17362_v26  ;;  %12417 = vmatprep.mubr.msk.bf16.mxu1 %vm1178_vm0, %v9271_v62  ;;  %v17484_v32 = vadd.f32 %v7928_v14, %v7687_v38  ;;  %v7386_v14 = vadd.f32 %v17329_v54, %v17370_v48 }
 0x511   : > { %v7635_v16 = vpop.f32.mrf.mxu1 }
 0x512   : > { %v8455_v10 = vpop.f32.mrf.mxu0  ;;  %v7690_v30 = vadd.f32 %v7635_v16, %v17365_v39  ;;  %v17490_v27 = vadd.f32 %v12235_v55, %v7692_v7  ;;  %v9272_v39 = vpack.c.bf16 %v9256_v2, %v9255_v56 }
 0x513   : > { %v12200_v13 = vpop.f32.mrf.mxu1 }
 0x514   : > { %v17492_v18 = vpop.f32.mrf.mxu0  ;;  %v7693_v26 = vadd.f32 %v12200_v13, %v17372_v35  ;;  %v17497_v5 = vadd.f32 %v7941_v15, %v7690_v30 }
 0x515   : > { %v7638_v44 = vpop.f32.mrf.mxu1 }
 0x516   : > { %v17499_v1 = vpop.f32.mrf.mxu0  ;;  %v7691_v45 = vadd.f32 %v7638_v44, %v7386_v14  ;;  %v17501_v53 = vadd.f32 %v12236_v57, %v7693_v26 }
 0x517   : > { %v12203_v55 = vpop.f32.mrf.mxu1  ;;  %12418 = vmatmul.mubr.msk.bf16.gmra.mxu1 %vm1178_vm0, %v9272_v39 }
 0x518   : > { %v12287_v51 = vpop.f32.mrf.mxu0  ;;  %v7696_v38 = vadd.f32 %v12203_v55, %v17378_v25  ;;  %v17505_v62 = vadd.f32 %v7944_v41, %v7691_v45 }
 0x519   : > { %v7651_v35 = vpop.f32.mrf.mxu1 }
 0x51a   : > { %v8471_v17 = vpop.f32.mrf.mxu0  ;;  %v7694_v54 = vadd.f32 %v7651_v35, %v17381_v23  ;;  %v17508_v48 = vadd.f32 %v12239_v42, %v7696_v38 }
 0x51b   : > { %v12204_v15 = vpop.f32.mrf.mxu1 }
 0x51c   : > { %v17510_v7 = vpop.f32.mrf.mxu0  ;;  %v7697_v57 = vadd.f32 %v12204_v15, %v17388_v46  ;;  %v17515_v16 = vadd.f32 %v7957_v47, %v7694_v54 }
 0x51d   : > { %v7654_v30 = vpop.f32.mrf.mxu1 }
 0x51e   : > { %v17517_v25 = vpop.f32.mrf.mxu0  ;;  %v7695_v41 = vadd.f32 %v7654_v30, %v7390_v6  ;;  %v17519_v56 = vadd.f32 %v12240_v3, %v7697_v57  ;;  %v7973_v3 = vadd.f32 %v17367_v0, %v17402_v24  ;;  %v7977_v24 = vadd.f32 %v17383_v12, %v17418_v49 }
 0x51f   : > { %v12247_v2 = vpop.f32.mrf.mxu1  ;;  %v7981_v49 = vadd.f32 %v17399_v61, %v17435_v63 }
 0x520   : > { %v12291_v23 = vpop.f32.mrf.mxu0  ;;  %v8279_v42 = vadd.f32 %v12247_v2, %v17394_v19  ;;  %v17522_v13 = vadd.f32 %v7960_v40, %v7695_v41 }
 0x521   : > { %v8150_v26 = vpop.f32.mrf.mxu1 }
 0x522   : > { %v8487_v14 = vpop.f32.mrf.mxu0  ;;  %v8277_v46 = vadd.f32 %v8150_v26, %v17397_v9  ;;  %v17525_v44 = vadd.f32 %v12283_v28, %v8279_v42 }
 0x523   : > { %v12248_v31 = vpop.f32.mrf.mxu1 }
 0x524   : > { %v12292_v29 = vpop.f32.mrf.mxu0  ;;  %v17528_v47 = vadd.f32 %v12248_v31, %v17404_v8  ;;  %v17532_v39 = vadd.f32 %v8455_v10, %v8277_v46 }
 0x525   : > { %v8153_v45 = vpop.f32.mrf.mxu1 }
 0x526   : > { %v17534_v19 = vpop.f32.mrf.mxu0  ;;  %v17536_v40 = vadd.f32 %v8153_v45, %v7973_v3 }
 0x527   : > { %v12251_v55 = vpop.f32.mrf.mxu1 }
 0x528   : > { %v12295_v38 = vpop.f32.mrf.mxu0  ;;  %v8283_v9 = vadd.f32 %v12251_v55, %v17410_v33 }
 0x529   : > { %v8166_v28 = vpop.f32.mrf.mxu1 }
 0x52a   : > { %v8503_v35 = vpop.f32.mrf.mxu0  ;;  %v8281_v54 = vadd.f32 %v8166_v28, %v17413_v37  ;;  %v17540_v8 = vadd.f32 %v12287_v51, %v8283_v9 }
 0x52b   : > { %v12252_v15 = vpop.f32.mrf.mxu1 }
 0x52c   : > { %v12296_v57 = vpop.f32.mrf.mxu0  ;;  %v17543_v0 = vadd.f32 %v12252_v15, %v17420_v43  ;;  %v17547_v10 = vadd.f32 %v8471_v17, %v8281_v54 }
 0x52d   : > { %v8169_v6 = vpop.f32.mrf.mxu1 }
 0x52e   : > { %v17549_v30 = vpop.f32.mrf.mxu0  ;;  %v17551_v33 = vadd.f32 %v8169_v6, %v7977_v24  ;;  %v18522_v24 = vld [vmem:[#allocation39_spill] sm:$0xff]  ;;  %v18523_v6 = vld [vmem:[#allocation38_spill] sm:$0xff] }
 0x52f   : > { %v12255_v41 = vpop.f32.mrf.mxu1 }
 0x530   : > { %v12299_v2 = vpop.f32.mrf.mxu0  ;;  %v8287_v37 = vadd.f32 %v12255_v41, %v17429_v50  ;;  %v7985_v41 = vadd.f32 %v18523_v6, %v18522_v24 }
 0x531   : > { %v8182_v51 = vpop.f32.mrf.mxu1 }
 0x532   : > { %v8519_v42 = vpop.f32.mrf.mxu0  ;;  %v8285_v26 = vadd.f32 %v8182_v51, %v17432_v21  ;;  %v17555_v43 = vadd.f32 %v12291_v23, %v8287_v37 }
 0x533   : > { %v12256_v46 = vpop.f32.mrf.mxu1 }
 0x534   : > { %v12300_v31 = vpop.f32.mrf.mxu0  ;;  %v8288_v12 = vadd.f32 %v12256_v46, %v17437_v52  ;;  %v17560_v17 = vadd.f32 %v8487_v14, %v8285_v26 }
 0x535   : > { %v8185_v3 = vpop.f32.mrf.mxu1 }
 0x536   : > { %v17562_v45 = vpop.f32.mrf.mxu0  ;;  %v17564_v55 = vadd.f32 %v8185_v3, %v7981_v49  ;;  %v17566_v50 = vadd.f32 %v12292_v29, %v8288_v12 }
 0x537   : > { %v12259_v9 = vpop.f32.mrf.mxu1 }
 0x538   : > { %v12303_v21 = vpop.f32.mrf.mxu0  ;;  %v8291_v23 = vadd.f32 %v12259_v9, %v17443_v36 }
 0x539   : > { %v8198_v28 = vpop.f32.mrf.mxu1 }
 0x53a   : > { %v8535_v54 = vpop.f32.mrf.mxu0  ;;  %v8289_v52 = vadd.f32 %v8198_v28, %v17446_v20  ;;  %v17570_v15 = vadd.f32 %v12295_v38, %v8291_v23  ;;  %v18525_v38 = vld [vmem:[#allocation30_spill] sm:$0xff] }
 0x53b   : > { %v12260_v61 = vpop.f32.mrf.mxu1 }
 0x53c   : > { %v12304_v63 = vpop.f32.mrf.mxu0  ;;  %v8292_v14 = vadd.f32 %v12260_v61, %v17451_v60  ;;  %v17575_v37 = vadd.f32 %v8503_v35, %v8289_v52 }
 0x53d   : > { %v8201_v29 = vpop.f32.mrf.mxu1 }
 0x53e   : > { %v17577_v51 = vpop.f32.mrf.mxu0  ;;  %v17579_v26 = vadd.f32 %v8201_v29, %v7985_v41  ;;  %v17581_v36 = vadd.f32 %v12296_v57, %v8292_v14 }
 0x53f   : > { %18524 = vst [vmem:[#allocation40_spill] sm:$0xff] %v17577_v51  ;;  %v12263_v46 = vpop.f32.mrf.mxu1 }
 0x540   : > { %v12307_v20 = vpop.f32.mrf.mxu0  ;;  %v8295_v12 = vadd.f32 %v12263_v46, %v18525_v38 }
 0x541   : > { %v8214_v49 = vpop.f32.mrf.mxu1 }
 0x542   : > { %v8293_v3 = vadd.f32 %v8214_v49, %v17462_v59  ;;  %v8551_v60 = vpop.f32.mrf.mxu0  ;;  %v17585_v9 = vadd.f32 %v12299_v2, %v8295_v12 }
 0x543   : > { %v12264_v23 = vpop.f32.mrf.mxu1 }
 0x544   : > { %v8296_v35 = vadd.f32 %v12264_v23, %v17464_v4  ;;  %v17588_v28 = vadd.f32 %v8519_v42, %v8293_v3  ;;  %v12308_v61 = vpop.f32.mrf.mxu0 }
 0x545   : > { %v8217_v52 = vpop.f32.mrf.mxu1 }
 0x546   : > { %v17591_v57 = vadd.f32 %v8217_v52, %v17469_v11  ;;  %v17593_v14 = vadd.f32 %v12300_v31, %v8296_v35  ;;  %v17596_v59 = vpop.f32.mrf.mxu0 }
 0x547   : > { %v12267_v24 = vpop.f32.mrf.mxu1  ;;  %18526 = vst [vmem:[#allocation41_spill] sm:$0xff] %v17596_v59 }
 0x548   : > { %v8299_v6 = vadd.f32 %v12267_v24, %v17472_v34  ;;  %v12311_v11 = vpop.f32.mrf.mxu0 }
 0x549   : > { %v8230_v41 = vpop.f32.mrf.mxu1 }
 0x54a   : > { %v8297_v2 = vadd.f32 %v8230_v41, %v17477_v58  ;;  %v17599_v29 = vadd.f32 %v12303_v21, %v8299_v6  ;;  %v8567_v23 = vpop.f32.mrf.mxu0 }
 0x54b   : > { %v12268_v4 = vpop.f32.mrf.mxu1 }
 0x54c   : > { %v8300_v42 = vadd.f32 %v12268_v4, %v17479_v22  ;;  %v17602_v46 = vadd.f32 %v8535_v54, %v8297_v2  ;;  %v12312_v24 = vpop.f32.mrf.mxu0 }
 0x54d   : > { %v8233_v38 = vpop.f32.mrf.mxu1 }
 0x54e   : > { %v17605_v31 = vadd.f32 %v8233_v38, %v17484_v32  ;;  %v17607_v12 = vadd.f32 %v12304_v63, %v8300_v42  ;;  %v17622_v2 = vpop.f32.mrf.mxu0 }
 0x54f   : > { %v12271_v34 = vpop.f32.mrf.mxu1  ;;  %18529 = vst [vmem:[#allocation29_spill] sm:$0xff] %v17622_v2 }
 0x550   : > { %18527 = vst [vmem:[#allocation42_spill] sm:$0xff] %v17605_v31  ;;  %v8303_v49 = vadd.f32 %v12271_v34, %v17490_v27 }
 0x551   : > { %v8246_v3 = vpop.f32.mrf.mxu1 }
 0x552   : > { %v8301_v58 = vadd.f32 %v8246_v3, %v17497_v5  ;;  %v17611_v21 = vadd.f32 %v12307_v20, %v8303_v49 }
 0x553   : > { %v12272_v35 = vpop.f32.mrf.mxu1 }
 0x554   : > { %v8304_v22 = vadd.f32 %v12272_v35, %v17501_v53  ;;  %v17614_v54 = vadd.f32 %v8551_v60, %v8301_v58 }
 0x555   : > { %v8249_v52 = vpop.f32.mrf.mxu1 }
 0x556   : > { %v17617_v32 = vadd.f32 %v8249_v52, %v17505_v62  ;;  %v17619_v63 = vadd.f32 %v12308_v61, %v8304_v22  ;;  %v17630_v62 = vpop.f32.mrf.mxu0 }
 0x557   : > { %v12275_v6 = vpop.f32.mrf.mxu1 }
 0x558   : > { %18528 = vst [vmem:[#allocation43_spill] sm:$0xff] %v17617_v32  ;;  %v8307_v27 = vadd.f32 %v12275_v6, %v17508_v48 }
 0x559   : > { %v8262_v41 = vpop.f32.mrf.mxu1 }
 0x55a   : > { %v8305_v5 = vadd.f32 %v8262_v41, %v17515_v16  ;;  %v17625_v20 = vadd.f32 %v12311_v11, %v8307_v27  ;;  %v17640_v11 = vpop.f32.mrf.mxu0 }
 0x55b   : > { %v12276_v53 = vpop.f32.mrf.mxu1 }
 0x55c   : > { %v8308_v60 = vadd.f32 %v12276_v53, %v17519_v56  ;;  %v17628_v4 = vadd.f32 %v8567_v23, %v8305_v5  ;;  %v17649_v23 = vpop.f32.mrf.mxu0 }
 0x55d   : > { %v8265_v42 = vpop.f32.mrf.mxu1 }
 0x55e   : > { %v17633_v61 = vadd.f32 %v8265_v42, %v17522_v13  ;;  %v17635_v38 = vadd.f32 %v12312_v24, %v8308_v60  ;;  %v17654_v22 = vpop.f32.mrf.mxu0 }
 0x55f   : > { %v12319_v48 = vpop.f32.mrf.mxu1 }
 0x560   : > { %18530 = vst [vmem:[#allocation27_spill] sm:$0xff] %v17633_v61  ;;  %v17638_v34 = vadd.f32 %v12319_v48, %v17525_v44  ;;  %v17663_v24 = vpop.f32.mrf.mxu0 }
 0x561   : > { %v8761_v16 = vpop.f32.mrf.mxu1 }
 0x562   : > { %v17643_v49 = vadd.f32 %v8761_v16, %v17532_v39  ;;  %v17668_v5 = vpop.f32.mrf.mxu0 }
 0x563   : > { %v17645_v56 = vpop.f32.mrf.mxu1 }
 0x564   : > { %v17678_v42 = vpop.f32.mrf.mxu0 }
 0x565   : > { %v17647_v3 = vpop.f32.mrf.mxu1 }
 0x567   : > { %v12323_v13 = vpop.f32.mrf.mxu1 }
 0x568   : > { %v17652_v58 = vadd.f32 %v12323_v13, %v17540_v8  ;;  %v17683_v13 = vpop.f32.mrf.mxu0 }
 0x569   : > { %v8777_v35 = vpop.f32.mrf.mxu1 }
 0x56a   : > { %v17657_v44 = vadd.f32 %v8777_v35, %v17547_v10 }
 0x56b   : > { %v17659_v52 = vpop.f32.mrf.mxu1 }
 0x56d   : > { %v17661_v39 = vpop.f32.mrf.mxu1 }
 0x56f   : > { %v12327_v6 = vpop.f32.mrf.mxu1 }
 0x570   : > { %v17666_v27 = vadd.f32 %v12327_v6, %v17555_v43 }
 0x571   : > { %v8793_v41 = vpop.f32.mrf.mxu1 }
 0x572   : > { %v17671_v8 = vadd.f32 %v8793_v41, %v17560_v17  ;;  %v17693_v41 = vpop.f32.mrf.mxu0 }
 0x573   : > { %v12328_v53 = vpop.f32.mrf.mxu1 }
 0x574   : > { %v17674_v10 = vadd.f32 %v12328_v53, %v17566_v50 }
 0x575   : > { %v17676_v60 = vpop.f32.mrf.mxu1 }
 0x577   : > { %v12331_v48 = vpop.f32.mrf.mxu1 }
 0x578   : > { %v17681_v16 = vadd.f32 %v12331_v48, %v17570_v15  ;;  %v17698_v48 = vpop.f32.mrf.mxu0 }
 0x579   : > { %v8809_v43 = vpop.f32.mrf.mxu1 }
 0x57a   : > { %v17686_v35 = vadd.f32 %v8809_v43, %v17575_v37 }
 0x57b   : > { %v12332_v17 = vpop.f32.mrf.mxu1 }
 0x57c   : > { %v17689_v6 = vadd.f32 %v12332_v17, %v17581_v36  ;;  %v17708_v17 = vpop.f32.mrf.mxu0 }
 0x57d   : > { %v17691_v50 = vpop.f32.mrf.mxu1 }
 0x57f   : > { %v12335_v53 = vpop.f32.mrf.mxu1 }
 0x580   : > { %v17696_v2 = vadd.f32 %v12335_v53, %v17585_v9  ;;  %v17713_v53 = vpop.f32.mrf.mxu0 }
 0x581   : > { %v8825_v15 = vpop.f32.mrf.mxu1 }
 0x582   : > { %v17701_v61 = vadd.f32 %v8825_v15, %v17588_v28 }
 0x583   : > { %v12336_v37 = vpop.f32.mrf.mxu1 }
 0x584   : > { %v17704_v43 = vadd.f32 %v12336_v37, %v17593_v14  ;;  %v17723_v37 = vpop.f32.mrf.mxu0 }
 0x585   : > { %v17706_v36 = vpop.f32.mrf.mxu1 }
 0x586   : > { %18531 = vst [vmem:[#allocation34_spill] sm:$0xff] %v17704_v43 }
 0x587   : > { %v12339_v59 = vpop.f32.mrf.mxu1 }
 0x588   : > { %v17711_v32 = vadd.f32 %v12339_v59, %v17599_v29  ;;  %v17728_v29 = vpop.f32.mrf.mxu0 }
 0x589   : > { %v8841_v9 = vpop.f32.mrf.mxu1 }
 0x58a   : > { %18532 = vst [vmem:[#allocation28_spill] sm:$0xff] %v17711_v32  ;;  %v17716_v51 = vadd.f32 %v8841_v9, %v17602_v46 }
 0x58b   : > { %v12340_v28 = vpop.f32.mrf.mxu1 }
 0x58c   : > { %v17719_v15 = vadd.f32 %v12340_v28, %v17607_v12  ;;  %v17738_v28 = vpop.f32.mrf.mxu0 }
 0x58d   : > { %v17721_v14 = vpop.f32.mrf.mxu1 }
 0x58e   : > { %18533 = vst [vmem:[#allocation33_spill] sm:$0xff] %v17719_v15  ;;  %18534 = vst [vmem:[#allocation32_spill] sm:$0xff] %v17721_v14 }
 0x58f   : > { %v12343_v31 = vpop.f32.mrf.mxu1 }
 0x590   : > { %v17726_v43 = vadd.f32 %v12343_v31, %v17611_v21  ;;  %v17743_v21 = vpop.f32.mrf.mxu0 }
 0x591   : > { %v8857_v59 = vpop.f32.mrf.mxu1 }
 0x592   : > { %18535 = vst [vmem:[#allocation31_spill] sm:$0xff] %v17726_v43  ;;  %v17731_v32 = vadd.f32 %v8857_v59, %v17614_v54  ;;  %v8585_v59 = vadd.f32 %v17492_v18, %v17528_v47  ;;  %v17765_v18 = vld [vmem:[%s18538_s19] ss:$0 sm:$0xff]  ;;  %s18556_s19 = sld [smem:[#allocation56_spill]] }
 0x593   : > { %v12344_v46 = vpop.f32.mrf.mxu1 }
 0x594   : > { %v17734_v9 = vadd.f32 %v12344_v46, %v17619_v63 }
 0x595   : > { %v17736_v12 = vpop.f32.mrf.mxu1 }
 0x596   : > { %18536 = vst [vmem:[#allocation35_spill] sm:$0xff] %v17734_v9  ;;  %v8891_v9 = vadd.f32 %v17645_v56, %v8585_v59  ;;  %v9193_v56 = vadd.f32 %v17640_v11, %v17643_v49  ;;  %v8589_v11 = vadd.f32 %v17510_v7, %v17543_v0  ;;  %v8587_v49 = vadd.f32 %v17517_v25, %v17551_v33 }
 0x597   : > { %v12347_v15 = vpop.f32.mrf.mxu1  ;;  %v9197_v7 = vadd.f32 %v17668_v5, %v17657_v44 }
 0x598   : > { %v17741_v14 = vadd.f32 %v12347_v15, %v17625_v20  ;;  %v8583_v20 = vadd.f32 %v17499_v1, %v17536_v40  ;;  %v17758_v15 = vpop.f32.mrf.mxu0  ;;  %s18087_s26 = scalar_lea.hbm %s18556_s19, %s10796_s17 }
 0x599   : > { %v8873_v31 = vpop.f32.mrf.mxu1 }
 0x59a   : > { %v17746_v43 = vadd.f32 %v8873_v31, %v17628_v4  ;;  %v9195_v4 = vadd.f32 %v17630_v62, %v17638_v34  ;;  %v8889_v47 = vadd.f32 %v17647_v3, %v8583_v20  ;;  %v17770_v59 = vpop.f32.mrf.mxu0  ;;  %v9196_v62 = vadd.f32 %v17649_v23, %v8891_v9  ;;  %v17777_v34 = vld [vmem:[%s18539_s14] ss:$0 sm:$0xff]  ;;  %s12750_s14 = scalar_lea.vmem %s18081_s1, 4096 }
 0x59b   : > { %v12348_v54 = vpop.f32.mrf.mxu1  ;;  %p12751_p12 = scmp.ne.s32.totalorder %s18081_s1, %s12750_s14 }
 0x59c   : > { %v17751_v63 = vadd.f32 %v12348_v54, %v17635_v38 }
 0x59d   : > { %v17753_v46 = vpop.f32.mrf.mxu1  ;;  %p12752_p9 = pnand %p12751_p12, %p18557_p7 }
 0x59e   : > { %18537 = vst [vmem:[#allocation36_spill] sm:$0xff] %v17751_v63 }
 0x59f   : > { %v12391_v31 = vpop.f32.mrf.mxu1  ;;  %p12753_p3 = pneg %p12752_p9 }
 0x5a0   : > { %v9500_v38 = vadd.f32 %v12391_v31, %v9195_v4  ;;  %v9194_v4 = vadd.f32 %v17654_v22, %v8889_v47  ;;  %v8893_v22 = vadd.f32 %v17661_v39, %v8587_v49 }
 0x5a1   : > { %v9371_v54 = vpop.f32.mrf.mxu1 }
 0x5a2   : > { %v9539_v1 = vmul.f32 %v17765_v18, %v9500_v38  ;;  %v9498_v40 = vadd.f32 %v9371_v54, %v9193_v56  ;;  %v17785_v38 = vpop.f32.mrf.mxu0  ;;  %v9199_v54 = vadd.f32 %v17663_v24, %v17652_v58  ;;  %v9198_v5 = vadd.f32 %v17683_v13, %v8893_v22 }
 0x5a3   : > { %v12392_v63 = vpop.f32.mrf.mxu1 }
 0x5a4   : > { %v9537_v3 = vmul.f32 %v17765_v18, %v9498_v40  ;;  %v9501_v20 = vadd.f32 %v12392_v63, %v9196_v62  ;;  %v9578_v23 = vadd.f32 %v17777_v34, %v9539_v1  ;;  %v8895_v63 = vadd.f32 %v17659_v52, %v8589_v11  ;;  %v17798_v62 = vpop.f32.mrf.mxu0 }
 0x5a5   : > { %v9374_v31 = vpop.f32.mrf.mxu1 }
 0x5a6   : > { %v9540_v9 = vmul.f32 %v17765_v18, %v9501_v20  ;;  %v9499_v56 = vadd.f32 %v9374_v31, %v9194_v4  ;;  %v9576_v25 = vadd.f32 %v17777_v34, %v9537_v3  ;;  %v9610_v20 = vmax.f32 %v9578_v23, 0.0 }
 0x5a7   : > { %v12395_v47 = vpop.f32.mrf.mxu1  ;;  %v9200_v4 = vadd.f32 %v17678_v42, %v8895_v63  ;;  %v8591_v42 = vadd.f32 %v17534_v19, %v17564_v55 }
 0x5a8   : > { %v9579_v0 = vadd.f32 %v17777_v34, %v9540_v9  ;;  %v9538_v33 = vmul.f32 %v17765_v18, %v9499_v56  ;;  %v9504_v1 = vadd.f32 %v12395_v47, %v9199_v54  ;;  %v9608_v3 = vmax.f32 %v9576_v25, 0.0  ;;  %v17805_v54 = vpop.f32.mrf.mxu0 }
 0x5a9   : > { %v9387_v40 = vpop.f32.mrf.mxu1 }
 0x5aa   : > { %v9611_v58 = vmax.f32 %v9579_v0, 0.0  ;;  %v9577_v52 = vadd.f32 %v17777_v34, %v9538_v33  ;;  %v9502_v24 = vadd.f32 %v9387_v40, %v9197_v7  ;;  %v9543_v39 = vmul.f32 %v17765_v18, %v9504_v1  ;;  %v17821_v55 = vpop.f32.mrf.mxu0 }
 0x5ab   : > { %v12396_v44 = vpop.f32.mrf.mxu1  ;;  %v9203_v7 = vadd.f32 %v17693_v41, %v17666_v27  ;;  %v9201_v1 = vadd.f32 %v17698_v48, %v17671_v8  ;;  %v8897_v27 = vadd.f32 %v17676_v60, %v8591_v42 }
 0x5ac   : > { %v9641_v11 = vpack.c.bf16 %v9611_v58, %v9610_v20  ;;  %v9609_v49 = vmax.f32 %v9577_v52, 0.0  ;;  %v9541_v31 = vmul.f32 %v17765_v18, %v9502_v24  ;;  %v9505_v9 = vadd.f32 %v12396_v44, %v9200_v4 }
 0x5ad   : > { %v9390_v56 = vpop.f32.mrf.mxu1  ;;  %v9582_v63 = vadd.f32 %v17777_v34, %v9543_v39  ;;  %v9204_v52 = vadd.f32 %v17708_v17, %v17674_v10  ;;  %v8595_v44 = vadd.f32 %v17549_v30, %v17579_v26 }
 0x5ae   : > { %v9640_v23 = vpack.c.bf16 %v9609_v49, %v9608_v3  ;;  %v9503_v47 = vadd.f32 %v9390_v56, %v9198_v5  ;;  %v9544_v13 = vmul.f32 %v17765_v18, %v9505_v9  ;;  %v9580_v25 = vadd.f32 %v17777_v34, %v9541_v31  ;;  %v17831_v31 = vpop.f32.mrf.mxu0 }
 0x5af   : > { %v12399_v22 = vpop.f32.mrf.mxu1  ;;  %v9614_v24 = vmax.f32 %v9582_v63, 0.0  ;;  %v9207_v56 = vadd.f32 %v17723_v37, %v17681_v16  ;;  %v8901_v30 = vadd.f32 %v17691_v50, %v8595_v44  ;;  %v9208_v16 = vadd.f32 %v17738_v28, %v17689_v6 }
 0x5b0   : > { %v9542_v0 = vmul.f32 %v17765_v18, %v9503_v47  ;;  %v9508_v33 = vadd.f32 %v12399_v22, %v9203_v7  ;;  %12425 = vmatprep.mubr.msk.bf16.mxu0 %vm1178_vm0, %v9640_v23  ;;  %v9583_v41 = vadd.f32 %v17777_v34, %v9544_v13  ;;  %v9612_v48 = vmax.f32 %v9580_v25, 0.0  ;;  %v17847_v37 = vpop.f32.mrf.mxu0 }
 0x5b1   : > { %v9403_v19 = vpop.f32.mrf.mxu1  ;;  %12426 = vmatmul.mubr.msk.bf16.vlgmr.msra.gmra.mxu0 %vm1178_vm0, %v9641_v11  ;;  %v9202_v11 = vadd.f32 %v17713_v53, %v8897_v27  ;;  %v9205_v53 = vadd.f32 %v17728_v29, %v17686_v35 }
 0x5b2   : > { %v9581_v40 = vadd.f32 %v17777_v34, %v9542_v0  ;;  %v9547_v20 = vmul.f32 %v17765_v18, %v9508_v33  ;;  %v9506_v58 = vadd.f32 %v9403_v19, %v9201_v1  ;;  %v9615_v39 = vmax.f32 %v9583_v41, 0.0 }
 0x5b3   : > { %v12400_v8 = vpop.f32.mrf.mxu1  ;;  %v9206_v41 = vadd.f32 %v17743_v21, %v8901_v30  ;;  %v8599_v19 = vadd.f32 %v17562_v45, %v17591_v57  ;;  %v9209_v45 = vadd.f32 %v17770_v59, %v17701_v61  ;;  %v18540_v59 = vld [vmem:[#allocation34_spill] sm:$0xff] }
 0x5b4   : > { %v9613_v60 = vmax.f32 %v9581_v40, 0.0  ;;  %v9509_v4 = vadd.f32 %v12400_v8, %v9204_v52  ;;  %v9643_v5 = vpack.c.bf16 %v9615_v39, %v9614_v24  ;;  %v9545_v3 = vmul.f32 %v17765_v18, %v9506_v58 }
 0x5b5   : > { %v9406_v49 = vpop.f32.mrf.mxu1  ;;  %v9586_v10 = vadd.f32 %v17777_v34, %v9547_v20  ;;  %v17855_v20 = vpop.f32.mrf.mxu0  ;;  %v9211_v39 = vadd.f32 %v17758_v15, %v17696_v2  ;;  %v8905_v8 = vadd.f32 %v17706_v36, %v8599_v19 }
 0x5b6   : > { %v9642_v9 = vpack.c.bf16 %v9613_v60, %v9612_v48  ;;  %v9548_v17 = vmul.f32 %v17765_v18, %v9509_v4  ;;  %v9507_v23 = vadd.f32 %v9406_v49, %v9202_v11  ;;  %v9584_v42 = vadd.f32 %v17777_v34, %v9545_v3 }
 0x5b7   : > { %v12403_v47 = vpop.f32.mrf.mxu1  ;;  %v9618_v50 = vmax.f32 %v9586_v10, 0.0  ;;  %v9162_v3 = vpop.f32.mrf.mxu0  ;;  %v9212_v49 = vadd.f32 %v17785_v38, %v18540_v59  ;;  %v9210_v10 = vadd.f32 %v17798_v62, %v8905_v8 }
 0x5b8   : > { %v9587_v26 = vadd.f32 %v17777_v34, %v9548_v17  ;;  %v9512_v7 = vadd.f32 %v12403_v47, %v9207_v56  ;;  %12429 = vmatprep.mubr.msk.bf16.mxu0 %vm1178_vm0, %v9642_v9  ;;  %v9546_v63 = vmul.f32 %v17765_v18, %v9507_v23  ;;  %v9616_v6 = vmax.f32 %v9584_v42, 0.0 }
 0x5b9   : > { %v9419_v13 = vpop.f32.mrf.mxu1  ;;  %12430 = vmatmul.mubr.msk.bf16.gmra.mxu0 %vm1178_vm0, %v9643_v5 }
 0x5ba   : > { %v9619_v22 = vmax.f32 %v9587_v26, 0.0  ;;  %v9551_v25 = vmul.f32 %v17765_v18, %v9512_v7  ;;  %v9510_v0 = vadd.f32 %v9419_v13, %v9205_v53  ;;  %v9585_v33 = vadd.f32 %v17777_v34, %v9546_v63  ;;  %v12380_v7 = vpop.f32.mrf.mxu0  ;;  %v18541_v63 = vld [vmem:[#allocation28_spill] sm:$0xff] }
 0x5bb   : > { %v12404_v35 = vpop.f32.mrf.mxu1  ;;  %v9215_v13 = vadd.f32 %v17805_v54, %v18541_v63 }
 0x5bc   : > { %v9645_v29 = vpack.c.bf16 %v9619_v22, %v9618_v50  ;;  %v9549_v1 = vmul.f32 %v17765_v18, %v9510_v0  ;;  %v9513_v27 = vadd.f32 %v12404_v35, %v9208_v16  ;;  %v9617_v28 = vmax.f32 %v9585_v33, 0.0  ;;  %v18542_v16 = vld [vmem:[#allocation42_spill] sm:$0xff]  ;;  %v18543_v50 = vld [vmem:[#allocation40_spill] sm:$0xff]  ;;  %v9165_v19 = vpop.f32.mrf.mxu0 }
 0x5bd   : > { %v9422_v40 = vpop.f32.mrf.mxu1  ;;  %v9590_v58 = vadd.f32 %v17777_v34, %v9551_v25  ;;  %v8603_v22 = vadd.f32 %v18543_v50, %v18542_v16 }
 0x5be   : > { %v9552_v52 = vmul.f32 %v17765_v18, %v9513_v27  ;;  %v9511_v24 = vadd.f32 %v9422_v40, %v9206_v41  ;;  %v9644_v48 = vpack.c.bf16 %v9617_v28, %v9616_v6  ;;  %v9588_v57 = vadd.f32 %v17777_v34, %v9549_v1  ;;  %v18544_v1 = vld [vmem:[#allocation32_spill] sm:$0xff] }
 0x5bf   : > { %v12407_v21 = vpop.f32.mrf.mxu1  ;;  %v9622_v11 = vmax.f32 %v9590_v58, 0.0  ;;  %v8909_v54 = vadd.f32 %v18544_v1, %v8603_v22  ;;  %v18545_v58 = vld [vmem:[#allocation33_spill] sm:$0xff] }
 0x5c0   : > { %v9591_v60 = vadd.f32 %v17777_v34, %v9552_v52  ;;  %v9550_v4 = vmul.f32 %v17765_v18, %v9511_v24  ;;  %v9516_v44 = vadd.f32 %v12407_v21, %v9211_v39  ;;  %12433 = vmatprep.mubr.msk.bf16.mxu0 %vm1178_vm0, %v9644_v48  ;;  %v9620_v17 = vmax.f32 %v9588_v57, 0.0  ;;  %v18546_v21 = vld [vmem:[#allocation43_spill] sm:$0xff] }
 0x5c1   : > { %v9435_v5 = vpop.f32.mrf.mxu1  ;;  %12434 = vmatmul.mubr.msk.bf16.gmra.mxu0 %vm1178_vm0, %v9645_v29  ;;  %v9213_v29 = vadd.f32 %v17821_v55, %v17716_v51  ;;  %v9216_v52 = vadd.f32 %v17831_v31, %v18545_v58 }
 0x5c2   : > { %v9623_v2 = vmax.f32 %v9591_v60, 0.0  ;;  %v9589_v36 = vadd.f32 %v17777_v34, %v9550_v4  ;;  %v9514_v15 = vadd.f32 %v9435_v5, %v9209_v45  ;;  %v9555_v61 = vmul.f32 %v17765_v18, %v9516_v44  ;;  %v18547_v45 = vld [vmem:[#allocation41_spill] sm:$0xff] }
 0x5c3   : > { %v12408_v9 = vpop.f32.mrf.mxu1  ;;  %v8607_v57 = vadd.f32 %v18547_v45, %v18546_v21  ;;  %v9214_v44 = vadd.f32 %v17847_v37, %v8909_v54  ;;  %v9217_v37 = vadd.f32 %v9162_v3, %v17731_v32 }
 0x5c4   : > { %v9647_v56 = vpack.c.bf16 %v9623_v2, %v9622_v11  ;;  %v9621_v23 = vmax.f32 %v9589_v36, 0.0  ;;  %v9553_v47 = vmul.f32 %v17765_v18, %v9514_v15  ;;  %v9517_v30 = vadd.f32 %v12408_v9, %v9212_v49  ;;  %v12383_v11 = vpop.f32.mrf.mxu0  ;;  %v18548_v15 = vld [vmem:[#allocation31_spill] sm:$0xff] }
 0x5c5   : > { %v9438_v26 = vpop.f32.mrf.mxu1  ;;  %v9594_v38 = vadd.f32 %v17777_v34, %v9555_v61  ;;  %v9219_v61 = vadd.f32 %v17855_v20, %v18548_v15  ;;  %v8913_v9 = vadd.f32 %v17736_v12, %v8607_v57 }
 0x5c6   : > { %v9646_v53 = vpack.c.bf16 %v9621_v23, %v9620_v17  ;;  %v9515_v42 = vadd.f32 %v9438_v26, %v9210_v10  ;;  %v9556_v62 = vmul.f32 %v17765_v18, %v9517_v30  ;;  %v9592_v0 = vadd.f32 %v17777_v34, %v9553_v47  ;;  %v18549_v30 = vld [vmem:[#allocation35_spill] sm:$0xff] }
 0x5c7   : > { %v12411_v25 = vpop.f32.mrf.mxu1  ;;  %v9626_v24 = vmax.f32 %v9594_v38, 0.0  ;;  %v9220_v26 = vadd.f32 %v12380_v7, %v18549_v30  ;;  %v9218_v22 = vadd.f32 %v9165_v19, %v8913_v9  ;;  %v18550_v38 = vld [vmem:[#allocation27_spill] sm:$0xff] }
 0x5c8   : > { %v9554_v33 = vmul.f32 %v17765_v18, %v9515_v42  ;;  %v9520_v35 = vadd.f32 %v12411_v25, %v9215_v13  ;;  %12437 = vmatprep.mubr.msk.bf16.mxu0 %vm1178_vm0, %v9646_v53  ;;  %v9595_v27 = vadd.f32 %v17777_v34, %v9556_v62  ;;  %v9624_v51 = vmax.f32 %v9592_v0, 0.0  ;;  %v9178_v53 = vpop.f32.mrf.mxu0  ;;  %v18551_v62 = vld [vmem:[#allocation29_spill] sm:$0xff] }
 0x5c9   : > { %v9451_v41 = vpop.f32.mrf.mxu1  ;;  %12438 = vmatmul.mubr.msk.bf16.gmra.mxu0 %vm1178_vm0, %v9647_v56  ;;  %v8611_v25 = vadd.f32 %v18551_v62, %v18550_v38  ;;  %v9221_v19 = vadd.f32 %v9178_v53, %v17746_v43 }
 0x5ca   : > { %v9593_v6 = vadd.f32 %v17777_v34, %v9554_v33  ;;  %v9559_v28 = vmul.f32 %v17765_v18, %v9520_v35  ;;  %v9518_v40 = vadd.f32 %v9451_v41, %v9213_v29  ;;  %v9627_v39 = vmax.f32 %v9595_v27, 0.0  ;;  %v12384_v35 = vpop.f32.mrf.mxu0 }
 0x5cb   : > { %v12412_v8 = vpop.f32.mrf.mxu1  ;;  %v9223_v27 = vadd.f32 %v12383_v11, %v17741_v14  ;;  %v8917_v41 = vadd.f32 %v17753_v46, %v8611_v25 }
 0x5cc   : > { %v9625_v55 = vmax.f32 %v9593_v6, 0.0  ;;  %v9521_v48 = vadd.f32 %v12412_v8, %v9216_v52  ;;  %v9649_v60 = vpack.c.bf16 %v9627_v39, %v9626_v24  ;;  %v9557_v4 = vmul.f32 %v17765_v18, %v9518_v40  ;;  %v9181_v8 = vpop.f32.mrf.mxu0 }
 0x5cd   : > { %v9454_v5 = vpop.f32.mrf.mxu1  ;;  %v9598_v36 = vadd.f32 %v17777_v34, %v9559_v28  ;;  %v9222_v57 = vadd.f32 %v9181_v8, %v8917_v41  ;;  %v9965_v41 = vld [vmem:[%s13247_s24 + $0x30] sm:$0xff] }
 0x5ce   : > { %v9648_v2 = vpack.c.bf16 %v9625_v55, %v9624_v51  ;;  %v9560_v31 = vmul.f32 %v17765_v18, %v9521_v48  ;;  %v9519_v59 = vadd.f32 %v9454_v5, %v9214_v44  ;;  %v9596_v56 = vadd.f32 %v17777_v34, %v9557_v4  ;;  %v18552_v48 = vld [vmem:[#allocation36_spill] sm:$0xff] }
 0x5cf   : > { %v12415_v49 = vpop.f32.mrf.mxu1  ;;  %v9630_v20 = vmax.f32 %v9598_v36, 0.0  ;;  %v9224_v21 = vadd.f32 %v12384_v35, %v18552_v48 }
 0x5d0   : > { %v9599_v10 = vadd.f32 %v17777_v34, %v9560_v31  ;;  %v9524_v17 = vadd.f32 %v12415_v49, %v9219_v61  ;;  %12441 = vmatprep.mubr.msk.bf16.mxu0 %vm1178_vm0, %v9648_v2  ;;  %v9558_v23 = vmul.f32 %v17765_v18, %v9519_v59  ;;  %v9628_v7 = vmax.f32 %v9596_v56, 0.0 }
 0x5d1   : > { %v9467_v47 = vpop.f32.mrf.mxu1  ;;  %12442 = vmatmul.mubr.msk.bf16.gmra.mxu0 %vm1178_vm0, %v9649_v60 }
 0x5d2   : > { %v9631_v42 = vmax.f32 %v9599_v10, 0.0  ;;  %v9563_v63 = vmul.f32 %v17765_v18, %v9524_v17  ;;  %v9522_v12 = vadd.f32 %v9467_v47, %v9217_v37  ;;  %v9597_v13 = vadd.f32 %v17777_v34, %v9558_v23 }
 0x5d3   : > { %v12416_v16 = vpop.f32.mrf.mxu1 }
 0x5d4   : > { %v9651_v50 = vpack.c.bf16 %v9631_v42, %v9630_v20  ;;  %v9561_v32 = vmul.f32 %v17765_v18, %v9522_v12  ;;  %v9525_v3 = vadd.f32 %v12416_v16, %v9220_v26  ;;  %v9629_v0 = vmax.f32 %v9597_v13, 0.0  ;;  %v17946_v26 = vld [vmem:[%s18554_s30] ss:$0 sm:$0xff]  ;;  %v9961_v20 = vld [vmem:[%s13247_s24 + $0x10] sm:$0xff] }
 0x5d5   : > { %v9470_v33 = vpop.f32.mrf.mxu1  ;;  %v9602_v29 = vadd.f32 %v17777_v34, %v9563_v63  ;;  %v9959_v13 = vld [vmem:[%s13247_s24] sm:$0xff] }
 0x5d6   : > { %v9564_v1 = vmul.f32 %v17765_v18, %v9525_v3  ;;  %v9523_v54 = vadd.f32 %v9470_v33, %v9218_v22  ;;  %v9650_v6 = vpack.c.bf16 %v9629_v0, %v9628_v7  ;;  %v9600_v40 = vadd.f32 %v17777_v34, %v9561_v32  ;;  %v9962_v22 = vld [vmem:[%s13247_s24 + $0x18] sm:$0xff]  ;;  %v9960_v33 = vld [vmem:[%s13247_s24 + $0x8] sm:$0xff] }
 0x5d7   : > { %v12419_v28 = vpop.f32.mrf.mxu1  ;;  %v9634_v51 = vmax.f32 %v9602_v29, 0.0 }
 0x5d8   : > { %v9603_v58 = vadd.f32 %v17777_v34, %v9564_v1  ;;  %v9562_v52 = vmul.f32 %v17765_v18, %v9523_v54  ;;  %v9528_v24 = vadd.f32 %v12419_v28, %v9223_v27  ;;  %12445 = vmatprep.mubr.msk.bf16.mxu0 %vm1178_vm0, %v9650_v6  ;;  %v9632_v60 = vmax.f32 %v9600_v40, 0.0 }
 0x5d9   : > { %v9483_v39 = vpop.f32.mrf.mxu1  ;;  %12446 = vmatmul.mubr.msk.bf16.gmra.mxu0 %vm1178_vm0, %v9651_v50 }
 0x5da   : > { %v9635_v55 = vmax.f32 %v9603_v58, 0.0  ;;  %v9601_v14 = vadd.f32 %v17777_v34, %v9562_v52  ;;  %v9526_v46 = vadd.f32 %v9483_v39, %v9221_v19  ;;  %v9567_v43 = vmul.f32 %v17765_v18, %v9528_v24  ;;  %v9963_v52 = vld [vmem:[%s13247_s24 + $0x20] sm:$0xff] }
 0x5db   : > { %v12420_v45 = vpop.f32.mrf.mxu1 }
 0x5dc   : > { %v9653_v4 = vpack.c.bf16 %v9635_v55, %v9634_v51  ;;  %v9633_v44 = vmax.f32 %v9601_v14, 0.0  ;;  %v9565_v5 = vmul.f32 %v17765_v18, %v9526_v46  ;;  %v9529_v11 = vadd.f32 %v12420_v45, %v9224_v21  ;;  %v9966_v14 = vld [vmem:[%s13247_s24 + $0x38] sm:$0xff] }
 0x5dd   : > { %v9486_v2 = vpop.f32.mrf.mxu1  ;;  %v9606_v15 = vadd.f32 %v17777_v34, %v9567_v43 }
 0x5de   : > { %v9652_v36 = vpack.c.bf16 %v9633_v44, %v9632_v60  ;;  %v9527_v31 = vadd.f32 %v9486_v2, %v9222_v57  ;;  %v9568_v61 = vmul.f32 %v17765_v18, %v9529_v11  ;;  %v9604_v59 = vadd.f32 %v17777_v34, %v9565_v5  ;;  %v9964_v57 = vld [vmem:[%s13247_s24 + $0x28] sm:$0xff] }
 0x5df   : > { %v9638_v17 = vmax.f32 %v9606_v15, 0.0 }
 0x5e0   : > { %v9566_v49 = vmul.f32 %v17765_v18, %v9527_v31  ;;  %12449 = vmatprep.mubr.msk.bf16.mxu0 %vm1178_vm0, %v9652_v36  ;;  %v9607_v9 = vadd.f32 %v17777_v34, %v9568_v61  ;;  %v9636_v56 = vmax.f32 %v9604_v59, 0.0  ;;  %v17941_v18 = vld [vmem:[%s18553_s29] ss:$0 sm:$0xff]  ;;  %v9969_v31 = vld [vmem:[%s13247_s24 + $0x50] sm:$0xff]  ;;  %s12756_s29 = scalar_lea.vmem %s12755_s10, 8192 }
 0x5e1   : > { %12450 = vmatmul.mubr.msk.bf16.gmra.mxu0 %vm1178_vm0, %v9653_v4  ;;  %p12758_p8 = scmp.lt.s32.totalorder %s12756_s29, %s12750_s14 }
 0x5e2   : > { %v9605_v10 = vadd.f32 %v17777_v34, %v9566_v49  ;;  %v9639_v37 = vmax.f32 %v9607_v9, 0.0  ;;  %v9967_v9 = vld [vmem:[%s13247_s24 + $0x40] sm:$0xff] }
 0x5e3   : > { %p12759_p5 = por %p12758_p8, %p12757_p1 }
 0x5e4   : > { %v9637_v23 = vmax.f32 %v9605_v10, 0.0  ;;  %v9655_v47 = vpack.c.bf16 %v9639_v37, %v9638_v17 }
 0x5e5   : > { %p12760_p6 = pnand %p12759_p5, %p12753_p3 }
 0x5e6   : > { %v9654_v30 = vpack.c.bf16 %v9637_v23, %v9636_v56  ;;  %v9970_v23 = vld [vmem:[%s13247_s24 + $0x58] sm:$0xff] }
 0x5e8   : > { %12453 = vmatprep.mubr.msk.bf16.mxu0 %vm1178_vm0, %v9654_v30 }
 0x5e9   : > { %12454 = vmatmul.mubr.msk.bf16.gmra.mxu0 %vm1178_vm0, %v9655_v47 }
 0x671   : > { %v12427_v34 = vpop.f32.mrf.mxu0 }
 0x672   : > { %v9890_v53 = vmul.f32 %v12427_v34, %v17941_v18 }
 0x673   : > { %v9754_v42 = vpop.f32.mrf.mxu0 }
 0x674   : > { %v9929_v63 = vadd.f32 %v17946_v26, %v9890_v53  ;;  %v9888_v12 = vmul.f32 %v17941_v18, %v9754_v42  ;;  %v9968_v42 = vld [vmem:[%s13247_s24 + $0x48] sm:$0xff] }
 0x675   : > { %v12428_v16 = vpop.f32.mrf.mxu0 }
 0x676   : > { %v9993_v50 = vadd.f32 %v9961_v20, %v9929_v63  ;;  %v9927_v32 = vadd.f32 %v17946_v26, %v9888_v12  ;;  %v9891_v3 = vmul.f32 %v12428_v16, %v17941_v18 }
 0x677   : > { %v9757_v38 = vpop.f32.mrf.mxu0 }
 0x678   : > { %v10025_v62 = vmax.f32 %v9993_v50, 0.0  ;;  %v9991_v25 = vadd.f32 %v9959_v13, %v9927_v32  ;;  %v9930_v7 = vadd.f32 %v17946_v26, %v9891_v3  ;;  %v9889_v0 = vmul.f32 %v17941_v18, %v9757_v38  ;;  %v9973_v32 = vld [vmem:[%s13247_s24 + $0x70] sm:$0xff] }
 0x679   : > { %v12431_v35 = vpop.f32.mrf.mxu0 }
 0x67a   : > { %10057 = vst [vmem:[%s17961_s25 + $0x10] sm:$0xff] %v10025_v62  ;;  %v10023_v29 = vmax.f32 %v9991_v25, 0.0  ;;  %v9994_v1 = vadd.f32 %v9962_v22, %v9930_v7  ;;  %v9928_v54 = vadd.f32 %v17946_v26, %v9889_v0  ;;  %v9894_v27 = vmul.f32 %v12431_v35, %v17941_v18  ;;  %v9971_v7 = vld [vmem:[%s13247_s24 + $0x60] sm:$0xff] }
 0x67b   : > { %v9770_v6 = vpop.f32.mrf.mxu0 }
 0x67c   : > { %10055 = vst [vmem:[%s17961_s25] sm:$0xff] %v10023_v29  ;;  %v10026_v28 = vmax.f32 %v9994_v1, 0.0  ;;  %v9992_v19 = vadd.f32 %v9960_v33, %v9928_v54  ;;  %v9933_v40 = vadd.f32 %v17946_v26, %v9894_v27  ;;  %v9892_v58 = vmul.f32 %v17941_v18, %v9770_v6  ;;  %v9974_v54 = vld [vmem:[%s13247_s24 + $0x78] sm:$0xff] }
 0x67d   : > { %v12432_v24 = vpop.f32.mrf.mxu0 }
 0x67e   : > { %10058 = vst [vmem:[%s17961_s25 + $0x18] sm:$0xff] %v10026_v28  ;;  %v10024_v39 = vmax.f32 %v9992_v19, 0.0  ;;  %v9997_v8 = vadd.f32 %v9965_v41, %v9933_v40  ;;  %v9931_v51 = vadd.f32 %v17946_v26, %v9892_v58  ;;  %v9895_v55 = vmul.f32 %v12432_v24, %v17941_v18  ;;  %v9972_v40 = vld [vmem:[%s13247_s24 + $0x68] sm:$0xff] }
 0x67f   : > { %v9773_v46 = vpop.f32.mrf.mxu0 }
 0x680   : > { %10056 = vst [vmem:[%s17961_s25 + $0x8] sm:$0xff] %v10024_v39  ;;  %v10029_v43 = vmax.f32 %v9997_v8, 0.0  ;;  %v9995_v48 = vadd.f32 %v9963_v52, %v9931_v51  ;;  %v9934_v21 = vadd.f32 %v17946_v26, %v9895_v55  ;;  %v9893_v45 = vmul.f32 %v17941_v18, %v9773_v46  ;;  %v9977_v51 = vld [vmem:[%s13247_s24 + $0x90] sm:$0xff] }
 0x681   : > { %v12435_v5 = vpop.f32.mrf.mxu0 }
 0x682   : > { %10061 = vst [vmem:[%s17961_s25 + $0x30] sm:$0xff] %v10029_v43  ;;  %v10027_v60 = vmax.f32 %v9995_v48, 0.0  ;;  %v9998_v4 = vadd.f32 %v9966_v14, %v9934_v21  ;;  %v9932_v44 = vadd.f32 %v17946_v26, %v9893_v45  ;;  %v9898_v11 = vmul.f32 %v12435_v5, %v17941_v18  ;;  %v9975_v21 = vld [vmem:[%s13247_s24 + $0x80] sm:$0xff]  ;;  %v9978_v5 = vld [vmem:[%s13247_s24 + $0x98] sm:$0xff] }
 0x683   : > { %v9786_v15 = vpop.f32.mrf.mxu0 }
 0x684   : > { %10059 = vst [vmem:[%s17961_s25 + $0x20] sm:$0xff] %v10027_v60  ;;  %v10030_v2 = vmax.f32 %v9998_v4, 0.0  ;;  %v9996_v36 = vadd.f32 %v9964_v57, %v9932_v44  ;;  %v9937_v61 = vadd.f32 %v17946_v26, %v9898_v11  ;;  %v9896_v59 = vmul.f32 %v17941_v18, %v9786_v15 }
 0x685   : > { %v12436_v10 = vpop.f32.mrf.mxu0 }
 0x686   : > { %10062 = vst [vmem:[%s17961_s25 + $0x38] sm:$0xff] %v10030_v2  ;;  %v10028_v49 = vmax.f32 %v9996_v36, 0.0  ;;  %v10001_v17 = vadd.f32 %v9969_v31, %v9937_v61  ;;  %v9935_v37 = vadd.f32 %v17946_v26, %v9896_v59  ;;  %v9899_v56 = vmul.f32 %v12436_v10, %v17941_v18  ;;  %v9976_v61 = vld [vmem:[%s13247_s24 + $0x88] sm:$0xff] }
 0x687   : > { %v9789_v47 = vpop.f32.mrf.mxu0 }
 0x688   : > { %10060 = vst [vmem:[%s17961_s25 + $0x28] sm:$0xff] %v10028_v49  ;;  %v10033_v30 = vmax.f32 %v10001_v17, 0.0  ;;  %v9999_v34 = vadd.f32 %v9967_v9, %v9935_v37  ;;  %v9938_v53 = vadd.f32 %v17946_v26, %v9899_v56  ;;  %v9897_v20 = vmul.f32 %v17941_v18, %v9789_v47  ;;  %v9981_v37 = vld [vmem:[%s13247_s24 + $0xb0] sm:$0xff] }
 0x689   : > { %v12439_v63 = vpop.f32.mrf.mxu0 }
 0x68a   : > { %10065 = vst [vmem:[%s17961_s25 + $0x50] sm:$0xff] %v10033_v30  ;;  %v10031_v12 = vmax.f32 %v9999_v34, 0.0  ;;  %v10002_v13 = vadd.f32 %v9970_v23, %v9938_v53  ;;  %v9936_v16 = vadd.f32 %v17946_v26, %v9897_v20  ;;  %v9902_v50 = vmul.f32 %v12439_v63, %v17941_v18  ;;  %v9979_v53 = vld [vmem:[%s13247_s24 + $0xa0] sm:$0xff] }
 0x68b   : > { %v9802_v3 = vpop.f32.mrf.mxu0 }
 0x68c   : > { %10063 = vst [vmem:[%s17961_s25 + $0x40] sm:$0xff] %v10031_v12  ;;  %v10034_v22 = vmax.f32 %v10002_v13, 0.0  ;;  %v10000_v38 = vadd.f32 %v9968_v42, %v9936_v16  ;;  %v9941_v62 = vadd.f32 %v17946_v26, %v9902_v50  ;;  %v9900_v25 = vmul.f32 %v17941_v18, %v9802_v3  ;;  %v9982_v16 = vld [vmem:[%s13247_s24 + $0xb8] sm:$0xff] }
 0x68d   : > { %v12440_v0 = vpop.f32.mrf.mxu0 }
 0x68e   : > { %10066 = vst [vmem:[%s17961_s25 + $0x58] sm:$0xff] %v10034_v22  ;;  %v10032_v33 = vmax.f32 %v10000_v38, 0.0  ;;  %v10005_v35 = vadd.f32 %v9973_v32, %v9941_v62  ;;  %v9939_v29 = vadd.f32 %v17946_v26, %v9900_v25  ;;  %v9903_v1 = vmul.f32 %v12440_v0, %v17941_v18  ;;  %v9980_v62 = vld [vmem:[%s13247_s24 + $0xa8] sm:$0xff] }
 0x68f   : > { %v9805_v27 = vpop.f32.mrf.mxu0 }
 0x690   : > { %10064 = vst [vmem:[%s17961_s25 + $0x48] sm:$0xff] %v10032_v33  ;;  %v10037_v41 = vmax.f32 %v10005_v35, 0.0  ;;  %v10003_v6 = vadd.f32 %v9971_v7, %v9939_v29  ;;  %v9942_v28 = vadd.f32 %v17946_v26, %v9903_v1  ;;  %v9901_v19 = vmul.f32 %v17941_v18, %v9805_v27  ;;  %v9985_v29 = vld [vmem:[%s13247_s24 + $0xd0] sm:$0xff] }
 0x691   : > { %v12443_v58 = vpop.f32.mrf.mxu0 }
 0x692   : > { %10069 = vst [vmem:[%s17961_s25 + $0x70] sm:$0xff] %v10037_v41  ;;  %v10035_v52 = vmax.f32 %v10003_v6, 0.0  ;;  %v10006_v24 = vadd.f32 %v9974_v54, %v9942_v28  ;;  %v9940_v39 = vadd.f32 %v17946_v26, %v9901_v19  ;;  %v9906_v8 = vmul.f32 %v12443_v58, %v17941_v18  ;;  %v9983_v28 = vld [vmem:[%s13247_s24 + $0xc0] sm:$0xff] }
 0x693   : > { %v9818_v55 = vpop.f32.mrf.mxu0 }
 0x694   : > { %10067 = vst [vmem:[%s17961_s25 + $0x60] sm:$0xff] %v10035_v52  ;;  %v10038_v14 = vmax.f32 %v10006_v24, 0.0  ;;  %v10004_v46 = vadd.f32 %v9972_v40, %v9940_v39  ;;  %v9945_v43 = vadd.f32 %v17946_v26, %v9906_v8  ;;  %v9904_v48 = vmul.f32 %v17941_v18, %v9818_v55  ;;  %v9986_v39 = vld [vmem:[%s13247_s24 + $0xd8] sm:$0xff] }
 0x695   : > { %v12444_v45 = vpop.f32.mrf.mxu0 }
 0x696   : > { %10070 = vst [vmem:[%s17961_s25 + $0x78] sm:$0xff] %v10038_v14  ;;  %v10036_v57 = vmax.f32 %v10004_v46, 0.0  ;;  %v10009_v60 = vadd.f32 %v9977_v51, %v9945_v43  ;;  %v9943_v4 = vadd.f32 %v17946_v26, %v9904_v48  ;;  %v9907_v44 = vmul.f32 %v12444_v45, %v17941_v18  ;;  %v9984_v43 = vld [vmem:[%s13247_s24 + $0xc8] sm:$0xff] }
 0x697   : > { %v9821_v11 = vpop.f32.mrf.mxu0 }
 0x698   : > { %10068 = vst [vmem:[%s17961_s25 + $0x68] sm:$0xff] %v10036_v57  ;;  %v10041_v2 = vmax.f32 %v10009_v60, 0.0  ;;  %v10007_v36 = vadd.f32 %v9975_v21, %v9943_v4  ;;  %v9946_v31 = vadd.f32 %v17946_v26, %v9907_v44  ;;  %v9905_v15 = vmul.f32 %v17941_v18, %v9821_v11  ;;  %v9989_v4 = vld [vmem:[%s13247_s24 + $0xf0] sm:$0xff] }
 0x699   : > { %v12447_v59 = vpop.f32.mrf.mxu0 }
 0x69a   : > { %10073 = vst [vmem:[%s17961_s25 + $0x90] sm:$0xff] %v10041_v2  ;;  %v10039_v49 = vmax.f32 %v10007_v36, 0.0  ;;  %v10010_v9 = vadd.f32 %v9978_v5, %v9946_v31  ;;  %v9944_v10 = vadd.f32 %v17946_v26, %v9905_v15  ;;  %v9910_v17 = vmul.f32 %v12447_v59, %v17941_v18  ;;  %v9987_v31 = vld [vmem:[%s13247_s24 + $0xe0] sm:$0xff] }
 0x69b   : > { %v9834_v56 = vpop.f32.mrf.mxu0 }
 0x69c   : > { %10071 = vst [vmem:[%s17961_s25 + $0x80] sm:$0xff] %v10039_v49  ;;  %v10042_v23 = vmax.f32 %v10010_v9, 0.0  ;;  %v10008_v47 = vadd.f32 %v9976_v61, %v9944_v10  ;;  %v9949_v30 = vadd.f32 %v17946_v26, %v9910_v17  ;;  %v9908_v34 = vmul.f32 %v17941_v18, %v9834_v56  ;;  %v9990_v10 = vld [vmem:[%s13247_s24 + $0xf8] sm:$0xff] }
 0x69d   : > { %v12448_v20 = vpop.f32.mrf.mxu0 }
 0x69e   : > { %10074 = vst [vmem:[%s17961_s25 + $0x98] sm:$0xff] %v10042_v23  ;;  %v10040_v42 = vmax.f32 %v10008_v47, 0.0  ;;  %v10013_v63 = vadd.f32 %v9981_v37, %v9949_v30  ;;  %v9947_v12 = vadd.f32 %v17946_v26, %v9908_v34  ;;  %v9911_v13 = vmul.f32 %v12448_v20, %v17941_v18  ;;  %v9988_v30 = vld [vmem:[%s13247_s24 + $0xe8] sm:$0xff] }
 0x69f   : > { %v9837_v50 = vpop.f32.mrf.mxu0 }
 0x6a0   : > { %10072 = vst [vmem:[%s17961_s25 + $0x88] sm:$0xff] %v10040_v42  ;;  %v10045_v32 = vmax.f32 %v10013_v63, 0.0  ;;  %v10011_v3 = vadd.f32 %v9979_v53, %v9947_v12  ;;  %v9950_v22 = vadd.f32 %v17946_v26, %v9911_v13  ;;  %v9909_v38 = vmul.f32 %v17941_v18, %v9837_v50 }
 0x6a1   : > { %v12451_v25 = vpop.f32.mrf.mxu0 }
 0x6a2   : > { %10077 = vst [vmem:[%s17961_s25 + $0xb0] sm:$0xff] %v10045_v32  ;;  %v10043_v7 = vmax.f32 %v10011_v3, 0.0  ;;  %v10014_v0 = vadd.f32 %v9982_v16, %v9950_v22  ;;  %v9948_v33 = vadd.f32 %v17946_v26, %v9909_v38  ;;  %v9914_v35 = vmul.f32 %v12451_v25, %v17941_v18 }
 0x6a3   : > { %v9850_v1 = vpop.f32.mrf.mxu0 }
 0x6a4   : > { %10075 = vst [vmem:[%s17961_s25 + $0xa0] sm:$0xff] %v10043_v7  ;;  %v10046_v54 = vmax.f32 %v10014_v0, 0.0  ;;  %v10012_v27 = vadd.f32 %v9980_v62, %v9948_v33  ;;  %v9953_v41 = vadd.f32 %v17946_v26, %v9914_v35  ;;  %v9912_v6 = vmul.f32 %v17941_v18, %v9850_v1 }
 0x6a5   : > { %v12452_v19 = vpop.f32.mrf.mxu0 }
 0x6a6   : > { %10078 = vst [vmem:[%s17961_s25 + $0xb8] sm:$0xff] %v10046_v54  ;;  %v10044_v40 = vmax.f32 %v10012_v27, 0.0  ;;  %v10017_v58 = vadd.f32 %v9985_v29, %v9953_v41  ;;  %v9951_v52 = vadd.f32 %v17946_v26, %v9912_v6  ;;  %v9915_v24 = vmul.f32 %v12452_v19, %v17941_v18 }
 0x6a7   : > { %v9853_v8 = vpop.f32.mrf.mxu0 }
 0x6a8   : > { %10076 = vst [vmem:[%s17961_s25 + $0xa8] sm:$0xff] %v10044_v40  ;;  %v10049_v51 = vmax.f32 %v10017_v58, 0.0  ;;  %v10015_v55 = vadd.f32 %v9983_v28, %v9951_v52  ;;  %v9954_v14 = vadd.f32 %v17946_v26, %v9915_v24  ;;  %v9913_v46 = vmul.f32 %v17941_v18, %v9853_v8 }
 0x6a9   : > { %v12455_v48 = vpop.f32.mrf.mxu0 }
 0x6aa   : > { %10081 = vst [vmem:[%s17961_s25 + $0xd0] sm:$0xff] %v10049_v51  ;;  %v10047_v21 = vmax.f32 %v10015_v55, 0.0  ;;  %v10018_v45 = vadd.f32 %v9986_v39, %v9954_v14  ;;  %v9952_v57 = vadd.f32 %v17946_v26, %v9913_v46  ;;  %v9918_v60 = vmul.f32 %v12455_v48, %v17941_v18 }
 0x6ab   : > { %v9866_v44 = vpop.f32.mrf.mxu0 }
 0x6ac   : > { %10079 = vst [vmem:[%s17961_s25 + $0xc0] sm:$0xff] %v10047_v21  ;;  %v10050_v5 = vmax.f32 %v10018_v45, 0.0  ;;  %v10016_v11 = vadd.f32 %v9984_v43, %v9952_v57  ;;  %v9957_v2 = vadd.f32 %v17946_v26, %v9918_v60  ;;  %v9916_v36 = vmul.f32 %v17941_v18, %v9866_v44 }
 0x6ad   : > { %v12456_v15 = vpop.f32.mrf.mxu0 }
 0x6ae   : > { %10082 = vst [vmem:[%s17961_s25 + $0xd8] sm:$0xff] %v10050_v5  ;;  %v10048_v61 = vmax.f32 %v10016_v11, 0.0  ;;  %v10021_v59 = vadd.f32 %v9989_v4, %v9957_v2  ;;  %v9955_v49 = vadd.f32 %v17946_v26, %v9916_v36  ;;  %v9919_v9 = vmul.f32 %v12456_v15, %v17941_v18 }
 0x6af   : > { %v9869_v17 = vpop.f32.mrf.mxu0 }
 0x6b0   : > { %10080 = vst [vmem:[%s17961_s25 + $0xc8] sm:$0xff] %v10048_v61  ;;  %v10053_v37 = vmax.f32 %v10021_v59, 0.0  ;;  %v10019_v56 = vadd.f32 %v9987_v31, %v9955_v49  ;;  %v9958_v23 = vadd.f32 %v17946_v26, %v9919_v9  ;;  %v9917_v47 = vmul.f32 %v17941_v18, %v9869_v17 }
 0x6b2   : > { %10085 = vst [vmem:[%s17961_s25 + $0xf0] sm:$0xff] %v10053_v37  ;;  %v10051_v34 = vmax.f32 %v10019_v56, 0.0  ;;  %v10022_v53 = vadd.f32 %v9990_v10, %v9958_v23  ;;  %v9956_v20 = vadd.f32 %v17946_v26, %v9917_v47 }
 0x6b4   : > { %10083 = vst [vmem:[%s17961_s25 + $0xe0] sm:$0xff] %v10051_v34  ;;  %v10054_v42 = vmax.f32 %v10022_v53, 0.0  ;;  %v10020_v63 = vadd.f32 %v9988_v30, %v9956_v20 }
 0x6b6   : > { %10086 = vst [vmem:[%s17961_s25 + $0xf8] sm:$0xff] %v10054_v42  ;;  %v10052_v18 = vmax.f32 %v10020_v63, 0.0 }
 0x6b8   : > { %10084 = vst [vmem:[%s17961_s25 + $0xe8] sm:$0xff] %v10052_v18 }
 0x6b9   : > { %12763 = shalt.err (!%p12760_p6)
}
 0x6ba   : > { %s12764_s18 = scalar_lea.hbm %s18087_s26, 4096  ;;  %s12768_s25 = scalar_lea.hbm %s18556_s19, 16384 }
 0x6bb   : > { %p12765_p10 = scmp.ne.s32.totalorder %s18087_s26, %s12764_s18  ;;  %p12769_p2 = scmp.lt.s32.totalorder %s18087_s26, %s18556_s19 }
 0x6bc   : > { %p12770_p11 = scmp.lt.s32.totalorder %s12768_s25, %s12764_s18 }
 0x6bd   : > { %p12766_p13 = pnand %p12765_p10, %p18557_p7 }
 0x6be   : > { %p12771_p4 = por %p12770_p11, %p12769_p2 }
 0x6bf   : > { %p12767_p0 = pneg %p12766_p13 }
 0x6c1   : > { %p12772_p12 = pnand %p12771_p4, %p12767_p0 }
 0x6c3   : > { %12775 = shalt.err (!%p12772_p12)
}
 0x6c4   : > { %s12911_s21 = smov 128   ;;  %s12912_s2 = smov 8  }
 0x6c5   : > { %12467 = dma.vmem_to_hbm [thread:$0]  (%p18557_p7), %s18081_s1, 4096, %s18087_s26, %s10088_s12, %s12911_s21, %s12911_s21, %s12912_s2  }
 0x6c6 PF: > { %p12484_p9 = scmp.ge.s32.totalorder %s12902_s16, 2  ;;  %s10119_s17 = sand.u32 1, %s12874_s27  }
 0x6c7   : > { %p18558_p3 = scmp.ne.s32.totalorder %s18251_s9, 0  ;;  %s10120_s4 = scalar_lea.sflag [#allocation5], %s10119_s17 }
 0x6c9   : > { %p12480_p1 = pnand %p12484_p9, %p18558_p3 }
 0x6cb   : > { %p12481_p8 = pneg %p12480_p1 }
 0x6cd   : > { %12845 = dma.done.wait (%p12481_p8), %s10120_s4, 4096  }
 0x6ce   : > { %12847 = vsyncadd (%p12481_p8), %s10120_s4, 4294963200  ;;  %s31_s16 = sadd.s32 1, %s12902_s16   ;;  %s18560_s7 = sld [smem:[#allocation14_spill]] }
 0x6cf   : > { %p18118_p5 = scmp.ge.s32.totalorder %s31_s16, 6   ;;  %s18561_s25 = sld [smem:[#allocation15_spill]] }
 0x6d0   : > { %s18562_s26 = sld [smem:[#allocation25_spill]]  ;;  %s18570_s21 = smov %s12854_s22 }
 0x6d1   : > { %s18563_s0 = sld [smem:[#allocation16_spill]]  ;;  %s18571_s22 = smov %s12858_s23 }
 0x6d2   : > { %s18564_s29 = sld [smem:[#allocation26_spill]]  ;;  %s18572_s23 = smov %s13216_s5 }
 0x6d3   : > { %s18565_s30 = sld [smem:[#allocation19_spill]]  ;;  %s18574_s27 = smov %s12878_s28 }
 0x6d4   : > { %s18566_s13 = sld [smem:[#allocation20_spill]]  ;;  %s18573_s24 = smov %s18560_s7 }
 0x6d5   : > { %s18567_s14 = sld [smem:[#allocation21_spill]]  ;;  %30 = sbr.rel (!%p18118_p5) target bundleno = 26 (0x1a), region = 147 }
 0x6d6   : > { %s18568_s15 = sld [smem:[#allocation22_spill]] }
 0x6d7   : > { %s18575_s28 = smov %s18563_s0 }
 0x6da   :  { %10125 = vsyncpa [#allocation4], 1 }
 0x6db   :  { %10127 = vsyncpa [#allocation4 + $0x1], 1 }
 0x6dc   :  { %10128 = vsyncpa [#allocation7], 1 }
 0x6dd   :  { %10130 = vsyncpa [#allocation7 + $0x1], 1 }
 0x6de   :  { %10131 = vsyncpa [#allocation5], 1 }
 0x6df   :  { %10133 = vsyncpa [#allocation5 + $0x1], 1 }

</bundles_post_ra>
